<compile_context>
chip_gen: v7x
topology: tpu7x:2x2x1
jax: 0.10.0
libtpu: 0.0.40
codegen_flags: <defaults>
</compile_context>

<pallas_src>
import numpy as np
import jax
import jax.numpy as jnp
from jax.experimental import pallas as pl
from jax.experimental.pallas import tpu as pltpu

NEG_SLOPE = 0.2
IN_EPS = 1e-5
_HI = jax.lax.Precision.HIGHEST


# ----------------------------- kernel helpers --------------------------------

def _in_affine_lrelu(y, b_ref, g_ref, be_ref):
    """InstanceNorm2d(affine) + LeakyReLU on one sample, layout (C, H*W)."""
    y = y + b_ref[...]                                   # conv bias
    m = jnp.mean(y, axis=1, keepdims=True)               # per-channel mean
    v = jnp.mean((y - m) ** 2, axis=1, keepdims=True)    # biased variance
    y = (y - m) * jax.lax.rsqrt(v + IN_EPS) * g_ref[...] + be_ref[...]
    return jnp.where(y >= 0.0, y, NEG_SLOPE * y)


def _exact_gather_dot(y, sel_bf16):
    """y (C, HW_in) f32 @ 0/1 selector (HW_in, 16*HW_out) bf16, near-exactly.

    Two native single-pass bf16 MXU dots on a hi/lo split of y reproduce the
    f32 selection to ~2^-18 relative error (cheaper than HIGHEST emulation).
    The split subtraction is plain f32 VPU math (v5e-safe).
    """
    y_hi = y.astype(jnp.bfloat16)
    y_lo = (y - y_hi.astype(jnp.float32)).astype(jnp.bfloat16)
    g = jnp.dot(y_hi, sel_bf16, preferred_element_type=jnp.float32)
    g = g + jnp.dot(y_lo, sel_bf16, preferred_element_type=jnp.float32)
    return g


def _make_fused_kernel(n_layers, layer_meta, c_last, hw_last, n_in):
    """Whole Discriminator forward for one sample (one grid step)."""
    n_taps = 16

    def kernel(*refs):
        ins = refs[:n_in]
        o_ref = refs[n_in]
        scratches = refs[n_in + 1:]
        conv_scr = scratches[:-1]          # one (16*C_in, HW_out) per layer>=2
        flat_ref = scratches[-1]           # (1, C_last*HW_last)
        it = iter(ins)

        # ---- conv layer 1: precomputed transposed im2col patches (K1, HW1) --
        p_ref = next(it)    # (1, K1, HW1)
        w_ref = next(it)    # (C1, K1)
        b_ref = next(it); g_ref = next(it); be_ref = next(it)   # (C1, 1) each
        y = jnp.dot(w_ref[...], p_ref[0], precision=_HI,
                    preferred_element_type=jnp.float32)         # (C1, HW1)
        y = _in_affine_lrelu(y, b_ref, g_ref, be_ref)

        # ---- conv layers 2..L: fused selector matmul + K-folded weight matmul
        for li in range(n_layers - 1):
            sel_ref = next(it)   # (HW_in, 16*HW_out) bf16 0/1 selectors
            w_ref = next(it)     # (C_out, 16*C_in) tap-folded weights
            b_ref = next(it); g_ref = next(it); be_ref = next(it)
            c_in, c_out, hw_out = layer_meta[li]
            scr = conv_scr[li]

            # one gather matmul for all 16 taps (exact bf16 hi/lo selection)
            g = _exact_gather_dot(y, sel_ref[...])       # (C_in, 16*HW_out)

            # relayout tap blocks from lanes to sublanes -> (16*C_in, HW_out)
            for t in range(n_taps):
                scr[t * c_in:(t + 1) * c_in, :] = \
                    g[:, t * hw_out:(t + 1) * hw_out]

            # one weight matmul with K = 16*C_in (128 / 256 deep)
            z = jnp.dot(w_ref[...], scr[...], precision=_HI,
                        preferred_element_type=jnp.float32)   # (C_out, HW_out)
            y = _in_affine_lrelu(z, b_ref, g_ref, be_ref)

        # ---- fused FC heads (adv + att share stage 1, block-diag stage 2) ---
        bfc_ref = next(it)   # (C_last*HW_last, 2*fc_dim)
        b1_ref = next(it)    # (1, 2*fc_dim)
        w2_ref = next(it)    # (2*fc_dim, 1+attr_dim) block-diagonal
        b2_ref = next(it)    # (1, 1+attr_dim)

        # in-VMEM NCHW flatten: (C_last, HW_last) -> (1, C_last*HW_last)
        for c in range(c_last):
            flat_ref[0:1, c * hw_last:(c + 1) * hw_last] = y[c:c + 1, :]

        h = jnp.dot(flat_ref[...], bfc_ref[...], precision=_HI,
                    preferred_element_type=jnp.float32) + b1_ref[...]
        h = jnp.where(h >= 0.0, h, NEG_SLOPE * h)
        out = jnp.dot(h, w2_ref[...], precision=_HI,
                      preferred_element_type=jnp.float32) + b2_ref[...]
        o_ref[0] = out

    return kernel


# ------------------------------ JAX glue -------------------------------------

def _tap_selectors_cat(h_in, w_in, k=4, s=2, p=1):
    """Concatenated 0/1 gather matrix sel[u, t*HW_out + m] = 1 iff flat input
    position u is the pixel read by conv tap t=(a*k+b) at flat output m."""
    h_out = (h_in + 2 * p - k) // s + 1
    w_out = (w_in + 2 * p - k) // s + 1
    hw_in, hw_out = h_in * w_in, h_out * w_out
    sel = np.zeros((hw_in, k * k * hw_out), np.float32)
    for a in range(k):
        for b in range(k):
            t = a * k + b
            for i in range(h_out):
                u = s * i + a - p
                if u < 0 or u >= h_in:
                    continue
                for j in range(w_out):
                    v = s * j + b - p
                    if 0 <= v < w_in:
                        sel[u * w_in + v, t * hw_out + i * w_out + j] = 1.0
    return sel, h_out, w_out


def _im2col_T(x_nchw, k=4, s=2, p=1):
    """Transposed im2col for the first conv: (N, k*k*C, Ho*Wo), tap-major."""
    n, c, h, w = x_nchw.shape
    h_out = (h + 2 * p - k) // s + 1
    w_out = (w + 2 * p - k) // s + 1
    xp = jnp.pad(x_nchw, ((0, 0), (0, 0), (p, p), (p, p)))
    taps = []
    for a in range(k):
        for b in range(k):
            taps.append(xp[:, :, a:a + s * h_out:s, b:b + s * w_out:s])
    pt = jnp.stack(taps, axis=1)                     # (N, k*k, C, Ho, Wo)
    return pt.reshape(n, k * k * c, h_out * w_out), h_out, w_out


@jax.jit
def discriminator_forward(x_nchw, params):
    x = x_nchw.astype(jnp.float32)
    n = x.shape[0]
    n_layers = len(params["conv"])

    args, specs = [], []

    def add(arr, spec):
        args.append(arr)
        specs.append(spec)

    # --- conv layer 1 (JAX-side im2col of the network input) -----------------
    w1, b1, g1, be1 = params["conv"][0]
    c1 = w1.shape[0]
    p1, h_cur, w_cur = _im2col_T(x)                           # (N, K1, HW1)
    k1, hw1 = p1.shape[1], p1.shape[2]
    w1m = jnp.transpose(w1, (0, 2, 3, 1)).reshape(c1, k1)     # (C1, K1), tap-major
    add(p1, pl.BlockSpec((1, k1, hw1), lambda i: (i, 0, 0)))
    add(w1m, pl.BlockSpec((c1, k1), lambda i: (0, 0)))
    for vec in (b1, g1, be1):
        add(vec.reshape(c1, 1), pl.BlockSpec((c1, 1), lambda i: (0, 0)))

    # --- conv layers 2..L: fused bf16 selectors + tap-folded weights ---------
    layer_meta = []
    scratch_shapes = []
    c_prev = c1
    for (w, b, g, be) in params["conv"][1:]:
        c_out = w.shape[0]
        sel, h_cur, w_cur = _tap_selectors_cat(h_cur, w_cur)
        hw_in = sel.shape[0]
        hw_out = h_cur * w_cur
        # w_fold[c_out, t*C_in + ci] = w[c_out, ci, a, b], t = a*4 + b
        w_fold = jnp.transpose(w, (0, 2, 3, 1)).reshape(c_out, 16 * c_prev)
        add(jnp.asarray(sel, dtype=jnp.bfloat16),
            pl.BlockSpec((hw_in, 16 * hw_out), lambda i: (0, 0)))
        add(w_fold, pl.BlockSpec((c_out, 16 * c_prev), lambda i: (0, 0)))
        for vec in (b, g, be):
            add(vec.reshape(c_out, 1), pl.BlockSpec((c_out, 1), lambda i: (0, 0)))
        layer_meta.append((c_prev, c_out, hw_out))
        scratch_shapes.append(pltpu.VMEM((16 * c_prev, hw_out), jnp.float32))
        c_prev = c_out

    hw_last = h_cur * w_cur
    flat = c_prev * hw_last

    # --- fused FC heads -------------------------------------------------------
    w1a, b1a, w2a, b2a = params["fc_adv"]
    w1t, b1t, w2t, b2t = params["fc_att"]
    fc_dim = w1a.shape[0]
    adv_dim, att_dim = w2a.shape[0], w2t.shape[0]
    out_dim = adv_dim + att_dim
    w1cat = jnp.concatenate([w1a.T, w1t.T], axis=1)           # (flat, 2*fc_dim)
    b1cat = jnp.concatenate([b1a, b1t]).reshape(1, 2 * fc_dim)
    w2blk = jnp.zeros((2 * fc_dim, out_dim), jnp.float32)
    w2blk = w2blk.at[:fc_dim, :adv_dim].set(w2a.T)
    w2blk = w2blk.at[fc_dim:, adv_dim:].set(w2t.T)
    b2cat = jnp.concatenate([b2a, b2t]).reshape(1, out_dim)
    add(w1cat, pl.BlockSpec((flat, 2 * fc_dim), lambda i: (0, 0)))
    add(b1cat, pl.BlockSpec((1, 2 * fc_dim), lambda i: (0, 0)))
    add(w2blk, pl.BlockSpec((2 * fc_dim, out_dim), lambda i: (0, 0)))
    add(b2cat, pl.BlockSpec((1, out_dim), lambda i: (0, 0)))

    # flatten scratch for the FC heads
    scratch_shapes.append(pltpu.VMEM((1, flat), jnp.float32))

    n_in = len(args)
    kernel = _make_fused_kernel(n_layers, layer_meta, c_prev, hw_last, n_in)

    out = pl.pallas_call(
        kernel,
        out_shape=jax.ShapeDtypeStruct((n, 1, out_dim), jnp.float32),
        grid=(n,),
        in_specs=specs,
        out_specs=pl.BlockSpec((1, 1, out_dim), lambda i: (i, 0, 0)),
        scratch_shapes=scratch_shapes,
        compiler_params=pltpu.CompilerParams(
            dimension_semantics=("parallel",)),   # one sample per TC on v7x
    )(*args)

    out = out[:, 0, :]
    return out[:, :adv_dim], out[:, adv_dim:]


# ------------------------- pure-JAX reference --------------------------------

def reference_forward(x, params):
    y = x.astype(jnp.float32)
    for (w, b, g, be) in params["conv"]:
        y = jax.lax.conv_general_dilated(
            y, w, window_strides=(2, 2), padding=((1, 1), (1, 1)),
            dimension_numbers=("NCHW", "OIHW", "NCHW"), precision=_HI)
        y = y + b[None, :, None, None]
        m = jnp.mean(y, axis=(2, 3), keepdims=True)
        v = jnp.mean((y - m) ** 2, axis=(2, 3), keepdims=True)
        y = (y - m) * jax.lax.rsqrt(v + IN_EPS) * g[None, :, None, None] \
            + be[None, :, None, None]
        y = jnp.where(y >= 0, y, NEG_SLOPE * y)
    yf = y.reshape(y.shape[0], -1)

    def head(w1, b1, w2, b2):
        h = jnp.dot(yf, w1.T, precision=_HI) + b1
        h = jnp.where(h >= 0, h, NEG_SLOPE * h)
        return jnp.dot(h, w2.T, precision=_HI) + b2

    return head(*params["fc_adv"]), head(*params["fc_att"])


# ------------------------------- params --------------------------------------

def init_params(key, image_size=32, attr_dim=4, conv_dim=8, fc_dim=32,
                n_layers=3):
    params = {"conv": [], "fc_adv": None, "fc_att": None}
    in_ch = 3
    for i in range(n_layers):
        out_ch = conv_dim * 2 ** i
        key, k1, k2, k3, k4 = jax.random.split(key, 5)
        w = 0.05 * jax.random.normal(k1, (out_ch, in_ch, 4, 4), jnp.float32)
        b = 0.05 * jax.random.normal(k2, (out_ch,), jnp.float32)
        g = 1.0 + 0.1 * jax.random.normal(k3, (out_ch,), jnp.float32)
        bt = 0.1 * jax.random.normal(k4, (out_ch,), jnp.float32)
        params["conv"].append((w, b, g, bt))
        in_ch = out_ch

    feature_size = image_size // 2 ** n_layers
    flat = conv_dim * 2 ** (n_layers - 1) * feature_size ** 2

    def fc_pair(key, out_dim):
        key, k1, k2, k3, k4 = jax.random.split(key, 5)
        w1 = 0.05 * jax.random.normal(k1, (fc_dim, flat), jnp.float32)
        b1 = 0.05 * jax.random.normal(k2, (fc_dim,), jnp.float32)
        w2 = 0.05 * jax.random.normal(k3, (out_dim, fc_dim), jnp.float32)
        b2 = 0.05 * jax.random.normal(k4, (out_dim,), jnp.float32)
        return key, (w1, b1, w2, b2)

    key, params["fc_adv"] = fc_pair(key, 1)
    key, params["fc_att"] = fc_pair(key, attr_dim)
    return params


# --------------------------------- main ---------------------------------------

if __name__ == "__main__":
    # Small config consistent with the module structure:
    # image_size=32, attr_dim=4, conv_dim=8, fc_dim=32, n_layers=3, batch=2.
    key = jax.random.PRNGKey(0)
    key, xk = jax.random.split(key)
    x = jax.random.normal(xk, (2, 3, 32, 32), jnp.float32)  # NCHW like PyTorch

    params = init_params(key, image_size=32, attr_dim=4, conv_dim=8,
                         fc_dim=32, n_layers=3)

    logit_adv, logit_att = discriminator_forward(x, params)
    jax.block_until_ready((logit_adv, logit_att))

    assert logit_adv.shape == (2, 1), logit_adv.shape
    assert logit_att.shape == (2, 4), logit_att.shape

    # Sanity check against a pure-JAX reference of the PyTorch forward.
    # Tolerance tightened (selection path is effectively exact f32 now).
    ref_adv, ref_att = reference_forward(x, params)
    err = max(float(jnp.max(jnp.abs(logit_adv - ref_adv))),
              float(jnp.max(jnp.abs(logit_att - ref_att))))
    assert err < 1e-3, f"mismatch vs reference: {err}"

    print("KERNEL_OK")
</pallas_src>

<mosaic_0001>
module attributes {stable_mosaic.version = 11 : i64} {
  func.func @kernel(%arg0: i32, %arg1: memref<1x48x256xf32, #tpu.memory_space<vmem>>, %arg2: memref<8x48xf32, #tpu.memory_space<vmem>>, %arg3: memref<8x1xf32, #tpu.memory_space<vmem>>, %arg4: memref<8x1xf32, #tpu.memory_space<vmem>>, %arg5: memref<8x1xf32, #tpu.memory_space<vmem>>, %arg6: memref<256x1024xbf16, #tpu.memory_space<vmem>>, %arg7: memref<16x128xf32, #tpu.memory_space<vmem>>, %arg8: memref<16x1xf32, #tpu.memory_space<vmem>>, %arg9: memref<16x1xf32, #tpu.memory_space<vmem>>, %arg10: memref<16x1xf32, #tpu.memory_space<vmem>>, %arg11: memref<64x256xbf16, #tpu.memory_space<vmem>>, %arg12: memref<32x256xf32, #tpu.memory_space<vmem>>, %arg13: memref<32x1xf32, #tpu.memory_space<vmem>>, %arg14: memref<32x1xf32, #tpu.memory_space<vmem>>, %arg15: memref<32x1xf32, #tpu.memory_space<vmem>>, %arg16: memref<512x64xf32, #tpu.memory_space<vmem>>, %arg17: memref<1x64xf32, #tpu.memory_space<vmem>>, %arg18: memref<64x5xf32, #tpu.memory_space<vmem>>, %arg19: memref<1x5xf32, #tpu.memory_space<vmem>>, %arg20: memref<1x1x5xf32, #tpu.memory_space<vmem>>, %arg21: memref<128x64xf32, #tpu.memory_space<vmem>>, %arg22: memref<256x16xf32, #tpu.memory_space<vmem>>, %arg23: memref<1x512xf32, #tpu.memory_space<vmem>>) attributes {dimension_semantics = [#tpu.dimension_semantics<parallel>], iteration_bounds = array<i64: 2>, scalar_prefetch = 0 : i64, scratch_operands = 3 : i64, tpu.core_type = #tpu.core_type<tc>, window_params = [{transform_indices = @transform_0, window_bounds = array<i64: 1, 48, 256>}, {pipeline_mode = #tpu.pipeline_mode<synchronous>, transform_indices = @transform_1, window_bounds = array<i64: 8, 48>}, {pipeline_mode = #tpu.pipeline_mode<synchronous>, transform_indices = @transform_2, window_bounds = array<i64: 8, 1>}, {pipeline_mode = #tpu.pipeline_mode<synchronous>, transform_indices = @transform_3, window_bounds = array<i64: 8, 1>}, {pipeline_mode = #tpu.pipeline_mode<synchronous>, transform_indices = @transform_4, window_bounds = array<i64: 8, 1>}, {pipeline_mode = #tpu.pipeline_mode<synchronous>, transform_indices = @transform_5, window_bounds = array<i64: 256, 1024>}, {pipeline_mode = #tpu.pipeline_mode<synchronous>, transform_indices = @transform_6, window_bounds = array<i64: 16, 128>}, {pipeline_mode = #tpu.pipeline_mode<synchronous>, transform_indices = @transform_7, window_bounds = array<i64: 16, 1>}, {pipeline_mode = #tpu.pipeline_mode<synchronous>, transform_indices = @transform_8, window_bounds = array<i64: 16, 1>}, {pipeline_mode = #tpu.pipeline_mode<synchronous>, transform_indices = @transform_9, window_bounds = array<i64: 16, 1>}, {pipeline_mode = #tpu.pipeline_mode<synchronous>, transform_indices = @transform_10, window_bounds = array<i64: 64, 256>}, {pipeline_mode = #tpu.pipeline_mode<synchronous>, transform_indices = @transform_11, window_bounds = array<i64: 32, 256>}, {pipeline_mode = #tpu.pipeline_mode<synchronous>, transform_indices = @transform_12, window_bounds = array<i64: 32, 1>}, {pipeline_mode = #tpu.pipeline_mode<synchronous>, transform_indices = @transform_13, window_bounds = array<i64: 32, 1>}, {pipeline_mode = #tpu.pipeline_mode<synchronous>, transform_indices = @transform_14, window_bounds = array<i64: 32, 1>}, {pipeline_mode = #tpu.pipeline_mode<synchronous>, transform_indices = @transform_15, window_bounds = array<i64: 512, 64>}, {pipeline_mode = #tpu.pipeline_mode<synchronous>, transform_indices = @transform_16, window_bounds = array<i64: 1, 64>}, {pipeline_mode = #tpu.pipeline_mode<synchronous>, transform_indices = @transform_17, window_bounds = array<i64: 64, 5>}, {pipeline_mode = #tpu.pipeline_mode<synchronous>, transform_indices = @transform_18, window_bounds = array<i64: 1, 5>}, {transform_indices = @transform_19, window_bounds = array<i64: 1, 1, 5>}]} {
    %c0 = arith.constant 0 : index
    %c0_0 = arith.constant 0 : index
    %0 = vector.load %arg2[%c0, %c0_0] : memref<8x48xf32, #tpu.memory_space<vmem>>, vector<8x48xf32>
    %c0_1 = arith.constant 0 : index
    %c0_2 = arith.constant 0 : index
    %c0_3 = arith.constant 0 : index
    %1 = vector.load %arg1[%c0_1, %c0_2, %c0_3] : memref<1x48x256xf32, #tpu.memory_space<vmem>>, vector<1x48x256xf32>
    %2 = vector.shape_cast %1 : vector<1x48x256xf32> to vector<48x256xf32>
    %cst = arith.constant dense<0.000000e+00> : vector<8x256xf32>
    %3 = tpu.matmul %0, %2, %cst {dimension_numbers = #tpu.dot_dimension_numbers<[1], [0], [0], [1], [0, 0, 1, 1], [], []>, precision = #tpu.contract_precision<fp32>} : vector<8x48xf32>, vector<48x256xf32>, vector<8x256xf32> -> vector<8x256xf32>
    %c0_4 = arith.constant 0 : index
    %c0_5 = arith.constant 0 : index
    %4 = vector.load %arg3[%c0_4, %c0_5] : memref<8x1xf32, #tpu.memory_space<vmem>>, vector<8x1xf32>
    %5 = vector.broadcast %4 : vector<8x1xf32> to vector<8x256xf32>
    %6 = arith.addf %3, %5 : vector<8x256xf32>
    %cst_6 = arith.constant dense<0.000000e+00> : vector<8xf32>
    %7 = vector.multi_reduction <add>, %6, %cst_6 [1] : vector<8x256xf32> to vector<8xf32>
    %8 = vector.shape_cast %7 : vector<8xf32> to vector<8x1xf32>
    %cst_7 = arith.constant 2.560000e+02 : f32
    %9 = vector.broadcast %cst_7 : f32 to vector<8x1xf32>
    %10 = arith.divf %8, %9 : vector<8x1xf32>
    %11 = vector.broadcast %10 : vector<8x1xf32> to vector<8x256xf32>
    %12 = arith.subf %6, %11 : vector<8x256xf32>
    %13 = arith.mulf %12, %12 : vector<8x256xf32>
    %cst_8 = arith.constant dense<0.000000e+00> : vector<8xf32>
    %14 = vector.multi_reduction <add>, %13, %cst_8 [1] : vector<8x256xf32> to vector<8xf32>
    %15 = vector.shape_cast %14 : vector<8xf32> to vector<8x1xf32>
    %cst_9 = arith.constant 2.560000e+02 : f32
    %16 = vector.broadcast %cst_9 : f32 to vector<8x1xf32>
    %17 = arith.divf %15, %16 : vector<8x1xf32>
    %18 = vector.broadcast %10 : vector<8x1xf32> to vector<8x256xf32>
    %19 = arith.subf %6, %18 : vector<8x256xf32>
    %cst_10 = arith.constant 9.99999974E-6 : f32
    %20 = vector.broadcast %cst_10 : f32 to vector<8x1xf32>
    %21 = arith.addf %17, %20 : vector<8x1xf32>
    %22 = math.rsqrt %21 : vector<8x1xf32>
    %23 = vector.broadcast %22 : vector<8x1xf32> to vector<8x256xf32>
    %24 = arith.mulf %19, %23 : vector<8x256xf32>
    %c0_11 = arith.constant 0 : index
    %c0_12 = arith.constant 0 : index
    %25 = vector.load %arg4[%c0_11, %c0_12] : memref<8x1xf32, #tpu.memory_space<vmem>>, vector<8x1xf32>
    %26 = vector.broadcast %25 : vector<8x1xf32> to vector<8x256xf32>
    %27 = arith.mulf %24, %26 : vector<8x256xf32>
    %c0_13 = arith.constant 0 : index
    %c0_14 = arith.constant 0 : index
    %28 = vector.load %arg5[%c0_13, %c0_14] : memref<8x1xf32, #tpu.memory_space<vmem>>, vector<8x1xf32>
    %29 = vector.broadcast %28 : vector<8x1xf32> to vector<8x256xf32>
    %30 = arith.addf %27, %29 : vector<8x256xf32>
    %cst_15 = arith.constant 0.000000e+00 : f32
    %31 = vector.broadcast %cst_15 : f32 to vector<8x256xf32>
    %32 = arith.cmpf oge, %30, %31 : vector<8x256xf32>
    %cst_16 = arith.constant 2.000000e-01 : f32
    %33 = vector.broadcast %cst_16 : f32 to vector<8x256xf32>
    %34 = arith.mulf %33, %30 : vector<8x256xf32>
    %35 = arith.select %32, %30, %34 : vector<8x256xi1>, vector<8x256xf32>
    %c0_17 = arith.constant 0 : index
    %c0_18 = arith.constant 0 : index
    %36 = vector.load %arg6[%c0_17, %c0_18] : memref<256x1024xbf16, #tpu.memory_space<vmem>>, vector<256x1024xbf16>
    %37 = arith.truncf %35 : vector<8x256xf32> to vector<8x256xbf16>
    %38 = arith.extf %37 : vector<8x256xbf16> to vector<8x256xf32>
    %39 = arith.subf %35, %38 : vector<8x256xf32>
    %40 = arith.truncf %39 : vector<8x256xf32> to vector<8x256xbf16>
    %cst_19 = arith.constant dense<0.000000e+00> : vector<8x1024xf32>
    %41 = tpu.matmul %37, %36, %cst_19 {dimension_numbers = #tpu.dot_dimension_numbers<[1], [0], [0], [1], [0, 0, 1, 1], [], []>} : vector<8x256xbf16>, vector<256x1024xbf16>, vector<8x1024xf32> -> vector<8x1024xf32>
    %cst_20 = arith.constant dense<0.000000e+00> : vector<8x1024xf32>
    %42 = tpu.matmul %40, %36, %cst_20 {dimension_numbers = #tpu.dot_dimension_numbers<[1], [0], [0], [1], [0, 0, 1, 1], [], []>} : vector<8x256xbf16>, vector<256x1024xbf16>, vector<8x1024xf32> -> vector<8x1024xf32>
    %43 = arith.addf %41, %42 : vector<8x1024xf32>
    %44 = vector.extract_strided_slice %43 {offsets = [0, 0], sizes = [8, 64], strides = [1, 1]} : vector<8x1024xf32> to vector<8x64xf32>
    %c0_21 = arith.constant 0 : index
    %c0_22 = arith.constant 0 : index
    %45 = vector.load %arg21[%c0_21, %c0_22] : memref<128x64xf32, #tpu.memory_space<vmem>>, vector<8x64xf32>
    tpu.vector_store %arg21[%c0_21, %c0_22], %44 {strides = array<i32>} : memref<128x64xf32, #tpu.memory_space<vmem>>, vector<8x64xf32>,
    %46 = vector.extract_strided_slice %43 {offsets = [0, 64], sizes = [8, 64], strides = [1, 1]} : vector<8x1024xf32> to vector<8x64xf32>
    %c8 = arith.constant 8 : index
    %c0_23 = arith.constant 0 : index
    %47 = vector.load %arg21[%c8, %c0_23] : memref<128x64xf32, #tpu.memory_space<vmem>>, vector<8x64xf32>
    tpu.vector_store %arg21[%c8, %c0_23], %46 {strides = array<i32>} : memref<128x64xf32, #tpu.memory_space<vmem>>, vector<8x64xf32>,
    %48 = vector.extract_strided_slice %43 {offsets = [0, 128], sizes = [8, 64], strides = [1, 1]} : vector<8x1024xf32> to vector<8x64xf32>
    %c16 = arith.constant 16 : index
    %c0_24 = arith.constant 0 : index
    %49 = vector.load %arg21[%c16, %c0_24] : memref<128x64xf32, #tpu.memory_space<vmem>>, vector<8x64xf32>
    tpu.vector_store %arg21[%c16, %c0_24], %48 {strides = array<i32>} : memref<128x64xf32, #tpu.memory_space<vmem>>, vector<8x64xf32>,
    %50 = vector.extract_strided_slice %43 {offsets = [0, 192], sizes = [8, 64], strides = [1, 1]} : vector<8x1024xf32> to vector<8x64xf32>
    %c24 = arith.constant 24 : index
    %c0_25 = arith.constant 0 : index
    %51 = vector.load %arg21[%c24, %c0_25] : memref<128x64xf32, #tpu.memory_space<vmem>>, vector<8x64xf32>
    tpu.vector_store %arg21[%c24, %c0_25], %50 {strides = array<i32>} : memref<128x64xf32, #tpu.memory_space<vmem>>, vector<8x64xf32>,
    %52 = vector.extract_strided_slice %43 {offsets = [0, 256], sizes = [8, 64], strides = [1, 1]} : vector<8x1024xf32> to vector<8x64xf32>
    %c32 = arith.constant 32 : index
    %c0_26 = arith.constant 0 : index
    %53 = vector.load %arg21[%c32, %c0_26] : memref<128x64xf32, #tpu.memory_space<vmem>>, vector<8x64xf32>
    tpu.vector_store %arg21[%c32, %c0_26], %52 {strides = array<i32>} : memref<128x64xf32, #tpu.memory_space<vmem>>, vector<8x64xf32>,
    %54 = vector.extract_strided_slice %43 {offsets = [0, 320], sizes = [8, 64], strides = [1, 1]} : vector<8x1024xf32> to vector<8x64xf32>
    %c40 = arith.constant 40 : index
    %c0_27 = arith.constant 0 : index
    %55 = vector.load %arg21[%c40, %c0_27] : memref<128x64xf32, #tpu.memory_space<vmem>>, vector<8x64xf32>
    tpu.vector_store %arg21[%c40, %c0_27], %54 {strides = array<i32>} : memref<128x64xf32, #tpu.memory_space<vmem>>, vector<8x64xf32>,
    %56 = vector.extract_strided_slice %43 {offsets = [0, 384], sizes = [8, 64], strides = [1, 1]} : vector<8x1024xf32> to vector<8x64xf32>
    %c48 = arith.constant 48 : index
    %c0_28 = arith.constant 0 : index
    %57 = vector.load %arg21[%c48, %c0_28] : memref<128x64xf32, #tpu.memory_space<vmem>>, vector<8x64xf32>
    tpu.vector_store %arg21[%c48, %c0_28], %56 {strides = array<i32>} : memref<128x64xf32, #tpu.memory_space<vmem>>, vector<8x64xf32>,
    %58 = vector.extract_strided_slice %43 {offsets = [0, 448], sizes = [8, 64], strides = [1, 1]} : vector<8x1024xf32> to vector<8x64xf32>
    %c56 = arith.constant 56 : index
    %c0_29 = arith.constant 0 : index
    %59 = vector.load %arg21[%c56, %c0_29] : memref<128x64xf32, #tpu.memory_space<vmem>>, vector<8x64xf32>
    tpu.vector_store %arg21[%c56, %c0_29], %58 {strides = array<i32>} : memref<128x64xf32, #tpu.memory_space<vmem>>, vector<8x64xf32>,
    %60 = vector.extract_strided_slice %43 {offsets = [0, 512], sizes = [8, 64], strides = [1, 1]} : vector<8x1024xf32> to vector<8x64xf32>
    %c64 = arith.constant 64 : index
    %c0_30 = arith.constant 0 : index
    %61 = vector.load %arg21[%c64, %c0_30] : memref<128x64xf32, #tpu.memory_space<vmem>>, vector<8x64xf32>
    tpu.vector_store %arg21[%c64, %c0_30], %60 {strides = array<i32>} : memref<128x64xf32, #tpu.memory_space<vmem>>, vector<8x64xf32>,
    %62 = vector.extract_strided_slice %43 {offsets = [0, 576], sizes = [8, 64], strides = [1, 1]} : vector<8x1024xf32> to vector<8x64xf32>
    %c72 = arith.constant 72 : index
    %c0_31 = arith.constant 0 : index
    %63 = vector.load %arg21[%c72, %c0_31] : memref<128x64xf32, #tpu.memory_space<vmem>>, vector<8x64xf32>
    tpu.vector_store %arg21[%c72, %c0_31], %62 {strides = array<i32>} : memref<128x64xf32, #tpu.memory_space<vmem>>, vector<8x64xf32>,
    %64 = vector.extract_strided_slice %43 {offsets = [0, 640], sizes = [8, 64], strides = [1, 1]} : vector<8x1024xf32> to vector<8x64xf32>
    %c80 = arith.constant 80 : index
    %c0_32 = arith.constant 0 : index
    %65 = vector.load %arg21[%c80, %c0_32] : memref<128x64xf32, #tpu.memory_space<vmem>>, vector<8x64xf32>
    tpu.vector_store %arg21[%c80, %c0_32], %64 {strides = array<i32>} : memref<128x64xf32, #tpu.memory_space<vmem>>, vector<8x64xf32>,
    %66 = vector.extract_strided_slice %43 {offsets = [0, 704], sizes = [8, 64], strides = [1, 1]} : vector<8x1024xf32> to vector<8x64xf32>
    %c88 = arith.constant 88 : index
    %c0_33 = arith.constant 0 : index
    %67 = vector.load %arg21[%c88, %c0_33] : memref<128x64xf32, #tpu.memory_space<vmem>>, vector<8x64xf32>
    tpu.vector_store %arg21[%c88, %c0_33], %66 {strides = array<i32>} : memref<128x64xf32, #tpu.memory_space<vmem>>, vector<8x64xf32>,
    %68 = vector.extract_strided_slice %43 {offsets = [0, 768], sizes = [8, 64], strides = [1, 1]} : vector<8x1024xf32> to vector<8x64xf32>
    %c96 = arith.constant 96 : index
    %c0_34 = arith.constant 0 : index
    %69 = vector.load %arg21[%c96, %c0_34] : memref<128x64xf32, #tpu.memory_space<vmem>>, vector<8x64xf32>
    tpu.vector_store %arg21[%c96, %c0_34], %68 {strides = array<i32>} : memref<128x64xf32, #tpu.memory_space<vmem>>, vector<8x64xf32>,
    %70 = vector.extract_strided_slice %43 {offsets = [0, 832], sizes = [8, 64], strides = [1, 1]} : vector<8x1024xf32> to vector<8x64xf32>
    %c104 = arith.constant 104 : index
    %c0_35 = arith.constant 0 : index
    %71 = vector.load %arg21[%c104, %c0_35] : memref<128x64xf32, #tpu.memory_space<vmem>>, vector<8x64xf32>
    tpu.vector_store %arg21[%c104, %c0_35], %70 {strides = array<i32>} : memref<128x64xf32, #tpu.memory_space<vmem>>, vector<8x64xf32>,
    %72 = vector.extract_strided_slice %43 {offsets = [0, 896], sizes = [8, 64], strides = [1, 1]} : vector<8x1024xf32> to vector<8x64xf32>
    %c112 = arith.constant 112 : index
    %c0_36 = arith.constant 0 : index
    %73 = vector.load %arg21[%c112, %c0_36] : memref<128x64xf32, #tpu.memory_space<vmem>>, vector<8x64xf32>
    tpu.vector_store %arg21[%c112, %c0_36], %72 {strides = array<i32>} : memref<128x64xf32, #tpu.memory_space<vmem>>, vector<8x64xf32>,
    %74 = vector.extract_strided_slice %43 {offsets = [0, 960], sizes = [8, 64], strides = [1, 1]} : vector<8x1024xf32> to vector<8x64xf32>
    %c120 = arith.constant 120 : index
    %c0_37 = arith.constant 0 : index
    %75 = vector.load %arg21[%c120, %c0_37] : memref<128x64xf32, #tpu.memory_space<vmem>>, vector<8x64xf32>
    tpu.vector_store %arg21[%c120, %c0_37], %74 {strides = array<i32>} : memref<128x64xf32, #tpu.memory_space<vmem>>, vector<8x64xf32>,
    %c0_38 = arith.constant 0 : index
    %c0_39 = arith.constant 0 : index
    %76 = vector.load %arg7[%c0_38, %c0_39] : memref<16x128xf32, #tpu.memory_space<vmem>>, vector<16x128xf32>
    %c0_40 = arith.constant 0 : index
    %c0_41 = arith.constant 0 : index
    %77 = vector.load %arg21[%c0_40, %c0_41] : memref<128x64xf32, #tpu.memory_space<vmem>>, vector<128x64xf32>
    %cst_42 = arith.constant dense<0.000000e+00> : vector<16x64xf32>
    %78 = tpu.matmul %76, %77, %cst_42 {dimension_numbers = #tpu.dot_dimension_numbers<[1], [0], [0], [1], [0, 0, 1, 1], [], []>, precision = #tpu.contract_precision<fp32>} : vector<16x128xf32>, vector<128x64xf32>, vector<16x64xf32> -> vector<16x64xf32>
    %c0_43 = arith.constant 0 : index
    %c0_44 = arith.constant 0 : index
    %79 = vector.load %arg8[%c0_43, %c0_44] : memref<16x1xf32, #tpu.memory_space<vmem>>, vector<16x1xf32>
    %80 = vector.broadcast %79 : vector<16x1xf32> to vector<16x64xf32>
    %81 = arith.addf %78, %80 : vector<16x64xf32>
    %cst_45 = arith.constant dense<0.000000e+00> : vector<16xf32>
    %82 = vector.multi_reduction <add>, %81, %cst_45 [1] : vector<16x64xf32> to vector<16xf32>
    %83 = vector.shape_cast %82 : vector<16xf32> to vector<16x1xf32>
    %cst_46 = arith.constant 6.400000e+01 : f32
    %84 = vector.broadcast %cst_46 : f32 to vector<16x1xf32>
    %85 = arith.divf %83, %84 : vector<16x1xf32>
    %86 = vector.broadcast %85 : vector<16x1xf32> to vector<16x64xf32>
    %87 = arith.subf %81, %86 : vector<16x64xf32>
    %88 = arith.mulf %87, %87 : vector<16x64xf32>
    %cst_47 = arith.constant dense<0.000000e+00> : vector<16xf32>
    %89 = vector.multi_reduction <add>, %88, %cst_47 [1] : vector<16x64xf32> to vector<16xf32>
    %90 = vector.shape_cast %89 : vector<16xf32> to vector<16x1xf32>
    %cst_48 = arith.constant 6.400000e+01 : f32
    %91 = vector.broadcast %cst_48 : f32 to vector<16x1xf32>
    %92 = arith.divf %90, %91 : vector<16x1xf32>
    %93 = vector.broadcast %85 : vector<16x1xf32> to vector<16x64xf32>
    %94 = arith.subf %81, %93 : vector<16x64xf32>
    %cst_49 = arith.constant 9.99999974E-6 : f32
    %95 = vector.broadcast %cst_49 : f32 to vector<16x1xf32>
    %96 = arith.addf %92, %95 : vector<16x1xf32>
    %97 = math.rsqrt %96 : vector<16x1xf32>
    %98 = vector.broadcast %97 : vector<16x1xf32> to vector<16x64xf32>
    %99 = arith.mulf %94, %98 : vector<16x64xf32>
    %c0_50 = arith.constant 0 : index
    %c0_51 = arith.constant 0 : index
    %100 = vector.load %arg9[%c0_50, %c0_51] : memref<16x1xf32, #tpu.memory_space<vmem>>, vector<16x1xf32>
    %101 = vector.broadcast %100 : vector<16x1xf32> to vector<16x64xf32>
    %102 = arith.mulf %99, %101 : vector<16x64xf32>
    %c0_52 = arith.constant 0 : index
    %c0_53 = arith.constant 0 : index
    %103 = vector.load %arg10[%c0_52, %c0_53] : memref<16x1xf32, #tpu.memory_space<vmem>>, vector<16x1xf32>
    %104 = vector.broadcast %103 : vector<16x1xf32> to vector<16x64xf32>
    %105 = arith.addf %102, %104 : vector<16x64xf32>
    %cst_54 = arith.constant 0.000000e+00 : f32
    %106 = vector.broadcast %cst_54 : f32 to vector<16x64xf32>
    %107 = arith.cmpf oge, %105, %106 : vector<16x64xf32>
    %cst_55 = arith.constant 2.000000e-01 : f32
    %108 = vector.broadcast %cst_55 : f32 to vector<16x64xf32>
    %109 = arith.mulf %108, %105 : vector<16x64xf32>
    %110 = arith.select %107, %105, %109 : vector<16x64xi1>, vector<16x64xf32>
    %c0_56 = arith.constant 0 : index
    %c0_57 = arith.constant 0 : index
    %111 = vector.load %arg11[%c0_56, %c0_57] : memref<64x256xbf16, #tpu.memory_space<vmem>>, vector<64x256xbf16>
    %112 = arith.truncf %110 : vector<16x64xf32> to vector<16x64xbf16>
    %113 = arith.extf %112 : vector<16x64xbf16> to vector<16x64xf32>
    %114 = arith.subf %110, %113 : vector<16x64xf32>
    %115 = arith.truncf %114 : vector<16x64xf32> to vector<16x64xbf16>
    %cst_58 = arith.constant dense<0.000000e+00> : vector<16x256xf32>
    %116 = tpu.matmul %112, %111, %cst_58 {dimension_numbers = #tpu.dot_dimension_numbers<[1], [0], [0], [1], [0, 0, 1, 1], [], []>} : vector<16x64xbf16>, vector<64x256xbf16>, vector<16x256xf32> -> vector<16x256xf32>
    %cst_59 = arith.constant dense<0.000000e+00> : vector<16x256xf32>
    %117 = tpu.matmul %115, %111, %cst_59 {dimension_numbers = #tpu.dot_dimension_numbers<[1], [0], [0], [1], [0, 0, 1, 1], [], []>} : vector<16x64xbf16>, vector<64x256xbf16>, vector<16x256xf32> -> vector<16x256xf32>
    %118 = arith.addf %116, %117 : vector<16x256xf32>
    %119 = vector.extract_strided_slice %118 {offsets = [0, 0], sizes = [16, 16], strides = [1, 1]} : vector<16x256xf32> to vector<16x16xf32>
    %c0_60 = arith.constant 0 : index
    %c0_61 = arith.constant 0 : index
    %120 = vector.load %arg22[%c0_60, %c0_61] : memref<256x16xf32, #tpu.memory_space<vmem>>, vector<16x16xf32>
    tpu.vector_store %arg22[%c0_60, %c0_61], %119 {strides = array<i32>} : memref<256x16xf32, #tpu.memory_space<vmem>>, vector<16x16xf32>,
    %121 = vector.extract_strided_slice %118 {offsets = [0, 16], sizes = [16, 16], strides = [1, 1]} : vector<16x256xf32> to vector<16x16xf32>
    %c16_62 = arith.constant 16 : index
    %c0_63 = arith.constant 0 : index
    %122 = vector.load %arg22[%c16_62, %c0_63] : memref<256x16xf32, #tpu.memory_space<vmem>>, vector<16x16xf32>
    tpu.vector_store %arg22[%c16_62, %c0_63], %121 {strides = array<i32>} : memref<256x16xf32, #tpu.memory_space<vmem>>, vector<16x16xf32>,
    %123 = vector.extract_strided_slice %118 {offsets = [0, 32], sizes = [16, 16], strides = [1, 1]} : vector<16x256xf32> to vector<16x16xf32>
    %c32_64 = arith.constant 32 : index
    %c0_65 = arith.constant 0 : index
    %124 = vector.load %arg22[%c32_64, %c0_65] : memref<256x16xf32, #tpu.memory_space<vmem>>, vector<16x16xf32>
    tpu.vector_store %arg22[%c32_64, %c0_65], %123 {strides = array<i32>} : memref<256x16xf32, #tpu.memory_space<vmem>>, vector<16x16xf32>,
    %125 = vector.extract_strided_slice %118 {offsets = [0, 48], sizes = [16, 16], strides = [1, 1]} : vector<16x256xf32> to vector<16x16xf32>
    %c48_66 = arith.constant 48 : index
    %c0_67 = arith.constant 0 : index
    %126 = vector.load %arg22[%c48_66, %c0_67] : memref<256x16xf32, #tpu.memory_space<vmem>>, vector<16x16xf32>
    tpu.vector_store %arg22[%c48_66, %c0_67], %125 {strides = array<i32>} : memref<256x16xf32, #tpu.memory_space<vmem>>, vector<16x16xf32>,
    %127 = vector.extract_strided_slice %118 {offsets = [0, 64], sizes = [16, 16], strides = [1, 1]} : vector<16x256xf32> to vector<16x16xf32>
    %c64_68 = arith.constant 64 : index
    %c0_69 = arith.constant 0 : index
    %128 = vector.load %arg22[%c64_68, %c0_69] : memref<256x16xf32, #tpu.memory_space<vmem>>, vector<16x16xf32>
    tpu.vector_store %arg22[%c64_68, %c0_69], %127 {strides = array<i32>} : memref<256x16xf32, #tpu.memory_space<vmem>>, vector<16x16xf32>,
    %129 = vector.extract_strided_slice %118 {offsets = [0, 80], sizes = [16, 16], strides = [1, 1]} : vector<16x256xf32> to vector<16x16xf32>
    %c80_70 = arith.constant 80 : index
    %c0_71 = arith.constant 0 : index
    %130 = vector.load %arg22[%c80_70, %c0_71] : memref<256x16xf32, #tpu.memory_space<vmem>>, vector<16x16xf32>
    tpu.vector_store %arg22[%c80_70, %c0_71], %129 {strides = array<i32>} : memref<256x16xf32, #tpu.memory_space<vmem>>, vector<16x16xf32>,
    %131 = vector.extract_strided_slice %118 {offsets = [0, 96], sizes = [16, 16], strides = [1, 1]} : vector<16x256xf32> to vector<16x16xf32>
    %c96_72 = arith.constant 96 : index
    %c0_73 = arith.constant 0 : index
    %132 = vector.load %arg22[%c96_72, %c0_73] : memref<256x16xf32, #tpu.memory_space<vmem>>, vector<16x16xf32>
    tpu.vector_store %arg22[%c96_72, %c0_73], %131 {strides = array<i32>} : memref<256x16xf32, #tpu.memory_space<vmem>>, vector<16x16xf32>,
    %133 = vector.extract_strided_slice %118 {offsets = [0, 112], sizes = [16, 16], strides = [1, 1]} : vector<16x256xf32> to vector<16x16xf32>
    %c112_74 = arith.constant 112 : index
    %c0_75 = arith.constant 0 : index
    %134 = vector.load %arg22[%c112_74, %c0_75] : memref<256x16xf32, #tpu.memory_space<vmem>>, vector<16x16xf32>
    tpu.vector_store %arg22[%c112_74, %c0_75], %133 {strides = array<i32>} : memref<256x16xf32, #tpu.memory_space<vmem>>, vector<16x16xf32>,
    %135 = vector.extract_strided_slice %118 {offsets = [0, 128], sizes = [16, 16], strides = [1, 1]} : vector<16x256xf32> to vector<16x16xf32>
    %c128 = arith.constant 128 : index
    %c0_76 = arith.constant 0 : index
    %136 = vector.load %arg22[%c128, %c0_76] : memref<256x16xf32, #tpu.memory_space<vmem>>, vector<16x16xf32>
    tpu.vector_store %arg22[%c128, %c0_76], %135 {strides = array<i32>} : memref<256x16xf32, #tpu.memory_space<vmem>>, vector<16x16xf32>,
    %137 = vector.extract_strided_slice %118 {offsets = [0, 144], sizes = [16, 16], strides = [1, 1]} : vector<16x256xf32> to vector<16x16xf32>
    %c144 = arith.constant 144 : index
    %c0_77 = arith.constant 0 : index
    %138 = vector.load %arg22[%c144, %c0_77] : memref<256x16xf32, #tpu.memory_space<vmem>>, vector<16x16xf32>
    tpu.vector_store %arg22[%c144, %c0_77], %137 {strides = array<i32>} : memref<256x16xf32, #tpu.memory_space<vmem>>, vector<16x16xf32>,
    %139 = vector.extract_strided_slice %118 {offsets = [0, 160], sizes = [16, 16], strides = [1, 1]} : vector<16x256xf32> to vector<16x16xf32>
    %c160 = arith.constant 160 : index
    %c0_78 = arith.constant 0 : index
    %140 = vector.load %arg22[%c160, %c0_78] : memref<256x16xf32, #tpu.memory_space<vmem>>, vector<16x16xf32>
    tpu.vector_store %arg22[%c160, %c0_78], %139 {strides = array<i32>} : memref<256x16xf32, #tpu.memory_space<vmem>>, vector<16x16xf32>,
    %141 = vector.extract_strided_slice %118 {offsets = [0, 176], sizes = [16, 16], strides = [1, 1]} : vector<16x256xf32> to vector<16x16xf32>
    %c176 = arith.constant 176 : index
    %c0_79 = arith.constant 0 : index
    %142 = vector.load %arg22[%c176, %c0_79] : memref<256x16xf32, #tpu.memory_space<vmem>>, vector<16x16xf32>
    tpu.vector_store %arg22[%c176, %c0_79], %141 {strides = array<i32>} : memref<256x16xf32, #tpu.memory_space<vmem>>, vector<16x16xf32>,
    %143 = vector.extract_strided_slice %118 {offsets = [0, 192], sizes = [16, 16], strides = [1, 1]} : vector<16x256xf32> to vector<16x16xf32>
    %c192 = arith.constant 192 : index
    %c0_80 = arith.constant 0 : index
    %144 = vector.load %arg22[%c192, %c0_80] : memref<256x16xf32, #tpu.memory_space<vmem>>, vector<16x16xf32>
    tpu.vector_store %arg22[%c192, %c0_80], %143 {strides = array<i32>} : memref<256x16xf32, #tpu.memory_space<vmem>>, vector<16x16xf32>,
    %145 = vector.extract_strided_slice %118 {offsets = [0, 208], sizes = [16, 16], strides = [1, 1]} : vector<16x256xf32> to vector<16x16xf32>
    %c208 = arith.constant 208 : index
    %c0_81 = arith.constant 0 : index
    %146 = vector.load %arg22[%c208, %c0_81] : memref<256x16xf32, #tpu.memory_space<vmem>>, vector<16x16xf32>
    tpu.vector_store %arg22[%c208, %c0_81], %145 {strides = array<i32>} : memref<256x16xf32, #tpu.memory_space<vmem>>, vector<16x16xf32>,
    %147 = vector.extract_strided_slice %118 {offsets = [0, 224], sizes = [16, 16], strides = [1, 1]} : vector<16x256xf32> to vector<16x16xf32>
    %c224 = arith.constant 224 : index
    %c0_82 = arith.constant 0 : index
    %148 = vector.load %arg22[%c224, %c0_82] : memref<256x16xf32, #tpu.memory_space<vmem>>, vector<16x16xf32>
    tpu.vector_store %arg22[%c224, %c0_82], %147 {strides = array<i32>} : memref<256x16xf32, #tpu.memory_space<vmem>>, vector<16x16xf32>,
    %149 = vector.extract_strided_slice %118 {offsets = [0, 240], sizes = [16, 16], strides = [1, 1]} : vector<16x256xf32> to vector<16x16xf32>
    %c240 = arith.constant 240 : index
    %c0_83 = arith.constant 0 : index
    %150 = vector.load %arg22[%c240, %c0_83] : memref<256x16xf32, #tpu.memory_space<vmem>>, vector<16x16xf32>
    tpu.vector_store %arg22[%c240, %c0_83], %149 {strides = array<i32>} : memref<256x16xf32, #tpu.memory_space<vmem>>, vector<16x16xf32>,
    %c0_84 = arith.constant 0 : index
    %c0_85 = arith.constant 0 : index
    %151 = vector.load %arg12[%c0_84, %c0_85] : memref<32x256xf32, #tpu.memory_space<vmem>>, vector<32x256xf32>
    %c0_86 = arith.constant 0 : index
    %c0_87 = arith.constant 0 : index
    %152 = vector.load %arg22[%c0_86, %c0_87] : memref<256x16xf32, #tpu.memory_space<vmem>>, vector<256x16xf32>
    %cst_88 = arith.constant dense<0.000000e+00> : vector<32x16xf32>
    %153 = tpu.matmul %151, %152, %cst_88 {dimension_numbers = #tpu.dot_dimension_numbers<[1], [0], [0], [1], [0, 0, 1, 1], [], []>, precision = #tpu.contract_precision<fp32>} : vector<32x256xf32>, vector<256x16xf32>, vector<32x16xf32> -> vector<32x16xf32>
    %c0_89 = arith.constant 0 : index
    %c0_90 = arith.constant 0 : index
    %154 = vector.load %arg13[%c0_89, %c0_90] : memref<32x1xf32, #tpu.memory_space<vmem>>, vector<32x1xf32>
    %155 = vector.broadcast %154 : vector<32x1xf32> to vector<32x16xf32>
    %156 = arith.addf %153, %155 : vector<32x16xf32>
    %cst_91 = arith.constant dense<0.000000e+00> : vector<32xf32>
    %157 = vector.multi_reduction <add>, %156, %cst_91 [1] : vector<32x16xf32> to vector<32xf32>
    %158 = vector.shape_cast %157 : vector<32xf32> to vector<32x1xf32>
    %cst_92 = arith.constant 1.600000e+01 : f32
    %159 = vector.broadcast %cst_92 : f32 to vector<32x1xf32>
    %160 = arith.divf %158, %159 : vector<32x1xf32>
    %161 = vector.broadcast %160 : vector<32x1xf32> to vector<32x16xf32>
    %162 = arith.subf %156, %161 : vector<32x16xf32>
    %163 = arith.mulf %162, %162 : vector<32x16xf32>
    %cst_93 = arith.constant dense<0.000000e+00> : vector<32xf32>
    %164 = vector.multi_reduction <add>, %163, %cst_93 [1] : vector<32x16xf32> to vector<32xf32>
    %165 = vector.shape_cast %164 : vector<32xf32> to vector<32x1xf32>
    %cst_94 = arith.constant 1.600000e+01 : f32
    %166 = vector.broadcast %cst_94 : f32 to vector<32x1xf32>
    %167 = arith.divf %165, %166 : vector<32x1xf32>
    %168 = vector.broadcast %160 : vector<32x1xf32> to vector<32x16xf32>
    %169 = arith.subf %156, %168 : vector<32x16xf32>
    %cst_95 = arith.constant 9.99999974E-6 : f32
    %170 = vector.broadcast %cst_95 : f32 to vector<32x1xf32>
    %171 = arith.addf %167, %170 : vector<32x1xf32>
    %172 = math.rsqrt %171 : vector<32x1xf32>
    %173 = vector.broadcast %172 : vector<32x1xf32> to vector<32x16xf32>
    %174 = arith.mulf %169, %173 : vector<32x16xf32>
    %c0_96 = arith.constant 0 : index
    %c0_97 = arith.constant 0 : index
    %175 = vector.load %arg14[%c0_96, %c0_97] : memref<32x1xf32, #tpu.memory_space<vmem>>, vector<32x1xf32>
    %176 = vector.broadcast %175 : vector<32x1xf32> to vector<32x16xf32>
    %177 = arith.mulf %174, %176 : vector<32x16xf32>
    %c0_98 = arith.constant 0 : index
    %c0_99 = arith.constant 0 : index
    %178 = vector.load %arg15[%c0_98, %c0_99] : memref<32x1xf32, #tpu.memory_space<vmem>>, vector<32x1xf32>
    %179 = vector.broadcast %178 : vector<32x1xf32> to vector<32x16xf32>
    %180 = arith.addf %177, %179 : vector<32x16xf32>
    %cst_100 = arith.constant 0.000000e+00 : f32
    %181 = vector.broadcast %cst_100 : f32 to vector<32x16xf32>
    %182 = arith.cmpf oge, %180, %181 : vector<32x16xf32>
    %cst_101 = arith.constant 2.000000e-01 : f32
    %183 = vector.broadcast %cst_101 : f32 to vector<32x16xf32>
    %184 = arith.mulf %183, %180 : vector<32x16xf32>
    %185 = arith.select %182, %180, %184 : vector<32x16xi1>, vector<32x16xf32>
    %186 = vector.extract_strided_slice %185 {offsets = [0, 0], sizes = [1, 16], strides = [1, 1]} : vector<32x16xf32> to vector<1x16xf32>
    %c0_102 = arith.constant 0 : index
    %c0_103 = arith.constant 0 : index
    %187 = vector.load %arg23[%c0_102, %c0_103] : memref<1x512xf32, #tpu.memory_space<vmem>>, vector<1x16xf32>
    tpu.vector_store %arg23[%c0_102, %c0_103], %186 {strides = array<i32>} : memref<1x512xf32, #tpu.memory_space<vmem>>, vector<1x16xf32>,
    %188 = vector.extract_strided_slice %185 {offsets = [1, 0], sizes = [1, 16], strides = [1, 1]} : vector<32x16xf32> to vector<1x16xf32>
    %c0_104 = arith.constant 0 : index
    %c16_105 = arith.constant 16 : index
    %189 = vector.load %arg23[%c0_104, %c16_105] : memref<1x512xf32, #tpu.memory_space<vmem>>, vector<1x16xf32>
    tpu.vector_store %arg23[%c0_104, %c16_105], %188 {strides = array<i32>} : memref<1x512xf32, #tpu.memory_space<vmem>>, vector<1x16xf32>,
    %190 = vector.extract_strided_slice %185 {offsets = [2, 0], sizes = [1, 16], strides = [1, 1]} : vector<32x16xf32> to vector<1x16xf32>
    %c0_106 = arith.constant 0 : index
    %c32_107 = arith.constant 32 : index
    %191 = vector.load %arg23[%c0_106, %c32_107] : memref<1x512xf32, #tpu.memory_space<vmem>>, vector<1x16xf32>
    tpu.vector_store %arg23[%c0_106, %c32_107], %190 {strides = array<i32>} : memref<1x512xf32, #tpu.memory_space<vmem>>, vector<1x16xf32>,
    %192 = vector.extract_strided_slice %185 {offsets = [3, 0], sizes = [1, 16], strides = [1, 1]} : vector<32x16xf32> to vector<1x16xf32>
    %c0_108 = arith.constant 0 : index
    %c48_109 = arith.constant 48 : index
    %193 = vector.load %arg23[%c0_108, %c48_109] : memref<1x512xf32, #tpu.memory_space<vmem>>, vector<1x16xf32>
    tpu.vector_store %arg23[%c0_108, %c48_109], %192 {strides = array<i32>} : memref<1x512xf32, #tpu.memory_space<vmem>>, vector<1x16xf32>,
    %194 = vector.extract_strided_slice %185 {offsets = [4, 0], sizes = [1, 16], strides = [1, 1]} : vector<32x16xf32> to vector<1x16xf32>
    %c0_110 = arith.constant 0 : index
    %c64_111 = arith.constant 64 : index
    %195 = vector.load %arg23[%c0_110, %c64_111] : memref<1x512xf32, #tpu.memory_space<vmem>>, vector<1x16xf32>
    tpu.vector_store %arg23[%c0_110, %c64_111], %194 {strides = array<i32>} : memref<1x512xf32, #tpu.memory_space<vmem>>, vector<1x16xf32>,
    %196 = vector.extract_strided_slice %185 {offsets = [5, 0], sizes = [1, 16], strides = [1, 1]} : vector<32x16xf32> to vector<1x16xf32>
    %c0_112 = arith.constant 0 : index
    %c80_113 = arith.constant 80 : index
    %197 = vector.load %arg23[%c0_112, %c80_113] : memref<1x512xf32, #tpu.memory_space<vmem>>, vector<1x16xf32>
    tpu.vector_store %arg23[%c0_112, %c80_113], %196 {strides = array<i32>} : memref<1x512xf32, #tpu.memory_space<vmem>>, vector<1x16xf32>,
    %198 = vector.extract_strided_slice %185 {offsets = [6, 0], sizes = [1, 16], strides = [1, 1]} : vector<32x16xf32> to vector<1x16xf32>
    %c0_114 = arith.constant 0 : index
    %c96_115 = arith.constant 96 : index
    %199 = vector.load %arg23[%c0_114, %c96_115] : memref<1x512xf32, #tpu.memory_space<vmem>>, vector<1x16xf32>
    tpu.vector_store %arg23[%c0_114, %c96_115], %198 {strides = array<i32>} : memref<1x512xf32, #tpu.memory_space<vmem>>, vector<1x16xf32>,
    %200 = vector.extract_strided_slice %185 {offsets = [7, 0], sizes = [1, 16], strides = [1, 1]} : vector<32x16xf32> to vector<1x16xf32>
    %c0_116 = arith.constant 0 : index
    %c112_117 = arith.constant 112 : index
    %201 = vector.load %arg23[%c0_116, %c112_117] : memref<1x512xf32, #tpu.memory_space<vmem>>, vector<1x16xf32>
    tpu.vector_store %arg23[%c0_116, %c112_117], %200 {strides = array<i32>} : memref<1x512xf32, #tpu.memory_space<vmem>>, vector<1x16xf32>,
    %202 = vector.extract_strided_slice %185 {offsets = [8, 0], sizes = [1, 16], strides = [1, 1]} : vector<32x16xf32> to vector<1x16xf32>
    %c0_118 = arith.constant 0 : index
    %c128_119 = arith.constant 128 : index
    %203 = vector.load %arg23[%c0_118, %c128_119] : memref<1x512xf32, #tpu.memory_space<vmem>>, vector<1x16xf32>
    tpu.vector_store %arg23[%c0_118, %c128_119], %202 {strides = array<i32>} : memref<1x512xf32, #tpu.memory_space<vmem>>, vector<1x16xf32>,
    %204 = vector.extract_strided_slice %185 {offsets = [9, 0], sizes = [1, 16], strides = [1, 1]} : vector<32x16xf32> to vector<1x16xf32>
    %c0_120 = arith.constant 0 : index
    %c144_121 = arith.constant 144 : index
    %205 = vector.load %arg23[%c0_120, %c144_121] : memref<1x512xf32, #tpu.memory_space<vmem>>, vector<1x16xf32>
    tpu.vector_store %arg23[%c0_120, %c144_121], %204 {strides = array<i32>} : memref<1x512xf32, #tpu.memory_space<vmem>>, vector<1x16xf32>,
    %206 = vector.extract_strided_slice %185 {offsets = [10, 0], sizes = [1, 16], strides = [1, 1]} : vector<32x16xf32> to vector<1x16xf32>
    %c0_122 = arith.constant 0 : index
    %c160_123 = arith.constant 160 : index
    %207 = vector.load %arg23[%c0_122, %c160_123] : memref<1x512xf32, #tpu.memory_space<vmem>>, vector<1x16xf32>
    tpu.vector_store %arg23[%c0_122, %c160_123], %206 {strides = array<i32>} : memref<1x512xf32, #tpu.memory_space<vmem>>, vector<1x16xf32>,
    %208 = vector.extract_strided_slice %185 {offsets = [11, 0], sizes = [1, 16], strides = [1, 1]} : vector<32x16xf32> to vector<1x16xf32>
    %c0_124 = arith.constant 0 : index
    %c176_125 = arith.constant 176 : index
    %209 = vector.load %arg23[%c0_124, %c176_125] : memref<1x512xf32, #tpu.memory_space<vmem>>, vector<1x16xf32>
    tpu.vector_store %arg23[%c0_124, %c176_125], %208 {strides = array<i32>} : memref<1x512xf32, #tpu.memory_space<vmem>>, vector<1x16xf32>,
    %210 = vector.extract_strided_slice %185 {offsets = [12, 0], sizes = [1, 16], strides = [1, 1]} : vector<32x16xf32> to vector<1x16xf32>
    %c0_126 = arith.constant 0 : index
    %c192_127 = arith.constant 192 : index
    %211 = vector.load %arg23[%c0_126, %c192_127] : memref<1x512xf32, #tpu.memory_space<vmem>>, vector<1x16xf32>
    tpu.vector_store %arg23[%c0_126, %c192_127], %210 {strides = array<i32>} : memref<1x512xf32, #tpu.memory_space<vmem>>, vector<1x16xf32>,
    %212 = vector.extract_strided_slice %185 {offsets = [13, 0], sizes = [1, 16], strides = [1, 1]} : vector<32x16xf32> to vector<1x16xf32>
    %c0_128 = arith.constant 0 : index
    %c208_129 = arith.constant 208 : index
    %213 = vector.load %arg23[%c0_128, %c208_129] : memref<1x512xf32, #tpu.memory_space<vmem>>, vector<1x16xf32>
    tpu.vector_store %arg23[%c0_128, %c208_129], %212 {strides = array<i32>} : memref<1x512xf32, #tpu.memory_space<vmem>>, vector<1x16xf32>,
    %214 = vector.extract_strided_slice %185 {offsets = [14, 0], sizes = [1, 16], strides = [1, 1]} : vector<32x16xf32> to vector<1x16xf32>
    %c0_130 = arith.constant 0 : index
    %c224_131 = arith.constant 224 : index
    %215 = vector.load %arg23[%c0_130, %c224_131] : memref<1x512xf32, #tpu.memory_space<vmem>>, vector<1x16xf32>
    tpu.vector_store %arg23[%c0_130, %c224_131], %214 {strides = array<i32>} : memref<1x512xf32, #tpu.memory_space<vmem>>, vector<1x16xf32>,
    %216 = vector.extract_strided_slice %185 {offsets = [15, 0], sizes = [1, 16], strides = [1, 1]} : vector<32x16xf32> to vector<1x16xf32>
    %c0_132 = arith.constant 0 : index
    %c240_133 = arith.constant 240 : index
    %217 = vector.load %arg23[%c0_132, %c240_133] : memref<1x512xf32, #tpu.memory_space<vmem>>, vector<1x16xf32>
    tpu.vector_store %arg23[%c0_132, %c240_133], %216 {strides = array<i32>} : memref<1x512xf32, #tpu.memory_space<vmem>>, vector<1x16xf32>,
    %218 = vector.extract_strided_slice %185 {offsets = [16, 0], sizes = [1, 16], strides = [1, 1]} : vector<32x16xf32> to vector<1x16xf32>
    %c0_134 = arith.constant 0 : index
    %c256 = arith.constant 256 : index
    %219 = vector.load %arg23[%c0_134, %c256] : memref<1x512xf32, #tpu.memory_space<vmem>>, vector<1x16xf32>
    tpu.vector_store %arg23[%c0_134, %c256], %218 {strides = array<i32>} : memref<1x512xf32, #tpu.memory_space<vmem>>, vector<1x16xf32>,
    %220 = vector.extract_strided_slice %185 {offsets = [17, 0], sizes = [1, 16], strides = [1, 1]} : vector<32x16xf32> to vector<1x16xf32>
    %c0_135 = arith.constant 0 : index
    %c272 = arith.constant 272 : index
    %221 = vector.load %arg23[%c0_135, %c272] : memref<1x512xf32, #tpu.memory_space<vmem>>, vector<1x16xf32>
    tpu.vector_store %arg23[%c0_135, %c272], %220 {strides = array<i32>} : memref<1x512xf32, #tpu.memory_space<vmem>>, vector<1x16xf32>,
    %222 = vector.extract_strided_slice %185 {offsets = [18, 0], sizes = [1, 16], strides = [1, 1]} : vector<32x16xf32> to vector<1x16xf32>
    %c0_136 = arith.constant 0 : index
    %c288 = arith.constant 288 : index
    %223 = vector.load %arg23[%c0_136, %c288] : memref<1x512xf32, #tpu.memory_space<vmem>>, vector<1x16xf32>
    tpu.vector_store %arg23[%c0_136, %c288], %222 {strides = array<i32>} : memref<1x512xf32, #tpu.memory_space<vmem>>, vector<1x16xf32>,
    %224 = vector.extract_strided_slice %185 {offsets = [19, 0], sizes = [1, 16], strides = [1, 1]} : vector<32x16xf32> to vector<1x16xf32>
    %c0_137 = arith.constant 0 : index
    %c304 = arith.constant 304 : index
    %225 = vector.load %arg23[%c0_137, %c304] : memref<1x512xf32, #tpu.memory_space<vmem>>, vector<1x16xf32>
    tpu.vector_store %arg23[%c0_137, %c304], %224 {strides = array<i32>} : memref<1x512xf32, #tpu.memory_space<vmem>>, vector<1x16xf32>,
    %226 = vector.extract_strided_slice %185 {offsets = [20, 0], sizes = [1, 16], strides = [1, 1]} : vector<32x16xf32> to vector<1x16xf32>
    %c0_138 = arith.constant 0 : index
    %c320 = arith.constant 320 : index
    %227 = vector.load %arg23[%c0_138, %c320] : memref<1x512xf32, #tpu.memory_space<vmem>>, vector<1x16xf32>
    tpu.vector_store %arg23[%c0_138, %c320], %226 {strides = array<i32>} : memref<1x512xf32, #tpu.memory_space<vmem>>, vector<1x16xf32>,
    %228 = vector.extract_strided_slice %185 {offsets = [21, 0], sizes = [1, 16], strides = [1, 1]} : vector<32x16xf32> to vector<1x16xf32>
    %c0_139 = arith.constant 0 : index
    %c336 = arith.constant 336 : index
    %229 = vector.load %arg23[%c0_139, %c336] : memref<1x512xf32, #tpu.memory_space<vmem>>, vector<1x16xf32>
    tpu.vector_store %arg23[%c0_139, %c336], %228 {strides = array<i32>} : memref<1x512xf32, #tpu.memory_space<vmem>>, vector<1x16xf32>,
    %230 = vector.extract_strided_slice %185 {offsets = [22, 0], sizes = [1, 16], strides = [1, 1]} : vector<32x16xf32> to vector<1x16xf32>
    %c0_140 = arith.constant 0 : index
    %c352 = arith.constant 352 : index
    %231 = vector.load %arg23[%c0_140, %c352] : memref<1x512xf32, #tpu.memory_space<vmem>>, vector<1x16xf32>
    tpu.vector_store %arg23[%c0_140, %c352], %230 {strides = array<i32>} : memref<1x512xf32, #tpu.memory_space<vmem>>, vector<1x16xf32>,
    %232 = vector.extract_strided_slice %185 {offsets = [23, 0], sizes = [1, 16], strides = [1, 1]} : vector<32x16xf32> to vector<1x16xf32>
    %c0_141 = arith.constant 0 : index
    %c368 = arith.constant 368 : index
    %233 = vector.load %arg23[%c0_141, %c368] : memref<1x512xf32, #tpu.memory_space<vmem>>, vector<1x16xf32>
    tpu.vector_store %arg23[%c0_141, %c368], %232 {strides = array<i32>} : memref<1x512xf32, #tpu.memory_space<vmem>>, vector<1x16xf32>,
    %234 = vector.extract_strided_slice %185 {offsets = [24, 0], sizes = [1, 16], strides = [1, 1]} : vector<32x16xf32> to vector<1x16xf32>
    %c0_142 = arith.constant 0 : index
    %c384 = arith.constant 384 : index
    %235 = vector.load %arg23[%c0_142, %c384] : memref<1x512xf32, #tpu.memory_space<vmem>>, vector<1x16xf32>
    tpu.vector_store %arg23[%c0_142, %c384], %234 {strides = array<i32>} : memref<1x512xf32, #tpu.memory_space<vmem>>, vector<1x16xf32>,
    %236 = vector.extract_strided_slice %185 {offsets = [25, 0], sizes = [1, 16], strides = [1, 1]} : vector<32x16xf32> to vector<1x16xf32>
    %c0_143 = arith.constant 0 : index
    %c400 = arith.constant 400 : index
    %237 = vector.load %arg23[%c0_143, %c400] : memref<1x512xf32, #tpu.memory_space<vmem>>, vector<1x16xf32>
    tpu.vector_store %arg23[%c0_143, %c400], %236 {strides = array<i32>} : memref<1x512xf32, #tpu.memory_space<vmem>>, vector<1x16xf32>,
    %238 = vector.extract_strided_slice %185 {offsets = [26, 0], sizes = [1, 16], strides = [1, 1]} : vector<32x16xf32> to vector<1x16xf32>
    %c0_144 = arith.constant 0 : index
    %c416 = arith.constant 416 : index
    %239 = vector.load %arg23[%c0_144, %c416] : memref<1x512xf32, #tpu.memory_space<vmem>>, vector<1x16xf32>
    tpu.vector_store %arg23[%c0_144, %c416], %238 {strides = array<i32>} : memref<1x512xf32, #tpu.memory_space<vmem>>, vector<1x16xf32>,
    %240 = vector.extract_strided_slice %185 {offsets = [27, 0], sizes = [1, 16], strides = [1, 1]} : vector<32x16xf32> to vector<1x16xf32>
    %c0_145 = arith.constant 0 : index
    %c432 = arith.constant 432 : index
    %241 = vector.load %arg23[%c0_145, %c432] : memref<1x512xf32, #tpu.memory_space<vmem>>, vector<1x16xf32>
    tpu.vector_store %arg23[%c0_145, %c432], %240 {strides = array<i32>} : memref<1x512xf32, #tpu.memory_space<vmem>>, vector<1x16xf32>,
    %242 = vector.extract_strided_slice %185 {offsets = [28, 0], sizes = [1, 16], strides = [1, 1]} : vector<32x16xf32> to vector<1x16xf32>
    %c0_146 = arith.constant 0 : index
    %c448 = arith.constant 448 : index
    %243 = vector.load %arg23[%c0_146, %c448] : memref<1x512xf32, #tpu.memory_space<vmem>>, vector<1x16xf32>
    tpu.vector_store %arg23[%c0_146, %c448], %242 {strides = array<i32>} : memref<1x512xf32, #tpu.memory_space<vmem>>, vector<1x16xf32>,
    %244 = vector.extract_strided_slice %185 {offsets = [29, 0], sizes = [1, 16], strides = [1, 1]} : vector<32x16xf32> to vector<1x16xf32>
    %c0_147 = arith.constant 0 : index
    %c464 = arith.constant 464 : index
    %245 = vector.load %arg23[%c0_147, %c464] : memref<1x512xf32, #tpu.memory_space<vmem>>, vector<1x16xf32>
    tpu.vector_store %arg23[%c0_147, %c464], %244 {strides = array<i32>} : memref<1x512xf32, #tpu.memory_space<vmem>>, vector<1x16xf32>,
    %246 = vector.extract_strided_slice %185 {offsets = [30, 0], sizes = [1, 16], strides = [1, 1]} : vector<32x16xf32> to vector<1x16xf32>
    %c0_148 = arith.constant 0 : index
    %c480 = arith.constant 480 : index
    %247 = vector.load %arg23[%c0_148, %c480] : memref<1x512xf32, #tpu.memory_space<vmem>>, vector<1x16xf32>
    tpu.vector_store %arg23[%c0_148, %c480], %246 {strides = array<i32>} : memref<1x512xf32, #tpu.memory_space<vmem>>, vector<1x16xf32>,
    %248 = vector.extract_strided_slice %185 {offsets = [31, 0], sizes = [1, 16], strides = [1, 1]} : vector<32x16xf32> to vector<1x16xf32>
    %c0_149 = arith.constant 0 : index
    %c496 = arith.constant 496 : index
    %249 = vector.load %arg23[%c0_149, %c496] : memref<1x512xf32, #tpu.memory_space<vmem>>, vector<1x16xf32>
    tpu.vector_store %arg23[%c0_149, %c496], %248 {strides = array<i32>} : memref<1x512xf32, #tpu.memory_space<vmem>>, vector<1x16xf32>,
    %c0_150 = arith.constant 0 : index
    %c0_151 = arith.constant 0 : index
    %250 = vector.load %arg23[%c0_150, %c0_151] : memref<1x512xf32, #tpu.memory_space<vmem>>, vector<1x512xf32>
    %c0_152 = arith.constant 0 : index
    %c0_153 = arith.constant 0 : index
    %251 = vector.load %arg16[%c0_152, %c0_153] : memref<512x64xf32, #tpu.memory_space<vmem>>, vector<512x64xf32>
    %cst_154 = arith.constant dense<0.000000e+00> : vector<1x64xf32>
    %252 = tpu.matmul %250, %251, %cst_154 {dimension_numbers = #tpu.dot_dimension_numbers<[1], [0], [0], [1], [0, 0, 1, 1], [], []>, precision = #tpu.contract_precision<fp32>} : vector<1x512xf32>, vector<512x64xf32>, vector<1x64xf32> -> vector<1x64xf32>
    %c0_155 = arith.constant 0 : index
    %c0_156 = arith.constant 0 : index
    %253 = vector.load %arg17[%c0_155, %c0_156] : memref<1x64xf32, #tpu.memory_space<vmem>>, vector<1x64xf32>
    %254 = arith.addf %252, %253 : vector<1x64xf32>
    %cst_157 = arith.constant 0.000000e+00 : f32
    %255 = vector.broadcast %cst_157 : f32 to vector<1x64xf32>
    %256 = arith.cmpf oge, %254, %255 : vector<1x64xf32>
    %cst_158 = arith.constant 2.000000e-01 : f32
    %257 = vector.broadcast %cst_158 : f32 to vector<1x64xf32>
    %258 = arith.mulf %257, %254 : vector<1x64xf32>
    %259 = arith.select %256, %254, %258 : vector<1x64xi1>, vector<1x64xf32>
    %c0_159 = arith.constant 0 : index
    %c0_160 = arith.constant 0 : index
    %260 = vector.load %arg18[%c0_159, %c0_160] : memref<64x5xf32, #tpu.memory_space<vmem>>, vector<64x5xf32>
    %cst_161 = arith.constant dense<0.000000e+00> : vector<1x5xf32>
    %261 = tpu.matmul %259, %260, %cst_161 {dimension_numbers = #tpu.dot_dimension_numbers<[1], [0], [0], [1], [0, 0, 1, 1], [], []>, precision = #tpu.contract_precision<fp32>} : vector<1x64xf32>, vector<64x5xf32>, vector<1x5xf32> -> vector<1x5xf32>
    %c0_162 = arith.constant 0 : index
    %c0_163 = arith.constant 0 : index
    %262 = vector.load %arg19[%c0_162, %c0_163] : memref<1x5xf32, #tpu.memory_space<vmem>>, vector<1x5xf32>
    %263 = arith.addf %261, %262 : vector<1x5xf32>
    %c0_164 = arith.constant 0 : index
    %c0_165 = arith.constant 0 : index
    %c0_166 = arith.constant 0 : index
    %264 = vector.load %arg20[%c0_164, %c0_165, %c0_166] : memref<1x1x5xf32, #tpu.memory_space<vmem>>, vector<1x1x5xf32>
    %265 = vector.shape_cast %264 : vector<1x1x5xf32> to vector<1x5xf32>
    %266 = vector.shape_cast %263 : vector<1x5xf32> to vector<1x1x5xf32>
    tpu.vector_store %arg20[%c0_164, %c0_165, %c0_166], %266 {strides = array<i32>} : memref<1x1x5xf32, #tpu.memory_space<vmem>>, vector<1x1x5xf32>,
    return
  }
  func.func @transform_0(%arg0: i32) -> (i32, i32, i32) {
    %c0_i32 = arith.constant 0 : i32
    %c0_i32_0 = arith.constant 0 : i32
    %c0_i32_1 = arith.constant 0 : i32
    return %arg0, %c0_i32, %c0_i32_0 : i32, i32, i32
  }
  func.func @transform_1(%arg0: i32) -> (i32, i32) {
    %c0_i32 = arith.constant 0 : i32
    %c0_i32_0 = arith.constant 0 : i32
    %c0_i32_1 = arith.constant 0 : i32
    return %c0_i32, %c0_i32_0 : i32, i32
  }
  func.func @transform_2(%arg0: i32) -> (i32, i32) {
    %c0_i32 = arith.constant 0 : i32
    %c0_i32_0 = arith.constant 0 : i32
    %c0_i32_1 = arith.constant 0 : i32
    return %c0_i32, %c0_i32_0 : i32, i32
  }
  func.func @transform_3(%arg0: i32) -> (i32, i32) {
    %c0_i32 = arith.constant 0 : i32
    %c0_i32_0 = arith.constant 0 : i32
    %c0_i32_1 = arith.constant 0 : i32
    return %c0_i32, %c0_i32_0 : i32, i32
  }
  func.func @transform_4(%arg0: i32) -> (i32, i32) {
    %c0_i32 = arith.constant 0 : i32
    %c0_i32_0 = arith.constant 0 : i32
    %c0_i32_1 = arith.constant 0 : i32
    return %c0_i32, %c0_i32_0 : i32, i32
  }
  func.func @transform_5(%arg0: i32) -> (i32, i32) {
    %c0_i32 = arith.constant 0 : i32
    %c0_i32_0 = arith.constant 0 : i32
    %c0_i32_1 = arith.constant 0 : i32
    return %c0_i32, %c0_i32_0 : i32, i32
  }
  func.func @transform_6(%arg0: i32) -> (i32, i32) {
    %c0_i32 = arith.constant 0 : i32
    %c0_i32_0 = arith.constant 0 : i32
    %c0_i32_1 = arith.constant 0 : i32
    return %c0_i32, %c0_i32_0 : i32, i32
  }
  func.func @transform_7(%arg0: i32) -> (i32, i32) {
    %c0_i32 = arith.constant 0 : i32
    %c0_i32_0 = arith.constant 0 : i32
    %c0_i32_1 = arith.constant 0 : i32
    return %c0_i32, %c0_i32_0 : i32, i32
  }
  func.func @transform_8(%arg0: i32) -> (i32, i32) {
    %c0_i32 = arith.constant 0 : i32
    %c0_i32_0 = arith.constant 0 : i32
    %c0_i32_1 = arith.constant 0 : i32
    return %c0_i32, %c0_i32_0 : i32, i32
  }
  func.func @transform_9(%arg0: i32) -> (i32, i32) {
    %c0_i32 = arith.constant 0 : i32
    %c0_i32_0 = arith.constant 0 : i32
    %c0_i32_1 = arith.constant 0 : i32
    return %c0_i32, %c0_i32_0 : i32, i32
  }
  func.func @transform_10(%arg0: i32) -> (i32, i32) {
    %c0_i32 = arith.constant 0 : i32
    %c0_i32_0 = arith.constant 0 : i32
    %c0_i32_1 = arith.constant 0 : i32
    return %c0_i32, %c0_i32_0 : i32, i32
  }
  func.func @transform_11(%arg0: i32) -> (i32, i32) {
    %c0_i32 = arith.constant 0 : i32
    %c0_i32_0 = arith.constant 0 : i32
    %c0_i32_1 = arith.constant 0 : i32
    return %c0_i32, %c0_i32_0 : i32, i32
  }
  func.func @transform_12(%arg0: i32) -> (i32, i32) {
    %c0_i32 = arith.constant 0 : i32
    %c0_i32_0 = arith.constant 0 : i32
    %c0_i32_1 = arith.constant 0 : i32
    return %c0_i32, %c0_i32_0 : i32, i32
  }
  func.func @transform_13(%arg0: i32) -> (i32, i32) {
    %c0_i32 = arith.constant 0 : i32
    %c0_i32_0 = arith.constant 0 : i32
    %c0_i32_1 = arith.constant 0 : i32
    return %c0_i32, %c0_i32_0 : i32, i32
  }
  func.func @transform_14(%arg0: i32) -> (i32, i32) {
    %c0_i32 = arith.constant 0 : i32
    %c0_i32_0 = arith.constant 0 : i32
    %c0_i32_1 = arith.constant 0 : i32
    return %c0_i32, %c0_i32_0 : i32, i32
  }
  func.func @transform_15(%arg0: i32) -> (i32, i32) {
    %c0_i32 = arith.constant 0 : i32
    %c0_i32_0 = arith.constant 0 : i32
    %c0_i32_1 = arith.constant 0 : i32
    return %c0_i32, %c0_i32_0 : i32, i32
  }
  func.func @transform_16(%arg0: i32) -> (i32, i32) {
    %c0_i32 = arith.constant 0 : i32
    %c0_i32_0 = arith.constant 0 : i32
    %c0_i32_1 = arith.constant 0 : i32
    return %c0_i32, %c0_i32_0 : i32, i32
  }
  func.func @transform_17(%arg0: i32) -> (i32, i32) {
    %c0_i32 = arith.constant 0 : i32
    %c0_i32_0 = arith.constant 0 : i32
    %c0_i32_1 = arith.constant 0 : i32
    return %c0_i32, %c0_i32_0 : i32, i32
  }
  func.func @transform_18(%arg0: i32) -> (i32, i32) {
    %c0_i32 = arith.constant 0 : i32
    %c0_i32_0 = arith.constant 0 : i32
    %c0_i32_1 = arith.constant 0 : i32
    return %c0_i32, %c0_i32_0 : i32, i32
  }
  func.func @transform_19(%arg0: i32) -> (i32, i32, i32) {
    %c0_i32 = arith.constant 0 : i32
    %c0_i32_0 = arith.constant 0 : i32
    %c0_i32_1 = arith.constant 0 : i32
    return %arg0, %c0_i32, %c0_i32_0 : i32, i32, i32
  }
}

</mosaic_0001>

<bundles_post_ra>
// kernel: discriminator_forward.1
= control target key start
LH: loop header
LB: loop body
LE: loop exit
PB: predicated region body
PF: predicated region fallthrough
CT: control target
= control target key end

     0   :  { %s13945_s0 = inlined_call_operand.vmem [shape: f32[2,48,256], index: 0, kind: input, shape index: {}]   ;;  %s13946_s1 = inlined_call_operand.vmem [shape: f32[8,48], index: 1, kind: input, shape index: {}]   ;;  %s13947_s2 = inlined_call_operand.vmem [shape: f32[8,1], index: 2, kind: input, shape index: {}]   ;;  %s13948_s3 = inlined_call_operand.vmem [shape: f32[8,1], index: 3, kind: input, shape index: {}]   ;;  %s13949_s4 = inlined_call_operand.vmem [shape: f32[8,1], index: 4, kind: input, shape index: {}]   ;;  %s13950_s5 = inlined_call_operand.vmem [shape: bf16[256,1024], index: 5, kind: input, shape index: {}]   ;;  %s13951_s6 = inlined_call_operand.vmem [shape: f32[16,128], index: 6, kind: input, shape index: {}]   ;;  %s13952_s7 = inlined_call_operand.vmem [shape: f32[16,1], index: 7, kind: input, shape index: {}]   ;;  %s13953_s8 = inlined_call_operand.vmem [shape: f32[16,1], index: 8, kind: input, shape index: {}]   ;;  %s13954_s9 = inlined_call_operand.vmem [shape: f32[16,1], index: 9, kind: input, shape index: {}]   ;;  %s13955_s10 = inlined_call_operand.vmem [shape: bf16[64,256], index: 10, kind: input, shape index: {}]   ;;  %s13956_s11 = inlined_call_operand.vmem [shape: f32[32,256], index: 11, kind: input, shape index: {}]   ;;  %s13957_s12 = inlined_call_operand.vmem [shape: f32[32,1], index: 12, kind: input, shape index: {}]   ;;  %s13958_s13 = inlined_call_operand.vmem [shape: f32[32,1], index: 13, kind: input, shape index: {}]   ;;  %s13959_s14 = inlined_call_operand.vmem [shape: f32[32,1], index: 14, kind: input, shape index: {}]   ;;  %s13960_s15 = inlined_call_operand.vmem [shape: f32[512,64], index: 15, kind: input, shape index: {}]   ;;  %s13961_s16 = inlined_call_operand.vmem [shape: f32[1,64], index: 16, kind: input, shape index: {}]   ;;  %s13962_s17 = inlined_call_operand.vmem [shape: f32[64,5], index: 17, kind: input, shape index: {}]   ;;  %s13963_s18 = inlined_call_operand.vmem [shape: f32[1,5], index: 18, kind: input, shape index: {}]   ;;  %s13964_s19 = inlined_call_operand.vmem [shape: f32[2,1,5], index: 19, kind: output, shape index: {}]  }
   0x1   :  { %14188 = sst [smem:[#allocation44_spill]] %s13945_s0  ;;  %s9872_s0 = smov 0  }
   0x2   :  { %14189 = sst [smem:[#allocation45_spill]] %s13946_s1 }
   0x3   :  { %14190 = sst [smem:[#allocation46_spill]] %s13947_s2 }
   0x4   :  { %14191 = sst [smem:[#allocation47_spill]] %s13948_s3 }
   0x5 LB: > { %s7420_s30 = sadd.s32 4294967295, %s9758_s0   ;;  %p7424_p0 = scmp.ge.s32.totalorder %s9758_s0, 1  ;;  %s9758_s0 = sphi %s9872_s0, %s29_s0  }
   0x6   : > { %p537_p1 = scmp.lt.s32.totalorder %s9758_s0, 3 }
   0x8   : > { %p538_p2 = pnand %p7424_p0, %p537_p1 }
   0xa   : > { %541 = sbr.rel (%p538_p2) target bundleno = 3898 (0xf3a), region = 96 }
  0x11   : > { %p591_p3 = scmp.lt.s32.totalorder %s7420_s30, 1  ;;  %s14192_s1 = sld [smem:[#allocation45_spill]]  ;;  %vm619_vm0 = vcmask 392192   ;;  %v13965_v2 = vmov 0.0   ;;  %v13967_v4 = vmov 0   ;;  %vm2361_vm3 = vcmask 523264  }
  0x12   : > { %s14193_s23 = sld [smem:[#allocation46_spill]]  ;;  %699 = vmatprep.mubr.f32.mxu0 %v13965_v2  ;;  %9724 = vset.pattern.permute.xlu0 %v13967_v4  ;;  %s14194_s26 = sld [smem:[#allocation44_spill]]  ;;  %vm3331_vm6 = vcmask 130048  }
  0x13   : > { %s14670_s30 = smov (!%p591_p3, %s7420_s30), 1  ;;  %9725 = vset.pattern.permute.xlu1 %v13967_v4  ;;  %s14195_s20 = sld [smem:[#allocation47_spill]]  ;;  %v1373_v4 = vld [vmem:[%s13950_s5 + $0x3a0] sm:$0xff] }
  0x14   : > { %s9703_s24 = smul.u32 96, %s14670_s30  ;;  %s9762_s29 = smov 64  }
  0x15   : > { %s14008_s3 = smov 112   ;;  %s14077_s28 = smov 48  }
  0x16   : > { %s9768_s22 = smov 16   ;;  %s14381_s2 = smov 48  }
  0x17   : > { %v600_v0 = vld [vmem:[%s14192_s1] sm:$0xff] }
  0x18   : > { %v613_v1 = vld [vmem:[%s14193_s23] sm:$0xff]  ;;  %v621_v3 = vsel %vm619_vm0, %v600_v0, 0  ;;  %s595_s27 = scalar_lea.vmem %s14194_s26, %s9703_s24  ;;  %s14010_s26 = smov 96  }
  0x19   : > { %v9890_v5 = vand.u32 4294901760, %v621_v3  ;;  %616 = vperm.xlu0 %9724, %v613_v1   ;;  %v602_v8 = vld [vmem:[%s595_s27 + $0x8] sm:$0xff]  ;;  %v604_v9 = vld [vmem:[%s595_s27 + $0x18] sm:$0xff]  ;;  %v601_v10 = vld [vmem:[%s595_s27] sm:$0xff]  ;;  %s14383_s23 = smov 96  }
  0x1a   : > { %v623_v11 = vand.u32 4294901760, %v602_v8  ;;  %v627_v12 = vand.u32 4294901760, %v604_v9  ;;  %v603_v13 = vld [vmem:[%s595_s27 + $0x10] sm:$0xff]  ;;  %v625_v14 = vand.u32 4294901760, %v601_v10  ;;  %v606_v15 = vld [vmem:[%s595_s27 + $0x28] sm:$0xff]  ;;  %v608_v16 = vld [vmem:[%s595_s27 + $0x38] sm:$0xff] }
  0x1b   : > { %v9895_v6 = vsub.f32 %v621_v3, %v9890_v5  ;;  %v629_v17 = vand.u32 4294901760, %v603_v13  ;;  %v631_v18 = vand.u32 4294901760, %v606_v15  ;;  %v635_v19 = vand.u32 4294901760, %v608_v16  ;;  %v605_v20 = vld [vmem:[%s595_s27 + $0x20] sm:$0xff]  ;;  %v607_v21 = vld [vmem:[%s595_s27 + $0x30] sm:$0xff]  ;;  %v610_v22 = vld [vmem:[%s595_s27 + $0x48] sm:$0xff] }
  0x1c   : > { %v9906_v24 = vpack.c.bf16 %v627_v12, %v623_v11  ;;  %v9908_v25 = vsub.f32 %v602_v8, %v623_v11  ;;  %v9910_v26 = vsub.f32 %v604_v9, %v627_v12  ;;  %v9912_v27 = vsub.f32 %v601_v10, %v625_v14  ;;  %v612_v28 = vld [vmem:[%s595_s27 + $0x58] sm:$0xff]  ;;  %v609_v29 = vld [vmem:[%s595_s27 + $0x40] sm:$0xff]  ;;  %v611_v30 = vld [vmem:[%s595_s27 + $0x50] sm:$0xff]  ;;  %s14075_s27 = smov 80  }
  0x1d   : > { %v702_v7 = vand.u32 4294901760, %v9895_v6  ;;  %v9914_v31 = vpack.c.bf16 %v629_v17, %v625_v14  ;;  %v9916_v32 = vsub.f32 %v603_v13, %v629_v17  ;;  %v9918_v33 = vpack.c.bf16 %v635_v19, %v631_v18 }
  0x1e   : > { %v9920_v34 = vsub.f32 %v606_v15, %v631_v18  ;;  %8737 = vmatprep.subr.bf16.mxu0 %v9906_v24  ;;  %v9923_v35 = vsub.f32 %v608_v16, %v635_v19  ;;  %v633_v36 = vand.u32 4294901760, %v605_v20  ;;  %v637_v37 = vand.u32 4294901760, %v607_v21 }
  0x1f   : > { %v9904_v23 = vsub.f32 %v9895_v6, %v702_v7  ;;  %v639_v38 = vand.u32 4294901760, %v610_v22  ;;  %8739 = vmatpush1.bf16.msra.mxu0 %v9914_v31  ;;  %v643_v39 = vand.u32 4294901760, %v612_v28  ;;  %v641_v40 = vand.u32 4294901760, %v609_v29 }
  0x20   : > { %v645_v41 = vand.u32 4294901760, %v611_v30  ;;  %v713_v42 = vand.u32 4294901760, %v9908_v25  ;;  %8741 = vmatprep.subr.bf16.mxu0 %v9918_v33  ;;  %v9928_v43 = vpack.c.bf16 %v637_v37, %v633_v36  ;;  %v9930_v44 = vsub.f32 %v605_v20, %v633_v36 }
  0x21   : > { %v9932_v45 = vsub.f32 %v607_v21, %v637_v37  ;;  %v9934_v46 = vsub.f32 %v610_v22, %v639_v38  ;;  %v9936_v47 = vpack.c.bf16 %v643_v39, %v639_v38  ;;  %v9938_v48 = vsub.f32 %v612_v28, %v643_v39 }
  0x22   : > { %v9940_v49 = vpack.c.bf16 %v645_v41, %v641_v40  ;;  %v9942_v50 = vsub.f32 %v609_v29, %v641_v40  ;;  %v9944_v51 = vsub.f32 %v611_v30, %v645_v41  ;;  %v714_v52 = vsub.f32 %v9908_v25, %v713_v42 }
  0x23   : > { %v725_v53 = vand.u32 4294901760, %v9910_v26  ;;  %v704_v54 = vand.u32 4294901760, %v9904_v23  ;;  %8743 = vmatpush1.bf16.msra.mxu0 %v9928_v43  ;;  %v719_v55 = vand.u32 4294901760, %v9912_v27  ;;  %v731_v56 = vand.u32 4294901760, %v9916_v32 }
  0x24   : > { %v737_v57 = vand.u32 4294901760, %v9920_v34  ;;  %v749_v58 = vand.u32 4294901760, %v9923_v35  ;;  %8745 = vmatprep.subr.bf16.mxu0 %v9936_v47  ;;  %v715_v59 = vand.u32 4294901760, %v714_v52  ;;  %v743_v61 = vand.u32 4294901760, %v9930_v44 }
  0x25   : > { %v726_v60 = vsub.f32 %v9910_v26, %v725_v53  ;;  %v755_v62 = vand.u32 4294901760, %v9932_v45  ;;  %v720_v63 = vsub.f32 %v9912_v27, %v719_v55  ;;  %v732_v0 = vsub.f32 %v9916_v32, %v731_v56 }
  0x26   : > { %v738_v1 = vsub.f32 %v9920_v34, %v737_v57  ;;  %v750_v3 = vsub.f32 %v9923_v35, %v749_v58  ;;  %v744_v9 = vsub.f32 %v9930_v44, %v743_v61  ;;  %v761_v11 = vand.u32 4294901760, %v9934_v46 }
  0x27   : > { %v727_v8 = vand.u32 4294901760, %v726_v60  ;;  %v756_v10 = vsub.f32 %v9932_v45, %v755_v62  ;;  %8747 = vmatpush1.bf16.msra.mxu0 %v9940_v49  ;;  %v721_v12 = vand.u32 4294901760, %v720_v63  ;;  %v733_v13 = vand.u32 4294901760, %v732_v0 }
  0x28   : > { %v739_v14 = vand.u32 4294901760, %v738_v1  ;;  %v751_v15 = vand.u32 4294901760, %v750_v3  ;;  %v745_v17 = vand.u32 4294901760, %v744_v9  ;;  %v762_v19 = vsub.f32 %v9934_v46, %v761_v11  ;;  %v1279_v9 = vld [vmem:[%s13950_s5 + $0xb0] sm:$0xff] }
  0x29   : > { %v8748_v16 = vpack.c.bf16 %v727_v8, %v715_v59  ;;  %v757_v18 = vand.u32 4294901760, %v756_v10  ;;  %v8750_v20 = vpack.c.bf16 %v733_v13, %v721_v12  ;;  %v773_v22 = vand.u32 4294901760, %v9938_v48  ;;  %v1275_v8 = vld [vmem:[%s13950_s5 + $0x90] sm:$0xff] }
  0x2a   : > { %v8752_v21 = vpack.c.bf16 %v751_v15, %v739_v14  ;;  %v767_v23 = vand.u32 4294901760, %v9942_v50  ;;  %705 = vmatmul.mubr.f32.vlgmr.msra.gmra.mrb[0].mxu0 %v704_v54  ;;  %v779_v28 = vand.u32 4294901760, %v9944_v51  ;;  %v763_v30 = vand.u32 4294901760, %v762_v19  ;;  %v1281_v14 = vld [vmem:[%s13950_s5 + $0xc0] sm:$0xff] }
  0x2b   : > { %8749 = vmatprep.subr.bf16.mxu0 %v8748_v16  ;;  %v8754_v29 = vpack.c.bf16 %v757_v18, %v745_v17  ;;  %v774_v36 = vsub.f32 %v9938_v48, %v773_v22  ;;  %835 = vmatprep.mubr.f32.mxu0 %v13965_v2  ;;  %v8760_v59 = vpack.c.bf16 %v9910_v26, %v9908_v25  ;;  %v1285_v15 = vld [vmem:[%s13950_s5 + $0xe0] sm:$0xff]  ;;  %v1283_v16 = vld [vmem:[%s13950_s5 + $0xd0] sm:$0xff] }
  0x2c   : > { %8751 = vmatpush1.bf16.msra.mxu0 %v8750_v20  ;;  %v768_v37 = vsub.f32 %v9942_v50, %v767_v23  ;;  %v780_v38 = vsub.f32 %v9944_v51, %v779_v28  ;;  %v8762_v60 = vpack.c.bf16 %v9916_v32, %v9912_v27  ;;  %v8764_v63 = vpack.c.bf16 %v9923_v35, %v9920_v34  ;;  %v1261_v35 = vld [vmem:[%s13950_s5 + $0x20] sm:$0xff]  ;;  %v1287_v17 = vld [vmem:[%s13950_s5 + $0xf0] sm:$0xff] }
  0x2d   : > { %8753 = vmatprep.subr.bf16.mxu0 %v8752_v21  ;;  %v775_v39 = vand.u32 4294901760, %v774_v36  ;;  %v8766_v0 = vpack.c.bf16 %v9932_v45, %v9930_v44  ;;  %v8768_v1 = vpack.c.bf16 %v9938_v48, %v9934_v46  ;;  %v8770_v3 = vpack.c.bf16 %v9944_v51, %v9942_v50  ;;  %v1263_v44 = vld [vmem:[%s13950_s5 + $0x30] sm:$0xff]  ;;  %v1265_v46 = vld [vmem:[%s13950_s5 + $0x40] sm:$0xff] }
  0x2e   : > { %v769_v40 = vand.u32 4294901760, %v768_v37  ;;  %v781_v41 = vand.u32 4294901760, %v780_v38  ;;  %v8784_v48 = vpack.c.bf16 %v725_v53, %v713_v42  ;;  %v8786_v50 = vpack.c.bf16 %v731_v56, %v719_v55  ;;  %v1259_v42 = vld [vmem:[%s13950_s5 + $0x10] sm:$0xff] }
  0x2f   : > { %v8756_v52 = vpack.c.bf16 %v775_v39, %v763_v30  ;;  %v8788_v51 = vpack.c.bf16 %v749_v58, %v737_v57  ;;  %v8790_v25 = vpack.c.bf16 %v755_v62, %v743_v61  ;;  %v8792_v26 = vpack.c.bf16 %v773_v22, %v761_v11  ;;  %v1267_v56 = vld [vmem:[%s13950_s5 + $0x50] sm:$0xff]  ;;  %v1273_v58 = vld [vmem:[%s13950_s5 + $0x80] sm:$0xff] }
  0x30   : > { %8755 = vmatpush1.bf16.msra.mxu0 %v8754_v29  ;;  %v8758_v54 = vpack.c.bf16 %v781_v41, %v769_v40  ;;  %v8794_v27 = vpack.c.bf16 %v779_v28, %v767_v23  ;;  %v10077_v53 = vcombine.high %v1259_v42, %v1263_v44  ;;  %v1271_v57 = vld [vmem:[%s13950_s5 + $0x70] sm:$0xff]  ;;  %v1277_v62 = vld [vmem:[%s13950_s5 + $0xa0] sm:$0xff]  ;;  %v10113_v13 = vcombine.high %v1275_v8, %v1279_v9 }
  0x31   : > { %8757 = vmatprep.subr.bf16.mxu0 %v8756_v52  ;;  %v10091_v61 = vcombine.high %v1267_v56, %v1271_v57  ;;  %v10108_v11 = vcombine.low %v1267_v56, %v1271_v57  ;;  %v10110_v12 = vcombine.high %v1273_v58, %v1277_v62  ;;  %v10128_v18 = vcombine.low %v1273_v58, %v1277_v62  ;;  %v1289_v22 = vld [vmem:[%s13950_s5 + $0x100] sm:$0xff]  ;;  %v1291_v28 = vld [vmem:[%s13950_s5 + $0x110] sm:$0xff] }
  0x32   : > { %v10132_v19 = vcombine.low %v1275_v8, %v1279_v9  ;;  %v10134_v20 = vcombine.high %v1281_v14, %v1285_v15  ;;  %v10137_v21 = vcombine.high %v1283_v16, %v1287_v17  ;;  %v1293_v23 = vld [vmem:[%s13950_s5 + $0x120] sm:$0xff]  ;;  %v1295_v29 = vld [vmem:[%s13950_s5 + $0x130] sm:$0xff]  ;;  %v10152_v30 = vcombine.low %v1281_v14, %v1285_v15 }
  0x33   : > { %v10156_v36 = vcombine.low %v1283_v16, %v1287_v17  ;;  %v10158_v37 = vcombine.high %v1289_v22, %v1293_v23  ;;  %v10161_v38 = vcombine.high %v1291_v28, %v1295_v29  ;;  %v1297_v39 = vld [vmem:[%s13950_s5 + $0x140] sm:$0xff]  ;;  %v1299_v41 = vld [vmem:[%s13950_s5 + $0x150] sm:$0xff] }
  0x34   : > { %8759 = vmatpush1.bf16.msra.mxu0 %v8758_v54  ;;  %v1301_v40 = vld [vmem:[%s13950_s5 + $0x160] sm:$0xff]  ;;  %v1303_v52 = vld [vmem:[%s13950_s5 + $0x170] sm:$0xff]  ;;  %v10176_v54 = vcombine.low %v1289_v22, %v1293_v23 }
  0x35   : > { %8761 = vmatprep.subr.bf16.mxu0 %v8760_v59  ;;  %v10180_v59 = vcombine.low %v1291_v28, %v1295_v29  ;;  %v1321_v9 = vld [vmem:[%s13950_s5 + $0x200] sm:$0xff]  ;;  %v1327_v15 = vld [vmem:[%s13950_s5 + $0x230] sm:$0xff] }
  0x36   : > { %v1243_v23 = vld [vmem:[%s13949_s4] sm:$0xff] }
  0x37   : > { %837 = vmatmul.mubr.f32.vlgmr.msra.gmra.mrb[0].mxu0 %v9890_v5  ;;  %v1329_v28 = vld [vmem:[%s13950_s5 + $0x240] sm:$0xff] }
  0x38   : > { %8763 = vmatpush1.bf16.msra.mxu0 %v8762_v60  ;;  %931 = vmatprep.mubr.f32.mxu0 %v13965_v2  ;;  %v10182_v60 = vcombine.high %v1297_v39, %v1301_v40  ;;  %v1333_v29 = vld [vmem:[%s13950_s5 + $0x260] sm:$0xff] }
  0x39   : > { %8765 = vmatprep.subr.bf16.mxu0 %v8764_v63  ;;  %v10185_v63 = vcombine.high %v1299_v41, %v1303_v52 }
  0x3c   : > { %8767 = vmatpush1.bf16.msra.mxu0 %v8766_v0  ;;  %v1305_v0 = vld [vmem:[%s13950_s5 + $0x180] sm:$0xff] }
  0x3d   : > { %8769 = vmatprep.subr.bf16.mxu0 %v8768_v1  ;;  %v1309_v1 = vld [vmem:[%s13950_s5 + $0x1a0] sm:$0xff] }
  0x40   : > { %8771 = vmatpush1.bf16.msra.mxu0 %v8770_v3  ;;  %v1307_v3 = vld [vmem:[%s13950_s5 + $0x190] sm:$0xff] }
  0x41   : > { %8773 = vmatprep.subr.bf16.mxu0 %v9906_v24 }
  0x43   : > { %934 = vmatmul.mubr.f32.vlgmr.msra.gmra.mrb[0].mxu0 %v9895_v6  ;;  %v1235_v6 = vld [vmem:[%s14195_s20] sm:$0xff]  ;;  %s9767_s20 = smov 32  }
  0x44   : > { %8775 = vmatpush1.bf16.msra.mxu0 %v9914_v31  ;;  %1016 = vmatprep.mubr.f32.mxu0 %v13965_v2 }
  0x45   : > { %8777 = vmatprep.subr.bf16.mxu0 %v9918_v33  ;;  %1238 = vperm.xlu1 %9725, %v1235_v6   ;;  %v1317_v6 = vld [vmem:[%s13950_s5 + $0x1e0] sm:$0xff] }
  0x48   : > { %8779 = vmatpush1.bf16.msra.mxu0 %v9928_v43 }
  0x49   : > { %8781 = vmatprep.subr.bf16.mxu0 %v9936_v47 }
  0x4c   : > { %8783 = vmatpush1.bf16.msra.mxu0 %v9940_v49 }
  0x4d   : > { %8785 = vmatprep.subr.bf16.mxu0 %v8784_v48  ;;  %v1311_v48 = vld [vmem:[%s13950_s5 + $0x1b0] sm:$0xff] }
  0x4f   : > { %1020 = vmatmul.mubr.f32.vlgmr.msra.gmra.mrb[0].mxu0 %v702_v7 }
  0x50   : > { %8787 = vmatpush1.bf16.msra.mxu0 %v8786_v50  ;;  %1126 = vmatprep.mubr.f32.mxu0 %v13965_v2  ;;  %v10200_v50 = vcombine.low %v1297_v39, %v1301_v40  ;;  %v1331_v39 = vld [vmem:[%s13950_s5 + $0x250] sm:$0xff]  ;;  %v10291_v40 = vcombine.high %v1329_v28, %v1333_v29 }
  0x51   : > { %8789 = vmatprep.subr.bf16.mxu0 %v8788_v51  ;;  %v10204_v51 = vcombine.low %v1299_v41, %v1303_v52  ;;  %v1335_v41 = vld [vmem:[%s13950_s5 + $0x270] sm:$0xff] }
  0x52   : > { %14201 = vst [vmem:[#allocation10_spill] sm:$0xff] %v10291_v40  ;;  %v10296_v52 = vcombine.low %v1331_v39, %v1335_v41 }
  0x54   : > { %8791 = vmatpush1.bf16.msra.mxu0 %v8790_v25  ;;  %v10206_v25 = vcombine.high %v1305_v0, %v1309_v1 }
  0x55   : > { %8793 = vmatprep.subr.bf16.mxu0 %v8792_v26  ;;  %v10209_v26 = vcombine.high %v1307_v3, %v1311_v48 }
  0x58   : > { %8795 = vmatpush1.bf16.msra.mxu0 %v8794_v27  ;;  %v1313_v27 = vld [vmem:[%s13950_s5 + $0x1c0] sm:$0xff] }
  0x59   : > { %8797 = vmatprep.subr.bf16.mxu0 %v9906_v24 }
  0x5b   : > { %1128 = vmatmul.mubr.f32.vlgmr.msra.gmra.mrb[0].mxu0 %v9890_v5 }
  0x5c   : > { %8799 = vmatpush1.bf16.msra.mxu0 %v9914_v31  ;;  %1210 = vmatprep.mubr.f32.mxu0 %v13965_v2  ;;  %v1369_v2 = vld [vmem:[%s13950_s5 + $0x380] sm:$0xff] }
  0x5d   : > { %8801 = vmatprep.subr.bf16.mxu0 %v9918_v33 }
  0x60   : > { %8803 = vmatpush1.bf16.msra.mxu0 %v9928_v43 }
  0x61   : > { %8805 = vmatprep.subr.bf16.mxu0 %v9936_v47  ;;  %v1269_v47 = vld [vmem:[%s13950_s5 + $0x60] sm:$0xff] }
  0x62   : > { %v10079_v55 = vcombine.high %v1265_v46, %v1269_v47  ;;  %v10104_v10 = vcombine.low %v1265_v46, %v1269_v47 }
  0x64   : > { %8807 = vmatpush1.bf16.msra.mxu0 %v9940_v49  ;;  %v10075_v49 = vcombine.low %v1259_v42, %v1263_v44  ;;  %v10236_v42 = vcombine.low %v1313_v27, %v1317_v6 }
  0x65   : > { %2115 = vmatprep.subr.bf16.mxu0 %v10077_v53 }
  0x66   : > { %14198 = vst [vmem:[#allocation7_spill] sm:$0xff] %v10236_v42 }
  0x67   : > { %1212 = vmatmul.mubr.f32.vlgmr.msra.gmra.mrb[0].mxu0 %v9890_v5  ;;  %v1257_v5 = vld [vmem:[%s13950_s5] sm:$0xff] }
  0x68   : > { %v10062_v43 = vcombine.high %v1257_v5, %v1261_v35  ;;  %v10067_v45 = vcombine.low %v1257_v5, %v1261_v35  ;;  %2116 = vmatpush1.bf16.msra.mxu0 %v10075_v49  ;;  %v10230_v5 = vcombine.high %v1313_v27, %v1317_v6  ;;  %v1339_v27 = vld [vmem:[%s13950_s5 + $0x290] sm:$0xff] }
  0x69   : > { %2117 = vmatprep.subr.bf16.mxu0 %v10091_v61 }
  0x6a   : > { %2033 = vmatprep.subr.bf16.mxu1 %v10062_v43  ;;  %14197 = vst [vmem:[#allocation6_spill] sm:$0xff] %v10230_v5 }
  0x6b   : > { %2034 = vmatpush1.bf16.msra.mxu1 %v10067_v45 }
  0x6c   : > { %2035 = vmatprep.subr.bf16.mxu1 %v10079_v55  ;;  %2118 = vmatpush1.bf16.msra.mxu0 %v10108_v11 }
  0x6d   : > { %2119 = vmatprep.subr.bf16.mxu0 %v10113_v13 }
  0x6f   : > { %2036 = vmatpush1.bf16.msra.mxu1 %v10104_v10 }
  0x70   : > { %2037 = vmatprep.subr.bf16.mxu1 %v10110_v12  ;;  %2120 = vmatpush1.bf16.msra.mxu0 %v10132_v19 }
  0x71   : > { %2121 = vmatprep.subr.bf16.mxu0 %v10137_v21 }
  0x73   : > { %2038 = vmatpush1.bf16.msra.mxu1 %v10128_v18 }
  0x74   : > { %2039 = vmatprep.subr.bf16.mxu1 %v10134_v20  ;;  %2122 = vmatpush1.bf16.msra.mxu0 %v10156_v36 }
  0x75   : > { %2123 = vmatprep.subr.bf16.mxu0 %v10161_v38 }
  0x77   : > { %2040 = vmatpush1.bf16.msra.mxu1 %v10152_v30 }
  0x78   : > { %2041 = vmatprep.subr.bf16.mxu1 %v10158_v37  ;;  %2124 = vmatpush1.bf16.msra.mxu0 %v10180_v59 }
  0x79   : > { %2125 = vmatprep.subr.bf16.mxu0 %v10185_v63 }
  0x7b   : > { %2042 = vmatpush1.bf16.msra.mxu1 %v10176_v54 }
  0x7c   : > { %2043 = vmatprep.subr.bf16.mxu1 %v10182_v60  ;;  %2126 = vmatpush1.bf16.msra.mxu0 %v10204_v51 }
  0x7d   : > { %2127 = vmatprep.subr.bf16.mxu0 %v10209_v26 }
  0x7f   : > { %2044 = vmatpush1.bf16.msra.mxu1 %v10200_v50 }
  0x80   : > { %2045 = vmatprep.subr.bf16.mxu1 %v10206_v25 }
  0x98   : > { %v617_v7 = vpop.permute.xlu0 %616 }
 0x13a   : > { %v1213_v24 = vpop.f32.mrb[0].mxu0 }
 0x13b   : > { %v10047_v31 = vadd.f32 %v1213_v24, %v617_v7  ;;  %v1215_v32 = vpop.f32.mrb[1].mxu0  ;;  %v1319_v24 = vld [vmem:[%s13950_s5 + $0x1f0] sm:$0xff] }
 0x13c   : > { %v10049_v34 = vadd.f32 %v1215_v32, %v617_v7  ;;  %v1315_v7 = vld [vmem:[%s13950_s5 + $0x1d0] sm:$0xff]  ;;  %v10224_v32 = vcombine.low %v1305_v0, %v1309_v1  ;;  %v10298_v0 = vcombine.high %v1331_v39, %v1335_v41  ;;  %v10300_v1 = vcombine.low %v1329_v28, %v1333_v29  ;;  %v1353_v28 = vld [vmem:[%s13950_s5 + $0x300] sm:$0xff] }
 0x13d   : > { %v10233_v35 = vcombine.high %v1315_v7, %v1319_v24  ;;  %v10240_v44 = vcombine.low %v1315_v7, %v1319_v24  ;;  %v1343_v7 = vld [vmem:[%s13950_s5 + $0x2b0] sm:$0xff]  ;;  %v1357_v29 = vld [vmem:[%s13950_s5 + $0x320] sm:$0xff] }
 0x13e   : > { %v1218_v33 = vadd.f32 %v10049_v34, %v10047_v31  ;;  %14196 = vst [vmem:[#allocation5_spill] sm:$0xff] %v10224_v32  ;;  %2046 = vmatpush1.bf16.msra.mxu1 %v10224_v32  ;;  %14202 = vst [vmem:[#allocation11_spill] sm:$0xff] %v10300_v1  ;;  %v10320_v24 = vcombine.low %v1339_v27, %v1343_v7  ;;  %v1355_v39 = vld [vmem:[%s13950_s5 + $0x310] sm:$0xff]  ;;  %v10363_v41 = vcombine.high %v1353_v28, %v1357_v29 }
 0x13f   : > { %2047 = vmatprep.subr.bf16.mxu1 %v10230_v5 }
 0x140   : > { %1219 = vadd.xlane.f32.xlu0 %v1218_v33  ;;  %v10228_v33 = vcombine.low %v1307_v3, %v1311_v48  ;;  %v1337_v3 = vld [vmem:[%s13950_s5 + $0x280] sm:$0xff]  ;;  %14207 = vst [vmem:[#allocation16_spill] sm:$0xff] %v10363_v41 }
 0x141   : > { %v1341_v48 = vld [vmem:[%s13950_s5 + $0x2a0] sm:$0xff] }
 0x142   : > { %2128 = vmatpush1.bf16.msra.mxu0 %v10228_v33  ;;  %2048 = vmatpush1.bf16.msra.mxu1 %v10236_v42  ;;  %v10315_v6 = vcombine.high %v1337_v3, %v1341_v48 }
 0x143   : > { %2129 = vmatprep.subr.bf16.mxu0 %v10233_v35 }
 0x144   : > { %14203 = vst [vmem:[#allocation12_spill] sm:$0xff] %v10315_v6 }
 0x146   : > { %2130 = vmatpush1.bf16.msra.mxu0 %v10240_v44 }
 0x1cd   : > { %v1220_v46 = vpop.xlane.xlu0 %1219 }
 0x1ce   : > { %v1222_v47 = vmul.f32 0.00390625, %v1220_v46  ;;  %v10322_v46 = vcombine.high %v1339_v27, %v1343_v7  ;;  %v10372_v7 = vcombine.low %v1353_v28, %v1357_v29  ;;  %v1367_v28 = vld [vmem:[%s13950_s5 + $0x370] sm:$0xff] }
 0x1d0   : > { %v10246_v56 = vsub.f32 %v10047_v31, %v1222_v47  ;;  %v10249_v57 = vsub.f32 %v10049_v34, %v1222_v47  ;;  %v1325_v31 = vld [vmem:[%s13950_s5 + $0x220] sm:$0xff]  ;;  %v1323_v34 = vld [vmem:[%s13950_s5 + $0x210] sm:$0xff]  ;;  %v10324_v47 = vcombine.low %v1337_v3, %v1341_v48  ;;  %14208 = vst [vmem:[#allocation17_spill] sm:$0xff] %v10372_v7 }
 0x1d1   : > { %v10264_v14 = vcombine.high %v1321_v9, %v1325_v31  ;;  %v10269_v16 = vcombine.low %v1323_v34, %v1327_v15  ;;  %v10271_v17 = vcombine.high %v1323_v34, %v1327_v15  ;;  %v10273_v22 = vcombine.low %v1321_v9, %v1325_v31  ;;  %v1351_v31 = vld [vmem:[%s13950_s5 + $0x2f0] sm:$0xff] }
 0x1d2   : > { %v1225_v58 = vmul.f32 %v10246_v56, %v10246_v56  ;;  %v1226_v62 = vmul.f32 %v10249_v57, %v10249_v57  ;;  %14204 = vst [vmem:[#allocation13_spill] sm:$0xff] %v10324_v47  ;;  %v1359_v3 = vld [vmem:[%s13950_s5 + $0x330] sm:$0xff] }
 0x1d3   : > { %14199 = vst [vmem:[#allocation8_spill] sm:$0xff] %v10264_v14  ;;  %14200 = vst [vmem:[#allocation9_spill] sm:$0xff] %v10273_v22  ;;  %2049 = vmatprep.subr.bf16.mxu1 %v10264_v14  ;;  %2131 = vmatprep.subr.bf16.mxu0 %v10271_v17  ;;  %v10368_v48 = vcombine.low %v1355_v39, %v1359_v3  ;;  %v10370_v27 = vcombine.high %v1355_v39, %v1359_v3 }
 0x1d4   : > { %v1227_v8 = vadd.f32 %v1226_v62, %v1225_v58  ;;  %2050 = vmatpush1.bf16.msra.mxu1 %v10273_v22  ;;  %2132 = vmatpush1.bf16.msra.mxu0 %v10269_v16  ;;  %v1345_v58 = vld [vmem:[%s13950_s5 + $0x2c0] sm:$0xff] }
 0x1d5   : > { %2051 = vmatprep.subr.bf16.mxu1 %v10291_v40  ;;  %2133 = vmatprep.subr.bf16.mxu0 %v10298_v0  ;;  %v1349_v62 = vld [vmem:[%s13950_s5 + $0x2e0] sm:$0xff] }
 0x1d6   : > { %1228 = vadd.xlane.f32.xlu1 %v1227_v8  ;;  %v1347_v8 = vld [vmem:[%s13950_s5 + $0x2d0] sm:$0xff]  ;;  %v10339_v9 = vcombine.high %v1345_v58, %v1349_v62 }
 0x1d7   : > { %v10344_v34 = vcombine.low %v1347_v8, %v1351_v31  ;;  %v10346_v15 = vcombine.high %v1347_v8, %v1351_v31  ;;  %v1363_v8 = vld [vmem:[%s13950_s5 + $0x350] sm:$0xff] }
 0x1d8   : > { %2052 = vmatpush1.bf16.msra.mxu1 %v10300_v1  ;;  %2134 = vmatpush1.bf16.msra.mxu0 %v10296_v52  ;;  %14205 = vst [vmem:[#allocation14_spill] sm:$0xff] %v10339_v9  ;;  %v10392_v29 = vcombine.low %v1363_v8, %v1367_v28  ;;  %v10394_v39 = vcombine.high %v1363_v8, %v1367_v28  ;;  %v1371_v8 = vld [vmem:[%s13950_s5 + $0x390] sm:$0xff] }
 0x1d9   : > { %2053 = vmatprep.subr.bf16.mxu1 %v10315_v6  ;;  %2135 = vmatprep.subr.bf16.mxu0 %v10322_v46 }
 0x1dc   : > { %2054 = vmatpush1.bf16.msra.mxu1 %v10324_v47  ;;  %2136 = vmatpush1.bf16.msra.mxu0 %v10320_v24 }
 0x1dd   : > { %2055 = vmatprep.subr.bf16.mxu1 %v10339_v9  ;;  %2137 = vmatprep.subr.bf16.mxu0 %v10346_v15 }
 0x1e0   : > { %2138 = vmatpush1.bf16.msra.mxu0 %v10344_v34 }
 0x1e1   : > { %2139 = vmatprep.subr.bf16.mxu0 %v10370_v27 }
 0x1e4   : > { %2140 = vmatpush1.bf16.msra.mxu0 %v10368_v48 }
 0x1e5   : > { %2141 = vmatprep.subr.bf16.mxu0 %v10394_v39 }
 0x1e7   : > { %1246 = vperm.xlu1 %9725, %v1243_v23   ;;  %v10348_v23 = vcombine.low %v1345_v58, %v1349_v62  ;;  %v1361_v58 = vld [vmem:[%s13950_s5 + $0x340] sm:$0xff] }
 0x1e8   : > { %v1365_v62 = vld [vmem:[%s13950_s5 + $0x360] sm:$0xff]  ;;  %2142 = vmatpush1.bf16.msra.mxu0 %v10392_v29 }
 0x1e9   : > { %14206 = vst [vmem:[#allocation15_spill] sm:$0xff] %v10348_v23  ;;  %2056 = vmatpush1.bf16.msra.mxu1 %v10348_v23  ;;  %v10387_v31 = vcombine.high %v1361_v58, %v1365_v62  ;;  %v10396_v3 = vcombine.low %v1361_v58, %v1365_v62  ;;  %v10411_v58 = vcombine.high %v1369_v2, %v1373_v4  ;;  %v1375_v62 = vld [vmem:[%s13950_s5 + $0x3b0] sm:$0xff] }
 0x1ea   : > { %2057 = vmatprep.subr.bf16.mxu1 %v10363_v41  ;;  %v10416_v28 = vcombine.low %v1371_v8, %v1375_v62  ;;  %v1381_v41 = vld [vmem:[%s13950_s5 + $0x3e0] sm:$0xff]  ;;  %v1379_v23 = vld [vmem:[%s13950_s5 + $0x3d0] sm:$0xff] }
 0x1eb   : > { %14209 = vst [vmem:[#allocation18_spill] sm:$0xff] %v10387_v31  ;;  %14210 = vst [vmem:[#allocation19_spill] sm:$0xff] %v10396_v3 }
 0x1ec   : > { %14211 = vst [vmem:[#allocation20_spill] sm:$0xff] %v10411_v58 }
 0x1ed   : > { %2058 = vmatpush1.bf16.msra.mxu1 %v10372_v7  ;;  %v1377_v7 = vld [vmem:[%s13950_s5 + $0x3c0] sm:$0xff] }
 0x1ee   : > { %2059 = vmatprep.subr.bf16.mxu1 %v10387_v31  ;;  %v10420_v31 = vcombine.low %v1369_v2, %v1373_v4  ;;  %v10434_v2 = vcombine.high %v1377_v7, %v1381_v41  ;;  %v1383_v4 = vld [vmem:[%s13950_s5 + $0x3f0] sm:$0xff] }
 0x1f0   : > { %14212 = vst [vmem:[#allocation21_spill] sm:$0xff] %v10420_v31  ;;  %14213 = vst [vmem:[#allocation22_spill] sm:$0xff] %v10434_v2 }
 0x1f1   : > { %2060 = vmatpush1.bf16.msra.mxu1 %v10396_v3  ;;  %v10418_v3 = vcombine.high %v1371_v8, %v1375_v62  ;;  %v10439_v8 = vcombine.low %v1377_v7, %v1381_v41  ;;  %v10442_v62 = vcombine.low %v1379_v23, %v1383_v4  ;;  %v1262_v41 = vld [vmem:[%s13950_s5 + $0x28] sm:$0xff] }
 0x1f2   : > { %2061 = vmatprep.subr.bf16.mxu1 %v10411_v58  ;;  %v10444_v58 = vcombine.high %v1379_v23, %v1383_v4  ;;  %v1239_v4 = vpop.permute.xlu1 %1238 }
 0x1f3   : > { %2143 = vmatprep.subr.bf16.mxu0 %v10418_v3  ;;  %14214 = vst [vmem:[#allocation23_spill] sm:$0xff] %v10439_v8 }
 0x1f4   : > { %2144 = vmatpush1.bf16.msra.mxu0 %v10416_v28 }
 0x1f5   : > { %2062 = vmatpush1.bf16.msra.mxu1 %v10420_v31  ;;  %2145 = vmatprep.subr.bf16.mxu0 %v10444_v58  ;;  %v1258_v31 = vld [vmem:[%s13950_s5 + $0x8] sm:$0xff] }
 0x1f6   : > { %2063 = vmatprep.subr.bf16.mxu1 %v10434_v2  ;;  %v10456_v7 = vcombine.high %v1258_v31, %v1262_v41  ;;  %v10458_v23 = vcombine.low %v1258_v31, %v1262_v41 }
 0x1f8   : > { %2146 = vmatpush1.bf16.msra.mxu0 %v10442_v62  ;;  %14215 = vst [vmem:[#allocation24_spill] sm:$0xff] %v10456_v7 }
 0x1f9   : > { %2064 = vmatpush1.bf16.msra.mxu1 %v10439_v8  ;;  %2279 = vmatprep.subr.bf16.mxu0 %v10077_v53 }
 0x1fa   : > { %2074 = vmatprep.subr.bf16.mxu1 %v10456_v7 }
 0x263   : > { %v1229_v8 = vpop.xlane.xlu1 %1228 }
 0x264   : > { %v1230_v2 = vmul.f32 0.00390625, %v1229_v8 }
 0x266   : > { %v1231_v9 = vadd.f32 1e-05, %v1230_v2 }
 0x267   : > { %v1247_v14 = vpop.permute.xlu1 %1246 }
 0x268   : > { %9738 = vrsqrt.f32 %v1231_v9 }
 0x272   : > { %v9739_v47 = vpop.eup %9738 }
 0x273   : > { %v1233_v6 = vmul.f32 %v9739_v47, %v10246_v56  ;;  %v1234_v1 = vmul.f32 %v9739_v47, %v10249_v57  ;;  %v1278_v47 = vld [vmem:[%s13950_s5 + $0xa8] sm:$0xff] }
 0x275   : > { %v1241_v40 = vmul.f32 %v1239_v4, %v1233_v6  ;;  %v1242_v22 = vmul.f32 %v1239_v4, %v1234_v1  ;;  %v1282_v4 = vld [vmem:[%s13950_s5 + $0xc8] sm:$0xff] }
 0x277   : > { %v1249_v42 = vadd.f32 %v1247_v14, %v1241_v40  ;;  %v1250_v31 = vadd.f32 %v1247_v14, %v1242_v22  ;;  %v1266_v14 = vld [vmem:[%s13950_s5 + $0x48] sm:$0xff] }
 0x278   : > { %v1270_v22 = vld [vmem:[%s13950_s5 + $0x68] sm:$0xff] }
 0x279   : > { %vm1251_vm1 = vcmp.ge.f32.partialorder %v1249_v42, 0.0  ;;  %vm1252_vm2 = vcmp.ge.f32.partialorder %v1250_v31, 0.0  ;;  %v1253_v53 = vmul.f32 0.2, %v1249_v42  ;;  %v1254_v41 = vmul.f32 0.2, %v1250_v31 }
 0x27a   : > { %v10482_v1 = vcombine.high %v1266_v14, %v1270_v22  ;;  %v10494_v8 = vcombine.low %v1266_v14, %v1270_v22  ;;  %v1314_v14 = vld [vmem:[%s13950_s5 + $0x1c8] sm:$0xff] }
 0x27b   : > { %v1255_v7 = vsel %vm1251_vm1, %v1249_v42, %v1253_v53  ;;  %v1256_v5 = vsel %vm1252_vm2, %v1250_v31, %v1254_v41  ;;  %v1294_v41 = vld [vmem:[%s13950_s5 + $0x128] sm:$0xff] }
 0x27c   : > { %v10464_v32 = vpack.c.bf16 %v1255_v7, %v1255_v7  ;;  %v10466_v2 = vpack.c.bf16 %v1256_v5, %v1256_v5  ;;  %v1318_v22 = vld [vmem:[%s13950_s5 + $0x1e8] sm:$0xff] }
 0x27e   : > { %v1388_v9 = vunpack.c.l.bf16 %v10466_v2  ;;  %v1387_v56 = vunpack.c.l.bf16 %v10464_v32 }
 0x280   : > { %v1390_v57 = vsub.f32 %v1256_v5, %v1388_v9  ;;  %v1389_v6 = vsub.f32 %v1255_v7, %v1387_v56  ;;  %v1274_v5 = vld [vmem:[%s13950_s5 + $0x88] sm:$0xff] }
 0x281   : > { %v10498_v7 = vcombine.high %v1274_v5, %v1278_v47  ;;  %v10510_v31 = vcombine.low %v1274_v5, %v1278_v47  ;;  %v1298_v9 = vld [vmem:[%s13950_s5 + $0x148] sm:$0xff] }
 0x282   : > { %v10476_v42 = vpack.c.bf16 %v1390_v57, %v1390_v57  ;;  %v10478_v40 = vpack.c.bf16 %v1389_v6, %v1389_v6  ;;  %v1302_v56 = vld [vmem:[%s13950_s5 + $0x168] sm:$0xff] }
 0x283   : > { %v1306_v57 = vld [vmem:[%s13950_s5 + $0x188] sm:$0xff] }
 0x284   : > { %2065 = vmatprep.mubr.bf16.mxu1 %v10476_v42  ;;  %2147 = vmatprep.mubr.bf16.mxu0 %v10476_v42  ;;  %v1310_v6 = vld [vmem:[%s13950_s5 + $0x1a8] sm:$0xff] }
 0x285   : > { %2066 = vmatmul.mubr.bf16.vlgmr.msra.gmra.mrb[0].mxu1 %v10478_v40  ;;  %2148 = vmatmul.mubr.bf16.vlgmr.msra.gmra.mrb[4].mxu0 %v10478_v40  ;;  %v1322_v5 = vld [vmem:[%s13950_s5 + $0x208] sm:$0xff] }
 0x286   : > { %2075 = vmatpush1.bf16.msra.mxu1 %v10458_v23  ;;  %2280 = vmatpush1.bf16.msra.mxu0 %v10075_v49  ;;  %v1286_v49 = vld [vmem:[%s13950_s5 + $0xe8] sm:$0xff] }
 0x287   : > { %2106 = vmatprep.mubr.bf16.mxu1 %v10476_v42  ;;  %2311 = vmatprep.mubr.bf16.mxu0 %v10466_v2  ;;  %v10514_v53 = vcombine.high %v1282_v4, %v1286_v49  ;;  %v1326_v47 = vld [vmem:[%s13950_s5 + $0x228] sm:$0xff] }
 0x288   : > { %2076 = vmatprep.subr.bf16.mxu1 %v10482_v1  ;;  %2281 = vmatprep.subr.bf16.mxu0 %v10091_v61  ;;  %v1290_v61 = vld [vmem:[%s13950_s5 + $0x108] sm:$0xff] }
 0x28a   : > { %2077 = vmatpush1.bf16.msra.mxu1 %v10494_v8  ;;  %2282 = vmatpush1.bf16.msra.mxu0 %v10108_v11  ;;  %v10524_v11 = vcombine.low %v1282_v4, %v1286_v49  ;;  %v1330_v4 = vld [vmem:[%s13950_s5 + $0x248] sm:$0xff] }
 0x28b   : > { %2078 = vmatprep.subr.bf16.mxu1 %v10498_v7  ;;  %2283 = vmatprep.subr.bf16.mxu0 %v10113_v13  ;;  %v10528_v13 = vcombine.high %v1290_v61, %v1294_v41  ;;  %v1334_v49 = vld [vmem:[%s13950_s5 + $0x268] sm:$0xff] }
 0x28e   : > { %2079 = vmatpush1.bf16.msra.mxu1 %v10510_v31  ;;  %2284 = vmatpush1.bf16.msra.mxu0 %v10132_v19  ;;  %v10538_v19 = vcombine.low %v1290_v61, %v1294_v41  ;;  %v1338_v61 = vld [vmem:[%s13950_s5 + $0x288] sm:$0xff] }
 0x28f   : > { %2080 = vmatprep.subr.bf16.mxu1 %v10514_v53  ;;  %2285 = vmatprep.subr.bf16.mxu0 %v10137_v21  ;;  %v10542_v21 = vcombine.high %v1298_v9, %v1302_v56  ;;  %v1342_v41 = vld [vmem:[%s13950_s5 + $0x2a8] sm:$0xff] }
 0x292   : > { %2081 = vmatpush1.bf16.msra.mxu1 %v10524_v11  ;;  %2286 = vmatpush1.bf16.msra.mxu0 %v10156_v36  ;;  %v10552_v36 = vcombine.low %v1298_v9, %v1302_v56  ;;  %v1346_v9 = vld [vmem:[%s13950_s5 + $0x2c8] sm:$0xff] }
 0x293   : > { %2082 = vmatprep.subr.bf16.mxu1 %v10528_v13  ;;  %2287 = vmatprep.subr.bf16.mxu0 %v10161_v38  ;;  %v10556_v38 = vcombine.high %v1306_v57, %v1310_v6  ;;  %v1350_v56 = vld [vmem:[%s13950_s5 + $0x2e8] sm:$0xff] }
 0x296   : > { %2083 = vmatpush1.bf16.msra.mxu1 %v10538_v19  ;;  %2288 = vmatpush1.bf16.msra.mxu0 %v10180_v59  ;;  %v10566_v59 = vcombine.low %v1306_v57, %v1310_v6  ;;  %v1354_v57 = vld [vmem:[%s13950_s5 + $0x308] sm:$0xff] }
 0x297   : > { %2084 = vmatprep.subr.bf16.mxu1 %v10542_v21  ;;  %2289 = vmatprep.subr.bf16.mxu0 %v10185_v63  ;;  %v10570_v63 = vcombine.high %v1314_v14, %v1318_v22  ;;  %v1358_v6 = vld [vmem:[%s13950_s5 + $0x328] sm:$0xff] }
 0x29a   : > { %2085 = vmatpush1.bf16.msra.mxu1 %v10552_v36  ;;  %2290 = vmatpush1.bf16.msra.mxu0 %v10204_v51  ;;  %v10580_v51 = vcombine.low %v1314_v14, %v1318_v22  ;;  %v1362_v14 = vld [vmem:[%s13950_s5 + $0x348] sm:$0xff] }
 0x29b   : > { %2086 = vmatprep.subr.bf16.mxu1 %v10556_v38  ;;  %2291 = vmatprep.subr.bf16.mxu0 %v10209_v26  ;;  %v10584_v26 = vcombine.high %v1322_v5, %v1326_v47  ;;  %v1366_v22 = vld [vmem:[%s13950_s5 + $0x368] sm:$0xff] }
 0x29e   : > { %2087 = vmatpush1.bf16.msra.mxu1 %v10566_v59  ;;  %2292 = vmatpush1.bf16.msra.mxu0 %v10228_v33  ;;  %v10594_v33 = vcombine.low %v1322_v5, %v1326_v47  ;;  %v1370_v5 = vld [vmem:[%s13950_s5 + $0x388] sm:$0xff] }
 0x29f   : > { %2088 = vmatprep.subr.bf16.mxu1 %v10570_v63  ;;  %2293 = vmatprep.subr.bf16.mxu0 %v10233_v35  ;;  %v10598_v35 = vcombine.high %v1330_v4, %v1334_v49  ;;  %v1374_v47 = vld [vmem:[%s13950_s5 + $0x3a8] sm:$0xff] }
 0x2a2   : > { %2089 = vmatpush1.bf16.msra.mxu1 %v10580_v51  ;;  %2294 = vmatpush1.bf16.msra.mxu0 %v10240_v44  ;;  %v10608_v44 = vcombine.low %v1330_v4, %v1334_v49  ;;  %v1378_v4 = vld [vmem:[%s13950_s5 + $0x3c8] sm:$0xff] }
 0x2a3   : > { %2090 = vmatprep.subr.bf16.mxu1 %v10584_v26  ;;  %2295 = vmatprep.subr.bf16.mxu0 %v10271_v17  ;;  %v10612_v17 = vcombine.high %v1338_v61, %v1342_v41  ;;  %v1382_v49 = vld [vmem:[%s13950_s5 + $0x3e8] sm:$0xff] }
 0x2a6   : > { %2091 = vmatpush1.bf16.msra.mxu1 %v10594_v33  ;;  %2296 = vmatpush1.bf16.msra.mxu0 %v10269_v16  ;;  %v10622_v16 = vcombine.low %v1338_v61, %v1342_v41  ;;  %v1260_v61 = vld [vmem:[%s13950_s5 + $0x18] sm:$0xff] }
 0x2a7   : > { %2092 = vmatprep.subr.bf16.mxu1 %v10598_v35  ;;  %2297 = vmatprep.subr.bf16.mxu0 %v10298_v0  ;;  %v10626_v0 = vcombine.high %v1346_v9, %v1350_v56  ;;  %v1264_v41 = vld [vmem:[%s13950_s5 + $0x38] sm:$0xff] }
 0x2aa   : > { %2093 = vmatpush1.bf16.msra.mxu1 %v10608_v44  ;;  %2298 = vmatpush1.bf16.msra.mxu0 %v10296_v52  ;;  %v10636_v52 = vcombine.low %v1346_v9, %v1350_v56  ;;  %v1268_v9 = vld [vmem:[%s13950_s5 + $0x58] sm:$0xff] }
 0x2ab   : > { %2094 = vmatprep.subr.bf16.mxu1 %v10612_v17  ;;  %2299 = vmatprep.subr.bf16.mxu0 %v10322_v46  ;;  %v10640_v46 = vcombine.high %v1354_v57, %v1358_v6  ;;  %v1272_v56 = vld [vmem:[%s13950_s5 + $0x78] sm:$0xff] }
 0x2ae   : > { %2095 = vmatpush1.bf16.msra.mxu1 %v10622_v16  ;;  %2300 = vmatpush1.bf16.msra.mxu0 %v10320_v24  ;;  %v10650_v24 = vcombine.low %v1354_v57, %v1358_v6  ;;  %v10709_v57 = vcombine.high %v1268_v9, %v1272_v56  ;;  %v1280_v6 = vld [vmem:[%s13950_s5 + $0xb8] sm:$0xff] }
 0x2af   : > { %2096 = vmatprep.subr.bf16.mxu1 %v10626_v0  ;;  %2301 = vmatprep.subr.bf16.mxu0 %v10346_v15  ;;  %v10654_v15 = vcombine.high %v1362_v14, %v1366_v22 }
 0x2b2   : > { %2097 = vmatpush1.bf16.msra.mxu1 %v10636_v52  ;;  %2302 = vmatpush1.bf16.msra.mxu0 %v10344_v34  ;;  %v10664_v34 = vcombine.low %v1362_v14, %v1366_v22  ;;  %v1284_v22 = vld [vmem:[%s13950_s5 + $0xd8] sm:$0xff] }
 0x2b3   : > { %2098 = vmatprep.subr.bf16.mxu1 %v10640_v46  ;;  %2303 = vmatprep.subr.bf16.mxu0 %v10370_v27  ;;  %v10668_v27 = vcombine.high %v1370_v5, %v1374_v47 }
 0x2b6   : > { %2099 = vmatpush1.bf16.msra.mxu1 %v10650_v24  ;;  %2304 = vmatpush1.bf16.msra.mxu0 %v10368_v48  ;;  %v10678_v48 = vcombine.low %v1370_v5, %v1374_v47  ;;  %v1288_v5 = vld [vmem:[%s13950_s5 + $0xf8] sm:$0xff] }
 0x2b7   : > { %2100 = vmatprep.subr.bf16.mxu1 %v10654_v15  ;;  %2305 = vmatprep.subr.bf16.mxu0 %v10394_v39  ;;  %v10682_v39 = vcombine.high %v1378_v4, %v1382_v49 }
 0x2ba   : > { %2101 = vmatpush1.bf16.msra.mxu1 %v10664_v34  ;;  %2306 = vmatpush1.bf16.msra.mxu0 %v10392_v29  ;;  %v10692_v29 = vcombine.low %v1378_v4, %v1382_v49  ;;  %v1292_v4 = vld [vmem:[%s13950_s5 + $0x118] sm:$0xff] }
 0x2bb   : > { %2102 = vmatprep.subr.bf16.mxu1 %v10668_v27  ;;  %2307 = vmatprep.subr.bf16.mxu0 %v10418_v3  ;;  %v10696_v3 = vcombine.high %v1260_v61, %v1264_v41  ;;  %v1296_v49 = vld [vmem:[%s13950_s5 + $0x138] sm:$0xff] }
 0x2be   : > { %2103 = vmatpush1.bf16.msra.mxu1 %v10678_v48  ;;  %2308 = vmatpush1.bf16.msra.mxu0 %v10416_v28  ;;  %v10706_v28 = vcombine.low %v1260_v61, %v1264_v41  ;;  %v10745_v61 = vcombine.low %v1284_v22, %v1288_v5  ;;  %v10748_v41 = vcombine.high %v1292_v4, %v1296_v49 }
 0x2bf   : > { %2104 = vmatprep.subr.bf16.mxu1 %v10682_v39  ;;  %2309 = vmatprep.subr.bf16.mxu0 %v10444_v58  ;;  %v1276_v58 = vld [vmem:[%s13950_s5 + $0x98] sm:$0xff] }
 0x2c0   : > { %v10724_v14 = vcombine.high %v1276_v58, %v1280_v6  ;;  %v10733_v47 = vcombine.low %v1276_v58, %v1280_v6  ;;  %14217 = vst [vmem:[#allocation26_spill] sm:$0xff] %v10745_v61  ;;  %14218 = vst [vmem:[#allocation27_spill] sm:$0xff] %v10748_v41  ;;  %v10757_v58 = vcombine.low %v1292_v4, %v1296_v49  ;;  %v1316_v49 = vld [vmem:[%s13950_s5 + $0x1d8] sm:$0xff] }
 0x2c2   : > { %2105 = vmatpush1.bf16.msra.mxu1 %v10692_v29  ;;  %2310 = vmatpush1.bf16.msra.mxu0 %v10442_v62  ;;  %v10721_v62 = vcombine.low %v1268_v9, %v1272_v56  ;;  %v1300_v9 = vld [vmem:[%s13950_s5 + $0x158] sm:$0xff]  ;;  %14219 = vst [vmem:[#allocation28_spill] sm:$0xff] %v10757_v58 }
 0x2c3   : > { %2156 = vmatprep.subr.bf16.mxu1 %v10696_v3  ;;  %v1304_v56 = vld [vmem:[%s13950_s5 + $0x178] sm:$0xff] }
 0x2c4   : > { %v10760_v6 = vcombine.high %v1300_v9, %v1304_v56 }
 0x2c5   : > { %2107 = vmatmul.mubr.bf16.vlgmr.msra.gmra.mrb[4].mxu1 %v10478_v40  ;;  %2312 = vmatmul.mubr.bf16.vlgmr.msra.gmra.mrb[4].mxu0 %v10464_v32 }
 0x2c6   : > { %2157 = vmatpush1.bf16.msra.mxu1 %v10706_v28  ;;  %2188 = vmatprep.mubr.bf16.mxu1 %v10476_v42  ;;  %v10736_v42 = vcombine.high %v1284_v22, %v1288_v5  ;;  %14220 = vst [vmem:[#allocation29_spill] sm:$0xff] %v10760_v6  ;;  %v1308_v22 = vld [vmem:[%s13950_s5 + $0x198] sm:$0xff] }
 0x2c7   : > { %2158 = vmatprep.subr.bf16.mxu1 %v10709_v57  ;;  %v1312_v5 = vld [vmem:[%s13950_s5 + $0x1b8] sm:$0xff] }
 0x2c8   : > { %14216 = vst [vmem:[#allocation25_spill] sm:$0xff] %v10736_v42  ;;  %v10772_v4 = vcombine.high %v1308_v22, %v1312_v5 }
 0x2ca   : > { %2159 = vmatpush1.bf16.msra.mxu1 %v10721_v62  ;;  %14222 = vst [vmem:[#allocation31_spill] sm:$0xff] %v10772_v4 }
 0x2cb   : > { %2160 = vmatprep.subr.bf16.mxu1 %v10724_v14 }
 0x2ce   : > { %2161 = vmatpush1.bf16.msra.mxu1 %v10733_v47 }
 0x2cf   : > { %2162 = vmatprep.subr.bf16.mxu1 %v10736_v42  ;;  %v10769_v42 = vcombine.low %v1300_v9, %v1304_v56  ;;  %v1324_v56 = vld [vmem:[%s13950_s5 + $0x218] sm:$0xff] }
 0x2d1   : > { %14221 = vst [vmem:[#allocation30_spill] sm:$0xff] %v10769_v42 }
 0x2d2   : > { %2163 = vmatpush1.bf16.msra.mxu1 %v10745_v61  ;;  %v10781_v61 = vcombine.low %v1308_v22, %v1312_v5  ;;  %v1332_v5 = vld [vmem:[%s13950_s5 + $0x258] sm:$0xff] }
 0x2d3   : > { %2164 = vmatprep.subr.bf16.mxu1 %v10748_v41  ;;  %v1320_v41 = vld [vmem:[%s13950_s5 + $0x1f8] sm:$0xff] }
 0x2d4   : > { %14223 = vst [vmem:[#allocation32_spill] sm:$0xff] %v10781_v61  ;;  %v10784_v9 = vcombine.high %v1316_v49, %v1320_v41 }
 0x2d6   : > { %2165 = vmatpush1.bf16.msra.mxu1 %v10757_v58  ;;  %14224 = vst [vmem:[#allocation33_spill] sm:$0xff] %v10784_v9  ;;  %v10793_v58 = vcombine.low %v1316_v49, %v1320_v41  ;;  %v1340_v49 = vld [vmem:[%s13950_s5 + $0x298] sm:$0xff] }
 0x2d7   : > { %2166 = vmatprep.subr.bf16.mxu1 %v10760_v6  ;;  %v1328_v6 = vld [vmem:[%s13950_s5 + $0x238] sm:$0xff] }
 0x2d8   : > { %14225 = vst [vmem:[#allocation34_spill] sm:$0xff] %v10793_v58  ;;  %v10796_v22 = vcombine.high %v1324_v56, %v1328_v6 }
 0x2da   : > { %2167 = vmatpush1.bf16.msra.mxu1 %v10769_v42  ;;  %14226 = vst [vmem:[#allocation35_spill] sm:$0xff] %v10796_v22  ;;  %v10805_v42 = vcombine.low %v1324_v56, %v1328_v6  ;;  %v1348_v56 = vld [vmem:[%s13950_s5 + $0x2d8] sm:$0xff] }
 0x2db   : > { %2168 = vmatprep.subr.bf16.mxu1 %v10772_v4  ;;  %v1336_v4 = vld [vmem:[%s13950_s5 + $0x278] sm:$0xff] }
 0x2dc   : > { %14227 = vst [vmem:[#allocation36_spill] sm:$0xff] %v10805_v42  ;;  %v10808_v41 = vcombine.high %v1332_v5, %v1336_v4 }
 0x2de   : > { %2169 = vmatpush1.bf16.msra.mxu1 %v10781_v61  ;;  %14228 = vst [vmem:[#allocation37_spill] sm:$0xff] %v10808_v41  ;;  %v10817_v61 = vcombine.low %v1332_v5, %v1336_v4  ;;  %v1356_v5 = vld [vmem:[%s13950_s5 + $0x318] sm:$0xff] }
 0x2df   : > { %2170 = vmatprep.subr.bf16.mxu1 %v10784_v9  ;;  %v1344_v9 = vld [vmem:[%s13950_s5 + $0x2b8] sm:$0xff] }
 0x2e0   : > { %14229 = vst [vmem:[#allocation38_spill] sm:$0xff] %v10817_v61  ;;  %v10820_v6 = vcombine.high %v1340_v49, %v1344_v9 }
 0x2e2   : > { %2171 = vmatpush1.bf16.msra.mxu1 %v10793_v58  ;;  %14230 = vst [vmem:[#allocation39_spill] sm:$0xff] %v10820_v6  ;;  %v10829_v58 = vcombine.low %v1340_v49, %v1344_v9  ;;  %v1364_v49 = vld [vmem:[%s13950_s5 + $0x358] sm:$0xff] }
 0x2e3   : > { %2172 = vmatprep.subr.bf16.mxu1 %v10796_v22  ;;  %v1352_v22 = vld [vmem:[%s13950_s5 + $0x2f8] sm:$0xff] }
 0x2e4   : > { %14231 = vst [vmem:[#allocation40_spill] sm:$0xff] %v10829_v58  ;;  %v10832_v4 = vcombine.high %v1348_v56, %v1352_v22 }
 0x2e6   : > { %2173 = vmatpush1.bf16.msra.mxu1 %v10805_v42  ;;  %14232 = vst [vmem:[#allocation41_spill] sm:$0xff] %v10832_v4  ;;  %v10841_v42 = vcombine.low %v1348_v56, %v1352_v22  ;;  %v1372_v56 = vld [vmem:[%s13950_s5 + $0x398] sm:$0xff] }
 0x2e7   : > { %2174 = vmatprep.subr.bf16.mxu1 %v10808_v41  ;;  %v1360_v41 = vld [vmem:[%s13950_s5 + $0x338] sm:$0xff] }
 0x2e8   : > { %14233 = vst [vmem:[#allocation42_spill] sm:$0xff] %v10841_v42  ;;  %v10844_v9 = vcombine.high %v1356_v5, %v1360_v41 }
 0x2ea   : > { %2175 = vmatpush1.bf16.msra.mxu1 %v10817_v61  ;;  %14234 = vst [vmem:[#allocation43_spill] sm:$0xff] %v10844_v9  ;;  %v10853_v61 = vcombine.low %v1356_v5, %v1360_v41  ;;  %v1380_v5 = vld [vmem:[%s13950_s5 + $0x3d8] sm:$0xff] }
 0x2eb   : > { %2176 = vmatprep.subr.bf16.mxu1 %v10820_v6  ;;  %v1368_v6 = vld [vmem:[%s13950_s5 + $0x378] sm:$0xff] }
 0x2ec   : > { %v10856_v22 = vcombine.high %v1364_v49, %v1368_v6 }
 0x2ee   : > { %2177 = vmatpush1.bf16.msra.mxu1 %v10829_v58  ;;  %v10865_v58 = vcombine.low %v1364_v49, %v1368_v6 }
 0x2ef   : > { %2178 = vmatprep.subr.bf16.mxu1 %v10832_v4  ;;  %v1376_v4 = vld [vmem:[%s13950_s5 + $0x3b8] sm:$0xff] }
 0x2f0   : > { %v10868_v41 = vcombine.high %v1372_v56, %v1376_v4 }
 0x2f2   : > { %2179 = vmatpush1.bf16.msra.mxu1 %v10841_v42  ;;  %v10877_v42 = vcombine.low %v1372_v56, %v1376_v4  ;;  %v14249_v4 = vld [vmem:[#allocation19_spill] sm:$0xff]  ;;  %v14251_v56 = vld [vmem:[#allocation21_spill] sm:$0xff] }
 0x2f3   : > { %2180 = vmatprep.subr.bf16.mxu1 %v10844_v9  ;;  %v1384_v9 = vld [vmem:[%s13950_s5 + $0x3f8] sm:$0xff] }
 0x2f4   : > { %v10880_v6 = vcombine.high %v1380_v5, %v1384_v9  ;;  %v10883_v49 = vcombine.low %v1380_v5, %v1384_v9  ;;  %v14250_v9 = vld [vmem:[#allocation20_spill] sm:$0xff]  ;;  %v14252_v5 = vld [vmem:[#allocation22_spill] sm:$0xff] }
 0x2f6   : > { %2181 = vmatpush1.bf16.msra.mxu1 %v10853_v61 }
 0x2f7   : > { %2182 = vmatprep.subr.bf16.mxu1 %v10856_v22 }
 0x2fa   : > { %2183 = vmatpush1.bf16.msra.mxu1 %v10865_v58 }
 0x2fb   : > { %2184 = vmatprep.subr.bf16.mxu1 %v10868_v41 }
 0x2fe   : > { %2185 = vmatpush1.bf16.msra.mxu1 %v10877_v42 }
 0x2ff   : > { %2186 = vmatprep.subr.bf16.mxu1 %v10880_v6 }
 0x302   : > { %2187 = vmatpush1.bf16.msra.mxu1 %v10883_v49 }
 0x303   : > { %2197 = vmatprep.subr.bf16.mxu1 %v10062_v43  ;;  %v14235_v43 = vld [vmem:[#allocation5_spill] sm:$0xff] }
 0x305   : > { %2189 = vmatmul.mubr.bf16.vlgmr.msra.gmra.mrb[8].mxu1 %v10478_v40  ;;  %v14248_v40 = vld [vmem:[#allocation18_spill] sm:$0xff] }
 0x306   : > { %2198 = vmatpush1.bf16.msra.mxu1 %v10067_v45  ;;  %2229 = vmatprep.mubr.bf16.mxu1 %v10466_v2  ;;  %v14236_v45 = vld [vmem:[#allocation6_spill] sm:$0xff] }
 0x307   : > { %2199 = vmatprep.subr.bf16.mxu1 %v10079_v55  ;;  %v14237_v55 = vld [vmem:[#allocation7_spill] sm:$0xff] }
 0x30a   : > { %2200 = vmatpush1.bf16.msra.mxu1 %v10104_v10  ;;  %v14238_v10 = vld [vmem:[#allocation8_spill] sm:$0xff] }
 0x30b   : > { %2201 = vmatprep.subr.bf16.mxu1 %v10110_v12  ;;  %v14239_v12 = vld [vmem:[#allocation9_spill] sm:$0xff] }
 0x30e   : > { %2202 = vmatpush1.bf16.msra.mxu1 %v10128_v18  ;;  %v14240_v18 = vld [vmem:[#allocation10_spill] sm:$0xff] }
 0x30f   : > { %2203 = vmatprep.subr.bf16.mxu1 %v10134_v20  ;;  %v14241_v20 = vld [vmem:[#allocation11_spill] sm:$0xff] }
 0x312   : > { %2204 = vmatpush1.bf16.msra.mxu1 %v10152_v30  ;;  %v14242_v30 = vld [vmem:[#allocation12_spill] sm:$0xff] }
 0x313   : > { %2205 = vmatprep.subr.bf16.mxu1 %v10158_v37  ;;  %v14243_v37 = vld [vmem:[#allocation13_spill] sm:$0xff] }
 0x316   : > { %2206 = vmatpush1.bf16.msra.mxu1 %v10176_v54  ;;  %v14244_v54 = vld [vmem:[#allocation14_spill] sm:$0xff] }
 0x317   : > { %2207 = vmatprep.subr.bf16.mxu1 %v10182_v60  ;;  %v14245_v60 = vld [vmem:[#allocation15_spill] sm:$0xff] }
 0x31a   : > { %2208 = vmatpush1.bf16.msra.mxu1 %v10200_v50  ;;  %v14246_v50 = vld [vmem:[#allocation16_spill] sm:$0xff] }
 0x31b   : > { %2209 = vmatprep.subr.bf16.mxu1 %v10206_v25  ;;  %v14247_v25 = vld [vmem:[#allocation17_spill] sm:$0xff] }
 0x31e   : > { %2210 = vmatpush1.bf16.msra.mxu1 %v14235_v43  ;;  %v14253_v43 = vld [vmem:[#allocation23_spill] sm:$0xff] }
 0x31f   : > { %2211 = vmatprep.subr.bf16.mxu1 %v14236_v45  ;;  %v14254_v45 = vld [vmem:[#allocation24_spill] sm:$0xff] }
 0x322   : > { %2212 = vmatpush1.bf16.msra.mxu1 %v14237_v55 }
 0x323   : > { %2213 = vmatprep.subr.bf16.mxu1 %v14238_v10 }
 0x326   : > { %2214 = vmatpush1.bf16.msra.mxu1 %v14239_v12 }
 0x327   : > { %2215 = vmatprep.subr.bf16.mxu1 %v14240_v18 }
 0x32a   : > { %2216 = vmatpush1.bf16.msra.mxu1 %v14241_v20 }
 0x32b   : > { %2217 = vmatprep.subr.bf16.mxu1 %v14242_v30 }
 0x32e   : > { %2218 = vmatpush1.bf16.msra.mxu1 %v14243_v37 }
 0x32f   : > { %2219 = vmatprep.subr.bf16.mxu1 %v14244_v54 }
 0x332   : > { %2220 = vmatpush1.bf16.msra.mxu1 %v14245_v60 }
 0x333   : > { %2221 = vmatprep.subr.bf16.mxu1 %v14246_v50 }
 0x336   : > { %2222 = vmatpush1.bf16.msra.mxu1 %v14247_v25 }
 0x337   : > { %2223 = vmatprep.subr.bf16.mxu1 %v14248_v40 }
 0x33a   : > { %2224 = vmatpush1.bf16.msra.mxu1 %v14249_v4 }
 0x33b   : > { %2225 = vmatprep.subr.bf16.mxu1 %v14250_v9 }
 0x33e   : > { %2226 = vmatpush1.bf16.msra.mxu1 %v14251_v56 }
 0x33f   : > { %2227 = vmatprep.subr.bf16.mxu1 %v14252_v5 }
 0x342   : > { %2228 = vmatpush1.bf16.msra.mxu1 %v14253_v43 }
 0x343   : > { %2238 = vmatprep.subr.bf16.mxu1 %v14254_v45 }
 0x345   : > { %2230 = vmatmul.mubr.bf16.vlgmr.msra.gmra.mrb[0].mxu1 %v10464_v32 }
 0x346   : > { %2239 = vmatpush1.bf16.msra.mxu1 %v10458_v23  ;;  %2270 = vmatprep.mubr.bf16.mxu1 %v10466_v2  ;;  %v14255_v23 = vld [vmem:[#allocation25_spill] sm:$0xff] }
 0x347   : > { %2240 = vmatprep.subr.bf16.mxu1 %v10482_v1  ;;  %v14256_v1 = vld [vmem:[#allocation26_spill] sm:$0xff] }
 0x34a   : > { %2241 = vmatpush1.bf16.msra.mxu1 %v10494_v8  ;;  %v14257_v8 = vld [vmem:[#allocation27_spill] sm:$0xff] }
 0x34b   : > { %2242 = vmatprep.subr.bf16.mxu1 %v10498_v7  ;;  %v14258_v7 = vld [vmem:[#allocation28_spill] sm:$0xff] }
 0x34e   : > { %2243 = vmatpush1.bf16.msra.mxu1 %v10510_v31  ;;  %v14259_v31 = vld [vmem:[#allocation29_spill] sm:$0xff] }
 0x34f   : > { %2244 = vmatprep.subr.bf16.mxu1 %v10514_v53 }
 0x352   : > { %2245 = vmatpush1.bf16.msra.mxu1 %v10524_v11 }
 0x353   : > { %2246 = vmatprep.subr.bf16.mxu1 %v10528_v13  ;;  %v14260_v13 = vld [vmem:[#allocation30_spill] sm:$0xff] }
 0x356   : > { %2247 = vmatpush1.bf16.msra.mxu1 %v10538_v19 }
 0x357   : > { %2248 = vmatprep.subr.bf16.mxu1 %v10542_v21  ;;  %v14261_v21 = vld [vmem:[#allocation31_spill] sm:$0xff] }
 0x35a   : > { %2249 = vmatpush1.bf16.msra.mxu1 %v10552_v36  ;;  %v14262_v36 = vld [vmem:[#allocation32_spill] sm:$0xff] }
 0x35b   : > { %2250 = vmatprep.subr.bf16.mxu1 %v10556_v38  ;;  %v14263_v38 = vld [vmem:[#allocation33_spill] sm:$0xff] }
 0x35e   : > { %2251 = vmatpush1.bf16.msra.mxu1 %v10566_v59  ;;  %v14264_v59 = vld [vmem:[#allocation34_spill] sm:$0xff] }
 0x35f   : > { %2252 = vmatprep.subr.bf16.mxu1 %v10570_v63  ;;  %v14265_v63 = vld [vmem:[#allocation35_spill] sm:$0xff] }
 0x362   : > { %2253 = vmatpush1.bf16.msra.mxu1 %v10580_v51  ;;  %v14266_v51 = vld [vmem:[#allocation36_spill] sm:$0xff] }
 0x363   : > { %2254 = vmatprep.subr.bf16.mxu1 %v10584_v26  ;;  %v14267_v26 = vld [vmem:[#allocation37_spill] sm:$0xff] }
 0x366   : > { %2255 = vmatpush1.bf16.msra.mxu1 %v10594_v33  ;;  %v14268_v33 = vld [vmem:[#allocation38_spill] sm:$0xff] }
 0x367   : > { %2256 = vmatprep.subr.bf16.mxu1 %v10598_v35  ;;  %v14269_v35 = vld [vmem:[#allocation39_spill] sm:$0xff] }
 0x36a   : > { %2257 = vmatpush1.bf16.msra.mxu1 %v10608_v44  ;;  %v14270_v44 = vld [vmem:[#allocation40_spill] sm:$0xff] }
 0x36b   : > { %2258 = vmatprep.subr.bf16.mxu1 %v10612_v17  ;;  %v14271_v17 = vld [vmem:[#allocation41_spill] sm:$0xff] }
 0x36e   : > { %2259 = vmatpush1.bf16.msra.mxu1 %v10622_v16  ;;  %v14272_v16 = vld [vmem:[#allocation42_spill] sm:$0xff] }
 0x36f   : > { %2260 = vmatprep.subr.bf16.mxu1 %v10626_v0  ;;  %v14273_v0 = vld [vmem:[#allocation43_spill] sm:$0xff] }
 0x372   : > { %2261 = vmatpush1.bf16.msra.mxu1 %v10636_v52 }
 0x373   : > { %2262 = vmatprep.subr.bf16.mxu1 %v10640_v46 }
 0x376   : > { %2263 = vmatpush1.bf16.msra.mxu1 %v10650_v24 }
 0x377   : > { %2264 = vmatprep.subr.bf16.mxu1 %v10654_v15 }
 0x37a   : > { %2265 = vmatpush1.bf16.msra.mxu1 %v10664_v34 }
 0x37b   : > { %2266 = vmatprep.subr.bf16.mxu1 %v10668_v27 }
 0x37e   : > { %2267 = vmatpush1.bf16.msra.mxu1 %v10678_v48 }
 0x37f   : > { %2268 = vmatprep.subr.bf16.mxu1 %v10682_v39  ;;  %v2429_v39 = vld [vmem:[%s13952_s7 + $0x8] sm:$0xff] }
 0x382   : > { %2269 = vmatpush1.bf16.msra.mxu1 %v10692_v29 }
 0x383   : > { %2320 = vmatprep.subr.bf16.mxu1 %v10696_v3 }
 0x385   : > { %2271 = vmatmul.mubr.bf16.vlgmr.msra.gmra.mrb[4].mxu1 %v10464_v32 }
 0x386   : > { %2321 = vmatpush1.bf16.msra.mxu1 %v10706_v28  ;;  %2352 = vmatprep.mubr.bf16.mxu1 %v10466_v2 }
 0x387   : > { %2322 = vmatprep.subr.bf16.mxu1 %v10709_v57 }
 0x38a   : > { %2323 = vmatpush1.bf16.msra.mxu1 %v10721_v62 }
 0x38b   : > { %2324 = vmatprep.subr.bf16.mxu1 %v10724_v14 }
 0x38e   : > { %2325 = vmatpush1.bf16.msra.mxu1 %v10733_v47 }
 0x38f   : > { %2326 = vmatprep.subr.bf16.mxu1 %v14255_v23 }
 0x392   : > { %2327 = vmatpush1.bf16.msra.mxu1 %v14256_v1 }
 0x393   : > { %2328 = vmatprep.subr.bf16.mxu1 %v14257_v8 }
 0x396   : > { %2329 = vmatpush1.bf16.msra.mxu1 %v14258_v7 }
 0x397   : > { %2330 = vmatprep.subr.bf16.mxu1 %v14259_v31  ;;  %v2428_v31 = vld [vmem:[%s13952_s7] sm:$0xff] }
 0x398   : > { %v2313_v2 = vpop.f32.mrb[4].mxu0 }
 0x399   : > { %2386 = vst.msk [vmem:[#allocation2 + $0x40] sm:$0xff] %vm2361_vm3, %v2313_v2  ;;  %v2315_v53 = vpop.f32.mrb[5].mxu0 }
 0x39a   : > { %2392 = vst.msk [vmem:[#allocation2 + $0x50] sm:$0xff] %vm2361_vm3, %v2315_v53  ;;  %v2317_v11 = vpop.f32.mrb[6].mxu0  ;;  %2331 = vmatpush1.bf16.msra.mxu1 %v14260_v13 }
 0x39b   : > { %v2318_v19 = vpop.f32.mrb[7].mxu0  ;;  %2332 = vmatprep.subr.bf16.mxu1 %v14261_v21 }
 0x39e   : > { %2333 = vmatpush1.bf16.msra.mxu1 %v14262_v36 }
 0x39f   : > { %2334 = vmatprep.subr.bf16.mxu1 %v14263_v38 }
 0x3a2   : > { %2335 = vmatpush1.bf16.msra.mxu1 %v14264_v59 }
 0x3a3   : > { %2336 = vmatprep.subr.bf16.mxu1 %v14265_v63 }
 0x3a6   : > { %2337 = vmatpush1.bf16.msra.mxu1 %v14266_v51 }
 0x3a7   : > { %2338 = vmatprep.subr.bf16.mxu1 %v14267_v26  ;;  %v2420_v26 = vld [vmem:[#allocation2 + $0x40] sm:$0xff] }
 0x3aa   : > { %2339 = vmatpush1.bf16.msra.mxu1 %v14268_v33 }
 0x3ab   : > { %2340 = vmatprep.subr.bf16.mxu1 %v14269_v35 }
 0x3ae   : > { %2341 = vmatpush1.bf16.msra.mxu1 %v14270_v44  ;;  %v2465_v44 = vand.u32 4294901760, %v2420_v26 }
 0x3af   : > { %2342 = vmatprep.subr.bf16.mxu1 %v14271_v17  ;;  %v2422_v17 = vld [vmem:[#allocation2 + $0x50] sm:$0xff] }
 0x3b2   : > { %2343 = vmatpush1.bf16.msra.mxu1 %v14272_v16 }
 0x3b3   : > { %2344 = vmatprep.subr.bf16.mxu1 %v14273_v0 }
 0x3b6   : > { %2345 = vmatpush1.bf16.msra.mxu1 %v10853_v61 }
 0x3b7   : > { %2346 = vmatprep.subr.bf16.mxu1 %v10856_v22 }
 0x3ba   : > { %2347 = vmatpush1.bf16.msra.mxu1 %v10865_v58 }
 0x3bb   : > { %2348 = vmatprep.subr.bf16.mxu1 %v10868_v41  ;;  %v2410_v41 = vld [vmem:[%s13951_s6] sm:$0xff] }
 0x3be   : > { %2349 = vmatpush1.bf16.msra.mxu1 %v10877_v42 }
 0x3bf   : > { %2350 = vmatprep.subr.bf16.mxu1 %v10880_v6  ;;  %v11015_v6 = vand.u32 4294901760, %v2410_v41 }
 0x3c1   : > { %v11022_v12 = vsub.f32 %v2410_v41, %v11015_v6  ;;  %8479 = vmatprep.mubr.f32.mxu0 %v11015_v6 }
 0x3c2   : > { %2351 = vmatpush1.bf16.msra.mxu1 %v10883_v49 }
 0x3c3   : > { %v2523_v50 = vand.u32 4294901760, %v11022_v12 }
 0x3c5   : > { %2353 = vmatmul.mubr.bf16.vlgmr.msra.gmra.mrb[8].mxu1 %v10464_v32  ;;  %v2524_v5 = vsub.f32 %v11022_v12, %v2523_v50 }
 0x3c7   : > { %v2525_v8 = vand.u32 4294901760, %v2524_v5 }
 0x3c9   : > { %8444 = vmatprep.mubr.f32.mxu1 %v2525_v8 }
 0x418   : > { %v2231_v52 = vpop.f32.mrb[0].mxu1 }
 0x419   : > { %2362 = vst.msk [vmem:[#allocation2] sm:$0xff] %vm2361_vm3, %v2231_v52  ;;  %2364 = vrot.lane.b32.xlu1 %v2231_v52, %s9762_s29  ;;  %v2233_v46 = vpop.f32.mrb[1].mxu1 }
 0x41a   : > { %2368 = vst.msk [vmem:[#allocation2 + $0x10] sm:$0xff] %vm2361_vm3, %v2233_v46  ;;  %v2235_v24 = vpop.f32.mrb[2].mxu1 }
 0x41b   : > { %v2236_v15 = vpop.f32.mrb[3].mxu1 }
 0x41d   : > { %2370 = vrot.lane.b32.xlu1 %v2233_v46, %s9762_s29 }
 0x420   : > { %v2412_v29 = vld [vmem:[#allocation2] sm:$0xff] }
 0x421   : > { %v2441_v28 = vand.u32 4294901760, %v2412_v29  ;;  %v2414_v57 = vld [vmem:[#allocation2 + $0x10] sm:$0xff] }
 0x422   : > { %v2447_v14 = vand.u32 4294901760, %v2414_v57 }
 0x423   : > { %v11007_v47 = vsub.f32 %v2412_v29, %v2441_v28 }
 0x424   : > { %v11010_v22 = vsub.f32 %v2414_v57, %v2447_v14 }
 0x425   : > { %v2544_v58 = vand.u32 4294901760, %v11007_v47 }
 0x426   : > { %v2558_v54 = vand.u32 4294901760, %v11010_v22 }
 0x427   : > { %v2545_v30 = vsub.f32 %v11007_v47, %v2544_v58 }
 0x428   : > { %v2559_v23 = vsub.f32 %v11010_v22, %v2558_v54 }
 0x429   : > { %v2546_v43 = vand.u32 4294901760, %v2545_v30 }
 0x458   : > { %v2272_v34 = vpop.f32.mrb[4].mxu1 }
 0x459   : > { %2374 = vst.msk [vmem:[#allocation2 + $0x20] sm:$0xff] %vm2361_vm3, %v2272_v34  ;;  %2376 = vrot.lane.b32.xlu1 %v2272_v34, %s9762_s29  ;;  %v2274_v27 = vpop.f32.mrb[5].mxu1  ;;  %v2471_v34 = vand.u32 4294901760, %v2422_v17 }
 0x45a   : > { %2380 = vst.msk [vmem:[#allocation2 + $0x30] sm:$0xff] %vm2361_vm3, %v2274_v27  ;;  %2382 = vrot.lane.b32.xlu0 %v2274_v27, %s9762_s29  ;;  %v2276_v32 = vpop.f32.mrb[6].mxu1 }
 0x45b   : > { %v2277_v48 = vpop.f32.mrb[7].mxu1  ;;  %v11089_v41 = vsub.f32 %v2422_v17, %v2471_v34  ;;  %v2411_v17 = vld [vmem:[%s13951_s6 + $0x8] sm:$0xff] }
 0x45d   : > { %2388 = vrot.lane.b32.xlu1 %v2313_v2, %s9762_s29  ;;  %v2614_v8 = vand.u32 4294901760, %v11089_v41 }
 0x45e   : > { %2437 = vperm.xlu0 %9724, %v2429_v39   ;;  %v11073_v39 = vsub.f32 %v2420_v26, %v2465_v44 }
 0x460   : > { %v2416_v19 = vld [vmem:[#allocation2 + $0x20] sm:$0xff] }
 0x461   : > { %2394 = vrot.lane.b32.xlu1 %v2315_v53, %s9762_s29  ;;  %v2560_v53 = vand.u32 4294901760, %v2559_v23  ;;  %v2418_v21 = vld [vmem:[#allocation2 + $0x30] sm:$0xff]  ;;  %v2453_v38 = vand.u32 4294901760, %v2416_v19 }
 0x462   : > { %v2459_v63 = vand.u32 4294901760, %v2418_v21 }
 0x463   : > { %v11061_v33 = vsub.f32 %v2416_v19, %v2453_v38 }
 0x464   : > { %v11064_v35 = vsub.f32 %v2418_v21, %v2459_v63 }
 0x465   : > { %v2572_v52 = vand.u32 4294901760, %v11061_v33 }
 0x466   : > { %v2586_v27 = vand.u32 4294901760, %v11064_v35 }
 0x48b   : > { %v2365_v3 = vpop.permute.xlu1 %2364 }
 0x48c   : > { %2367 = vst.msk [vmem:[#allocation2 + $0x8] sm:$0xff] %vm2361_vm3, %v2365_v3 }
 0x48f   : > { %v2371_v62 = vpop.permute.xlu1 %2370 }
 0x490   : > { %2373 = vst.msk [vmem:[#allocation2 + $0x18] sm:$0xff] %vm2361_vm3, %v2371_v62 }
 0x493   : > { %v2413_v42 = vld [vmem:[#allocation2 + $0x8] sm:$0xff] }
 0x494   : > { %v2444_v61 = vand.u32 4294901760, %v2413_v42 }
 0x496   : > { %v11017_v49 = vpack.c.bf16 %v2444_v61, %v2441_v28  ;;  %v11019_v55 = vsub.f32 %v2413_v42, %v2444_v61  ;;  %v2573_v28 = vsub.f32 %v11061_v33, %v2572_v52  ;;  %v2587_v42 = vsub.f32 %v11064_v35, %v2586_v27 }
 0x497   : > { %v2415_v10 = vld [vmem:[#allocation2 + $0x18] sm:$0xff] }
 0x498   : > { %v2354_v18 = vpop.f32.mrb[8].mxu1  ;;  %8809 = vmatprep.subr.bf16.mxu1 %v11017_v49  ;;  %v2450_v20 = vand.u32 4294901760, %v2415_v10  ;;  %v2551_v37 = vand.u32 4294901760, %v11019_v55  ;;  %v2574_v30 = vand.u32 4294901760, %v2573_v28 }
 0x499   : > { %2398 = vst.msk [vmem:[#allocation2 + $0x60] sm:$0xff] %vm2361_vm3, %v2354_v18  ;;  %8811 = vmatpush3.bf16.msra.mxu1 %v11017_v49  ;;  %2400 = vrot.lane.b32.xlu1 %v2354_v18, %s9762_s29  ;;  %v2356_v60 = vpop.f32.mrb[9].mxu1  ;;  %v2600_v18 = vand.u32 4294901760, %v11073_v39 }
 0x49a   : > { %2404 = vst.msk [vmem:[#allocation2 + $0x70] sm:$0xff] %vm2361_vm3, %v2356_v60  ;;  %v2358_v25 = vpop.f32.mrb[10].mxu1  ;;  %v11036_v40 = vpack.c.bf16 %v2450_v20, %v2447_v14  ;;  %v2552_v4 = vsub.f32 %v11019_v55, %v2551_v37  ;;  %v11041_v9 = vsub.f32 %v2415_v10, %v2450_v20 }
 0x49b   : > { %v2359_v56 = vpop.f32.mrb[11].mxu1 }
 0x49c   : > { %8813 = vmatprep.subr.bf16.mxu1 %v11036_v40  ;;  %v2553_v45 = vand.u32 4294901760, %v2552_v4  ;;  %v2565_v1 = vand.u32 4294901760, %v11041_v9 }
 0x49d   : > { %8815 = vmatpush3.bf16.msra.mxu1 %v11036_v40  ;;  %2406 = vrot.lane.b32.xlu1 %v2356_v60, %s9762_s29 }
 0x49e   : > { %v8840_v7 = vpack.c.bf16 %v2553_v45, %v2546_v43  ;;  %v2566_v2 = vsub.f32 %v11041_v9, %v2565_v1  ;;  %v2588_v45 = vand.u32 4294901760, %v2587_v42 }
 0x4a0   : > { %8841 = vmatprep.subr.bf16.mxu0 %v8840_v7  ;;  %v2567_v11 = vand.u32 4294901760, %v2566_v2 }
 0x4a1   : > { %8843 = vmatpush3.bf16.msra.mxu0 %v8840_v7  ;;  %2432 = vperm.xlu1 %9725, %v2428_v31   ;;  %v2601_v31 = vsub.f32 %v11073_v39, %v2600_v18 }
 0x4a2   : > { %v8844_v13 = vpack.c.bf16 %v2567_v11, %v2560_v53 }
 0x4a4   : > { %8845 = vmatprep.subr.bf16.mxu0 %v8844_v13 }
 0x4a5   : > { %8847 = vmatpush3.bf16.msra.mxu0 %v8844_v13 }
 0x4cb   : > { %v2377_v36 = vpop.permute.xlu1 %2376 }
 0x4cc   : > { %2379 = vst.msk [vmem:[#allocation2 + $0x28] sm:$0xff] %vm2361_vm3, %v2377_v36  ;;  %v2383_v59 = vpop.permute.xlu0 %2382  ;;  %v2602_v36 = vand.u32 4294901760, %v2601_v31 }
 0x4cd   : > { %2385 = vst.msk [vmem:[#allocation2 + $0x38] sm:$0xff] %vm2361_vm3, %v2383_v59 }
 0x4cf   : > { %v2389_v51 = vpop.permute.xlu1 %2388 }
 0x4d0   : > { %2391 = vst.msk [vmem:[#allocation2 + $0x48] sm:$0xff] %vm2361_vm3, %v2389_v51 }
 0x4d3   : > { %v2395_v16 = vpop.permute.xlu1 %2394  ;;  %v2417_v0 = vld [vmem:[#allocation2 + $0x28] sm:$0xff] }
 0x4d4   : > { %2397 = vst.msk [vmem:[#allocation2 + $0x58] sm:$0xff] %vm2361_vm3, %v2395_v16  ;;  %v2456_v46 = vand.u32 4294901760, %v2417_v0  ;;  %v2419_v24 = vld [vmem:[#allocation2 + $0x38] sm:$0xff]  ;;  %v2424_v16 = vld [vmem:[#allocation2 + $0x60] sm:$0xff] }
 0x4d5   : > { %v2462_v15 = vand.u32 4294901760, %v2419_v24 }
 0x4d6   : > { %v11069_v32 = vpack.c.bf16 %v2456_v46, %v2453_v38  ;;  %v11071_v48 = vsub.f32 %v2417_v0, %v2456_v46  ;;  %v2615_v38 = vsub.f32 %v11089_v41, %v2614_v8  ;;  %v11130_v46 = vand.u32 4294901760, %v2411_v17 }
 0x4d7   : > { %v11075_v29 = vpack.c.bf16 %v2462_v15, %v2459_v63  ;;  %v2421_v3 = vld [vmem:[#allocation2 + $0x48] sm:$0xff]  ;;  %v11080_v57 = vsub.f32 %v2419_v24, %v2462_v15  ;;  %v2477_v24 = vand.u32 4294901760, %v2424_v16  ;;  %v2426_v15 = vld [vmem:[#allocation2 + $0x70] sm:$0xff] }
 0x4d8   : > { %8817 = vmatprep.subr.bf16.mxu1 %v11069_v32  ;;  %v2468_v62 = vand.u32 4294901760, %v2421_v3  ;;  %v2579_v14 = vand.u32 4294901760, %v11071_v48  ;;  %v2616_v26 = vand.u32 4294901760, %v2615_v38  ;;  %v2483_v28 = vand.u32 4294901760, %v2426_v15 }
 0x4d9   : > { %8819 = vmatpush3.bf16.msra.mxu1 %v11069_v32  ;;  %v2593_v61 = vand.u32 4294901760, %v11080_v57 }
 0x4da   : > { %8821 = vmatprep.subr.bf16.mxu1 %v11075_v29  ;;  %v2580_v10 = vsub.f32 %v11071_v48, %v2579_v14  ;;  %v11096_v20 = vsub.f32 %v2421_v3, %v2468_v62  ;;  %v11101_v4 = vpack.c.bf16 %v2468_v62, %v2465_v44  ;;  %v11134_v3 = vsub.f32 %v2411_v17, %v11130_v46 }
 0x4db   : > { %v2423_v60 = vld [vmem:[#allocation2 + $0x58] sm:$0xff]  ;;  %v2594_v25 = vsub.f32 %v11080_v57, %v2593_v61  ;;  %v11137_v62 = vsub.f32 %v2424_v16, %v2477_v24 }
 0x4dc   : > { %v2581_v56 = vand.u32 4294901760, %v2580_v10  ;;  %v2474_v5 = vand.u32 4294901760, %v2423_v60  ;;  %v2607_v43 = vand.u32 4294901760, %v11096_v20  ;;  %v2533_v10 = vand.u32 4294901760, %v11134_v3 }
 0x4dd   : > { %8823 = vmatpush3.bf16.msra.mxu1 %v11075_v29  ;;  %v2595_v23 = vand.u32 4294901760, %v2594_v25  ;;  %v11141_v25 = vsub.f32 %v2426_v15, %v2483_v28  ;;  %v14274_v15 = vmov 0  }
 0x4de   : > { %8825 = vmatprep.subr.bf16.mxu1 %v11101_v4  ;;  %v8848_v7 = vpack.c.bf16 %v2581_v56, %v2574_v30  ;;  %v2608_v2 = vsub.f32 %v11096_v20, %v2607_v43  ;;  %v11113_v53 = vsub.f32 %v2423_v60, %v2474_v5  ;;  %v11115_v13 = vpack.c.bf16 %v2474_v5, %v2471_v34 }
 0x4df   : > { %v8852_v11 = vpack.c.bf16 %v2595_v23, %v2588_v45  ;;  %v2628_v60 = vand.u32 4294901760, %v11137_v62  ;;  %v2534_v23 = vsub.f32 %v11134_v3, %v2533_v10 }
 0x4e0   : > { %8849 = vmatprep.subr.bf16.mxu0 %v8848_v7  ;;  %v2609_v19 = vand.u32 4294901760, %v2608_v2  ;;  %v2621_v21 = vand.u32 4294901760, %v11113_v53 }
 0x4e1   : > { %8827 = vmatpush3.bf16.msra.mxu1 %v11101_v4  ;;  %8851 = vmatpush3.bf16.msra.mxu0 %v8848_v7  ;;  %v2629_v31 = vsub.f32 %v11137_v62, %v2628_v60 }
 0x4e2   : > { %8829 = vmatprep.subr.bf16.mxu1 %v11115_v13  ;;  %8853 = vmatprep.subr.bf16.mxu0 %v8852_v11  ;;  %v2622_v59 = vsub.f32 %v11113_v53, %v2621_v21  ;;  %v8856_v63 = vpack.c.bf16 %v2609_v19, %v2602_v36 }
 0x4e4   : > { %v2623_v51 = vand.u32 4294901760, %v2622_v59  ;;  %v2535_v59 = vand.u32 4294901760, %v2534_v23  ;;  %v8888_v23 = vpack.c.bf16 %v11096_v20, %v11073_v39 }
 0x4e5   : > { %8831 = vmatpush3.bf16.msra.mxu1 %v11115_v13  ;;  %8855 = vmatpush3.bf16.msra.mxu0 %v8852_v11  ;;  %v2642_v11 = vand.u32 4294901760, %v11141_v25 }
 0x4e6   : > { %8857 = vmatprep.subr.bf16.mxu0 %v8856_v63  ;;  %v8860_v44 = vpack.c.bf16 %v2623_v51, %v2616_v26 }
 0x4e7   : > { %v2643_v26 = vsub.f32 %v11141_v25, %v2642_v11 }
 0x4e9   : > { %8859 = vmatpush3.bf16.msra.mxu0 %v8856_v63  ;;  %v2630_v63 = vand.u32 4294901760, %v2629_v31 }
 0x4ea   : > { %8861 = vmatprep.subr.bf16.mxu0 %v8860_v44 }
 0x4ed   : > { %8863 = vmatpush3.bf16.msra.mxu0 %v8860_v44 }
 0x50b   : > { %v2401_v0 = vpop.permute.xlu1 %2400 }
 0x50c   : > { %2403 = vst.msk [vmem:[#allocation2 + $0x68] sm:$0xff] %vm2361_vm3, %v2401_v0  ;;  %v2644_v0 = vand.u32 4294901760, %v2643_v26 }
 0x50f   : > { %v2407_v34 = vpop.permute.xlu1 %2406 }
 0x510   : > { %2409 = vst.msk [vmem:[#allocation2 + $0x78] sm:$0xff] %vm2361_vm3, %v2407_v34 }
 0x513   : > { %v2425_v42 = vld [vmem:[#allocation2 + $0x68] sm:$0xff] }
 0x514   : > { %v2480_v30 = vand.u32 4294901760, %v2425_v42 }
 0x516   : > { %v11143_v56 = vpack.c.bf16 %v2480_v30, %v2477_v24  ;;  %v11145_v5 = vsub.f32 %v2425_v42, %v2480_v30  ;;  %v8876_v42 = vpack.c.bf16 %v11041_v9, %v11010_v22  ;;  %v8880_v30 = vpack.c.bf16 %v11071_v48, %v11061_v33 }
 0x517   : > { %v2427_v45 = vld [vmem:[#allocation2 + $0x78] sm:$0xff]  ;;  %v8952_v22 = vpack.c.bf16 %v2607_v43, %v2600_v18 }
 0x518   : > { %8833 = vmatprep.subr.bf16.mxu1 %v11143_v56  ;;  %v2486_v7 = vand.u32 4294901760, %v2427_v45  ;;  %v2635_v2 = vand.u32 4294901760, %v11145_v5  ;;  %v8896_v31 = vpack.c.bf16 %v11145_v5, %v11137_v62  ;;  %v9726_v62 = vld [vmem:[%s13955_s10] ss:$8 sps:$4 sm:$0xff]  }
 0x519   : > { %8835 = vmatpush3.bf16.msra.mxu1 %v11143_v56 }
 0x51a   : > { %v11157_v19 = vpack.c.bf16 %v2486_v7, %v2483_v28  ;;  %v2636_v36 = vsub.f32 %v11145_v5, %v2635_v2  ;;  %v11162_v38 = vsub.f32 %v2427_v45, %v2486_v7  ;;  %v8872_v28 = vpack.c.bf16 %v11019_v55, %v11007_v47  ;;  %v9737_v5 = vld [vmem:[%s13955_s10 + $0x34] ss:$8 sps:$4 sm:$0xff]  }
 0x51b   : > { %v8884_v45 = vpack.c.bf16 %v11080_v57, %v11064_v35  ;;  %v8892_v7 = vpack.c.bf16 %v11113_v53, %v11089_v41  ;;  %v8944_v47 = vpack.c.bf16 %v2579_v14, %v2572_v52  ;;  %v8956_v55 = vpack.c.bf16 %v2621_v21, %v2614_v8  ;;  %v3151_v57 = vld [vmem:[%s13953_s8] sm:$0xff] }
 0x51c   : > { %8837 = vmatprep.subr.bf16.mxu1 %v11157_v19  ;;  %v2637_v51 = vand.u32 4294901760, %v2636_v36  ;;  %v2649_v44 = vand.u32 4294901760, %v11162_v38  ;;  %v8900_v36 = vpack.c.bf16 %v11162_v38, %v11141_v25  ;;  %v3165_v21 = vld [vmem:[%s13954_s9] sm:$0xff] }
 0x51d   : > { %8839 = vmatpush3.bf16.msra.mxu1 %v11157_v19  ;;  %v9734_v25 = vld [vmem:[%s13955_s10 + $0x24] ss:$8 sps:$4 sm:$0xff]  }
 0x51e   : > { %v8864_v17 = vpack.c.bf16 %v2637_v51, %v2630_v63  ;;  %v2650_v16 = vsub.f32 %v11162_v38, %v2649_v44 }
 0x520   : > { %8865 = vmatprep.subr.bf16.mxu0 %v8864_v17  ;;  %8445 = vmatmul.mubr.f32.vlgmr.msra.gmra.mrb[12].mxu1 %v2535_v59  ;;  %v2651_v24 = vand.u32 4294901760, %v2650_v16  ;;  %v2433_v9 = vpop.permute.xlu1 %2432 }
 0x521   : > { %8867 = vmatpush3.bf16.msra.mxu0 %v8864_v17  ;;  %3274 = vmatprep.mubr.bf16.mxu1 %v14274_v15 }
 0x522   : > { %v8868_v34 = vpack.c.bf16 %v2651_v24, %v2644_v0 }
 0x524   : > { %8869 = vmatprep.subr.bf16.mxu0 %v8868_v34 }
 0x525   : > { %8871 = vmatpush3.bf16.msra.mxu0 %v8868_v34 }
 0x526   : > { %8873 = vmatprep.subr.bf16.mxu0 %v8872_v28 }
 0x528   : > { %8480 = vmatmul.mubr.f32.vlgmr.msra.gmra.mrb[2].mxu0 %v11130_v46 }
 0x529   : > { %8875 = vmatpush3.bf16.msra.mxu0 %v8872_v28  ;;  %8514 = vmatprep.mubr.f32.mxu0 %v11022_v12  ;;  %v8936_v12 = vpack.c.bf16 %v2551_v37, %v2544_v58  ;;  %v8948_v58 = vpack.c.bf16 %v2593_v61, %v2586_v27  ;;  %v8960_v37 = vpack.c.bf16 %v2635_v2, %v2628_v60  ;;  %v9729_v60 = vld [vmem:[%s13955_s10 + $0x10] ss:$8 sps:$4 sm:$0xff]  }
 0x52a   : > { %8877 = vmatprep.subr.bf16.mxu0 %v8876_v42  ;;  %v9735_v2 = vld [vmem:[%s13955_s10 + $0x30] ss:$8 sps:$4 sm:$0xff]  }
 0x52d   : > { %8879 = vmatpush3.bf16.msra.mxu0 %v8876_v42 }
 0x52e   : > { %8881 = vmatprep.subr.bf16.mxu0 %v8880_v30 }
 0x531   : > { %8883 = vmatpush3.bf16.msra.mxu0 %v8880_v30 }
 0x532   : > { %8885 = vmatprep.subr.bf16.mxu0 %v8884_v45 }
 0x535   : > { %8887 = vmatpush3.bf16.msra.mxu0 %v8884_v45 }
 0x536   : > { %8889 = vmatprep.subr.bf16.mxu0 %v8888_v23 }
 0x539   : > { %8891 = vmatpush3.bf16.msra.mxu0 %v8888_v23 }
 0x53a   : > { %8893 = vmatprep.subr.bf16.mxu0 %v8892_v7 }
 0x53d   : > { %8895 = vmatpush3.bf16.msra.mxu0 %v8892_v7 }
 0x53e   : > { %8897 = vmatprep.subr.bf16.mxu0 %v8896_v31 }
 0x541   : > { %8899 = vmatpush3.bf16.msra.mxu0 %v8896_v31 }
 0x542   : > { %8901 = vmatprep.subr.bf16.mxu0 %v8900_v36 }
 0x545   : > { %8903 = vmatpush3.bf16.msra.mxu0 %v8900_v36 }
 0x546   : > { %8905 = vmatprep.subr.bf16.mxu0 %v11017_v49 }
 0x548   : > { %8515 = vmatmul.mubr.f32.vlgmr.msra.gmra.mrb[2].mxu0 %v11134_v3  ;;  %v9728_v3 = vld [vmem:[%s13955_s10 + $0x4] ss:$8 sps:$4 sm:$0xff]  }
 0x549   : > { %8907 = vmatpush3.bf16.msra.mxu0 %v11017_v49  ;;  %8549 = vmatprep.mubr.f32.mxu0 %v2523_v50  ;;  %v8940_v50 = vpack.c.bf16 %v2565_v1, %v2558_v54  ;;  %v8964_v54 = vpack.c.bf16 %v2649_v44, %v2642_v11 }
 0x54a   : > { %8909 = vmatprep.subr.bf16.mxu0 %v11036_v40  ;;  %3242 = vmatprep.subr.bf16.mxu1 %v9728_v3 }
 0x54b   : > { %3243 = vmatpush1.bf16.msra.mxu1 %v9726_v62 }
 0x54d   : > { %8911 = vmatpush3.bf16.msra.mxu0 %v11036_v40 }
 0x54e   : > { %8913 = vmatprep.subr.bf16.mxu0 %v11069_v32 }
 0x551   : > { %8915 = vmatpush3.bf16.msra.mxu0 %v11069_v32 }
 0x552   : > { %8917 = vmatprep.subr.bf16.mxu0 %v11075_v29 }
 0x555   : > { %8919 = vmatpush3.bf16.msra.mxu0 %v11075_v29 }
 0x556   : > { %8921 = vmatprep.subr.bf16.mxu0 %v11101_v4 }
 0x559   : > { %8923 = vmatpush3.bf16.msra.mxu0 %v11101_v4 }
 0x55a   : > { %8925 = vmatprep.subr.bf16.mxu0 %v11115_v13 }
 0x55d   : > { %8927 = vmatpush3.bf16.msra.mxu0 %v11115_v13 }
 0x55e   : > { %8929 = vmatprep.subr.bf16.mxu0 %v11143_v56 }
 0x561   : > { %8931 = vmatpush3.bf16.msra.mxu0 %v11143_v56 }
 0x562   : > { %8933 = vmatprep.subr.bf16.mxu0 %v11157_v19 }
 0x565   : > { %8935 = vmatpush3.bf16.msra.mxu0 %v11157_v19 }
 0x566   : > { %8937 = vmatprep.subr.bf16.mxu0 %v8936_v12 }
 0x568   : > { %8550 = vmatmul.mubr.f32.vlgmr.msra.gmra.mrb[2].mxu0 %v2533_v10  ;;  %v9731_v10 = vld [vmem:[%s13955_s10 + $0x14] ss:$8 sps:$4 sm:$0xff]  }
 0x569   : > { %8939 = vmatpush3.bf16.msra.mxu0 %v8936_v12  ;;  %8584 = vmatprep.mubr.f32.mxu0 %v11015_v6 }
 0x56a   : > { %8941 = vmatprep.subr.bf16.mxu0 %v8940_v50  ;;  %3244 = vmatprep.subr.bf16.mxu1 %v9731_v10 }
 0x56b   : > { %3245 = vmatpush1.bf16.msra.mxu1 %v9729_v60 }
 0x56c   : > { %3246 = vmatprep.subr.bf16.mxu1 %v9734_v25 }
 0x56d   : > { %8943 = vmatpush3.bf16.msra.mxu0 %v8940_v50 }
 0x56e   : > { %8945 = vmatprep.subr.bf16.mxu0 %v8944_v47 }
 0x571   : > { %8947 = vmatpush3.bf16.msra.mxu0 %v8944_v47 }
 0x572   : > { %8949 = vmatprep.subr.bf16.mxu0 %v8948_v58 }
 0x575   : > { %8951 = vmatpush3.bf16.msra.mxu0 %v8948_v58 }
 0x576   : > { %8953 = vmatprep.subr.bf16.mxu0 %v8952_v22 }
 0x579   : > { %8955 = vmatpush3.bf16.msra.mxu0 %v8952_v22 }
 0x57a   : > { %8957 = vmatprep.subr.bf16.mxu0 %v8956_v55 }
 0x57d   : > { %8959 = vmatpush3.bf16.msra.mxu0 %v8956_v55 }
 0x57e   : > { %8961 = vmatprep.subr.bf16.mxu0 %v8960_v37 }
 0x581   : > { %8963 = vmatpush3.bf16.msra.mxu0 %v8960_v37 }
 0x582   : > { %8965 = vmatprep.subr.bf16.mxu0 %v8964_v54 }
 0x585   : > { %8967 = vmatpush3.bf16.msra.mxu0 %v8964_v54 }
 0x586   : > { %8969 = vmatprep.subr.bf16.mxu0 %v11017_v49 }
 0x588   : > { %8585 = vmatmul.mubr.f32.vlgmr.msra.gmra.mrb[2].mxu0 %v11130_v46 }
 0x589   : > { %8971 = vmatpush3.bf16.msra.mxu0 %v11017_v49  ;;  %8619 = vmatprep.mubr.f32.mxu0 %v11015_v6 }
 0x58a   : > { %8973 = vmatprep.subr.bf16.mxu0 %v11036_v40 }
 0x58d   : > { %8975 = vmatpush3.bf16.msra.mxu0 %v11036_v40  ;;  %v2438_v40 = vpop.permute.xlu0 %2437 }
 0x58e   : > { %8977 = vmatprep.subr.bf16.mxu0 %v11069_v32 }
 0x591   : > { %8979 = vmatpush3.bf16.msra.mxu0 %v11069_v32 }
 0x592   : > { %8981 = vmatprep.subr.bf16.mxu0 %v11075_v29 }
 0x595   : > { %8983 = vmatpush3.bf16.msra.mxu0 %v11075_v29  ;;  %v3152_v29 = vld [vmem:[%s13953_s8 + $0x8] sm:$0xff] }
 0x596   : > { %8985 = vmatprep.subr.bf16.mxu0 %v11101_v4 }
 0x599   : > { %8987 = vmatpush3.bf16.msra.mxu0 %v11101_v4 }
 0x59a   : > { %8989 = vmatprep.subr.bf16.mxu0 %v11115_v13 }
 0x59d   : > { %8991 = vmatpush3.bf16.msra.mxu0 %v11115_v13 }
 0x59e   : > { %8993 = vmatprep.subr.bf16.mxu0 %v11143_v56 }
 0x5a1   : > { %8995 = vmatpush3.bf16.msra.mxu0 %v11143_v56  ;;  %v9732_v56 = vld [vmem:[%s13955_s10 + $0x20] ss:$8 sps:$4 sm:$0xff]  }
 0x5a2   : > { %8997 = vmatprep.subr.bf16.mxu0 %v11157_v19  ;;  %3247 = vmatpush1.bf16.msra.mxu1 %v9732_v56 }
 0x5a3   : > { %3248 = vmatprep.subr.bf16.mxu1 %v9737_v5 }
 0x5a5   : > { %8999 = vmatpush3.bf16.msra.mxu0 %v11157_v19 }
 0x5a6   : > { %3249 = vmatpush1.bf16.msra.mxu1 %v9735_v2 }
 0x5a7   : > { %3288 = vmatprep.subr.bf16.mxu1 %v9728_v3 }
 0x5a8   : > { %8620 = vmatmul.mubr.f32.vlgmr.msra.gmra.mrb[2].mxu0 %v11130_v46  ;;  %v3166_v46 = vld [vmem:[%s13954_s9 + $0x8] sm:$0xff] }
 0x5f3   : > { %v8446_v6 = vpop.f32.mrb[12].mxu1 }
 0x5f4   : > { %v2527_v49 = vpop.f32.mrb[13].mxu1  ;;  %v2538_v1 = vadd.f32 %v8446_v6, %v2438_v40 }
 0x5f5   : > { %v2528_v33 = vadd.f32 %v2527_v49, %v2433_v9 }
 0x67b   : > { %v8621_v35 = vpop.f32.mrb[2].mxu0 }
 0x67c   : > { %v9651_v52 = vadd.f32 %v8621_v35, %v2538_v1  ;;  %v3114_v27 = vpop.f32.mrb[3].mxu0 }
 0x67d   : > { %v9653_v32 = vadd.f32 %v3114_v27, %v2528_v33 }
 0x67e   : > { %v3127_v48 = vsel %vm2361_vm3, %v9651_v52, 0.0 }
 0x67f   : > { %3128 = vadd.xlane.f32.xlu0 %v3127_v48  ;;  %v3124_v39 = vsel %vm2361_vm3, %v9653_v32, 0.0 }
 0x680   : > { %3125 = vadd.xlane.f32.xlu1 %v3124_v39 }
 0x691   : > { %3160 = vperm.xlu1 %9725, %v3152_v29  }
 0x695   : > { %3155 = vperm.xlu0 %9724, %v3151_v57  }
 0x70c   : > { %v3129_v14 = vpop.xlane.xlu0 %3128 }
 0x70d   : > { %v3132_v61 = vmul.f32 0.015625, %v3129_v14  ;;  %v3126_v41 = vpop.xlane.xlu1 %3125 }
 0x70e   : > { %v3131_v18 = vmul.f32 0.015625, %v3126_v41 }
 0x70f   : > { %v3134_v20 = vsub.f32 %v9651_v52, %v3132_v61 }
 0x710   : > { %v3133_v4 = vsub.f32 %v9653_v32, %v3131_v18 }
 0x711   : > { %v3136_v43 = vmul.f32 %v3134_v20, %v3134_v20  ;;  %v3161_v11 = vpop.permute.xlu1 %3160 }
 0x712   : > { %v3135_v8 = vmul.f32 %v3133_v4, %v3133_v4 }
 0x713   : > { %v3140_v53 = vsel %vm2361_vm3, %v3136_v43, 0.0 }
 0x714   : > { %3141 = vadd.xlane.f32.xlu1 %v3140_v53  ;;  %v3137_v13 = vsel %vm2361_vm3, %v3135_v8, 0.0  ;;  %v3156_v19 = vpop.permute.xlu0 %3155 }
 0x715   : > { %3138 = vadd.xlane.f32.xlu0 %v3137_v13 }
 0x725   : > { %3169 = vperm.xlu1 %9725, %v3165_v21  }
 0x72b   : > { %3174 = vperm.xlu0 %9724, %v3166_v46  }
 0x7a1   : > { %v3142_v38 = vpop.xlane.xlu1 %3141 }
 0x7a2   : > { %v3144_v59 = vmul.f32 0.015625, %v3142_v38  ;;  %v3139_v63 = vpop.xlane.xlu0 %3138 }
 0x7a3   : > { %v3143_v51 = vmul.f32 0.015625, %v3139_v63 }
 0x7a4   : > { %v3146_v26 = vadd.f32 1e-05, %v3144_v59 }
 0x7a5   : > { %v3145_v44 = vadd.f32 1e-05, %v3143_v51  ;;  %v3170_v30 = vpop.permute.xlu1 %3169  ;;  %v3492_v51 = vld [vmem:[%s13957_s12] sm:$0xff] }
 0x7a6   : > { %9740 = vrsqrt.f32 %v3146_v26 }
 0x7a7   : > { %9742 = vrsqrt.f32 %v3145_v44  ;;  %v3493_v44 = vld [vmem:[%s13957_s12 + $0x8] sm:$0xff] }
 0x7aa   : > { %v3175_v42 = vpop.permute.xlu0 %3174 }
 0x7b0   : > { %v9741_v17 = vpop.eup %9740 }
 0x7b1   : > { %v9743_v16 = vpop.eup %9742  ;;  %v3150_v0 = vmul.f32 %v9741_v17, %v3134_v20  ;;  %v3494_v17 = vld [vmem:[%s13957_s12 + $0x10] sm:$0xff] }
 0x7b2   : > { %v3149_v24 = vmul.f32 %v9743_v16, %v3133_v4  ;;  %v3495_v16 = vld [vmem:[%s13957_s12 + $0x18] sm:$0xff] }
 0x7b3   : > { %v3164_v34 = vmul.f32 %v3161_v11, %v3150_v0  ;;  %v3453_v11 = vld [vmem:[%s13956_s11 + $0x8] sm:$0xff] }
 0x7b4   : > { %v3163_v28 = vmul.f32 %v3156_v19, %v3149_v24  ;;  %v11405_v19 = vand.u32 4294901760, %v3453_v11 }
 0x7b5   : > { %v3178_v45 = vadd.f32 %v3175_v42, %v3164_v34 }
 0x7b6   : > { %v3177_v23 = vadd.f32 %v3170_v30, %v3163_v28  ;;  %14277 = vst [vmem:[#allocation7_spill] sm:$0xff] %v11405_v19  ;;  %v11410_v38 = vsub.f32 %v3453_v11, %v11405_v19 }
 0x7b7   : > { %vm3180_vm4 = vcmp.ge.f32.partialorder %v3178_v45, 0.0  ;;  %v3182_v7 = vmul.f32 0.2, %v3178_v45 }
 0x7b8   : > { %vm3179_vm5 = vcmp.ge.f32.partialorder %v3177_v23, 0.0  ;;  %v3181_v31 = vmul.f32 0.2, %v3177_v23  ;;  %14278 = vst [vmem:[#allocation8_spill] sm:$0xff] %v11410_v38  ;;  %v14017_v59 = vand.u32 4294901760, %v11410_v38 }
 0x7b9   : > { %v3184_v36 = vsel %vm3180_vm4, %v3178_v45, %v3182_v7  ;;  %v3452_v45 = vld [vmem:[%s13956_s11] sm:$0xff] }
 0x7ba   : > { %v3183_v12 = vsel %vm3179_vm5, %v3177_v23, %v3181_v31  ;;  %v3615_v63 = vsub.f32 %v11410_v38, %v14017_v59  ;;  %v11447_v31 = vand.u32 4294901760, %v3452_v45 }
 0x7bb   : > { %v3193_v50 = vpack.c.bf16 %v3184_v36, %v3183_v12 }
 0x7bc   : > { %v3616_v26 = vand.u32 4294901760, %v3615_v63 }
 0x7bd   : > { %v3194_v47 = vunpack.c.l.bf16 %v3193_v50  ;;  %v3195_v58 = vunpack.c.h.bf16 %v3193_v50 }
 0x7be   : > { %3617 = vmatprep.mubr.f32.mxu0 %v3616_v26 }
 0x7bf   : > { %v3196_v22 = vsub.f32 %v3183_v12, %v3194_v47  ;;  %v3197_v55 = vsub.f32 %v3184_v36, %v3195_v58 }
 0x7c1   : > { %v3198_v37 = vpack.c.bf16 %v3197_v55, %v3196_v22 }
 0x7c3   : > { %7562 = vmatmul.mubr.msk.bf16.vlgmr.msra.gmra.mrb[16].mxu1 %vm2361_vm3, %v3198_v37 }
 0x7c4   : > { %3289 = vmatpush1.bf16.msra.mxu1 %v9726_v62  ;;  %3320 = vmatprep.mubr.bf16.mxu1 %v14274_v15 }
 0x7c5   : > { %3290 = vmatprep.subr.bf16.mxu1 %v9731_v10 }
 0x7c8   : > { %3291 = vmatpush1.bf16.msra.mxu1 %v9729_v60 }
 0x7c9   : > { %3292 = vmatprep.subr.bf16.mxu1 %v9734_v25 }
 0x7cc   : > { %3293 = vmatpush1.bf16.msra.mxu1 %v9732_v56 }
 0x7cd   : > { %3294 = vmatprep.subr.bf16.mxu1 %v9737_v5 }
 0x7d0   : > { %3295 = vmatpush1.bf16.msra.mxu1 %v9735_v2 }
 0x7d3   : > { %7563 = vmatmul.mubr.msk.bf16.vlgmr.msra.gmra.mrb[16].mxu1 %vm2361_vm3, %v3193_v50  ;;  %v3455_v50 = vld [vmem:[%s13956_s11 + $0x18] sm:$0xff] }
 0x7d4   : > { %3898 = vmatprep.mubr.f32.mxu1 %v11405_v19 }
 0x8a6   : > { %v11308_v54 = vpop.f32.mrb[16].mxu1 }
 0x8a7   : > { %3332 = vst.msk [vmem:[#allocation3] sm:$0xff] %vm3331_vm6, %v11308_v54  ;;  %3336 = vrot.lane.b32.xlu1 %v11308_v54, %s14008_s3  ;;  %v11314_v6 = vpop.f32.mrb[17].mxu1 }
 0x8a8   : > { %3392 = vst.msk [vmem:[#allocation3 + $0x80] sm:$0xff] %vm3331_vm6, %v11314_v6  ;;  %v11318_v15 = vpop.f32.mrb[18].mxu1 }
 0x8a9   : > { %3333 = vst.msk [vmem:[#allocation3 + $0x8] sm:$0xff] %vm3331_vm6, %v11318_v15  ;;  %3338 = vrot.lane.b32.xlu0 %v11318_v15, %s14008_s3  ;;  %v11324_v49 = vpop.f32.mrb[19].mxu1 }
 0x8aa   : > { %3393 = vst.msk [vmem:[#allocation3 + $0x88] sm:$0xff] %vm3331_vm6, %v11324_v49 }
 0x8ab   : > { %3344 = vrot.lane.b32.xlu1 %v11308_v54, %s14010_s26 }
 0x8ad   : > { %3346 = vrot.lane.b32.xlu0 %v11318_v15, %s14010_s26 }
 0x8ae   : > { %v3460_v40 = vld [vmem:[#allocation3] sm:$0xff] }
 0x8af   : > { %3352 = vrot.lane.b32.xlu1 %v11308_v54, %s14075_s27  ;;  %v3476_v9 = vld [vmem:[#allocation3 + $0x80] sm:$0xff]  ;;  %v3517_v1 = vand.u32 4294901760, %v3460_v40 }
 0x8b0   : > { %v3565_v33 = vand.u32 4294901760, %v3476_v9  ;;  %v3461_v35 = vld [vmem:[#allocation3 + $0x8] sm:$0xff] }
 0x8b1   : > { %3354 = vrot.lane.b32.xlu0 %v11318_v15, %s14075_s27  ;;  %v3477_v52 = vld [vmem:[#allocation3 + $0x88] sm:$0xff]  ;;  %v3520_v27 = vand.u32 4294901760, %v3461_v35  ;;  %v11336_v32 = vsub.f32 %v3460_v40, %v3517_v1  ;;  %v3454_v40 = vld [vmem:[%s13956_s11 + $0x10] sm:$0xff] }
 0x8b2   : > { %v3568_v48 = vand.u32 4294901760, %v3477_v52  ;;  %v11338_v39 = vsub.f32 %v3476_v9, %v3565_v33 }
 0x8b3   : > { %3360 = vrot.lane.b32.xlu1 %v11308_v54, %s9762_s29  ;;  %v11342_v29 = vsub.f32 %v3461_v35, %v3520_v27  ;;  %v3676_v57 = vand.u32 4294901760, %v11336_v32  ;;  %v11352_v18 = vpack.c.bf16 %v3520_v27, %v3517_v1 }
 0x8b4   : > { %v11345_v14 = vpack.c.bf16 %v3568_v48, %v3565_v33  ;;  %v11347_v61 = vsub.f32 %v3477_v52, %v3568_v48  ;;  %v3788_v41 = vand.u32 4294901760, %v11338_v39 }
 0x8b5   : > { %3362 = vrot.lane.b32.xlu0 %v11318_v15, %s9762_s29  ;;  %v3683_v20 = vand.u32 4294901760, %v11342_v29  ;;  %v3677_v13 = vsub.f32 %v11336_v32, %v3676_v57 }
 0x8b6   : > { %9001 = vmatprep.subr.bf16.mxu0 %v11345_v14  ;;  %v3789_v43 = vsub.f32 %v11338_v39, %v3788_v41  ;;  %v3795_v8 = vand.u32 4294901760, %v11347_v61 }
 0x8b7   : > { %3368 = vrot.lane.b32.xlu1 %v11308_v54, %s14077_s28  ;;  %9003 = vmatpush3.bf16.msra.mxu0 %v11352_v18  ;;  %v3684_v21 = vsub.f32 %v11342_v29, %v3683_v20  ;;  %v11367_v46 = vpack.c.bf16 %v3683_v20, %v3676_v57  ;;  %v3678_v56 = vand.u32 4294901760, %v3677_v13 }
 0x8b8   : > { %v3796_v3 = vsub.f32 %v11347_v61, %v3795_v8  ;;  %v11370_v62 = vpack.c.bf16 %v3795_v8, %v3788_v41  ;;  %v3790_v60 = vand.u32 4294901760, %v3789_v43  ;;  %v11492_v41 = vand.u32 4294901760, %v3454_v40 }
 0x8b9   : > { %14275 = vst [vmem:[#allocation5_spill] sm:$0xff] %v11367_v46  ;;  %3370 = vrot.lane.b32.xlu0 %v11318_v15, %s14077_s28  ;;  %v3685_v10 = vand.u32 4294901760, %v3684_v21 }
 0x8ba   : > { %14276 = vst [vmem:[#allocation6_spill] sm:$0xff] %v11370_v62  ;;  %v3797_v25 = vand.u32 4294901760, %v3796_v3  ;;  %v11521_v63 = vsub.f32 %v3454_v40, %v11492_v41 }
 0x8bb   : > { %3376 = vrot.lane.b32.xlu1 %v11308_v54, %s9767_s20  ;;  %v9034_v2 = vpack.c.bf16 %v3685_v10, %v3678_v56 }
 0x8bc   : > { %v9032_v5 = vpack.c.bf16 %v3797_v25, %v3790_v60  ;;  %v3457_v60 = vld [vmem:[%s13956_s11 + $0x28] sm:$0xff]  ;;  %v3456_v25 = vld [vmem:[%s13956_s11 + $0x20] sm:$0xff] }
 0x8bd   : > { %3378 = vrot.lane.b32.xlu0 %v11318_v15, %s9767_s20 }
 0x8be   : > { %9033 = vmatprep.subr.bf16.mxu1 %v9032_v5 }
 0x8bf   : > { %3396 = vrot.lane.b32.xlu1 %v11314_v6, %s14008_s3  ;;  %9035 = vmatpush3.bf16.msra.mxu1 %v9034_v2 }
 0x8c1   : > { %3398 = vrot.lane.b32.xlu0 %v11324_v49, %s14008_s3  ;;  %s14384_s3 = smov 112  }
 0x8c3   : > { %3404 = vrot.lane.b32.xlu1 %v11314_v6, %s14010_s26 }
 0x8c5   : > { %3406 = vrot.lane.b32.xlu0 %v11324_v49, %s14010_s26  ;;  %s14382_s26 = smov 80  }
 0x8c7   : > { %3412 = vrot.lane.b32.xlu1 %v11314_v6, %s14075_s27 }
 0x8c9   : > { %3414 = vrot.lane.b32.xlu0 %v11324_v49, %s14075_s27 }
 0x8cb   : > { %3420 = vrot.lane.b32.xlu1 %v11314_v6, %s9762_s29 }
 0x8cd   : > { %3422 = vrot.lane.b32.xlu0 %v11324_v49, %s9762_s29 }
 0x8cf   : > { %3428 = vrot.lane.b32.xlu1 %v11314_v6, %s14077_s28 }
 0x8d1   : > { %3430 = vrot.lane.b32.xlu0 %v11324_v49, %s14077_s28 }
 0x8d3   : > { %3436 = vrot.lane.b32.xlu1 %v11314_v6, %s9767_s20 }
 0x8d5   : > { %3438 = vrot.lane.b32.xlu0 %v11324_v49, %s9767_s20 }
 0x8d7   : > { %3444 = vrot.lane.b32.xlu1 %v11314_v6, %s9768_s22  ;;  %v11465_v6 = vand.u32 4294901760, %v3455_v50 }
 0x8d9   : > { %3446 = vrot.lane.b32.xlu0 %v11324_v49, %s9768_s22  ;;  %v11490_v57 = vsub.f32 %v3455_v50, %v11465_v6 }
 0x8db   : > { %3384 = vrot.lane.b32.xlu1 %v11308_v54, %s9768_s22  ;;  %v11463_v54 = vsub.f32 %v3452_v45, %v11447_v31  ;;  %14280 = vst [vmem:[#allocation10_spill] sm:$0xff] %v11490_v57  ;;  %v14012_v11 = vand.u32 4294901760, %v11490_v57  ;;  %v11542_v45 = vld [vmem:[%s13956_s11 + $0x38] sm:$0xff] }
 0x8dd   : > { %3386 = vrot.lane.b32.xlu0 %v11318_v15, %s9768_s22  ;;  %14279 = vst [vmem:[#allocation9_spill] sm:$0xff] %v11463_v54  ;;  %v14013_v48 = vand.u32 4294901760, %v11463_v54  ;;  %v11552_v50 = vsub.f32 %v11490_v57, %v14012_v11 }
 0x8df   : > { %3498 = vperm.xlu1 %9725, %v3492_v51   ;;  %v11517_v2 = vsub.f32 %v11463_v54, %v14013_v48 }
 0x8e1   : > { %3503 = vperm.xlu0 %9724, %v3493_v44  }
 0x8e3   : > { %3508 = vperm.xlu1 %9725, %v3494_v17  }
 0x8e5   : > { %3513 = vperm.xlu0 %9724, %v3495_v16  }
 0x919   : > { %v3337_v0 = vpop.permute.xlu1 %3336 }
 0x91a   : > { %3342 = vst.msk [vmem:[#allocation3 + $0x10] sm:$0xff] %vm3331_vm6, %v3337_v0 }
 0x91b   : > { %v3339_v24 = vpop.permute.xlu0 %3338 }
 0x91c   : > { %3343 = vst.msk [vmem:[#allocation3 + $0x18] sm:$0xff] %vm3331_vm6, %v3339_v24  ;;  %v11534_v24 = vand.u32 4294901760, %v3457_v60 }
 0x91d   : > { %v3345_v34 = vpop.permute.xlu1 %3344 }
 0x91e   : > { %3350 = vst.msk [vmem:[#allocation3 + $0x20] sm:$0xff] %vm3331_vm6, %v3345_v34  ;;  %14281 = vst [vmem:[#allocation11_spill] sm:$0xff] %v11534_v24  ;;  %v11536_v34 = vand.u32 4294901760, %v3456_v25 }
 0x91f   : > { %v3347_v28 = vpop.permute.xlu0 %3346 }
 0x920   : > { %3351 = vst.msk [vmem:[#allocation3 + $0x28] sm:$0xff] %vm3331_vm6, %v3347_v28  ;;  %14282 = vst [vmem:[#allocation12_spill] sm:$0xff] %v11536_v34 }
 0x921   : > { %v3353_v42 = vpop.permute.xlu1 %3352  ;;  %v11449_v12 = vld [vmem:[#allocation3 + $0x10] sm:$0xff] }
 0x922   : > { %3358 = vst.msk [vmem:[#allocation3 + $0x30] sm:$0xff] %vm3331_vm6, %v3353_v42  ;;  %v3523_v55 = vand.u32 4294901760, %v11449_v12 }
 0x923   : > { %v3355_v30 = vpop.permute.xlu0 %3354  ;;  %v11444_v7 = vld [vmem:[#allocation3 + $0x18] sm:$0xff] }
 0x924   : > { %3359 = vst.msk [vmem:[#allocation3 + $0x38] sm:$0xff] %vm3331_vm6, %v3355_v30  ;;  %v3526_v47 = vand.u32 4294901760, %v11444_v7  ;;  %v11486_v27 = vsub.f32 %v11449_v12, %v3523_v55 }
 0x925   : > { %v3361_v23 = vpop.permute.xlu1 %3360  ;;  %v11460_v37 = vld [vmem:[#allocation3 + $0x20] sm:$0xff] }
 0x926   : > { %3366 = vst.msk [vmem:[#allocation3 + $0x40] sm:$0xff] %vm3331_vm6, %v3361_v23  ;;  %v11475_v9 = vsub.f32 %v11444_v7, %v3526_v47  ;;  %v3529_v52 = vand.u32 4294901760, %v11460_v37  ;;  %v14016_v56 = vand.u32 4294901760, %v11486_v27 }
 0x927   : > { %v3363_v36 = vpop.permute.xlu0 %3362  ;;  %v11456_v58 = vld [vmem:[#allocation3 + $0x28] sm:$0xff] }
 0x928   : > { %3367 = vst.msk [vmem:[#allocation3 + $0x48] sm:$0xff] %vm3331_vm6, %v3363_v36  ;;  %v3532_v49 = vand.u32 4294901760, %v11456_v58  ;;  %v14015_v21 = vand.u32 4294901760, %v11475_v9  ;;  %v11504_v10 = vsub.f32 %v11460_v37, %v3529_v52  ;;  %v3691_v23 = vsub.f32 %v11486_v27, %v14016_v56  ;;  %v11558_v37 = vld [vmem:[%s13956_s11 + $0x30] sm:$0xff] }
 0x929   : > { %v3369_v22 = vpop.permute.xlu1 %3368  ;;  %v11477_v1 = vld [vmem:[#allocation3 + $0x30] sm:$0xff] }
 0x92a   : > { %3374 = vst.msk [vmem:[#allocation3 + $0x50] sm:$0xff] %vm3331_vm6, %v3369_v22  ;;  %v11497_v43 = vsub.f32 %v11456_v58, %v3532_v49  ;;  %v3535_v8 = vand.u32 4294901760, %v11477_v1  ;;  %v3698_v16 = vsub.f32 %v11475_v9, %v14015_v21  ;;  %v14018_v30 = vand.u32 4294901760, %v11504_v10 }
 0x92b   : > { %v3371_v15 = vpop.permute.xlu0 %3370  ;;  %v11479_v33 = vld [vmem:[#allocation3 + $0x38] sm:$0xff]  ;;  %v11592_v12 = vpack.c.bf16 %v3532_v49, %v3529_v52 }
 0x92c   : > { %3375 = vst.msk [vmem:[#allocation3 + $0x58] sm:$0xff] %vm3331_vm6, %v3371_v15  ;;  %v3538_v13 = vand.u32 4294901760, %v11479_v33  ;;  %v11524_v26 = vsub.f32 %v11477_v1, %v3535_v8  ;;  %v14014_v17 = vand.u32 4294901760, %v11497_v43 }
 0x92d   : > { %v3377_v35 = vpop.permute.xlu1 %3376  ;;  %v3468_v5 = vld [vmem:[#allocation3 + $0x40] sm:$0xff]  ;;  %14286 = vst [vmem:[#allocation16_spill] sm:$0xff] %v11592_v12 }
 0x92e   : > { %3382 = vst.msk [vmem:[#allocation3 + $0x60] sm:$0xff] %vm3331_vm6, %v3377_v35  ;;  %v11527_v44 = vsub.f32 %v11479_v33, %v3538_v13  ;;  %v3541_v42 = vand.u32 4294901760, %v3468_v5  ;;  %v3712_v1 = vsub.f32 %v11497_v43, %v14014_v17  ;;  %v14019_v33 = vand.u32 4294901760, %v11524_v26 }
 0x92f   : > { %v3379_v20 = vpop.permute.xlu0 %3378  ;;  %v3469_v0 = vld [vmem:[#allocation3 + $0x48] sm:$0xff]  ;;  %v11579_v17 = vpack.c.bf16 %v3526_v47, %v3523_v55  ;;  %v11594_v7 = vpack.c.bf16 %v3538_v13, %v3535_v8  ;;  %v3692_v47 = vand.u32 4294901760, %v3691_v23 }
 0x930   : > { %3383 = vst.msk [vmem:[#allocation3 + $0x68] sm:$0xff] %vm3331_vm6, %v3379_v20  ;;  %v3544_v40 = vand.u32 4294901760, %v3469_v0  ;;  %v14020_v35 = vand.u32 4294901760, %v11527_v44  ;;  %v3699_v20 = vand.u32 4294901760, %v3698_v16  ;;  %v11581_v21 = vsub.f32 %v3468_v5, %v3541_v42 }
 0x931   : > { %v3397_v3 = vpop.permute.xlu1 %3396  ;;  %14283 = vst [vmem:[#allocation13_spill] sm:$0xff] %v11579_v17  ;;  %v3470_v16 = vld [vmem:[#allocation3 + $0x50] sm:$0xff]  ;;  %14287 = vst [vmem:[#allocation17_spill] sm:$0xff] %v11594_v7  ;;  %v3719_v4 = vsub.f32 %v11524_v26, %v14019_v33 }
 0x932   : > { %3402 = vst.msk [vmem:[#allocation3 + $0x90] sm:$0xff] %vm3331_vm6, %v3397_v3  ;;  %v11567_v3 = vsub.f32 %v3457_v60, %v11534_v24  ;;  %14284 = vst [vmem:[#allocation14_spill] sm:$0xff] %v11581_v21  ;;  %v3705_v60 = vsub.f32 %v11504_v10, %v14018_v30  ;;  %v11596_v59 = vsub.f32 %v3469_v0, %v3544_v40  ;;  %v3713_v30 = vand.u32 4294901760, %v3712_v1 }
 0x933   : > { %v3399_v51 = vpop.permute.xlu0 %3398  ;;  %v3471_v55 = vld [vmem:[#allocation3 + $0x58] sm:$0xff]  ;;  %v11607_v52 = vpack.c.bf16 %v3699_v20, %v3692_v47  ;;  %v3547_v8 = vand.u32 4294901760, %v3470_v16  ;;  %v11609_v23 = vpack.c.bf16 %v3544_v40, %v3541_v42  ;;  %v3720_v19 = vand.u32 4294901760, %v3719_v4 }
 0x934   : > { %3403 = vst.msk [vmem:[#allocation3 + $0x98] sm:$0xff] %vm3331_vm6, %v3399_v51  ;;  %v11570_v51 = vsub.f32 %v3456_v25, %v11536_v34  ;;  %v11587_v25 = vand.u32 4294901760, %v11558_v37  ;;  %14288 = vst [vmem:[#allocation18_spill] sm:$0xff] %v11596_v59  ;;  %v3706_v1 = vand.u32 4294901760, %v3705_v60  ;;  %v3550_v36 = vand.u32 4294901760, %v3471_v55 }
 0x935   : > { %v3405_v28 = vpop.permute.xlu1 %3404  ;;  %14289 = vst [vmem:[#allocation19_spill] sm:$0xff] %v11609_v23  ;;  %v11620_v40 = vld [vmem:[#allocation3 + $0x60] sm:$0xff] }
 0x936   : > { %3410 = vst.msk [vmem:[#allocation3 + $0xa0] sm:$0xff] %vm3331_vm6, %v3405_v28  ;;  %v11573_v28 = vand.u32 4294901760, %v11542_v45  ;;  %14285 = vst [vmem:[#allocation15_spill] sm:$0xff] %v11587_v25  ;;  %v11618_v22 = vpack.c.bf16 %v3713_v30, %v3706_v1  ;;  %v11636_v1 = vsub.f32 %v3471_v55, %v3550_v36 }
 0x937   : > { %v3407_v15 = vpop.permute.xlu0 %3406  ;;  %v11648_v57 = vld [vmem:[#allocation3 + $0x68] sm:$0xff] }
 0x938   : > { %3411 = vst.msk [vmem:[#allocation3 + $0xa8] sm:$0xff] %vm3331_vm6, %v3407_v15  ;;  %14292 = vst [vmem:[#allocation22_spill] sm:$0xff] %v11636_v1 }
 0x939   : > { %v3413_v11 = vpop.permute.xlu1 %3412  ;;  %v3478_v48 = vld [vmem:[#allocation3 + $0x90] sm:$0xff] }
 0x93a   : > { %3418 = vst.msk [vmem:[#allocation3 + $0xb0] sm:$0xff] %vm3331_vm6, %v3413_v11  ;;  %v3571_v15 = vand.u32 4294901760, %v3478_v48  ;;  %v3726_v11 = vsub.f32 %v11527_v44, %v14020_v35 }
 0x93b   : > { %v3415_v5 = vpop.permute.xlu0 %3414  ;;  %v3479_v56 = vld [vmem:[#allocation3 + $0x98] sm:$0xff] }
 0x93c   : > { %3419 = vst.msk [vmem:[#allocation3 + $0xb8] sm:$0xff] %vm3331_vm6, %v3415_v5  ;;  %v3574_v58 = vand.u32 4294901760, %v3479_v56  ;;  %v11605_v49 = vsub.f32 %v3478_v48, %v3571_v15  ;;  %v3727_v42 = vand.u32 4294901760, %v3726_v11  ;;  %v11634_v11 = vpack.c.bf16 %v3550_v36, %v3547_v8 }
 0x93d   : > { %v3421_v13 = vpop.permute.xlu1 %3420  ;;  %v3480_v0 = vld [vmem:[#allocation3 + $0xa0] sm:$0xff] }
 0x93e   : > { %3426 = vst.msk [vmem:[#allocation3 + $0xc0] sm:$0xff] %vm3331_vm6, %v3421_v13  ;;  %v11613_v53 = vpack.c.bf16 %v3574_v58, %v3571_v15  ;;  %v11615_v35 = vsub.f32 %v3479_v56, %v3574_v58  ;;  %v3577_v5 = vand.u32 4294901760, %v3480_v0  ;;  %v14025_v48 = vand.u32 4294901760, %v11605_v49  ;;  %14291 = vst [vmem:[#allocation21_spill] sm:$0xff] %v11634_v11 }
 0x93f   : > { %v3423_v20 = vpop.permute.xlu0 %3422  ;;  %v3481_v47 = vld [vmem:[#allocation3 + $0xa8] sm:$0xff]  ;;  %v11628_v13 = vsub.f32 %v3470_v16, %v3547_v8  ;;  %v11655_v54 = vpack.c.bf16 %v3727_v42, %v3720_v19 }
 0x940   : > { %3427 = vst.msk [vmem:[#allocation3 + $0xc8] sm:$0xff] %vm3331_vm6, %v3423_v20  ;;  %9005 = vmatprep.subr.bf16.mxu0 %v11613_v53  ;;  %v3580_v15 = vand.u32 4294901760, %v3481_v47  ;;  %v11625_v56 = vsub.f32 %v3480_v0, %v3577_v5  ;;  %v3803_v30 = vsub.f32 %v11605_v49, %v14025_v48  ;;  %v14293_v20 = vand.u32 4294901760, %v11581_v21 }
 0x941   : > { %14290 = vst [vmem:[#allocation20_spill] sm:$0xff] %v11628_v13  ;;  %v3429_v33 = vpop.permute.xlu1 %3428  ;;  %9007 = vmatpush3.bf16.msra.mxu0 %v11579_v17  ;;  %v3482_v4 = vld [vmem:[#allocation3 + $0xb0] sm:$0xff]  ;;  %v14295_v36 = vand.u32 4294901760, %v11615_v35 }
 0x942   : > { %v11641_v0 = vsub.f32 %v11581_v21, %v14293_v20  ;;  %3434 = vst.msk [vmem:[#allocation3 + $0xd0] sm:$0xff] %vm3331_vm6, %v3429_v33  ;;  %v11644_v16 = vpack.c.bf16 %v3580_v15, %v3577_v5  ;;  %v11646_v60 = vsub.f32 %v3481_v47, %v3580_v15  ;;  %v3583_v58 = vand.u32 4294901760, %v3482_v4 }
 0x943   : > { %v3431_v8 = vpop.permute.xlu0 %3430  ;;  %v3483_v46 = vld [vmem:[#allocation3 + $0xb8] sm:$0xff]  ;;  %v3810_v55 = vsub.f32 %v11615_v35, %v14295_v36  ;;  %v14296_v33 = vand.u32 4294901760, %v11596_v59  ;;  %v3804_v19 = vand.u32 4294901760, %v3803_v30 }
 0x944   : > { %14294 = vst [vmem:[#allocation23_spill] sm:$0xff] %v11644_v16  ;;  %3435 = vst.msk [vmem:[#allocation3 + $0xd8] sm:$0xff] %vm3331_vm6, %v3431_v8  ;;  %9009 = vmatprep.subr.bf16.mxu0 %v11644_v16  ;;  %v3586_v47 = vand.u32 4294901760, %v3483_v46  ;;  %v11664_v15 = vsub.f32 %v3482_v4, %v3583_v58  ;;  %v14299_v36 = vand.u32 4294901760, %v11646_v60 }
 0x945   : > { %v11660_v5 = vsub.f32 %v11596_v59, %v14296_v33  ;;  %v3437_v62 = vpop.permute.xlu1 %3436  ;;  %9011 = vmatpush3.bf16.msra.mxu0 %v11592_v12  ;;  %v3811_v42 = vand.u32 4294901760, %v3810_v55  ;;  %v3484_v20 = vld [vmem:[#allocation3 + $0xc0] sm:$0xff]  ;;  %v14297_v33 = vand.u32 4294901760, %v11625_v56 }
 0x946   : > { %3442 = vst.msk [vmem:[#allocation3 + $0xe0] sm:$0xff] %vm3331_vm6, %v3437_v62  ;;  %v11674_v4 = vpack.c.bf16 %v3586_v47, %v3583_v58  ;;  %v11676_v38 = vsub.f32 %v3483_v46, %v3586_v47  ;;  %v3589_v48 = vand.u32 4294901760, %v3484_v20  ;;  %v3824_v12 = vsub.f32 %v11646_v60, %v14299_v36 }
 0x947   : > { %v3817_v34 = vsub.f32 %v11625_v56, %v14297_v33  ;;  %v3439_v30 = vpop.permute.xlu0 %3438  ;;  %v9036_v55 = vpack.c.bf16 %v3811_v42, %v3804_v19  ;;  %v3485_v59 = vld [vmem:[#allocation3 + $0xc8] sm:$0xff]  ;;  %v14040_v24 = vand.u32 4294901760, %v11664_v15  ;;  %v14300_v42 = vand.u32 4294901760, %v11620_v40 }
 0x948   : > { %14298 = vst [vmem:[#allocation24_spill] sm:$0xff] %v11674_v4  ;;  %3443 = vst.msk [vmem:[#allocation3 + $0xe8] sm:$0xff] %vm3331_vm6, %v3439_v30  ;;  %9013 = vmatprep.subr.bf16.mxu0 %v11674_v4  ;;  %v3592_v62 = vand.u32 4294901760, %v3485_v59  ;;  %v11685_v46 = vsub.f32 %v3484_v20, %v3589_v48  ;;  %v3825_v58 = vand.u32 4294901760, %v3824_v12  ;;  %v3734_v20 = vand.u32 4294901760, %v11641_v0 }
 0x949   : > { %v3818_v21 = vand.u32 4294901760, %v3817_v34  ;;  %9037 = vmatprep.subr.bf16.mxu1 %v9036_v55  ;;  %v3445_v36 = vpop.permute.xlu1 %3444  ;;  %9015 = vmatpush3.bf16.msra.mxu0 %v11594_v7  ;;  %v3486_v19 = vld [vmem:[#allocation3 + $0xd0] sm:$0xff]  ;;  %v3831_v34 = vsub.f32 %v11664_v15, %v14040_v24  ;;  %v11695_v30 = vsub.f32 %v11620_v40, %v14300_v42  ;;  %v3741_v12 = vand.u32 4294901760, %v11660_v5 }
 0x94a   : > { %3450 = vst.msk [vmem:[#allocation3 + $0xf0] sm:$0xff] %vm3331_vm6, %v3445_v36  ;;  %9039 = vmatpush3.bf16.msra.mxu1 %v11607_v52  ;;  %v11701_v55 = vpack.c.bf16 %v3592_v62, %v3589_v48  ;;  %v11703_v33 = vsub.f32 %v3485_v59, %v3592_v62  ;;  %v3595_v47 = vand.u32 4294901760, %v3486_v19  ;;  %v14302_v4 = vand.u32 4294901760, %v11676_v38 }
 0x94b   : > { %v9040_v8 = vpack.c.bf16 %v3825_v58, %v3818_v21  ;;  %v3447_v24 = vpop.permute.xlu0 %3446  ;;  %v3487_v7 = vld [vmem:[#allocation3 + $0xd8] sm:$0xff]  ;;  %v14303_v5 = vand.u32 4294901760, %v11648_v57  ;;  %v14304_v52 = vand.u32 4294901760, %v11628_v13  ;;  %v14305_v62 = vand.u32 4294901760, %v11636_v1 }
 0x94c   : > { %14301 = vst [vmem:[#allocation25_spill] sm:$0xff] %v11701_v55  ;;  %v3838_v42 = vsub.f32 %v11676_v38, %v14302_v4  ;;  %3451 = vst.msk [vmem:[#allocation3 + $0xf8] sm:$0xff] %vm3331_vm6, %v3447_v24  ;;  %9017 = vmatprep.subr.bf16.mxu0 %v11701_v55  ;;  %v3598_v21 = vand.u32 4294901760, %v3487_v7  ;;  %v11719_v48 = vsub.f32 %v3486_v19, %v3595_v47  ;;  %v3832_v0 = vand.u32 4294901760, %v3831_v34 }
 0x94d   : > { %v11712_v36 = vsub.f32 %v11648_v57, %v14303_v5  ;;  %v3747_v59 = vsub.f32 %v11628_v13, %v14304_v52  ;;  %9041 = vmatprep.subr.bf16.mxu1 %v9040_v8  ;;  %v3754_v58 = vsub.f32 %v11636_v1, %v14305_v62  ;;  %v3385_v5 = vpop.permute.xlu1 %3384  ;;  %9019 = vmatpush3.bf16.msra.mxu0 %v11609_v23  ;;  %v3488_v52 = vld [vmem:[#allocation3 + $0xe0] sm:$0xff]  ;;  %v14306_v24 = vand.u32 4294901760, %v11685_v46 }
 0x94e   : > { %v3839_v16 = vand.u32 4294901760, %v3838_v42  ;;  %3390 = vst.msk [vmem:[#allocation3 + $0x70] sm:$0xff] %vm3331_vm6, %v3385_v5  ;;  %9043 = vmatpush3.bf16.msra.mxu1 %v11618_v22  ;;  %v11732_v19 = vpack.c.bf16 %v3598_v21, %v3595_v47  ;;  %v11734_v4 = vsub.f32 %v3487_v7, %v3598_v21  ;;  %v3601_v62 = vand.u32 4294901760, %v3488_v52 }
 0x94f   : > { %v3845_v55 = vsub.f32 %v11685_v46, %v14306_v24  ;;  %v14307_v23 = vand.u32 4294901760, %v11703_v33  ;;  %v3387_v42 = vpop.permute.xlu0 %3386  ;;  %v3489_v13 = vld [vmem:[#allocation3 + $0xe8] sm:$0xff]  ;;  %v14057_v24 = vand.u32 4294901760, %v11719_v48 }
 0x950   : > { %v9044_v1 = vpack.c.bf16 %v3839_v16, %v3832_v0  ;;  %3391 = vst.msk [vmem:[#allocation3 + $0x78] sm:$0xff] %vm3331_vm6, %v3387_v42  ;;  %9021 = vmatprep.subr.bf16.mxu0 %v11732_v19  ;;  %v3604_v22 = vand.u32 4294901760, %v3489_v13  ;;  %v11743_v7 = vsub.f32 %v3488_v52, %v3601_v62  ;;  %v14309_v16 = vand.u32 4294901760, %v11648_v57 }
 0x951   : > { %v3852_v34 = vsub.f32 %v11703_v33, %v14307_v23  ;;  %v3846_v17 = vand.u32 4294901760, %v3845_v55  ;;  %9023 = vmatpush3.bf16.msra.mxu0 %v11634_v11  ;;  %v14308_v23 = vand.u32 4294901760, %v11620_v40  ;;  %v9050_v0 = vpack.c.bf16 %v3741_v12, %v3734_v20  ;;  %v3490_v5 = vld [vmem:[#allocation3 + $0xf0] sm:$0xff] }
 0x952   : > { %9045 = vmatprep.subr.bf16.mxu1 %v9044_v1  ;;  %v3859_v42 = vsub.f32 %v11719_v48, %v14057_v24  ;;  %v3755_v52 = vand.u32 4294901760, %v3754_v58  ;;  %v11759_v1 = vsub.f32 %v3489_v13, %v3604_v22  ;;  %v3607_v21 = vand.u32 4294901760, %v3490_v5 }
 0x953   : > { %v3853_v47 = vand.u32 4294901760, %v3852_v34  ;;  %v11751_v55 = vpack.c.bf16 %v14309_v16, %v14308_v23  ;;  %9047 = vmatpush3.bf16.msra.mxu1 %v11655_v54  ;;  %v11757_v34 = vpack.c.bf16 %v3604_v22, %v3601_v62  ;;  %v3491_v40 = vld [vmem:[#allocation3 + $0xf8] sm:$0xff]  ;;  %v14312_v57 = vand.u32 4294901760, %v11734_v4 }
 0x954   : > { %v3748_v20 = vand.u32 4294901760, %v3747_v59  ;;  %v14064_v12 = vand.u32 4294901760, %v11743_v7  ;;  %v14313_v16 = vand.u32 4294901760, %v11712_v36  ;;  %v3610_v54 = vand.u32 4294901760, %v3491_v40 }
 0x955   : > { %14310 = vst [vmem:[#allocation26_spill] sm:$0xff] %v11751_v55  ;;  %14311 = vst [vmem:[#allocation27_spill] sm:$0xff] %v11757_v34  ;;  %v9048_v8 = vpack.c.bf16 %v3853_v47, %v3846_v17  ;;  %v3866_v23 = vsub.f32 %v11734_v4, %v14312_v57  ;;  %9025 = vmatprep.subr.bf16.mxu0 %v11757_v34  ;;  %v11769_v13 = vsub.f32 %v3490_v5, %v3607_v21  ;;  %v3474_v24 = vld [vmem:[#allocation3 + $0x70] sm:$0xff] }
 0x956   : > { %v3768_v58 = vsub.f32 %v11712_v36, %v14313_v16  ;;  %v14314_v62 = vand.u32 4294901760, %v11695_v30  ;;  %9027 = vmatpush3.bf16.msra.mxu0 %v11751_v55  ;;  %v3860_v59 = vand.u32 4294901760, %v3859_v42  ;;  %v9054_v57 = vpack.c.bf16 %v3755_v52, %v3748_v20 }
 0x957   : > { %9049 = vmatprep.subr.bf16.mxu1 %v9048_v8  ;;  %v3867_v47 = vand.u32 4294901760, %v3866_v23  ;;  %v3873_v16 = vsub.f32 %v11743_v7, %v14064_v12  ;;  %v11779_v8 = vpack.c.bf16 %v3610_v54, %v3607_v21  ;;  %v11781_v5 = vsub.f32 %v3491_v40, %v3610_v54  ;;  %v3475_v55 = vld [vmem:[#allocation3 + $0x78] sm:$0xff] }
 0x958   : > { %v3761_v22 = vsub.f32 %v11695_v30, %v14314_v62  ;;  %9051 = vmatpush3.bf16.msra.mxu1 %v9050_v0  ;;  %v3559_v17 = vand.u32 4294901760, %v3474_v24  ;;  %v14315_v34 = vand.u32 4294901760, %v11759_v1  ;;  %v3769_v23 = vand.u32 4294901760, %v3768_v58 }
 0x959   : > { %v9052_v11 = vpack.c.bf16 %v3867_v47, %v3860_v59  ;;  %v3874_v42 = vand.u32 4294901760, %v3873_v16  ;;  %v14065_v52 = vand.u32 4294901760, %v11769_v13  ;;  %9029 = vmatprep.subr.bf16.mxu0 %v11779_v8  ;;  %v3562_v20 = vand.u32 4294901760, %v3475_v55 }
 0x95a   : > { %v3880_v62 = vsub.f32 %v11759_v1, %v14315_v34  ;;  %v11788_v12 = vsub.f32 %v3474_v24, %v3559_v17  ;;  %v14068_v0 = vand.u32 4294901760, %v11781_v5  ;;  %v3762_v40 = vand.u32 4294901760, %v3761_v22 }
 0x95b   : > { %9053 = vmatprep.subr.bf16.mxu1 %v9052_v11  ;;  %v3887_v34 = vsub.f32 %v11769_v13, %v14065_v52  ;;  %v14072_v54 = vand.u32 4294901760, %v11567_v3  ;;  %v11797_v58 = vsub.f32 %v11542_v45, %v11573_v28  ;;  %v11799_v59 = vpack.c.bf16 %v3562_v20, %v3559_v17 }
 0x95c   : > { %v3881_v21 = vand.u32 4294901760, %v3880_v62  ;;  %9055 = vmatpush3.bf16.msra.mxu1 %v9054_v57  ;;  %v11801_v24 = vsub.f32 %v3475_v55, %v3562_v20  ;;  %v3894_v11 = vsub.f32 %v11781_v5, %v14068_v0  ;;  %v14316_v22 = vand.u32 4294901760, %v11521_v63  ;;  %v14336_v0 = vld [vmem:[#allocation27_spill] sm:$0xff] }
 0x95d   : > { %v14067_v62 = vand.u32 4294901760, %v11788_v12  ;;  %v14071_v52 = vand.u32 4294901760, %v11570_v51  ;;  %v11813_v45 = vsub.f32 %v11558_v37, %v11587_v25  ;;  %9031 = vmatpush3.bf16.msra.mxu0 %v11799_v59  ;;  %v9058_v55 = vpack.c.bf16 %v3769_v23, %v3762_v40 }
 0x95e   : > { %v9056_v47 = vpack.c.bf16 %v3881_v21, %v3874_v42  ;;  %v3636_v16 = vsub.f32 %v11521_v63, %v14316_v22  ;;  %v3888_v17 = vand.u32 4294901760, %v3887_v34  ;;  %v3895_v57 = vand.u32 4294901760, %v3894_v11 }
 0x95f   : > { %v14066_v42 = vand.u32 4294901760, %v11801_v24  ;;  %v14317_v20 = vpack.c.bf16 %v11347_v61, %v11338_v39  ;;  %v3631_v21 = vand.u32 4294901760, %v11552_v50  ;;  %v3775_v22 = vsub.f32 %v11788_v12, %v14067_v62  ;;  %v14334_v62 = vld [vmem:[#allocation19_spill] sm:$0xff] }
 0x960   : > { %9057 = vmatprep.subr.bf16.mxu1 %v9056_v47  ;;  %v9060_v37 = vpack.c.bf16 %v3895_v57, %v3888_v17  ;;  %v3645_v40 = vsub.f32 %v11567_v3, %v14072_v54  ;;  %v14070_v34 = vand.u32 4294901760, %v11797_v58  ;;  %v14318_v39 = vand.u32 4294901760, %v11517_v2 }
 0x961   : > { %9065 = vmatprep.subr.bf16.mxu0 %v14317_v20  ;;  %9059 = vmatpush3.bf16.msra.mxu1 %v9058_v55  ;;  %v3782_v23 = vsub.f32 %v11801_v24, %v14066_v42  ;;  %v9068_v61 = vpack.c.bf16 %v11615_v35, %v11605_v49  ;;  %v3637_v50 = vand.u32 4294901760, %v3636_v16  ;;  %v3651_v47 = vsub.f32 %v11570_v51, %v14071_v52  ;;  %v14342_v52 = vld [vmem:[#allocation5_spill] sm:$0xff] }
 0x962   : > { %3623 = vmatmul.mubr.f32.vlgmr.msra.gmra.mrb[8].mxu0 %v14318_v39  ;;  %v14069_v11 = vand.u32 4294901760, %v11813_v45  ;;  %9061 = vmatprep.subr.bf16.mxu1 %v9060_v37  ;;  %v14319_v55 = vpack.c.bf16 %v11342_v29, %v11336_v32  ;;  %v3776_v17 = vand.u32 4294901760, %v3775_v22  ;;  %v9070_v20 = vpack.c.bf16 %v11475_v9, %v11486_v27 }
 0x963   : > { %v3783_v57 = vand.u32 4294901760, %v3782_v23  ;;  %3632 = vmatprep.mubr.f32.mxu0 %v3631_v21  ;;  %v3646_v16 = vand.u32 4294901760, %v3645_v40  ;;  %v3660_v39 = vsub.f32 %v11797_v58, %v14070_v34  ;;  %v9072_v37 = vpack.c.bf16 %v11646_v60, %v11625_v56 }
 0x964   : > { %9067 = vmatpush3.bf16.msra.mxu0 %v14319_v55  ;;  %v3652_v42 = vand.u32 4294901760, %v3651_v47  ;;  %v3666_v32 = vsub.f32 %v11813_v45, %v14069_v11  ;;  %v9074_v29 = vpack.c.bf16 %v11497_v43, %v11504_v10  ;;  %v9076_v22 = vpack.c.bf16 %v11676_v38, %v11664_v15  ;;  %v14322_v47 = vld [vmem:[#allocation11_spill] sm:$0xff]  ;;  %v14323_v55 = vld [vmem:[#allocation14_spill] sm:$0xff] }
 0x965   : > { %9069 = vmatprep.subr.bf16.mxu0 %v9068_v61  ;;  %v9062_v2 = vpack.c.bf16 %v3783_v57, %v3776_v17  ;;  %v3661_v21 = vand.u32 4294901760, %v3660_v39  ;;  %v9078_v40 = vpack.c.bf16 %v11527_v44, %v11524_v26  ;;  %v14320_v61 = vld [vmem:[#allocation13_spill] sm:$0xff]  ;;  %v14324_v17 = vld [vmem:[#allocation18_spill] sm:$0xff]  ;;  %v14327_v39 = vld [vmem:[#allocation16_spill] sm:$0xff]  ;;  %v14344_v54 = vand.u32 4294901760, %v11486_v27 }
 0x966   : > { %3638 = vmatmul.mubr.f32.gmra.mrb[10].mxu0 %v3637_v50  ;;  %v3667_v23 = vand.u32 4294901760, %v3666_v32  ;;  %v14321_v50 = vld [vmem:[#allocation23_spill] sm:$0xff]  ;;  %v9082_v57 = vpack.c.bf16 %v14324_v17, %v14323_v55  ;;  %v14329_v32 = vld [vmem:[#allocation20_spill] sm:$0xff]  ;;  %v14337_v11 = vld [vmem:[#allocation6_spill] sm:$0xff]  ;;  %v14348_v27 = vand.u32 4294901760, %v11504_v10  ;;  %v14355_v10 = vand.u32 4294901760, %v11527_v44 }
 0x967   : > { %9063 = vmatpush3.bf16.msra.mxu1 %v9062_v2  ;;  %3647 = vmatprep.mubr.f32.mxu0 %v3646_v16  ;;  %v14325_v2 = vld [vmem:[#allocation8_spill] sm:$0xff]  ;;  %v9084_v16 = vpack.c.bf16 %v11734_v4, %v11719_v48  ;;  %v14360_v44 = vand.u32 4294901760, %v14323_v55 }
 0x968   : > { %9071 = vmatpush3.bf16.msra.mxu0 %v9070_v20  ;;  %9097 = vmatprep.subr.bf16.mxu1 %v11345_v14  ;;  %v14326_v20 = vld [vmem:[#allocation12_spill] sm:$0xff] }
 0x969   : > { %9073 = vmatprep.subr.bf16.mxu0 %v9072_v37  ;;  %v14328_v37 = vld [vmem:[#allocation24_spill] sm:$0xff] }
 0x96a   : > { %3653 = vmatmul.mubr.f32.gmra.mrb[12].mxu0 %v3652_v42  ;;  %3900 = vmatmul.mubr.f32.vlgmr.msra.gmra.mrb[14].mxu1 %v11447_v31  ;;  %v9080_v42 = vpack.c.bf16 %v11703_v33, %v11685_v46 }
 0x96b   : > { %9099 = vmatpush3.bf16.msra.mxu1 %v11352_v18  ;;  %3662 = vmatprep.mubr.f32.mxu0 %v3661_v21 }
 0x96c   : > { %9075 = vmatpush3.bf16.msra.mxu0 %v9074_v29  ;;  %9101 = vmatprep.subr.bf16.mxu1 %v11613_v53  ;;  %v14330_v29 = vld [vmem:[#allocation22_spill] sm:$0xff] }
 0x96d   : > { %9077 = vmatprep.subr.bf16.mxu0 %v9076_v22  ;;  %3905 = vmatprep.mubr.f32.mxu1 %v11465_v6  ;;  %v9086_v21 = vpack.c.bf16 %v14330_v29, %v14329_v32  ;;  %v9088_v22 = vpack.c.bf16 %v11759_v1, %v11743_v7  ;;  %v14368_v55 = vand.u32 4294901760, %v14330_v29 }
 0x96e   : > { %3668 = vmatmul.mubr.f32.gmra.mrb[14].mxu0 %v3667_v23  ;;  %3907 = vmatmul.mubr.f32.gmra.mrb[20].mxu1 %v11492_v41  ;;  %v14331_v23 = vld [vmem:[#allocation17_spill] sm:$0xff] }
 0x96f   : > { %9103 = vmatpush3.bf16.msra.mxu1 %v14320_v61  ;;  %3912 = vmatprep.mubr.f32.mxu1 %v14322_v47 }
 0x970   : > { %9079 = vmatpush3.bf16.msra.mxu0 %v9078_v40  ;;  %9105 = vmatprep.subr.bf16.mxu1 %v14321_v50  ;;  %v14332_v40 = vld [vmem:[#allocation25_spill] sm:$0xff] }
 0x971   : > { %9081 = vmatprep.subr.bf16.mxu0 %v9080_v42  ;;  %4056 = vmatprep.mubr.f32.mxu0 %v14325_v2  ;;  %v9090_v42 = vpack.c.bf16 %v11712_v36, %v11695_v30 }
 0x972   : > { %3914 = vmatmul.mubr.f32.gmra.mrb[22].mxu1 %v14326_v20 }
 0x973   : > { %9107 = vmatpush3.bf16.msra.mxu1 %v14327_v39  ;;  %3919 = vmatprep.mubr.f32.mxu1 %v11573_v28 }
 0x974   : > { %9083 = vmatpush3.bf16.msra.mxu0 %v9082_v57  ;;  %9109 = vmatprep.subr.bf16.mxu1 %v14328_v37  ;;  %v14333_v57 = vand.u32 4294901760, %v14325_v2  ;;  %v14338_v2 = vld [vmem:[#allocation9_spill] sm:$0xff] }
 0x975   : > { %9085 = vmatprep.subr.bf16.mxu0 %v9084_v16  ;;  %v9092_v16 = vpack.c.bf16 %v11781_v5, %v11769_v13 }
 0x976   : > { %3921 = vmatmul.mubr.f32.gmra.mrb[24].mxu1 %v11587_v25 }
 0x977   : > { %9111 = vmatpush3.bf16.msra.mxu1 %v14331_v23  ;;  %4190 = vmatprep.mubr.f32.mxu1 %v14333_v57  ;;  %v14339_v57 = vand.u32 4294901760, %v11605_v49  ;;  %v14346_v49 = vand.u32 4294901760, %v11625_v56  ;;  %v14350_v56 = vand.u32 4294901760, %v14338_v2 }
 0x978   : > { %9087 = vmatpush3.bf16.msra.mxu0 %v9086_v21  ;;  %9113 = vmatprep.subr.bf16.mxu1 %v14332_v40  ;;  %v9094_v21 = vpack.c.bf16 %v11801_v24, %v11788_v12 }
 0x979   : > { %9089 = vmatprep.subr.bf16.mxu0 %v9088_v22  ;;  %v14335_v22 = vld [vmem:[#allocation21_spill] sm:$0xff] }
 0x97b   : > { %9115 = vmatpush3.bf16.msra.mxu1 %v14334_v62 }
 0x97c   : > { %9091 = vmatpush3.bf16.msra.mxu0 %v9090_v42  ;;  %9117 = vmatprep.subr.bf16.mxu1 %v11732_v19  ;;  %v14340_v42 = vand.u32 4294901760, %v11615_v35  ;;  %v14347_v35 = vand.u32 4294901760, %v11646_v60  ;;  %v14351_v60 = vand.u32 4294901760, %v11664_v15  ;;  %v14358_v15 = vand.u32 4294901760, %v11703_v33 }
 0x97d   : > { %9093 = vmatprep.subr.bf16.mxu0 %v9092_v16  ;;  %v14341_v16 = vld [vmem:[#allocation26_spill] sm:$0xff]  ;;  %v14364_v33 = vand.u32 4294901760, %v11719_v48  ;;  %v14370_v48 = vand.u32 4294901760, %v11743_v7  ;;  %v14375_v7 = vand.u32 4294901760, %v11781_v5 }
 0x97e   : > { %v9132_v34 = vpack.c.bf16 %v14340_v42, %v14339_v57  ;;  %v9136_v57 = vpack.c.bf16 %v14347_v35, %v14346_v49  ;;  %v14362_v42 = vld [vmem:[#allocation7_spill] sm:$0xff] }
 0x97f   : > { %9119 = vmatpush3.bf16.msra.mxu1 %v14335_v22 }
 0x980   : > { %9095 = vmatpush3.bf16.msra.mxu0 %v9094_v21  ;;  %9121 = vmatprep.subr.bf16.mxu1 %v14336_v0  ;;  %v14343_v21 = vld [vmem:[#allocation10_spill] sm:$0xff] }
 0x981   : > { %9129 = vmatprep.subr.bf16.mxu0 %v14337_v11  ;;  %v14345_v11 = vand.u32 4294901760, %v11475_v9  ;;  %v14349_v9 = vand.u32 4294901760, %v11497_v43  ;;  %v14354_v43 = vand.u32 4294901760, %v11524_v26  ;;  %v14359_v26 = vand.u32 4294901760, %v11567_v3 }
 0x983   : > { %4059 = vmatmul.mubr.f32.vlgmr.msra.gmra.mrb[16].mxu0 %v14338_v2  ;;  %9123 = vmatpush3.bf16.msra.mxu1 %v14341_v16  ;;  %v9134_v25 = vpack.c.bf16 %v14345_v11, %v14344_v54  ;;  %v14352_v54 = vand.u32 4294901760, %v11676_v38  ;;  %v14356_v38 = vand.u32 4294901760, %v11521_v63  ;;  %v14361_v2 = vand.u32 4294901760, %v14324_v17 }
 0x984   : > { %9131 = vmatpush3.bf16.msra.mxu0 %v14342_v52  ;;  %9125 = vmatprep.subr.bf16.mxu1 %v11779_v8  ;;  %v9138_v52 = vpack.c.bf16 %v14349_v9, %v14348_v27  ;;  %v14369_v17 = vand.u32 4294901760, %v11813_v45 }
 0x985   : > { %9133 = vmatprep.subr.bf16.mxu0 %v9132_v34  ;;  %4065 = vmatprep.mubr.f32.mxu0 %v14343_v21  ;;  %v9142_v34 = vpack.c.bf16 %v14355_v10, %v14354_v43 }
 0x987   : > { %4068 = vmatmul.mubr.f32.gmra.mrb[18].mxu0 %v11521_v63  ;;  %9127 = vmatpush3.bf16.msra.mxu1 %v11799_v59  ;;  %v9146_v63 = vpack.c.bf16 %v14361_v2, %v14360_v44 }
 0x988   : > { %9135 = vmatpush3.bf16.msra.mxu0 %v9134_v25  ;;  %9161 = vmatprep.subr.bf16.mxu1 %v11345_v14  ;;  %v9140_v25 = vpack.c.bf16 %v14352_v54, %v14351_v60  ;;  %v14353_v14 = vand.u32 4294901760, %v14343_v21 }
 0x989   : > { %9137 = vmatprep.subr.bf16.mxu0 %v9136_v57  ;;  %4074 = vmatprep.mubr.f32.mxu0 %v11567_v3  ;;  %v14366_v3 = vand.u32 4294901760, %v11797_v58 }
 0x98a   : > { %4194 = vmatmul.mubr.f32.vlgmr.msra.gmra.mrb[26].mxu1 %v14350_v56 }
 0x98b   : > { %4077 = vmatmul.mubr.f32.gmra.mrb[20].mxu0 %v11570_v51  ;;  %9163 = vmatpush3.bf16.msra.mxu1 %v11352_v18  ;;  %v14357_v18 = vand.u32 4294901760, %v11685_v46  ;;  %v14363_v46 = vand.u32 4294901760, %v11570_v51 }
 0x98c   : > { %9139 = vmatpush3.bf16.msra.mxu0 %v9138_v52  ;;  %9165 = vmatprep.subr.bf16.mxu1 %v11613_v53 }
 0x98d   : > { %9141 = vmatprep.subr.bf16.mxu0 %v9140_v25  ;;  %4083 = vmatprep.mubr.f32.mxu0 %v11797_v58  ;;  %v9144_v53 = vpack.c.bf16 %v14358_v15, %v14357_v18  ;;  %v14372_v58 = vand.u32 4294901760, %v11695_v30  ;;  %v14377_v30 = vand.u32 4294901760, %v11801_v24 }
 0x98e   : > { %4201 = vmatprep.mubr.f32.mxu1 %v14353_v14 }
 0x98f   : > { %4086 = vmatmul.mubr.f32.gmra.mrb[22].mxu0 %v11813_v45  ;;  %4205 = vmatmul.mubr.f32.gmra.mrb[28].mxu1 %v14356_v38  ;;  %v14374_v45 = vand.u32 4294901760, %v11769_v13 }
 0x990   : > { %9143 = vmatpush3.bf16.msra.mxu0 %v9142_v34  ;;  %9167 = vmatpush3.bf16.msra.mxu1 %v14320_v61  ;;  %v14365_v61 = vand.u32 4294901760, %v11734_v4  ;;  %v14371_v4 = vand.u32 4294901760, %v11759_v1  ;;  %v14376_v1 = vand.u32 4294901760, %v11788_v12 }
 0x991   : > { %9145 = vmatprep.subr.bf16.mxu0 %v9144_v53  ;;  %9169 = vmatprep.subr.bf16.mxu1 %v14321_v50  ;;  %v14367_v50 = vand.u32 4294901760, %v14329_v32  ;;  %v9156_v32 = vpack.c.bf16 %v14375_v7, %v14374_v45 }
 0x992   : > { %4212 = vmatprep.mubr.f32.mxu1 %v14359_v26  ;;  %4393 = vmatprep.mubr.f32.mxu0 %v14362_v42  ;;  %v9148_v21 = vpack.c.bf16 %v14365_v61, %v14364_v33  ;;  %v9152_v11 = vpack.c.bf16 %v14371_v4, %v14370_v48  ;;  %v9158_v29 = vpack.c.bf16 %v14377_v30, %v14376_v1 }
 0x993   : > { %4216 = vmatmul.mubr.f32.gmra.mrb[30].mxu1 %v14363_v46  ;;  %v9150_v51 = vpack.c.bf16 %v14368_v55, %v14367_v50 }
 0x994   : > { %9147 = vmatpush3.bf16.msra.mxu0 %v9146_v63  ;;  %9171 = vmatpush3.bf16.msra.mxu1 %v14327_v39  ;;  %v14373_v39 = vand.u32 4294901760, %v11712_v36  ;;  %v14378_v36 = vld [vmem:[#allocation15_spill] sm:$0xff] }
 0x995   : > { %9149 = vmatprep.subr.bf16.mxu0 %v9148_v21  ;;  %9173 = vmatprep.subr.bf16.mxu1 %v14328_v37 }
 0x996   : > { %4223 = vmatprep.mubr.f32.mxu1 %v14366_v3  ;;  %v9154_v37 = vpack.c.bf16 %v14373_v39, %v14372_v58 }
 0x997   : > { %4227 = vmatmul.mubr.f32.gmra.mrb[32].mxu1 %v14369_v17 }
 0x998   : > { %9151 = vmatpush3.bf16.msra.mxu0 %v9150_v51  ;;  %9175 = vmatpush3.bf16.msra.mxu1 %v14331_v23 }
 0x999   : > { %9153 = vmatprep.subr.bf16.mxu0 %v9152_v11  ;;  %9177 = vmatprep.subr.bf16.mxu1 %v14332_v40  ;;  %v3504_v40 = vpop.permute.xlu0 %3503 }
 0x99a   : > { %4518 = vmatprep.mubr.f32.mxu1 %v14362_v42 }
 0x99c   : > { %9155 = vmatpush3.bf16.msra.mxu0 %v9154_v37  ;;  %9179 = vmatpush3.bf16.msra.mxu1 %v14334_v62 }
 0x99d   : > { %9157 = vmatprep.subr.bf16.mxu0 %v9156_v32  ;;  %9181 = vmatprep.subr.bf16.mxu1 %v11732_v19  ;;  %v3514_v10 = vpop.permute.xlu0 %3513 }
 0x9a0   : > { %9159 = vmatpush3.bf16.msra.mxu0 %v9158_v29  ;;  %9183 = vmatpush3.bf16.msra.mxu1 %v14335_v22 }
 0x9a1   : > { %9185 = vmatprep.subr.bf16.mxu1 %v14336_v0  ;;  %v3499_v0 = vpop.permute.xlu1 %3498 }
 0x9a3   : > { %4395 = vmatmul.mubr.f32.vlgmr.msra.gmra.mrb[24].mxu0 %v11447_v31 }
 0x9a4   : > { %9187 = vmatpush3.bf16.msra.mxu1 %v14341_v16  ;;  %4400 = vmatprep.mubr.f32.mxu0 %v11465_v6 }
 0x9a5   : > { %9189 = vmatprep.subr.bf16.mxu1 %v11779_v8  ;;  %v3509_v56 = vpop.permute.xlu1 %3508 }
 0x9a7   : > { %4402 = vmatmul.mubr.f32.gmra.mrb[26].mxu0 %v11492_v41 }
 0x9a8   : > { %9191 = vmatpush3.bf16.msra.mxu1 %v11799_v59  ;;  %4407 = vmatprep.mubr.f32.mxu0 %v14322_v47 }
 0x9ab   : > { %4409 = vmatmul.mubr.f32.gmra.mrb[28].mxu0 %v14326_v20  ;;  %4520 = vmatmul.mubr.f32.vlgmr.msra.gmra.mrb[34].mxu1 %v11447_v31 }
 0x9ac   : > { %4414 = vmatprep.mubr.f32.mxu0 %v11573_v28  ;;  %4525 = vmatprep.mubr.f32.mxu1 %v11465_v6 }
 0x9af   : > { %4416 = vmatmul.mubr.f32.gmra.mrb[30].mxu0 %v14378_v36  ;;  %4527 = vmatmul.mubr.f32.gmra.mrb[36].mxu1 %v11492_v41 }
 0x9b0   : > { %4532 = vmatprep.mubr.f32.mxu1 %v14322_v47 }
 0x9b3   : > { %4534 = vmatmul.mubr.f32.gmra.mrb[38].mxu1 %v14326_v20 }
 0x9b4   : > { %4539 = vmatprep.mubr.f32.mxu1 %v11573_v28 }
 0x9b7   : > { %4541 = vmatmul.mubr.f32.gmra.mrb[40].mxu1 %v14378_v36 }
 0xa35   : > { %v7706_v19 = vpop.f32.mrb[8].mxu0 }
 0xa36   : > { %v7707_v12 = vpop.f32.mrb[9].mxu0 }
 0xa37   : > { %v7708_v13 = vadd.f32 %v7707_v12, %v7706_v19 }
 0xa39   : > { %v7709_v31 = vpop.f32.mrb[10].mxu0  ;;  %v3625_v41 = vadd.f32 %v7708_v13, %v3499_v0 }
 0xa3a   : > { %v7710_v8 = vpop.f32.mrb[11].mxu0 }
 0xa3b   : > { %v7711_v5 = vadd.f32 %v7710_v8, %v7709_v31 }
 0xa3d   : > { %v7712_v6 = vpop.f32.mrb[12].mxu0  ;;  %v7750_v59 = vpop.f32.mrb[14].mxu1  ;;  %v3640_v35 = vadd.f32 %v7711_v5, %v3504_v40 }
 0xa3e   : > { %v7713_v24 = vpop.f32.mrb[13].mxu0  ;;  %v7751_v62 = vpop.f32.mrb[15].mxu1 }
 0xa3f   : > { %v7714_v23 = vadd.f32 %v7713_v24, %v7712_v6  ;;  %v7752_v47 = vadd.f32 %v7751_v62, %v7750_v59 }
 0xa41   : > { %v3902_v20 = vadd.f32 %v7752_v47, %v3625_v41  ;;  %v7715_v22 = vpop.f32.mrb[14].mxu0  ;;  %v7753_v28 = vpop.f32.mrb[20].mxu1  ;;  %v3655_v54 = vadd.f32 %v7714_v23, %v3509_v56 }
 0xa42   : > { %v7716_v16 = vpop.f32.mrb[15].mxu0  ;;  %v7754_v49 = vpop.f32.mrb[21].mxu1 }
 0xa43   : > { %v7717_v57 = vadd.f32 %v7716_v16, %v7715_v22  ;;  %v7755_v27 = vadd.f32 %v7754_v49, %v7753_v28 }
 0xa45   : > { %v3909_v9 = vadd.f32 %v7755_v27, %v3640_v35  ;;  %v7756_v52 = vpop.f32.mrb[22].mxu1  ;;  %v3670_v38 = vadd.f32 %v7717_v57, %v3514_v10 }
 0xa46   : > { %v7757_v60 = vpop.f32.mrb[23].mxu1 }
 0xa47   : > { %v7758_v25 = vadd.f32 %v7757_v60, %v7756_v52 }
 0xa49   : > { %v3916_v14 = vadd.f32 %v7758_v25, %v3655_v54  ;;  %v7759_v43 = vpop.f32.mrb[24].mxu1 }
 0xa4a   : > { %v7760_v34 = vpop.f32.mrb[25].mxu1 }
 0xa4b   : > { %v7761_v18 = vadd.f32 %v7760_v34, %v7759_v43 }
 0xa4d   : > { %v3923_v15 = vadd.f32 %v7761_v18, %v3670_v38 }
 0xa56   : > { %v7794_v53 = vpop.f32.mrb[16].mxu0 }
 0xa57   : > { %v7795_v26 = vpop.f32.mrb[17].mxu0 }
 0xa58   : > { %v7796_v44 = vadd.f32 %v7795_v26, %v7794_v53 }
 0xa5a   : > { %v4061_v2 = vadd.f32 %v7796_v44, %v3902_v20  ;;  %v7797_v63 = vpop.f32.mrb[18].mxu0 }
 0xa5b   : > { %v7798_v42 = vpop.f32.mrb[19].mxu0 }
 0xa5c   : > { %v7799_v46 = vadd.f32 %v7798_v42, %v7797_v63  ;;  %v4600_v63 = vld [vmem:[%s13958_s13 + $0x8] sm:$0xff]  ;;  %v4599_v42 = vld [vmem:[%s13958_s13] sm:$0xff] }
 0xa5d   : > { %v7838_v21 = vpop.f32.mrb[26].mxu1 }
 0xa5e   : > { %v4070_v33 = vadd.f32 %v7799_v46, %v3909_v9  ;;  %v7800_v61 = vpop.f32.mrb[20].mxu0  ;;  %v7839_v50 = vpop.f32.mrb[27].mxu1  ;;  %v4601_v46 = vld [vmem:[%s13958_s13 + $0x10] sm:$0xff] }
 0xa5f   : > { %v7801_v3 = vpop.f32.mrb[21].mxu0  ;;  %v7840_v51 = vadd.f32 %v7839_v50, %v7838_v21  ;;  %v4628_v21 = vld [vmem:[%s13959_s14 + $0x8] sm:$0xff] }
 0xa60   : > { %v7802_v55 = vadd.f32 %v7801_v3, %v7800_v61  ;;  %v4627_v61 = vld [vmem:[%s13959_s14] sm:$0xff] }
 0xa61   : > { %v4196_v48 = vadd.f32 %v7840_v51, %v4061_v2 }
 0xa62   : > { %v4079_v17 = vadd.f32 %v7802_v55, %v3916_v14  ;;  %v7803_v4 = vpop.f32.mrb[22].mxu0  ;;  %v7841_v11 = vpop.f32.mrb[28].mxu1 }
 0xa63   : > { %v7804_v58 = vpop.f32.mrb[23].mxu0  ;;  %v7842_v39 = vpop.f32.mrb[29].mxu1 }
 0xa64   : > { %v7805_v37 = vadd.f32 %v7804_v58, %v7803_v4  ;;  %v7843_v45 = vadd.f32 %v7842_v39, %v7841_v11 }
 0xa66   : > { %v4088_v7 = vadd.f32 %v7805_v37, %v3923_v15  ;;  %v4207_v32 = vadd.f32 %v7843_v45, %v4070_v33  ;;  %v7844_v1 = vpop.f32.mrb[30].mxu1  ;;  %v4602_v33 = vld [vmem:[%s13958_s13 + $0x18] sm:$0xff] }
 0xa67   : > { %v7845_v30 = vpop.f32.mrb[31].mxu1 }
 0xa68   : > { %v7846_v29 = vadd.f32 %v7845_v30, %v7844_v1 }
 0xa6a   : > { %v4218_v36 = vadd.f32 %v7846_v29, %v4079_v17  ;;  %v7847_v19 = vpop.f32.mrb[32].mxu1 }
 0xa6b   : > { %v7848_v12 = vpop.f32.mrb[33].mxu1 }
 0xa6c   : > { %v7849_v13 = vadd.f32 %v7848_v12, %v7847_v19 }
 0xa6e   : > { %v4229_v31 = vadd.f32 %v7849_v13, %v4088_v7  ;;  %v4629_v13 = vld [vmem:[%s13959_s14 + $0x10] sm:$0xff] }
 0xa76   : > { %v7882_v8 = vpop.f32.mrb[24].mxu0 }
 0xa77   : > { %v7883_v5 = vpop.f32.mrb[25].mxu0 }
 0xa78   : > { %v7884_v0 = vadd.f32 %v7883_v5, %v7882_v8 }
 0xa7a   : > { %v4397_v6 = vadd.f32 %v7884_v0, %v4196_v48  ;;  %v7885_v59 = vpop.f32.mrb[26].mxu0 }
 0xa7b   : > { %v7886_v24 = vpop.f32.mrb[27].mxu0 }
 0xa7c   : > { %v7887_v62 = vadd.f32 %v7886_v24, %v7885_v59 }
 0xa7e   : > { %v4404_v41 = vadd.f32 %v7887_v62, %v4207_v32  ;;  %v7888_v23 = vpop.f32.mrb[28].mxu0  ;;  %v7926_v47 = vpop.f32.mrb[34].mxu1 }
 0xa7f   : > { %v7889_v40 = vpop.f32.mrb[29].mxu0  ;;  %v7927_v20 = vpop.f32.mrb[35].mxu1 }
 0xa80   : > { %v7890_v22 = vadd.f32 %v7889_v40, %v7888_v23  ;;  %v7928_v28 = vadd.f32 %v7927_v20, %v7926_v47 }
 0xa82   : > { %v4411_v16 = vadd.f32 %v7890_v22, %v4218_v36  ;;  %v7891_v49 = vpop.f32.mrb[30].mxu0  ;;  %v7929_v35 = vpop.f32.mrb[36].mxu1  ;;  %v4522_v57 = vadd.f32 %v7928_v28, %v4397_v6 }
 0xa83   : > { %v7892_v27 = vpop.f32.mrb[31].mxu0  ;;  %v7930_v9 = vpop.f32.mrb[37].mxu1 }
 0xa84   : > { %v7893_v52 = vadd.f32 %v7892_v27, %v7891_v49  ;;  %v7931_v56 = vadd.f32 %v7930_v9, %v7929_v35  ;;  %v4546_v60 = vsel %vm3331_vm6, %v4522_v57, 0.0  ;;  %v9769_v27 = vmov 1966171168  }
 0xa85   : > { %4547 = vadd.xlane.f32.xlu1 %v4546_v60  ;;  %v4674_v9 = vunpack.c.l.s4 %v9769_v27 }
 0xa86   : > { %v4418_v54 = vadd.f32 %v7893_v52, %v4229_v31  ;;  %v7932_v25 = vpop.f32.mrb[38].mxu1  ;;  %v4529_v14 = vadd.f32 %v7931_v56, %v4404_v41  ;;  %v4630_v31 = vld [vmem:[%s13959_s14 + $0x18] sm:$0xff] }
 0xa87   : > { %v7933_v43 = vpop.f32.mrb[39].mxu1 }
 0xa88   : > { %v7934_v10 = vadd.f32 %v7933_v43, %v7932_v25  ;;  %v4549_v34 = vsel %vm3331_vm6, %v4529_v14, 0.0 }
 0xa89   : > { %4550 = vadd.xlane.f32.xlu0 %v4549_v34 }
 0xa8a   : > { %v7935_v38 = vpop.f32.mrb[40].mxu1  ;;  %v4536_v18 = vadd.f32 %v7934_v10, %v4411_v16 }
 0xa8b   : > { %v7936_v15 = vpop.f32.mrb[41].mxu1 }
 0xa8c   : > { %v7937_v53 = vadd.f32 %v7936_v15, %v7935_v38  ;;  %v4552_v26 = vsel %vm3331_vm6, %v4536_v18, 0.0 }
 0xa8d   : > { %4553 = vadd.xlane.f32.xlu0 %v4552_v26 }
 0xa8e   : > { %v4543_v44 = vadd.f32 %v7937_v53, %v4418_v54  ;;  %v4675_v54 = vunpack.c.0.s8 %v4674_v9 }
 0xa90   : > { %v4555_v2 = vsel %vm3331_vm6, %v4543_v44, 0.0 }
 0xa91   : > { %4556 = vadd.xlane.f32.xlu1 %v4555_v2 }
 0xaa2   : > { %4610 = vperm.xlu1 %9725, %v4600_v63  }
 0xaa3   : > { %4605 = vperm.xlu0 %9724, %v4599_v42  }
 0xaa6   : > { %4615 = vperm.xlu1 %9725, %v4601_v46  }
 0xaa7   : > { %4620 = vperm.xlu0 %9724, %v4602_v33  }
 0xaaa   : > { %4633 = vperm.xlu1 %9725, %v4627_v61  }
 0xaab   : > { %4638 = vperm.xlu0 %9724, %v4628_v21  }
 0xb12   : > { %v4548_v3 = vpop.xlane.xlu1 %4547 }
 0xb13   : > { %v4559_v50 = vmul.f32 0.0625, %v4548_v3 }
 0xb15   : > { %v4563_v55 = vsub.f32 %v4522_v57, %v4559_v50  ;;  %v14087_v57 = vlaneseq }
 0xb16   : > { %v4551_v51 = vpop.xlane.xlu0 %4550 }
 0xb17   : > { %v4560_v17 = vmul.f32 0.0625, %v4551_v51  ;;  %v4567_v48 = vmul.f32 %v4563_v55, %v4563_v55  ;;  %v12044_v25 = vshrl.u32 %v14087_v57, 7  ;;  %vm12050_vm8 = vcmp.lt.s32.totalorder %v14087_v57, 16  ;;  %v12334_v57 = vld [vmem:[%s13960_s15 + $0x30] sm:$0xff] }
 0xb19   : > { %v4564_v4 = vsub.f32 %v4529_v14, %v4560_v17  ;;  %v4571_v11 = vsel %vm3331_vm6, %v4567_v48, 0.0  ;;  %v12047_v38 = vsub.s32 %v4675_v54, %v12044_v25 }
 0xb1a   : > { %v4554_v58 = vpop.xlane.xlu0 %4553  ;;  %4572 = vadd.xlane.f32.xlu0 %v4571_v11 }
 0xb1b   : > { %v4561_v39 = vmul.f32 0.0625, %v4554_v58  ;;  %v4568_v37 = vmul.f32 %v4564_v4, %v4564_v4 }
 0xb1d   : > { %v4565_v45 = vsub.f32 %v4536_v18, %v4561_v39  ;;  %v4574_v7 = vsel %vm3331_vm6, %v4568_v37, 0.0 }
 0xb1e   : > { %4575 = vadd.xlane.f32.xlu1 %v4574_v7  ;;  %v4557_v32 = vpop.xlane.xlu1 %4556 }
 0xb1f   : > { %v4562_v1 = vmul.f32 0.0625, %v4557_v32  ;;  %v4569_v30 = vmul.f32 %v4565_v45, %v4565_v45 }
 0xb21   : > { %v4566_v29 = vsub.f32 %v4543_v44, %v4562_v1  ;;  %v4577_v36 = vsel %vm3331_vm6, %v4569_v30, 0.0 }
 0xb22   : > { %4578 = vadd.xlane.f32.xlu0 %v4577_v36  ;;  %v4606_v8 = vpop.permute.xlu0 %4605  ;;  %v4611_v5 = vpop.permute.xlu1 %4610 }
 0xb23   : > { %v4570_v19 = vmul.f32 %v4566_v29, %v4566_v29 }
 0xb25   : > { %v4580_v12 = vsel %vm3331_vm6, %v4570_v19, 0.0 }
 0xb26   : > { %4581 = vadd.xlane.f32.xlu1 %v4580_v12  ;;  %v4621_v0 = vpop.permute.xlu0 %4620  ;;  %v4616_v6 = vpop.permute.xlu1 %4615 }
 0xb2a   : > { %v4639_v59 = vpop.permute.xlu0 %4638  ;;  %v4634_v24 = vpop.permute.xlu1 %4633 }
 0xb37   : > { %4643 = vperm.xlu1 %9725, %v4629_v13  }
 0xb38   : > { %4648 = vperm.xlu0 %9724, %v4630_v31  }
 0xba7   : > { %v4573_v62 = vpop.xlane.xlu0 %4572 }
 0xba8   : > { %v4583_v41 = vmul.f32 0.0625, %v4573_v62 }
 0xbaa   : > { %v4587_v23 = vadd.f32 1e-05, %v4583_v41 }
 0xbab   : > { %v4576_v47 = vpop.xlane.xlu1 %4575 }
 0xbac   : > { %9744 = vrsqrt.f32 %v4587_v23  ;;  %v4584_v40 = vmul.f32 0.0625, %v4576_v47 }
 0xbae   : > { %v4588_v20 = vadd.f32 1e-05, %v4584_v40 }
 0xbaf   : > { %v4579_v22 = vpop.xlane.xlu0 %4578 }
 0xbb0   : > { %9746 = vrsqrt.f32 %v4588_v20  ;;  %v4585_v28 = vmul.f32 0.0625, %v4579_v22 }
 0xbb2   : > { %v4589_v16 = vadd.f32 1e-05, %v4585_v28 }
 0xbb3   : > { %v4582_v49 = vpop.xlane.xlu1 %4581 }
 0xbb4   : > { %9748 = vrsqrt.f32 %v4589_v16  ;;  %v4586_v35 = vmul.f32 0.0625, %v4582_v49 }
 0xbb6   : > { %v9745_v52 = vpop.eup %9744  ;;  %v4590_v56 = vadd.f32 1e-05, %v4586_v35 }
 0xbb7   : > { %v4595_v60 = vmul.f32 %v9745_v52, %v4563_v55  ;;  %v4644_v3 = vpop.permute.xlu1 %4643  ;;  %v4649_v7 = vpop.permute.xlu0 %4648 }
 0xbb8   : > { %9750 = vrsqrt.f32 %v4590_v56 }
 0xbb9   : > { %v4623_v14 = vmul.f32 %v4606_v8, %v4595_v60 }
 0xbba   : > { %v9747_v43 = vpop.eup %9746 }
 0xbbb   : > { %v4596_v10 = vmul.f32 %v9747_v43, %v4564_v4  ;;  %v4651_v34 = vadd.f32 %v4634_v24, %v4623_v14 }
 0xbbd   : > { %v4624_v18 = vmul.f32 %v4611_v5, %v4596_v10  ;;  %vm4655_vm7 = vcmp.ge.f32.partialorder %v4651_v34, 0.0  ;;  %v4659_v15 = vmul.f32 0.2, %v4651_v34 }
 0xbbe   : > { %v9749_v26 = vpop.eup %9748 }
 0xbbf   : > { %v4597_v44 = vmul.f32 %v9749_v26, %v4565_v45  ;;  %v4663_v2 = vsel %vm4655_vm7, %v4651_v34, %v4659_v15  ;;  %v4652_v63 = vadd.f32 %v4639_v59, %v4624_v18 }
 0xbc0   : > { %v4679_v42 = vrot.slane %v4663_v2, %v12047_v38  ;;  %v4718_v46 = vcombine.high %v4663_v2, %v4663_v2  ;;  %4671 = vst.msk [vmem:[#allocation4] sm:$0x1] %vm12050_vm8, %v4663_v2  ;;  %v12131_v2 = vld [vmem:[%s13960_s15 + $0x80] sm:$0xff] }
 0xbc1   : > { %v4625_v33 = vmul.f32 %v4616_v6, %v4597_v44  ;;  %vm4656_vm9 = vcmp.ge.f32.partialorder %v4652_v63, 0.0  ;;  %v4660_v61 = vmul.f32 0.2, %v4652_v63 }
 0xbc2   : > { %v9751_v21 = vpop.eup %9750  ;;  %v4680_v50 = vcombine.high %v4679_v42, %v4679_v42  ;;  %v4687_v4 = vrot.slane %v4679_v42, %v12047_v38  ;;  %v4725_v58 = vrot.slane %v4718_v46, %v12047_v38 }
 0xbc3   : > { %v4598_v55 = vmul.f32 %v9751_v21, %v4566_v29  ;;  %v4653_v51 = vadd.f32 %v4644_v3, %v4625_v33  ;;  %v4664_v17 = vsel %vm4656_vm9, %v4652_v63, %v4660_v61  ;;  %v12136_v63 = vld [vmem:[%s13960_s15 + $0x88] sm:$0xff]  ;;  %v5144_v33 = vand.u32 4294901760, %v12131_v2  ;;  %v12148_v21 = vld [vmem:[%s13960_s15] sm:$0xff] }
 0xbc4   : > { %v4694_v48 = vrot.slane %v4680_v50, %v12047_v38  ;;  %v4779_v11 = vrot.slane %v4664_v17, %v12047_v38  ;;  %4771 = vst.msk [vmem:[#allocation4 + $0x1] sm:$0x1] %vm12050_vm8, %v4664_v17  ;;  %v4809_v45 = vcombine.high %v4664_v17, %v4664_v17  ;;  %v4702_v19 = vcombine.high %v4687_v4, %v4687_v4  ;;  %v12153_v3 = vld [vmem:[%s13960_s15 + $0x8] sm:$0xff] }
 0xbc5   : > { %v4626_v39 = vmul.f32 %v4621_v0, %v4598_v55  ;;  %vm4657_vm10 = vcmp.ge.f32.partialorder %v4653_v51, 0.0  ;;  %v4661_v37 = vmul.f32 0.2, %v4653_v51  ;;  %v4740_v5 = vcombine.high %v4725_v58, %v4725_v58 }
 0xbc6   : > { %4695 = vrot.lane.b32.xlu1 %v4694_v48, %s9768_s22  ;;  %v4780_v32 = vcombine.high %v4779_v11, %v4779_v11  ;;  %v4816_v29 = vrot.slane %v4809_v45, %v12047_v38  ;;  %v4787_v13 = vrot.slane %v4779_v11, %v12047_v38  ;;  %v12074_v41 = vrot.slane %v4725_v58, %v12047_v38  ;;  %v12193_v45 = vld [vmem:[%s13960_s15 + $0x90] sm:$0xff] }
 0xbc7   : > { %v4654_v1 = vadd.f32 %v4649_v7, %v4626_v39  ;;  %v4665_v30 = vsel %vm4657_vm10, %v4653_v51, %v4661_v37  ;;  %v12079_v47 = vrot.slane %v4740_v5, %v12047_v38  ;;  %v4710_v9 = vcombine.high %v4694_v48, %v4694_v48  ;;  %v12198_v7 = vld [vmem:[%s13960_s15 + $0x98] sm:$0xff] }
 0xbc8   : > { %v4858_v36 = vrot.slane %v4665_v30, %v12047_v38  ;;  %v4794_v12 = vrot.slane %v4780_v32, %v12047_v38  ;;  %4850 = vst.msk [vmem:[#allocation4 + $0x2] sm:$0x1] %vm12050_vm8, %v4665_v30  ;;  %v4888_v8 = vcombine.high %v4665_v30, %v4665_v30  ;;  %v4828_v6 = vcombine.high %v4816_v29, %v4816_v29 }
 0xbc9   : > { %vm4658_vm11 = vcmp.ge.f32.partialorder %v4654_v1, 0.0  ;;  %v4662_v31 = vmul.f32 0.2, %v4654_v1  ;;  %v4799_v23 = vcombine.high %v4787_v13, %v4787_v13  ;;  %v12086_v20 = vrot.slane %v4816_v29, %v12047_v38 }
 0xbca   : > { %4703 = vrot.lane.b32.xlu1 %v4702_v19, %s9767_s20  ;;  %4795 = vrot.lane.b32.xlu0 %v4794_v12, %s9768_s22  ;;  %v4859_v59 = vcombine.high %v4858_v36, %v4858_v36  ;;  %v4895_v40 = vrot.slane %v4888_v8, %v12047_v38  ;;  %v12089_v28 = vrot.slane %v4858_v36, %v12047_v38  ;;  %v5147_v61 = vand.u32 4294901760, %v12136_v63  ;;  %v12207_v36 = vld [vmem:[%s13960_s15 + $0x10] sm:$0xff]  ;;  %v12212_v19 = vld [vmem:[%s13960_s15 + $0x18] sm:$0xff] }
 0xbcb   : > { %v4666_v0 = vsel %vm4658_vm11, %v4654_v1, %v4662_v31  ;;  %v12092_v16 = vrot.slane %v4828_v6, %v12047_v38  ;;  %v4755_v52 = vcombine.high %v12074_v41, %v12074_v41  ;;  %v4804_v60 = vcombine.high %v4794_v12, %v4794_v12 }
 0xbcc   : > { %v4937_v24 = vrot.slane %v4666_v0, %v12047_v38  ;;  %v4967_v62 = vcombine.high %v4666_v0, %v4666_v0  ;;  %4929 = vst.msk [vmem:[#allocation4 + $0x3] sm:$0x1] %vm12050_vm8, %v4666_v0  ;;  %v12095_v49 = vrot.slane %v4859_v59, %v12047_v38  ;;  %v4907_v35 = vcombine.high %v4895_v40, %v4895_v40 }
 0xbcd   : > { %v4763_v54 = vcombine.high %v12079_v47, %v12079_v47  ;;  %v12109_v43 = vrot.slane %v4895_v40, %v12047_v38  ;;  %v4840_v10 = vcombine.high %v12086_v20, %v12086_v20  ;;  %v4845_v15 = vcombine.high %v12092_v16, %v12092_v16 }
 0xbce   : > { %4733 = vrot.lane.b32.xlu1 %v12074_v41, %s9762_s29  ;;  %4800 = vrot.lane.b32.xlu0 %v4799_v23, %s9767_s20  ;;  %v4938_v22 = vcombine.high %v4937_v24, %v4937_v24  ;;  %v4974_v27 = vrot.slane %v4967_v62, %v12047_v38  ;;  %v12101_v56 = vrot.slane %v4937_v24, %v12047_v38  ;;  %v5096_v55 = vand.u32 4294901760, %v12148_v21  ;;  %v12251_v23 = vld [vmem:[%s13960_s15 + $0xa0] sm:$0xff] }
 0xbcf   : > { %v4878_v26 = vcombine.high %v12089_v28, %v12089_v28  ;;  %v12126_v44 = vrot.slane %v4907_v35, %v12047_v38  ;;  %v5099_v51 = vand.u32 4294901760, %v12153_v3  ;;  %v12169_v48 = vsub.f32 %v12131_v2, %v5144_v33 }
 0xbd0   : > { %v12106_v14 = vrot.slane %v4938_v22, %v12047_v38  ;;  %v12117_v34 = vrot.slane %v4974_v27, %v12047_v38  ;;  %v4986_v18 = vcombine.high %v4974_v27, %v4974_v27  ;;  %v4957_v42 = vcombine.high %v12101_v56, %v12101_v56  ;;  %v12262_v27 = vld [vmem:[%s13960_s15 + $0xa8] sm:$0xff] }
 0xbd1   : > { %v12174_v4 = vsub.f32 %v12136_v63, %v5147_v61  ;;  %v12183_v39 = vsub.f32 %v12148_v21, %v5096_v55  ;;  %v12188_v37 = vsub.f32 %v12153_v3, %v5099_v51  ;;  %v14086_v32 = vand.u32 4294901760, %v12169_v48  ;;  %v12408_v3 = vld [vmem:[%s13960_s15 + $0xc8] sm:$0xff] }
 0xbd2   : > { %4711 = vrot.lane.b32.xlu1 %v4710_v9, %s14381_s2  ;;  %4824 = vrot.lane.b32.xlu0 %v12086_v20, %s9762_s29  ;;  %v12141_v46 = vrot.slane %v4986_v18, %v12047_v38  ;;  %v5150_v30 = vand.u32 4294901760, %v12193_v45  ;;  %v5153_v29 = vand.u32 4294901760, %v12198_v7  ;;  %v5102_v31 = vand.u32 4294901760, %v12207_v36 }
 0xbd3   : > { %v14081_v1 = vand.u32 4294901760, %v12174_v4  ;;  %v14080_v12 = vand.u32 4294901760, %v12183_v39  ;;  %v14079_v13 = vand.u32 4294901760, %v12188_v37  ;;  %v5105_v8 = vand.u32 4294901760, %v12212_v19 }
 0xbd4   : > { %v5323_v5 = vsub.f32 %v12169_v48, %v14086_v32  ;;  %v12230_v6 = vsub.f32 %v12193_v45, %v5150_v30  ;;  %v12241_v62 = vsub.f32 %v12198_v7, %v5153_v29  ;;  %v12246_v41 = vsub.f32 %v12207_v36, %v5102_v31 }
 0xbd5   : > { %v5330_v0 = vsub.f32 %v12174_v4, %v14081_v1  ;;  %v5211_v59 = vsub.f32 %v12183_v39, %v14080_v12  ;;  %v5218_v24 = vsub.f32 %v12188_v37, %v14079_v13  ;;  %v12257_v35 = vsub.f32 %v12212_v19, %v5105_v8  ;;  %v12284_v12 = vld [vmem:[%s13960_s15 + $0x28] sm:$0xff] }
 0xbd6   : > { %4748 = vrot.lane.b32.xlu1 %v12079_v47, %s14382_s26  ;;  %4805 = vrot.lane.b32.xlu0 %v4804_v60, %s14381_s2  ;;  %v5324_v40 = vand.u32 4294901760, %v5323_v5  ;;  %v14084_v22 = vand.u32 4294901760, %v12230_v6  ;;  %v14083_v60 = vand.u32 4294901760, %v12241_v62  ;;  %v14082_v18 = vand.u32 4294901760, %v12246_v41  ;;  %v12269_v5 = vld [vmem:[%s13960_s15 + $0x20] sm:$0xff]  ;;  %v12457_v19 = vld [vmem:[%s13960_s15 + $0x48] sm:$0xff] }
 0xbd7   : > { %v5331_v20 = vand.u32 4294901760, %v5330_v0  ;;  %v5212_v9 = vand.u32 4294901760, %v5211_v59  ;;  %v5156_v13 = vand.u32 4294901760, %v12251_v23  ;;  %v12439_v45 = vpack.c.bf16 %v5105_v8, %v5102_v31 }
 0xbd8   : > { %v5337_v59 = vsub.f32 %v12230_v6, %v14084_v22  ;;  %v5344_v47 = vsub.f32 %v12241_v62, %v14083_v60  ;;  %v12310_v60 = vld [vmem:[%s13960_s15 + $0xb8] sm:$0xff] }
 0xbd9   : > { %v9224_v0 = vpack.c.bf16 %v5331_v20, %v5324_v40  ;;  %v12296_v40 = vld [vmem:[%s13960_s15 + $0xb0] sm:$0xff]  ;;  %v14091_v58 = vand.u32 4294901760, %v12310_v60 }
 0xbda   : > { %4756 = vrot.lane.b32.xlu1 %v4755_v52, %s14383_s23  ;;  %4836 = vrot.lane.b32.xlu0 %v12092_v16, %s14382_s26  ;;  %v5219_v52 = vand.u32 4294901760, %v5218_v24  ;;  %v14085_v24 = vand.u32 4294901760, %v12257_v35  ;;  %v5338_v20 = vand.u32 4294901760, %v5337_v59  ;;  %v5345_v22 = vand.u32 4294901760, %v5344_v47 }
 0xbdb   : > { %9225 = vmatprep.subr.bf16.mxu1 %v9224_v0 }
 0xbdc   : > { %v9226_v1 = vpack.c.bf16 %v5219_v52, %v5212_v9  ;;  %v5232_v9 = vsub.f32 %v12257_v35, %v14085_v24  ;;  %v12304_v52 = vsub.f32 %v12251_v23, %v5156_v13  ;;  %v5111_v24 = vand.u32 4294901760, %v12284_v12 }
 0xbdd   : > { %v9228_v16 = vpack.c.bf16 %v5345_v22, %v5338_v20  ;;  %v14388_v23 = vcombine.high %v12095_v49, %v12095_v49 }
 0xbde   : > { %4764 = vrot.lane.b32.xlu1 %v4763_v54, %s14384_s3  ;;  %4841 = vrot.lane.b32.xlu0 %v4840_v10, %s14383_s23  ;;  %v5225_v54 = vsub.f32 %v12246_v41, %v14082_v18  ;;  %v5159_v10 = vand.u32 4294901760, %v12262_v27  ;;  %v5108_v18 = vand.u32 4294901760, %v12269_v5  ;;  %v5233_v32 = vand.u32 4294901760, %v5232_v9 }
 0xbdf   : > { %9227 = vmatpush3.bf16.msra.mxu1 %v9226_v1  ;;  %v14089_v1 = vand.u32 4294901760, %v12304_v52  ;;  %v12340_v9 = vsub.f32 %v12284_v12, %v5111_v24 }
 0xbe0   : > { %v5226_v0 = vand.u32 4294901760, %v5225_v54  ;;  %v12315_v59 = vsub.f32 %v12262_v27, %v5159_v10  ;;  %v12328_v47 = vsub.f32 %v12269_v5, %v5108_v18  ;;  %v14092_v54 = vand.u32 4294901760, %v12296_v40  ;;  %9229 = vmatprep.subr.bf16.mxu1 %v9228_v16  ;;  %v12370_v16 = vld [vmem:[%s13960_s15 + $0xc0] sm:$0xff] }
 0xbe1   : > { %v5351_v17 = vsub.f32 %v12304_v52, %v14089_v1  ;;  %v14099_v38 = vand.u32 4294901760, %v12340_v9  ;;  %v5114_v1 = vand.u32 4294901760, %v12334_v57  ;;  %v5123_v5 = vand.u32 4294901760, %v12457_v19 }
 0xbe2   : > { %4846 = vrot.lane.b32.xlu0 %v4845_v15, %s14384_s3  ;;  %4874 = vrot.lane.b32.xlu1 %v12095_v49, %s9768_s22  ;;  %v14090_v15 = vand.u32 4294901760, %v12315_v59  ;;  %v9230_v11 = vpack.c.bf16 %v5233_v32, %v5226_v0  ;;  %v14104_v50 = vand.u32 4294901760, %v12328_v47  ;;  %v12350_v22 = vsub.f32 %v12296_v40, %v14092_v54  ;;  %v12364_v0 = vld [vmem:[%s13960_s15 + $0x38] sm:$0xff] }
 0xbe3   : > { %v12359_v32 = vsub.f32 %v12310_v60, %v14091_v58  ;;  %v5352_v58 = vand.u32 4294901760, %v5351_v17  ;;  %v12388_v54 = vpack.c.bf16 %v5099_v51, %v5096_v55  ;;  %v12403_v21 = vsub.f32 %v12334_v57, %v5114_v1  ;;  %v12577_v57 = vld [vmem:[%s13960_s15 + $0xe0] sm:$0xff] }
 0xbe4   : > { %v5358_v20 = vsub.f32 %v12315_v59, %v14090_v15  ;;  %v12382_v15 = vpack.c.bf16 %v5147_v61, %v5144_v33  ;;  %v5239_v53 = vsub.f32 %v12328_v47, %v14104_v50  ;;  %9231 = vmatpush3.bf16.msra.mxu1 %v9230_v11  ;;  %v14097_v2 = vand.u32 4294901760, %v12350_v22 }
 0xbe5   : > { %v14096_v63 = vand.u32 4294901760, %v12359_v32  ;;  %v5117_v61 = vand.u32 4294901760, %v12364_v0  ;;  %14385 = vst [vmem:[#allocation28_spill] sm:$0xff] %v12403_v21  ;;  %v5168_v55 = vand.u32 4294901760, %v12370_v16  ;;  %v14095_v7 = vand.u32 4294901760, %v12403_v21 }
 0xbe6   : > { %4953 = vrot.lane.b32.xlu0 %v12106_v14, %s9768_s22  ;;  %4879 = vrot.lane.b32.xlu1 %v4878_v26, %s9767_s20  ;;  %v5359_v28 = vand.u32 4294901760, %v5358_v20  ;;  %v5246_v26 = vsub.f32 %v12340_v9, %v14099_v38  ;;  %v5240_v33 = vand.u32 4294901760, %v5239_v53  ;;  %v12416_v53 = vpack.c.bf16 %v5153_v29, %v5150_v30  ;;  %v12424_v20 = vld [vmem:[%s13960_s15 + $0x40] sm:$0xff] }
 0xbe7   : > { %9193 = vmatprep.subr.bf16.mxu0 %v12382_v15  ;;  %v5365_v11 = vsub.f32 %v12350_v22, %v14097_v2  ;;  %v12445_v56 = vsub.f32 %v12364_v0, %v5117_v61  ;;  %v5171_v29 = vand.u32 4294901760, %v12408_v3  ;;  %v12452_v36 = vsub.f32 %v12370_v16, %v5168_v55 }
 0xbe8   : > { %v9232_v51 = vpack.c.bf16 %v5359_v28, %v5352_v58  ;;  %9195 = vmatpush3.bf16.msra.mxu0 %v12388_v54  ;;  %v5247_v17 = vand.u32 4294901760, %v5246_v26  ;;  %v5372_v58 = vsub.f32 %v12359_v32, %v14096_v63  ;;  %v5253_v8 = vsub.f32 %v12403_v21, %v14095_v7 }
 0xbe9   : > { %14386 = vst [vmem:[#allocation29_spill] sm:$0xff] %v12445_v56  ;;  %9197 = vmatprep.subr.bf16.mxu0 %v12416_v53  ;;  %v5366_v30 = vand.u32 4294901760, %v5365_v11  ;;  %v14094_v28 = vand.u32 4294901760, %v12445_v56  ;;  %v5120_v26 = vand.u32 4294901760, %v12424_v20  ;;  %v12478_v11 = vsub.f32 %v12408_v3, %v5171_v29 }
 0xbea   : > { %4958 = vrot.lane.b32.xlu0 %v4957_v42, %s9767_s20  ;;  %4903 = vrot.lane.b32.xlu1 %v12109_v43, %s9762_s29  ;;  %v9234_v42 = vpack.c.bf16 %v5247_v17, %v5240_v33  ;;  %v5373_v31 = vand.u32 4294901760, %v5372_v58  ;;  %v12467_v33 = vld [vmem:[%s13960_s15 + $0xd0] sm:$0xff]  ;;  %v14093_v17 = vand.u32 4294901760, %v12452_v36  ;;  %v12484_v58 = vpack.c.bf16 %v5111_v24, %v5108_v18 }
 0xbeb   : > { %9233 = vmatprep.subr.bf16.mxu1 %v9232_v51  ;;  %v12474_v51 = vpack.c.bf16 %v5159_v10, %v5156_v13  ;;  %14387 = vst [vmem:[#allocation30_spill] sm:$0xff] %v12478_v11  ;;  %v12494_v13 = vld [vmem:[%s13960_s15 + $0x50] sm:$0xff]  ;;  %v5254_v27 = vand.u32 4294901760, %v5253_v8  ;;  %v5260_v18 = vsub.f32 %v12445_v56, %v14094_v28  ;;  %v14098_v10 = vand.u32 4294901760, %v12478_v11 }
 0xbec   : > { %9235 = vmatpush3.bf16.msra.mxu1 %v9234_v42  ;;  %9199 = vmatpush3.bf16.msra.mxu0 %v12439_v45  ;;  %v12489_v42 = vld [vmem:[%s13960_s15 + $0xd8] sm:$0xff]  ;;  %v9236_v12 = vpack.c.bf16 %v5373_v31, %v5366_v30  ;;  %v5379_v24 = vsub.f32 %v12452_v36, %v14093_v17  ;;  %v12514_v49 = vsub.f32 %v12424_v20, %v5120_v26  ;;  %v5174_v3 = vand.u32 4294901760, %v12467_v33 }
 0xbed   : > { %9201 = vmatprep.subr.bf16.mxu0 %v12474_v51  ;;  %v5261_v30 = vand.u32 4294901760, %v5260_v18  ;;  %v12518_v31 = vsub.f32 %v12457_v19, %v5123_v5  ;;  %v5177_v8 = vand.u32 4294901760, %v12489_v42  ;;  %v14105_v17 = vand.u32 4294901760, %v12494_v13 }
 0xbee   : > { %4982 = vrot.lane.b32.xlu0 %v12117_v34, %s9762_s29  ;;  %4884 = vrot.lane.b32.xlu1 %v14388_v23, %s14381_s2  ;;  %v12524_v23 = vld [vmem:[%s13960_s15 + $0x58] sm:$0xff]  ;;  %v5380_v28 = vand.u32 4294901760, %v5379_v24  ;;  %v5386_v7 = vsub.f32 %v12478_v11, %v14098_v10  ;;  %v14389_v19 = vand.u32 4294901760, %v12296_v40  ;;  %v14390_v18 = vand.u32 4294901760, %v12310_v60 }
 0xbef   : > { %9237 = vmatprep.subr.bf16.mxu1 %v9236_v12  ;;  %v14101_v12 = vand.u32 4294901760, %v12514_v49  ;;  %v14391_v2 = vcombine.high %v12106_v14, %v12106_v14  ;;  %v9238_v24 = vpack.c.bf16 %v5261_v30, %v5254_v27  ;;  %v14100_v10 = vand.u32 4294901760, %v12518_v31 }
 0xbf0   : > { %9203 = vmatpush3.bf16.msra.mxu0 %v12484_v58  ;;  %v12536_v63 = vpack.c.bf16 %v14390_v18, %v14389_v19  ;;  %v12548_v38 = vsub.f32 %v12467_v33, %v5174_v3  ;;  %v12551_v60 = vsub.f32 %v12489_v42, %v5177_v8  ;;  %v5387_v40 = vand.u32 4294901760, %v5386_v7 }
 0xbf1   : > { %v5267_v14 = vsub.f32 %v12514_v49, %v14101_v12  ;;  %v5129_v27 = vand.u32 4294901760, %v12524_v23  ;;  %9239 = vmatpush3.bf16.msra.mxu1 %v9238_v24  ;;  %v5274_v42 = vsub.f32 %v12518_v31, %v14100_v10  ;;  %v12572_v19 = vsub.f32 %v12494_v13, %v14105_v17 }
 0xbf2   : > { %4963 = vrot.lane.b32.xlu0 %v14391_v2, %s14381_s2  ;;  %4915 = vrot.lane.b32.xlu1 %v12126_v44, %s14382_s26  ;;  %v12561_v2 = vpack.c.bf16 %v5117_v61, %v5114_v1  ;;  %v14103_v7 = vand.u32 4294901760, %v12548_v38  ;;  %v14102_v30 = vand.u32 4294901760, %v12551_v60  ;;  %v12582_v1 = vld [vmem:[%s13960_s15 + $0xe8] sm:$0xff]  ;;  %v9240_v0 = vpack.c.bf16 %v5387_v40, %v5380_v28  ;;  %s598_s2 = scalar_lea.vmem %s13964_s19, %s14670_s30 }
 0xbf3   : > { %9205 = vmatprep.subr.bf16.mxu0 %v12536_v63  ;;  %v5268_v61 = vand.u32 4294901760, %v5267_v14  ;;  %v12586_v18 = vsub.f32 %v12524_v23, %v5129_v27  ;;  %v12590_v24 = vpack.c.bf16 %v5171_v29, %v5168_v55  ;;  %v14393_v10 = vcombine.high %v12109_v43, %v12109_v43  ;;  %v12608_v55 = vld [vmem:[%s13960_s15 + $0x60] sm:$0xff]  ;;  %v5022_v14 = vld [vmem:[%s13960_s15 + $0x68] sm:$0xff] }
 0xbf4   : > { %9207 = vmatpush3.bf16.msra.mxu0 %v12561_v2  ;;  %v5275_v12 = vand.u32 4294901760, %v5274_v42  ;;  %v5393_v28 = vsub.f32 %v12548_v38, %v14103_v7  ;;  %v5400_v23 = vsub.f32 %v12551_v60, %v14102_v30  ;;  %v14107_v16 = vand.u32 4294901760, %v12572_v19  ;;  %9241 = vmatprep.subr.bf16.mxu1 %v9240_v0 }
 0xbf5   : > { %14392 = vst [vmem:[#allocation31_spill] sm:$0xff] %v12590_v24  ;;  %v14106_v43 = vand.u32 4294901760, %v12586_v18  ;;  %9209 = vmatprep.subr.bf16.mxu0 %v12590_v24  ;;  %v5180_v29 = vand.u32 4294901760, %v12577_v57  ;;  %v12616_v40 = vpack.c.bf16 %v5123_v5, %v5120_v26  ;;  %v5132_v26 = vand.u32 4294901760, %v12608_v55  ;;  %v5039_v5 = vld [vmem:[%s13960_s15 + $0xf0] sm:$0xff] }
 0xbf6   : > { %4994 = vrot.lane.b32.xlu0 %v12141_v46, %s14382_s26  ;;  %4920 = vrot.lane.b32.xlu1 %v14393_v10, %s14383_s23  ;;  %v5183_v10 = vand.u32 4294901760, %v12582_v1  ;;  %v9242_v42 = vpack.c.bf16 %v5275_v12, %v5268_v61  ;;  %v5394_v30 = vand.u32 4294901760, %v5393_v28  ;;  %v5401_v7 = vand.u32 4294901760, %v5400_v23  ;;  %v5040_v12 = vld [vmem:[%s13960_s15 + $0xf8] sm:$0xff] }
 0xbf7   : > { %14394 = vst [vmem:[#allocation32_spill] sm:$0xff] %v12616_v40  ;;  %v5281_v0 = vsub.f32 %v12572_v19, %v14107_v16  ;;  %v5288_v50 = vsub.f32 %v12586_v18, %v14106_v43  ;;  %v12628_v17 = vsub.f32 %v12577_v57, %v5180_v29  ;;  %v14395_v57 = vcombine.high %v12117_v34, %v12117_v34 }
 0xbf8   : > { %v12631_v20 = vsub.f32 %v12582_v1, %v5183_v10  ;;  %9211 = vmatpush3.bf16.msra.mxu0 %v12616_v40  ;;  %v14396_v1 = vcombine.high %v12126_v44, %v12126_v44  ;;  %v9244_v61 = vpack.c.bf16 %v5401_v7, %v5394_v30  ;;  %v5135_v23 = vand.u32 4294901760, %v5022_v14  ;;  %9243 = vmatpush3.bf16.msra.mxu1 %v9242_v42  ;;  %v5023_v44 = vld [vmem:[%s13960_s15 + $0x70] sm:$0xff]  ;;  %v5024_v30 = vld [vmem:[%s13960_s15 + $0x78] sm:$0xff] }
 0xbf9   : > { %v5282_v28 = vand.u32 4294901760, %v5281_v0  ;;  %v12651_v43 = vpack.c.bf16 %v5177_v8, %v5174_v3  ;;  %v5289_v16 = vand.u32 4294901760, %v5288_v50  ;;  %v14113_v40 = vand.u32 4294901760, %v12628_v17 }
 0xbfa   : > { %4999 = vrot.lane.b32.xlu0 %v14395_v57, %s14383_s23  ;;  %4925 = vrot.lane.b32.xlu1 %v14396_v1, %s14384_s3  ;;  %v14112_v24 = vand.u32 4294901760, %v12631_v20  ;;  %v12656_v34 = vsub.f32 %v12608_v55, %v5132_v26  ;;  %v12661_v7 = vsub.f32 %v5022_v14, %v5135_v23  ;;  %v5186_v33 = vand.u32 4294901760, %v5039_v5 }
 0xbfb   : > { %14397 = vst [vmem:[#allocation33_spill] sm:$0xff] %v12651_v43  ;;  %9245 = vmatprep.subr.bf16.mxu1 %v9244_v61  ;;  %9213 = vmatprep.subr.bf16.mxu0 %v12651_v43  ;;  %v5189_v3 = vand.u32 4294901760, %v5040_v12  ;;  %v14398_v50 = vand.u32 4294901760, %v12494_v13  ;;  %v9246_v55 = vpack.c.bf16 %v5289_v16, %v5282_v28  ;;  %v5407_v42 = vsub.f32 %v12628_v17, %v14113_v40 }
 0xbfc   : > { %v5414_v14 = vsub.f32 %v12631_v20, %v14112_v24  ;;  %v14116_v0 = vand.u32 4294901760, %v12656_v34  ;;  %v14400_v13 = vcombine.high %v12141_v46, %v12141_v46  ;;  %v12683_v57 = vsub.f32 %v5039_v5, %v5186_v33 }
 0xbfd   : > { %v12666_v8 = vpack.c.bf16 %v5129_v27, %v14398_v50  ;;  %v14117_v27 = vand.u32 4294901760, %v12661_v7  ;;  %v12685_v16 = vsub.f32 %v5040_v12, %v5189_v3  ;;  %v5138_v1 = vand.u32 4294901760, %v5023_v44  ;;  %9247 = vmatpush3.bf16.msra.mxu1 %v9246_v55 }
 0xbfe   : > { %5004 = vrot.lane.b32.xlu0 %v14400_v13, %s14384_s3  ;;  %v5408_v61 = vand.u32 4294901760, %v5407_v42  ;;  %v5415_v28 = vand.u32 4294901760, %v5414_v14  ;;  %v5295_v50 = vsub.f32 %v12656_v34, %v14116_v0  ;;  %v5141_v24 = vand.u32 4294901760, %v5024_v30 }
 0xbff   : > { %14399 = vst [vmem:[#allocation34_spill] sm:$0xff] %v12666_v8  ;;  %9215 = vmatpush3.bf16.msra.mxu0 %v12666_v8  ;;  %v5302_v46 = vsub.f32 %v12661_v7, %v14117_v27  ;;  %v14121_v5 = vand.u32 4294901760, %v12683_v57  ;;  %v14120_v12 = vand.u32 4294901760, %v12685_v16  ;;  %v12696_v13 = vsub.f32 %v5023_v44, %v5138_v1 }
 0xc00   : > { %v9248_v40 = vpack.c.bf16 %v5415_v28, %v5408_v61  ;;  %v5296_v8 = vand.u32 4294901760, %v5295_v50  ;;  %v12698_v55 = vsub.f32 %v5024_v30, %v5141_v24  ;;  %v12700_v42 = vpack.c.bf16 %v5183_v10, %v5180_v29 }
 0xc01   : > { %v5303_v14 = vand.u32 4294901760, %v5302_v46  ;;  %v5421_v0 = vsub.f32 %v12683_v57, %v14121_v5  ;;  %v5428_v27 = vsub.f32 %v12685_v16, %v14120_v12  ;;  %v5308_v43 = vand.u32 4294901760, %v12696_v13 }
 0xc02   : > { %9249 = vmatprep.subr.bf16.mxu1 %v9248_v40  ;;  %v5315_v44 = vand.u32 4294901760, %v12698_v55  ;;  %9217 = vmatprep.subr.bf16.mxu0 %v12700_v42  ;;  %v12711_v30 = vpack.c.bf16 %v5135_v23, %v5132_v26  ;;  %v12716_v46 = vpack.c.bf16 %v5189_v3, %v5186_v33  ;;  %v12718_v12 = vpack.c.bf16 %v5141_v24, %v5138_v1 }
 0xc03   : > { %v9250_v29 = vpack.c.bf16 %v5303_v14, %v5296_v8  ;;  %v5422_v10 = vand.u32 4294901760, %v5421_v0  ;;  %v5429_v61 = vand.u32 4294901760, %v5428_v27  ;;  %v5309_v28 = vsub.f32 %v12696_v13, %v5308_v43 }
 0xc04   : > { %14401 = vst [vmem:[#allocation35_spill] sm:$0xff] %v12711_v30  ;;  %v5316_v50 = vsub.f32 %v12698_v55, %v5315_v44  ;;  %9219 = vmatpush3.bf16.msra.mxu0 %v12711_v30  ;;  %14402 = vst [vmem:[#allocation36_spill] sm:$0xff] %v12716_v46  ;;  %v9256_v26 = vpack.c.bf16 %v12174_v4, %v12169_v48  ;;  %v14412_v14 = vand.u32 4294901760, %v12661_v7 }
 0xc05   : > { %9251 = vmatpush3.bf16.msra.mxu1 %v9250_v29  ;;  %v9252_v40 = vpack.c.bf16 %v5429_v61, %v5422_v10  ;;  %v5310_v5 = vand.u32 4294901760, %v5309_v28  ;;  %9221 = vmatprep.subr.bf16.mxu0 %v12716_v46  ;;  %v14408_v61 = vand.u32 4294901760, %v12628_v17  ;;  %v14409_v10 = vand.u32 4294901760, %v12631_v20 }
 0xc06   : > { %v5317_v8 = vand.u32 4294901760, %v5316_v50 }
 0xc07   : > { %9253 = vmatprep.subr.bf16.mxu1 %v9252_v40  ;;  %v12773_v29 = vpack.c.bf16 %v14409_v10, %v14408_v61  ;;  %v14414_v10 = vand.u32 4294901760, %v12683_v57  ;;  %v14415_v61 = vand.u32 4294901760, %v12685_v16 }
 0xc08   : > { %v9254_v33 = vpack.c.bf16 %v5317_v8, %v5310_v5  ;;  %9223 = vmatpush3.bf16.msra.mxu0 %v12718_v12  ;;  %v14403_v8 = vlaneseq }
 0xc09   : > { %9257 = vmatprep.subr.bf16.mxu0 %v9256_v26  ;;  %14410 = vst [vmem:[#allocation37_spill] sm:$0xff] %v12773_v29 }
 0xc0a   : > { %9255 = vmatpush3.bf16.msra.mxu1 %v9254_v33  ;;  %vm4698_vm12 = vcmp.ge.s32.totalorder %v14403_v8, 16  ;;  %vm4699_vm13 = vcmp.lt.s32.totalorder %v14403_v8, 32  ;;  %vm4706_vm15 = vcmp.ge.s32.totalorder %v14403_v8, 32  ;;  %vm4707_vm0 = vcmp.lt.s32.totalorder %v14403_v8, 48 }
 0xc0b   : > { %9289 = vmatprep.subr.bf16.mxu1 %v12382_v15  ;;  %vm12757_vm14 = vmand %vm4698_vm12, %vm4699_vm13  ;;  %vm4714_vm2 = vcmp.ge.s32.totalorder %v14403_v8, 48  ;;  %vm4715_vm4 = vcmp.lt.s32.totalorder %v14403_v8, 64  ;;  %vm4736_vm5 = vcmp.ge.s32.totalorder %v14403_v8, 64  ;;  %vm4737_vm6 = vcmp.lt.s32.totalorder %v14403_v8, 80 }
 0xc0c   : > { %vm12765_vm1 = vmand %vm4706_vm15, %vm4707_vm0  ;;  %vm4751_vm9 = vcmp.ge.s32.totalorder %v14403_v8, 80  ;;  %vm4752_vm10 = vcmp.lt.s32.totalorder %v14403_v8, 96  ;;  %vm4759_vm12 = vcmp.ge.s32.totalorder %v14403_v8, 96  ;;  %vm4760_vm13 = vcmp.lt.s32.totalorder %v14403_v8, 112 }
 0xc0d   : > { %vm12799_vm7 = vmand %vm4714_vm2, %vm4715_vm4  ;;  %vm4767_vm0 = vcmp.ge.s32.totalorder %v14403_v8, 112  ;;  %vm4768_vm2 = vcmp.lt.s32.totalorder %v14403_v8, 128 }
 0xc0e   : > { %vm12803_vm8 = vmand %vm4736_vm5, %vm4737_vm6 }
 0xc0f   : > { %vm12813_vm11 = vmand %vm4751_vm9, %vm4752_vm10 }
 0xc10   : > { %vm12825_vm15 = vmand %vm4759_vm12, %vm4760_vm13 }
 0xc11   : > { %vm12835_vm4 = vmand %vm4767_vm0, %vm4768_vm2 }
 0xc38   : > { %v4696_v28 = vpop.permute.xlu1 %4695 }
 0xc39   : > { %4701 = vst.msk [vmem:[#allocation4] sm:$0x1] %vm12757_vm14, %v4696_v28  ;;  %v14411_v28 = vand.u32 4294901760, %v12656_v34 }
 0xc3b   : > { %v12785_v5 = vpack.c.bf16 %v14412_v14, %v14411_v28  ;;  %v5081_v28 = vsub.s32 1, %v12044_v25 }
 0xc3c   : > { %v4796_v26 = vpop.permute.xlu0 %4795  ;;  %v4704_v50 = vpop.permute.xlu1 %4703 }
 0xc3d   : > { %4798 = vst.msk [vmem:[#allocation4 + $0x1] sm:$0x1] %vm12757_vm14, %v4796_v26  ;;  %14413 = vst [vmem:[#allocation38_spill] sm:$0xff] %v12785_v5  ;;  %v12797_v26 = vpack.c.bf16 %v5315_v44, %v5308_v43  ;;  %v5077_v43 = vsub.s32 0, %v12044_v25 }
 0xc3e   : > { %4709 = vst.msk [vmem:[#allocation4] sm:$0x1] %vm12765_vm1, %v4704_v50  ;;  %v12793_v50 = vpack.c.bf16 %v14415_v61, %v14414_v10 }
 0xc3f   : > { %14417 = vst [vmem:[#allocation40_spill] sm:$0xff] %v12797_v26  ;;  %v12953_v26 = vld [vmem:[%s13960_s15 + $0x168] sm:$0xff] }
 0xc40   : > { %v4801_v1 = vpop.permute.xlu0 %4800  ;;  %v4734_v27 = vpop.permute.xlu1 %4733  ;;  %14416 = vst [vmem:[#allocation39_spill] sm:$0xff] %v12793_v50  ;;  %14444 = vst [vmem:[#allocation18_spill] sm:$0xff] %v12953_v26  ;;  %v12963_v50 = vld [vmem:[%s13960_s15 + $0x1f8] sm:$0xff] }
 0xc41   : > { %4803 = vst.msk [vmem:[#allocation4 + $0x1] sm:$0x1] %vm12765_vm1, %v4801_v1  ;;  %14446 = vst [vmem:[#allocation12_spill] sm:$0xff] %v12963_v50 }
 0xc44   : > { %v4825_v3 = vpop.permute.xlu0 %4824  ;;  %v4712_v10 = vpop.permute.xlu1 %4711 }
 0xc45   : > { %4717 = vst.msk [vmem:[#allocation4] sm:$0x1] %vm12799_vm7, %v4712_v10 }
 0xc46   : > { %4739 = vst.msk [vmem:[#allocation4] sm:$0x1] %vm12803_vm8, %v4734_v27 }
 0xc48   : > { %v4806_v44 = vpop.permute.xlu0 %4805  ;;  %v4749_v1 = vpop.permute.xlu1 %4748 }
 0xc49   : > { %4808 = vst.msk [vmem:[#allocation4 + $0x1] sm:$0x1] %vm12799_vm7, %v4806_v44 }
 0xc4a   : > { %4754 = vst.msk [vmem:[#allocation4] sm:$0x1] %vm12813_vm11, %v4749_v1 }
 0xc4b   : > { %4827 = vst.msk [vmem:[#allocation4 + $0x1] sm:$0x1] %vm12803_vm8, %v4825_v3 }
 0xc4c   : > { %v4837_v61 = vpop.permute.xlu0 %4836  ;;  %v4757_v10 = vpop.permute.xlu1 %4756 }
 0xc4d   : > { %4839 = vst.msk [vmem:[#allocation4 + $0x1] sm:$0x1] %vm12813_vm11, %v4837_v61 }
 0xc4e   : > { %4762 = vst.msk [vmem:[#allocation4] sm:$0x1] %vm12825_vm15, %v4757_v10 }
 0xc50   : > { %v4842_v3 = vpop.permute.xlu0 %4841  ;;  %v4765_v1 = vpop.permute.xlu1 %4764 }
 0xc51   : > { %4844 = vst.msk [vmem:[#allocation4 + $0x1] sm:$0x1] %vm12825_vm15, %v4842_v3 }
 0xc52   : > { %4770 = vst.msk [vmem:[#allocation4] sm:$0x1] %vm12835_vm4, %v4765_v1 }
 0xc54   : > { %v4847_v8 = vpop.permute.xlu0 %4846  ;;  %v4875_v24 = vpop.permute.xlu1 %4874 }
 0xc55   : > { %4849 = vst.msk [vmem:[#allocation4 + $0x1] sm:$0x1] %vm12835_vm4, %v4847_v8 }
 0xc56   : > { %4877 = vst.msk [vmem:[#allocation4 + $0x2] sm:$0x1] %vm12757_vm14, %v4875_v24 }
 0xc58   : > { %v4954_v61 = vpop.permute.xlu0 %4953  ;;  %v4880_v10 = vpop.permute.xlu1 %4879 }
 0xc59   : > { %4956 = vst.msk [vmem:[#allocation4 + $0x3] sm:$0x1] %vm12757_vm14, %v4954_v61  ;;  %vm9771_vm14 = vmmov 0  }
 0xc5a   : > { %4882 = vst.msk [vmem:[#allocation4 + $0x2] sm:$0x1] %vm12765_vm1, %v4880_v10 }
 0xc5c   : > { %v4959_v3 = vpop.permute.xlu0 %4958  ;;  %v4904_v0 = vpop.permute.xlu1 %4903 }
 0xc5d   : > { %4961 = vst.msk [vmem:[#allocation4 + $0x3] sm:$0x1] %vm12765_vm1, %v4959_v3 }
 0xc60   : > { %v4983_v1 = vpop.permute.xlu0 %4982  ;;  %v4885_v23 = vpop.permute.xlu1 %4884 }
 0xc61   : > { %4887 = vst.msk [vmem:[#allocation4 + $0x2] sm:$0x1] %vm12799_vm7, %v4885_v23 }
 0xc62   : > { %4906 = vst.msk [vmem:[#allocation4 + $0x2] sm:$0x1] %vm12803_vm8, %v4904_v0 }
 0xc64   : > { %v4964_v24 = vpop.permute.xlu0 %4963  ;;  %v4916_v8 = vpop.permute.xlu1 %4915 }
 0xc65   : > { %4966 = vst.msk [vmem:[#allocation4 + $0x3] sm:$0x1] %vm12799_vm7, %v4964_v24 }
 0xc66   : > { %4918 = vst.msk [vmem:[#allocation4 + $0x2] sm:$0x1] %vm12813_vm11, %v4916_v8 }
 0xc67   : > { %4985 = vst.msk [vmem:[#allocation4 + $0x3] sm:$0x1] %vm12803_vm8, %v4983_v1 }
 0xc68   : > { %v4995_v40 = vpop.permute.xlu0 %4994  ;;  %v4921_v33 = vpop.permute.xlu1 %4920 }
 0xc69   : > { %4997 = vst.msk [vmem:[#allocation4 + $0x3] sm:$0x1] %vm12813_vm11, %v4995_v40 }
 0xc6a   : > { %4923 = vst.msk [vmem:[#allocation4 + $0x2] sm:$0x1] %vm12825_vm15, %v4921_v33 }
 0xc6c   : > { %v5000_v23 = vpop.permute.xlu0 %4999  ;;  %v4926_v0 = vpop.permute.xlu1 %4925 }
 0xc6d   : > { %5002 = vst.msk [vmem:[#allocation4 + $0x3] sm:$0x1] %vm12825_vm15, %v5000_v23 }
 0xc6e   : > { %4928 = vst.msk [vmem:[#allocation4 + $0x2] sm:$0x1] %vm12835_vm4, %v4926_v0 }
 0xc70   : > { %v5005_v14 = vpop.permute.xlu0 %5004 }
 0xc71   : > { %5007 = vst.msk [vmem:[#allocation4 + $0x3] sm:$0x1] %vm12835_vm4, %v5005_v14 }
 0xc78   : > { %v12875_v61 = vld [vmem:[#allocation4] sm:$0xf] }
 0xc79   : > { %14428 = vst [vmem:[#allocation41_spill] sm:$0xff] %v12875_v61  ;;  %v5082_v10 = vrot.slane %v12875_v61, %v5081_v28  ;;  %v5078_v3 = vrot.slane %v12875_v61, %v5077_v43  ;;  %v14430_v28 = vpack.c.bf16 %v12188_v37, %v12183_v39  ;;  %v14431_v43 = vpack.c.bf16 %v12241_v62, %v12230_v6 }
 0xc7b   : > { %v12879_v1 = vand.u32 4294901760, %v5082_v10  ;;  %v12881_v27 = vand.u32 4294901760, %v5078_v3 }
 0xc7d   : > { %14429 = vst [vmem:[#allocation42_spill] sm:$0xff] %v12881_v27  ;;  %5432 = vmatprep.mubr.f32.mxu1 %v12879_v1  ;;  %v12885_v24 = vsub.f32 %v5078_v3, %v12881_v27  ;;  %v5192_v44 = vsub.f32 %v5082_v10, %v12879_v1  ;;  %v14432_v10 = vpack.c.bf16 %v12257_v35, %v12246_v41 }
 0xc7e   : > { %5434 = vmatmul.mubr.f32.vlgmr.msra.gmra.mrb[42].mxu1 %v12881_v27  ;;  %v14433_v3 = vpack.c.bf16 %v12315_v59, %v12304_v52 }
 0xc7f   : > { %9291 = vmatpush3.bf16.msra.mxu1 %v12388_v54  ;;  %v5193_v8 = vand.u32 4294901760, %v5192_v44  ;;  %v14122_v40 = vand.u32 4294901760, %v12885_v24 }
 0xc80   : > { %9293 = vmatprep.subr.bf16.mxu1 %v12416_v53 }
 0xc81   : > { %5676 = vmatprep.mubr.f32.mxu1 %v5193_v8  ;;  %v5194_v33 = vsub.f32 %v5192_v44, %v5193_v8  ;;  %v5200_v23 = vsub.f32 %v12885_v24, %v14122_v40  ;;  %v14434_v8 = vld [vmem:[#allocation31_spill] sm:$0xff]  ;;  %v12946_v40 = vld [vmem:[%s13960_s15 + $0x160] sm:$0xff] }
 0xc82   : > { %14443 = vst [vmem:[#allocation14_spill] sm:$0xff] %v12946_v40 }
 0xc83   : > { %9295 = vmatpush3.bf16.msra.mxu1 %v12439_v45  ;;  %v5195_v0 = vand.u32 4294901760, %v5194_v33  ;;  %v5201_v14 = vand.u32 4294901760, %v5200_v23  ;;  %v12921_v33 = vld [vmem:[%s13960_s15 + $0x158] sm:$0xff]  ;;  %v14437_v23 = vpack.c.bf16 %v12340_v9, %v12328_v47 }
 0xc84   : > { %9297 = vmatprep.subr.bf16.mxu1 %v12474_v51  ;;  %14436 = vst [vmem:[#allocation13_spill] sm:$0xff] %v12921_v33  ;;  %v14450_v29 = vand.u32 4294901760, %v12921_v33 }
 0xc85   : > { %5196 = vmatprep.mubr.f32.mxu0 %v5195_v0  ;;  %v14438_v0 = vld [vmem:[#allocation32_spill] sm:$0xff] }
 0xc86   : > { %5202 = vmatmul.mubr.f32.vlgmr.msra.gmra.mrb[32].mxu0 %v5201_v14  ;;  %v14448_v14 = vld [vmem:[#allocation34_spill] sm:$0xff]  ;;  %v12977_v61 = vsub.f32 %v12921_v33, %v14450_v29  ;;  %v14457_v29 = vpack.c.bf16 %v12518_v31, %v12514_v49  ;;  %v14458_v33 = vpack.c.bf16 %v12551_v60, %v12548_v38 }
 0xc87   : > { %9259 = vmatpush3.bf16.msra.mxu0 %v14430_v28  ;;  %9299 = vmatpush3.bf16.msra.mxu1 %v12484_v58  ;;  %v14447_v28 = vpack.c.bf16 %v12445_v56, %v12403_v21 }
 0xc88   : > { %5569 = vmatprep.mubr.f32.mxu0 %v5192_v44  ;;  %9261 = vmatprep.subr.bf16.mxu0 %v14431_v43  ;;  %v12916_v44 = vld [vmem:[%s13960_s15 + $0x150] sm:$0xff]  ;;  %v12932_v43 = vld [vmem:[%s13960_s15 + $0x1e0] sm:$0xff] }
 0xc89   : > { %9301 = vmatprep.subr.bf16.mxu1 %v12536_v63  ;;  %14435 = vst [vmem:[#allocation43_spill] sm:$0xff] %v12916_v44  ;;  %14439 = vst [vmem:[#allocation23_spill] sm:$0xff] %v12932_v43  ;;  %v14449_v5 = vand.u32 4294901760, %v12916_v44 }
 0xc8b   : > { %9263 = vmatpush3.bf16.msra.mxu0 %v14432_v10  ;;  %9303 = vmatpush3.bf16.msra.mxu1 %v12561_v2  ;;  %v12937_v10 = vld [vmem:[%s13960_s15 + $0x1e8] sm:$0xff]  ;;  %v12972_v27 = vsub.f32 %v12916_v44, %v14449_v5 }
 0xc8c   : > { %9265 = vmatprep.subr.bf16.mxu0 %v14433_v3  ;;  %9305 = vmatprep.subr.bf16.mxu1 %v14434_v8  ;;  %14440 = vst [vmem:[#allocation11_spill] sm:$0xff] %v12937_v10  ;;  %v14441_v3 = vpack.c.bf16 %v12359_v32, %v12350_v22  ;;  %v14455_v21 = vand.u32 4294901760, %v12937_v10 }
 0xc8f   : > { %9267 = vmatpush3.bf16.msra.mxu0 %v14437_v23  ;;  %9307 = vmatpush3.bf16.msra.mxu1 %v14438_v0  ;;  %v14442_v23 = vld [vmem:[#allocation33_spill] sm:$0xff]  ;;  %v14454_v0 = vand.u32 4294901760, %v12932_v43 }
 0xc90   : > { %9269 = vmatprep.subr.bf16.mxu0 %v14441_v3  ;;  %9309 = vmatprep.subr.bf16.mxu1 %v14442_v23  ;;  %v12958_v3 = vld [vmem:[%s13960_s15 + $0x1f0] sm:$0xff] }
 0xc91   : > { %14445 = vst [vmem:[#allocation8_spill] sm:$0xff] %v12958_v3  ;;  %v12982_v23 = vld [vmem:[%s13960_s15 + $0x170] sm:$0xff]  ;;  %v13000_v56 = vsub.f32 %v12932_v43, %v14454_v0  ;;  %v14461_v44 = vand.u32 4294901760, %v12958_v3  ;;  %v14464_v43 = vand.u32 4294901760, %v12977_v61 }
 0xc92   : > { %14451 = vst [vmem:[#allocation16_spill] sm:$0xff] %v12982_v23 }
 0xc93   : > { %9271 = vmatpush3.bf16.msra.mxu0 %v14447_v28  ;;  %9311 = vmatpush3.bf16.msra.mxu1 %v14448_v14  ;;  %v12987_v28 = vld [vmem:[%s13960_s15 + $0x178] sm:$0xff]  ;;  %v14453_v14 = vpack.c.bf16 %v12478_v11, %v12452_v36  ;;  %v13005_v11 = vsub.f32 %v12937_v10, %v14455_v21  ;;  %v14459_v21 = vand.u32 4294901760, %v12946_v40  ;;  %v14462_v10 = vand.u32 4294901760, %v12963_v50 }
 0xc94   : > { %14452 = vst [vmem:[#allocation24_spill] sm:$0xff] %v12987_v28  ;;  %9313 = vmatprep.subr.bf16.mxu1 %v12700_v42 }
 0xc95   : > { %9273 = vmatprep.subr.bf16.mxu0 %v14453_v14  ;;  %14456 = vst [vmem:[#allocation20_spill] sm:$0xff] %v13005_v11  ;;  %v13022_v5 = vsub.f32 %v12946_v40, %v14459_v21  ;;  %v14460_v14 = vand.u32 4294901760, %v12953_v26  ;;  %v13042_v21 = vsub.f32 %v12963_v50, %v14462_v10  ;;  %v14463_v40 = vand.u32 4294901760, %v12972_v27 }
 0xc96   : > { %v14468_v50 = vpack.c.bf16 %v12586_v18, %v12572_v19 }
 0xc97   : > { %9275 = vmatpush3.bf16.msra.mxu0 %v14457_v29  ;;  %9315 = vmatpush3.bf16.msra.mxu1 %v12711_v30  ;;  %v13027_v29 = vld [vmem:[%s13960_s15 + $0x180] sm:$0xff]  ;;  %v13032_v0 = vsub.f32 %v12953_v26, %v14460_v14  ;;  %v14142_v30 = vand.u32 4294901760, %v13000_v56  ;;  %v14141_v14 = vand.u32 4294901760, %v13005_v11  ;;  %v14466_v26 = vand.u32 4294901760, %v12982_v23 }
 0xc98   : > { %9277 = vmatprep.subr.bf16.mxu0 %v14458_v33  ;;  %9317 = vmatprep.subr.bf16.mxu1 %v12716_v46  ;;  %v13037_v33 = vsub.f32 %v12958_v3, %v14461_v44  ;;  %v13048_v46 = vpack.c.bf16 %v14464_v43, %v14463_v40  ;;  %v14467_v3 = vand.u32 4294901760, %v12987_v28  ;;  %v13069_v40 = vld [vmem:[%s13960_s15 + $0x188] sm:$0xff]  ;;  %v14472_v11 = vpack.c.bf16 %v12661_v7, %v12656_v34 }
 0xc99   : > { %v13055_v44 = vsub.f32 %v12982_v23, %v14466_v26  ;;  %v14469_v26 = vpack.c.bf16 %v12631_v20, %v12628_v17  ;;  %v13090_v17 = vpack.c.bf16 %v14141_v14, %v14142_v30  ;;  %v13100_v20 = vld [vmem:[%s13960_s15 + $0x198] sm:$0xff]  ;;  %v14471_v14 = vand.u32 4294901760, %v12885_v24 }
 0xc9a   : > { %14465 = vst [vmem:[#allocation22_spill] sm:$0xff] %v13048_v46  ;;  %v13060_v10 = vsub.f32 %v12987_v28, %v14467_v3  ;;  %v13079_v3 = vld [vmem:[%s13960_s15 + $0x100] sm:$0xff]  ;;  %v14475_v30 = vand.u32 4294901760, %v13037_v33  ;;  %v14476_v23 = vand.u32 4294901760, %v13042_v21  ;;  %v14480_v34 = vand.u32 4294901760, %v12174_v4 }
 0xc9b   : > { %9279 = vmatpush3.bf16.msra.mxu0 %v14468_v50  ;;  %9319 = vmatpush3.bf16.msra.mxu1 %v12718_v12  ;;  %v13084_v50 = vld [vmem:[%s13960_s15 + $0x108] sm:$0xff]  ;;  %14470 = vst [vmem:[#allocation17_spill] sm:$0xff] %v13090_v17  ;;  %v14150_v43 = vand.u32 4294901760, %v13079_v3  ;;  %v14481_v46 = vand.u32 4294901760, %v13055_v44  ;;  %v14486_v4 = vand.u32 4294901760, %v12183_v39 }
 0xc9c   : > { %9281 = vmatprep.subr.bf16.mxu0 %v14469_v26  ;;  %9353 = vmatprep.subr.bf16.mxu1 %v12382_v15  ;;  %v13095_v15 = vld [vmem:[%s13960_s15 + $0x190] sm:$0xff]  ;;  %v14146_v26 = vand.u32 4294901760, %v13022_v5  ;;  %v13127_v17 = vpack.c.bf16 %v14476_v23, %v14475_v30  ;;  %v14482_v30 = vand.u32 4294901760, %v13060_v10  ;;  %v14492_v39 = vand.u32 4294901760, %v13084_v50 }
 0xc9e   : > { %5680 = vmatmul.mubr.f32.vlgmr.msra.gmra.mrb[44].mxu1 %v14471_v14  ;;  %v14473_v14 = vand.u32 4294901760, %v13032_v0  ;;  %14477 = vst [vmem:[#allocation19_spill] sm:$0xff] %v13127_v17  ;;  %v13143_v23 = vpack.c.bf16 %v14482_v30, %v14481_v46  ;;  %v14488_v46 = vpack.c.bf16 %v12698_v55, %v12696_v13  ;;  %v13172_v30 = vsub.f32 %v13079_v3, %v14150_v43 }
 0xc9f   : > { %9283 = vmatpush3.bf16.msra.mxu0 %v14472_v11  ;;  %9355 = vmatpush3.bf16.msra.mxu1 %v12388_v54  ;;  %v14478_v54 = vpack.c.bf16 %v12685_v16, %v12683_v57  ;;  %v14479_v11 = vand.u32 4294901760, %v12169_v48  ;;  %v14484_v57 = vand.u32 4294901760, %v13027_v29  ;;  %v13154_v48 = vld [vmem:[%s13960_s15 + $0x110] sm:$0xff]  ;;  %v14495_v13 = vand.u32 4294901760, %v12241_v62 }
 0xca0   : > { %v13121_v28 = vpack.c.bf16 %v14473_v14, %v14146_v26  ;;  %5950 = vmatprep.mubr.f32.mxu1 %v12879_v1  ;;  %v14148_v14 = vand.u32 4294901760, %v13095_v15  ;;  %v14147_v26 = vand.u32 4294901760, %v13100_v20  ;;  %14483 = vst [vmem:[#allocation21_spill] sm:$0xff] %v13143_v23  ;;  %9357 = vmatprep.subr.bf16.mxu1 %v12416_v53  ;;  %v14489_v53 = vand.u32 4294901760, %v13069_v40  ;;  %14491 = vst [vmem:[#allocation9_spill] sm:$0xff] %v13172_v30 }
 0xca1   : > { %9285 = vmatprep.subr.bf16.mxu0 %v14478_v54  ;;  %v9320_v7 = vpack.c.bf16 %v14480_v34, %v14479_v11  ;;  %v13149_v16 = vsub.f32 %v13027_v29, %v14484_v57  ;;  %v14487_v54 = vand.u32 4294901760, %v12188_v37  ;;  %v13177_v37 = vsub.f32 %v13084_v50, %v14492_v39 }
 0xca2   : > { %14474 = vst [vmem:[#allocation25_spill] sm:$0xff] %v13121_v28  ;;  %v13167_v34 = vsub.f32 %v13069_v40, %v14489_v53  ;;  %v13187_v57 = vsub.f32 %v13095_v15, %v14148_v14  ;;  %v14498_v62 = vand.u32 4294901760, %v12246_v41  ;;  %v14500_v53 = vand.u32 4294901760, %v12304_v52  ;;  %v13217_v41 = vld [vmem:[%s13960_s15 + $0x1a0] sm:$0xff] }
 0xca3   : > { %14485 = vst [vmem:[#allocation27_spill] sm:$0xff] %v13149_v16  ;;  %v9322_v11 = vpack.c.bf16 %v14487_v54, %v14486_v4  ;;  %9287 = vmatpush3.bf16.msra.mxu0 %v14488_v46  ;;  %9359 = vmatpush3.bf16.msra.mxu1 %v12439_v45  ;;  %14493 = vst [vmem:[#allocation26_spill] sm:$0xff] %v13177_v37  ;;  %v14494_v45 = vand.u32 4294901760, %v12230_v6  ;;  %v13192_v4 = vsub.f32 %v13100_v20, %v14147_v26  ;;  %v13199_v6 = vld [vmem:[%s13960_s15 + $0x118] sm:$0xff] }
 0xca4   : > { %14490 = vst [vmem:[#allocation6_spill] sm:$0xff] %v13167_v34  ;;  %9321 = vmatprep.subr.bf16.mxu0 %v9320_v7  ;;  %9361 = vmatprep.subr.bf16.mxu1 %v12474_v51  ;;  %14496 = vst [vmem:[#allocation5_spill] sm:$0xff] %v13187_v57  ;;  %v14149_v54 = vand.u32 4294901760, %v13154_v48  ;;  %v14151_v7 = vand.u32 4294901760, %v13149_v16  ;;  %v14499_v51 = vand.u32 4294901760, %v12257_v35  ;;  %v14501_v39 = vand.u32 4294901760, %v12315_v59 }
 0xca5   : > { %v9324_v55 = vpack.c.bf16 %v14495_v13, %v14494_v45  ;;  %14497 = vst [vmem:[#allocation10_spill] sm:$0xff] %v13192_v4  ;;  %v14156_v13 = vand.u32 4294901760, %v13167_v34  ;;  %v14154_v26 = vand.u32 4294901760, %v13172_v30  ;;  %v14153_v14 = vand.u32 4294901760, %v13177_v37  ;;  %v13222_v35 = vld [vmem:[%s13960_s15 + $0x1a8] sm:$0xff] }
 0xca6   : > { %5572 = vmatmul.mubr.f32.vlgmr.msra.gmra.mrb[34].mxu0 %v12885_v24  ;;  %v9326_v46 = vpack.c.bf16 %v14499_v51, %v14498_v62  ;;  %v9328_v45 = vpack.c.bf16 %v14501_v39, %v14500_v53  ;;  %v14152_v52 = vand.u32 4294901760, %v13187_v57  ;;  %v14155_v59 = vand.u32 4294901760, %v13192_v4 }
 0xca7   : > { %9323 = vmatpush3.bf16.msra.mxu0 %v9322_v11  ;;  %5846 = vmatprep.mubr.f32.mxu0 %v12879_v1  ;;  %v14157_v1 = vand.u32 4294901760, %v13199_v6  ;;  %v13231_v24 = vsub.f32 %v13154_v48, %v14149_v54  ;;  %v6185_v11 = vsub.f32 %v13149_v16, %v14151_v7  ;;  %v5089_v51 = vsub.s32 3, %v12044_v25 }
 0xca8   : > { %9363 = vmatpush3.bf16.msra.mxu1 %v12484_v58  ;;  %9325 = vmatprep.subr.bf16.mxu0 %v9324_v55  ;;  %v14503_v58 = vand.u32 4294901760, %v12328_v47  ;;  %v14504_v55 = vand.u32 4294901760, %v12340_v9  ;;  %v14505_v54 = vand.u32 4294901760, %v12350_v22  ;;  %v6192_v7 = vsub.f32 %v13167_v34, %v14156_v13  ;;  %v13265_v22 = vld [vmem:[%s13960_s15 + $0x128] sm:$0xff] }
 0xca9   : > { %14502 = vst [vmem:[#allocation7_spill] sm:$0xff] %v13231_v24  ;;  %9365 = vmatprep.subr.bf16.mxu1 %v12536_v63  ;;  %v14506_v63 = vand.u32 4294901760, %v12359_v32  ;;  %v6073_v47 = vsub.f32 %v13172_v30, %v14154_v26  ;;  %v6080_v9 = vsub.f32 %v13177_v37, %v14153_v14  ;;  %v6199_v32 = vsub.f32 %v13187_v57, %v14152_v52  ;;  %v14510_v52 = vld [vmem:[#allocation29_spill] sm:$0xff]  ;;  %v14513_v13 = vld [vmem:[#allocation30_spill] sm:$0xff] }
 0xcaa   : > { %v9330_v62 = vpack.c.bf16 %v14504_v55, %v14503_v58  ;;  %v13278_v55 = vsub.f32 %v13199_v6, %v14157_v1  ;;  %v14511_v14 = vand.u32 4294901760, %v14510_v52  ;;  %v14514_v58 = vand.u32 4294901760, %v14513_v13 }
 0xcab   : > { %9327 = vmatpush3.bf16.msra.mxu0 %v9326_v46  ;;  %v9332_v43 = vpack.c.bf16 %v14506_v63, %v14505_v54  ;;  %v13260_v46 = vld [vmem:[%s13960_s15 + $0x120] sm:$0xff]  ;;  %v6206_v54 = vsub.f32 %v13192_v4, %v14155_v59  ;;  %v14512_v59 = vand.u32 4294901760, %v12452_v36  ;;  %v14515_v1 = vand.u32 4294901760, %v12514_v49  ;;  %v13313_v49 = vld [vmem:[%s13960_s15 + $0x1b8] sm:$0xff] }
 0xcac   : > { %9367 = vmatpush3.bf16.msra.mxu1 %v12561_v2  ;;  %9329 = vmatprep.subr.bf16.mxu0 %v9328_v45  ;;  %14507 = vst [vmem:[#allocation15_spill] sm:$0xff] %v13278_v55  ;;  %v13283_v2 = vld [vmem:[%s13960_s15 + $0x1b0] sm:$0xff]  ;;  %v14508_v45 = vld [vmem:[#allocation28_spill] sm:$0xff]  ;;  %v14516_v53 = vand.u32 4294901760, %v12518_v31  ;;  %v6186_v17 = vand.u32 4294901760, %v6185_v11  ;;  %v14517_v28 = vand.u32 4294901760, %v13217_v41 }
 0xcad   : > { %9369 = vmatprep.subr.bf16.mxu1 %v14434_v8  ;;  %v14509_v63 = vand.u32 4294901760, %v14508_v45  ;;  %v9336_v39 = vpack.c.bf16 %v14514_v58, %v14512_v59  ;;  %v14519_v45 = vand.u32 4294901760, %v13222_v35  ;;  %v6193_v31 = vand.u32 4294901760, %v6192_v7  ;;  %v13326_v7 = vld [vmem:[%s13960_s15 + $0x130] sm:$0xff] }
 0xcae   : > { %v9338_v23 = vpack.c.bf16 %v14516_v53, %v14515_v1  ;;  %v13301_v8 = vsub.f32 %v13217_v41, %v14517_v28  ;;  %v6074_v52 = vand.u32 4294901760, %v6073_v47  ;;  %v6081_v59 = vand.u32 4294901760, %v6080_v9  ;;  %v14521_v1 = vld [vmem:[#allocation32_spill] sm:$0xff] }
 0xcaf   : > { %v9334_v26 = vpack.c.bf16 %v14511_v14, %v14509_v63  ;;  %v13306_v14 = vsub.f32 %v13222_v35, %v14519_v45  ;;  %9331 = vmatpush3.bf16.msra.mxu0 %v9330_v62  ;;  %v6200_v11 = vand.u32 4294901760, %v6199_v32  ;;  %v6207_v53 = vand.u32 4294901760, %v6206_v54  ;;  %v13331_v62 = vld [vmem:[%s13960_s15 + $0x138] sm:$0xff]  ;;  %v14528_v45 = vld [vmem:[#allocation41_spill] sm:$0xff] }
 0xcb0   : > { %14518 = vst [vmem:[#allocation31_spill] sm:$0xff] %v13301_v8  ;;  %9371 = vmatpush3.bf16.msra.mxu1 %v14521_v1  ;;  %9333 = vmatprep.subr.bf16.mxu0 %v9332_v43  ;;  %v14522_v58 = vand.u32 4294901760, %v13231_v24  ;;  %v14523_v43 = vld [vmem:[#allocation33_spill] sm:$0xff]  ;;  %v14524_v47 = vand.u32 4294901760, %v12548_v38  ;;  %v14525_v9 = vand.u32 4294901760, %v12551_v60  ;;  %v14526_v54 = vand.u32 4294901760, %v12572_v19 }
 0xcb1   : > { %14520 = vst [vmem:[#allocation28_spill] sm:$0xff] %v13306_v14  ;;  %9373 = vmatprep.subr.bf16.mxu1 %v14523_v43  ;;  %v14527_v1 = vand.u32 4294901760, %v12586_v18  ;;  %v5090_v28 = vrot.slane %v14528_v45, %v5089_v51  ;;  %v14529_v43 = vand.u32 4294901760, %v13260_v46  ;;  %v14531_v60 = vand.u32 4294901760, %v13265_v22  ;;  %v13359_v18 = vld [vmem:[%s13960_s15 + $0x1c0] sm:$0xff]  ;;  %v13364_v51 = vld [vmem:[%s13960_s15 + $0x1c8] sm:$0xff] }
 0xcb2   : > { %v13320_v63 = vsub.f32 %v13231_v24, %v14522_v58  ;;  %v9340_v32 = vpack.c.bf16 %v14525_v9, %v14524_v47  ;;  %v9416_v47 = vpack.c.bf16 %v6193_v31, %v6186_v17  ;;  %v14533_v9 = vand.u32 4294901760, %v13283_v2  ;;  %v13383_v31 = vld [vmem:[%s13960_s15 + $0x140] sm:$0xff] }
 0xcb3   : > { %v9342_v58 = vpack.c.bf16 %v14527_v1, %v14526_v54  ;;  %v13349_v38 = vsub.f32 %v13260_v46, %v14529_v43  ;;  %v13354_v19 = vsub.f32 %v13265_v22, %v14531_v60  ;;  %9335 = vmatpush3.bf16.msra.mxu0 %v9334_v26  ;;  %v14535_v60 = vld [vmem:[#allocation34_spill] sm:$0xff]  ;;  %v9418_v24 = vpack.c.bf16 %v6081_v59, %v6074_v52 }
 0xcb4   : > { %v13369_v54 = vsub.f32 %v13283_v2, %v14533_v9  ;;  %9375 = vmatpush3.bf16.msra.mxu1 %v14535_v60  ;;  %9337 = vmatprep.subr.bf16.mxu0 %v9336_v39  ;;  %v13374_v36 = vpack.c.bf16 %v6207_v53, %v6200_v11  ;;  %v6088_v13 = vand.u32 4294901760, %v13320_v63  ;;  %v14536_v26 = vand.u32 4294901760, %v13278_v55  ;;  %v13398_v53 = vld [vmem:[%s13960_s15 + $0x148] sm:$0xff]  ;;  %v13408_v63 = vld [vmem:[%s13960_s15 + $0x1d8] sm:$0xff] }
 0xcb5   : > { %14530 = vst [vmem:[#allocation29_spill] sm:$0xff] %v13349_v38  ;;  %14532 = vst [vmem:[#allocation30_spill] sm:$0xff] %v13354_v19  ;;  %9377 = vmatprep.subr.bf16.mxu1 %v12700_v42  ;;  %v13386_v9 = vand.u32 4294901760, %v5090_v28  ;;  %v14538_v39 = vand.u32 4294901760, %v13313_v49  ;;  %v13403_v42 = vld [vmem:[%s13960_s15 + $0x1d0] sm:$0xff]  ;;  %v14541_v60 = vand.u32 4294901760, %v13301_v8 }
 0xcb6   : > { %14534 = vst [vmem:[#allocation32_spill] sm:$0xff] %v13369_v54  ;;  %v6094_v17 = vsub.f32 %v13278_v55, %v14536_v26  ;;  %14539 = vst [vmem:[#allocation41_spill] sm:$0xff] %v13403_v42  ;;  %v14543_v55 = vand.u32 4294901760, %v13326_v7  ;;  %v14544_v57 = vand.u32 4294901760, %v13331_v62  ;;  %v14547_v37 = vand.u32 4294901760, %v13359_v18 }
 0xcb7   : > { %14537 = vst [vmem:[#allocation33_spill] sm:$0xff] %v13386_v9  ;;  %v13391_v52 = vsub.f32 %v13313_v49, %v14538_v39  ;;  %14540 = vst [vmem:[#allocation34_spill] sm:$0xff] %v13408_v63  ;;  %v6213_v26 = vsub.f32 %v13301_v8, %v14541_v60  ;;  %v14542_v39 = vand.u32 4294901760, %v13306_v14  ;;  %9339 = vmatpush3.bf16.msra.mxu0 %v9338_v23  ;;  %v14549_v43 = vand.u32 4294901760, %v13349_v38 }
 0xcb8   : > { %v13422_v4 = vsub.f32 %v13326_v7, %v14543_v55  ;;  %v13427_v60 = vsub.f32 %v13331_v62, %v14544_v57  ;;  %9341 = vmatprep.subr.bf16.mxu0 %v9340_v32  ;;  %v6095_v59 = vand.u32 4294901760, %v6094_v17  ;;  %v13436_v55 = vsub.f32 %v5090_v28, %v13386_v9 }
 0xcb9   : > { %v6220_v11 = vsub.f32 %v13306_v14, %v14542_v39  ;;  %v14545_v39 = vld [vmem:[#allocation35_spill] sm:$0xff]  ;;  %v14546_v14 = vld [vmem:[#allocation36_spill] sm:$0xff]  ;;  %v13442_v8 = vsub.f32 %v13359_v18, %v14547_v37  ;;  %v14548_v32 = vand.u32 4294901760, %v13364_v51  ;;  %v14550_v28 = vand.u32 4294901760, %v13354_v19 }
 0xcba   : > { %9379 = vmatpush3.bf16.msra.mxu1 %v14545_v39  ;;  %v6214_v39 = vand.u32 4294901760, %v6213_v26  ;;  %v14551_v23 = vand.u32 4294901760, %v13369_v54  ;;  %v14552_v26 = vand.u32 4294901760, %v13383_v31  ;;  %v14559_v34 = vand.u32 4294901760, %v13069_v40 }
 0xcbb   : > { %9381 = vmatprep.subr.bf16.mxu1 %v14546_v14  ;;  %v13447_v17 = vsub.f32 %v13364_v51, %v14548_v32  ;;  %v6221_v1 = vand.u32 4294901760, %v6220_v11  ;;  %v6101_v14 = vsub.f32 %v13349_v38, %v14549_v43  ;;  %v6108_v57 = vsub.f32 %v13354_v19, %v14550_v28  ;;  %9343 = vmatpush3.bf16.msra.mxu0 %v9342_v58  ;;  %v14553_v43 = vld [vmem:[#allocation37_spill] sm:$0xff] }
 0xcbc   : > { %v6227_v37 = vsub.f32 %v13369_v54, %v14551_v23  ;;  %v13463_v11 = vsub.f32 %v13383_v31, %v14552_v26  ;;  %9345 = vmatprep.subr.bf16.mxu0 %v14553_v43  ;;  %v14554_v28 = vand.u32 4294901760, %v13398_v53  ;;  %v14555_v23 = vand.u32 4294901760, %v13403_v42 }
 0xcbd   : > { %v14556_v32 = vand.u32 4294901760, %v13408_v63  ;;  %v14557_v26 = vand.u32 4294901760, %v13391_v52  ;;  %v9422_v38 = vpack.c.bf16 %v6095_v59, %v6088_v13  ;;  %v14563_v19 = vand.u32 4294901760, %v13427_v60 }
 0xcbe   : > { %9383 = vmatpush3.bf16.msra.mxu1 %v12718_v12  ;;  %v13470_v58 = vsub.f32 %v13398_v53, %v14554_v28  ;;  %v13475_v30 = vsub.f32 %v13403_v42, %v14555_v23  ;;  %v14558_v23 = vand.u32 4294901760, %v13027_v29  ;;  %v14561_v12 = vld [vmem:[#allocation38_spill] sm:$0xff]  ;;  %v6109_v42 = vand.u32 4294901760, %v6108_v57  ;;  %v14564_v57 = vld [vmem:[#allocation39_spill] sm:$0xff] }
 0xcbf   : > { %v13480_v54 = vsub.f32 %v13408_v63, %v14556_v32  ;;  %9417 = vmatprep.subr.bf16.mxu1 %v9416_v47  ;;  %v6234_v43 = vsub.f32 %v13391_v52, %v14557_v26  ;;  %v9424_v32 = vpack.c.bf16 %v6221_v1, %v6214_v39  ;;  %v6102_v63 = vand.u32 4294901760, %v6101_v14  ;;  %v14560_v47 = vld [vmem:[#allocation42_spill] sm:$0xff]  ;;  %9347 = vmatpush3.bf16.msra.mxu0 %v14561_v12 }
 0xcc0   : > { %v13492_v16 = vpack.c.bf16 %v14559_v34, %v14558_v23  ;;  %v14562_v26 = vand.u32 4294901760, %v13422_v4  ;;  %v6122_v13 = vsub.f32 %v13427_v60, %v14563_v19  ;;  %v6228_v40 = vand.u32 4294901760, %v6227_v37  ;;  %9349 = vmatprep.subr.bf16.mxu0 %v14564_v57 }
 0xcc1   : > { %5952 = vmatmul.mubr.f32.vlgmr.msra.gmra.mrb[46].mxu1 %v14560_v47  ;;  %v14565_v39 = vand.u32 4294901760, %v13436_v55  ;;  %v6235_v14 = vand.u32 4294901760, %v6234_v43  ;;  %v14567_v37 = vand.u32 4294901760, %v13447_v17  ;;  %v14569_v59 = vand.u32 4294901760, %v13084_v50  ;;  %v14572_v43 = vld [vmem:[#allocation40_spill] sm:$0xff] }
 0xcc2   : > { %v6115_v28 = vsub.f32 %v13422_v4, %v14562_v26  ;;  %9419 = vmatpush3.bf16.msra.mxu1 %v9418_v24  ;;  %6294 = vmatprep.mubr.f32.mxu1 %v13386_v9  ;;  %v14566_v24 = vand.u32 4294901760, %v13442_v8  ;;  %v14568_v26 = vand.u32 4294901760, %v13079_v3  ;;  %v14571_v1 = vand.u32 4294901760, %v13100_v20 }
 0xcc3   : > { %9421 = vmatprep.subr.bf16.mxu1 %v13374_v36  ;;  %v6056_v19 = vsub.f32 %v13436_v55, %v14565_v39  ;;  %v6248_v23 = vsub.f32 %v13447_v17, %v14567_v37  ;;  %v14570_v36 = vand.u32 4294901760, %v13095_v15  ;;  %9351 = vmatpush3.bf16.msra.mxu0 %v14572_v43  ;;  %v9426_v34 = vpack.c.bf16 %v6109_v42, %v6102_v63 }
 0xcc4   : > { %v6241_v12 = vsub.f32 %v13442_v8, %v14566_v24  ;;  %v13522_v57 = vpack.c.bf16 %v14569_v59, %v14568_v26  ;;  %v6116_v24 = vand.u32 4294901760, %v6115_v28  ;;  %v6123_v29 = vand.u32 4294901760, %v6122_v13  ;;  %9385 = vmatprep.subr.bf16.mxu0 %v13492_v16 }
 0xcc5   : > { %v13528_v39 = vpack.c.bf16 %v14571_v1, %v14570_v36  ;;  %v14573_v9 = vand.u32 4294901760, %v13463_v11  ;;  %v14574_v3 = vand.u32 4294901760, %v13470_v58  ;;  %v14575_v15 = vand.u32 4294901760, %v13475_v30 }
 0xcc6   : > { %9423 = vmatpush3.bf16.msra.mxu1 %v9422_v38  ;;  %v14576_v1 = vand.u32 4294901760, %v13480_v54  ;;  %v6057_v63 = vand.u32 4294901760, %v6056_v19  ;;  %v9428_v28 = vpack.c.bf16 %v6235_v14, %v6228_v40  ;;  %v6242_v13 = vand.u32 4294901760, %v6241_v12  ;;  %5848 = vmatmul.mubr.f32.vlgmr.msra.gmra.mrb[36].mxu0 %v14560_v47 }
 0xcc7   : > { %v6129_v37 = vsub.f32 %v13463_v11, %v14573_v9  ;;  %v6136_v50 = vsub.f32 %v13470_v58, %v14574_v3  ;;  %v6255_v20 = vsub.f32 %v13475_v30, %v14575_v15  ;;  %9425 = vmatprep.subr.bf16.mxu1 %v9424_v32  ;;  %v6249_v9 = vand.u32 4294901760, %v6248_v23  ;;  %9387 = vmatpush3.bf16.msra.mxu0 %v13522_v57 }
 0xcc8   : > { %v6262_v42 = vsub.f32 %v13480_v54, %v14576_v1  ;;  %v14577_v38 = vand.u32 4294901760, %v13154_v48  ;;  %v14578_v59 = vand.u32 4294901760, %v13199_v6  ;;  %v14579_v36 = vand.u32 4294901760, %v13217_v41  ;;  %6058 = vmatprep.mubr.f32.mxu0 %v6057_v63  ;;  %9389 = vmatprep.subr.bf16.mxu0 %v13528_v39 }
 0xcc9   : > { %v14580_v43 = vand.u32 4294901760, %v13222_v35  ;;  %v9430_v32 = vpack.c.bf16 %v6123_v29, %v6116_v24  ;;  %v14581_v40 = vand.u32 4294901760, %v12972_v27  ;;  %v14582_v48 = vand.u32 4294901760, %v12977_v61  ;;  %v14584_v24 = vld [vmem:[#allocation20_spill] sm:$0xff] }
 0xcca   : > { %v13549_v26 = vpack.c.bf16 %v14578_v59, %v14577_v38  ;;  %9427 = vmatpush3.bf16.msra.mxu1 %v9426_v34  ;;  %v6130_v41 = vand.u32 4294901760, %v6129_v37  ;;  %v6137_v19 = vand.u32 4294901760, %v6136_v50  ;;  %v6256_v35 = vand.u32 4294901760, %v6255_v20 }
 0xccb   : > { %v13555_v3 = vpack.c.bf16 %v14580_v43, %v14579_v36  ;;  %v6143_v47 = vsub.f32 %v12972_v27, %v14581_v40  ;;  %v6150_v6 = vsub.f32 %v12977_v61, %v14582_v48  ;;  %v6263_v14 = vand.u32 4294901760, %v6262_v42  ;;  %9429 = vmatprep.subr.bf16.mxu1 %v9428_v28 }
 0xccc   : > { %v9432_v12 = vpack.c.bf16 %v6249_v9, %v6242_v13  ;;  %v14583_v23 = vand.u32 4294901760, %v13000_v56  ;;  %v14585_v15 = vand.u32 4294901760, %v14584_v24  ;;  %v14586_v63 = vand.u32 4294901760, %v13260_v46  ;;  %9391 = vmatpush3.bf16.msra.mxu0 %v13549_v26 }
 0xccd   : > { %v14587_v34 = vand.u32 4294901760, %v13265_v22  ;;  %v14588_v37 = vand.u32 4294901760, %v13283_v2  ;;  %v14589_v50 = vand.u32 4294901760, %v13313_v49  ;;  %v6144_v42 = vand.u32 4294901760, %v6143_v47  ;;  %9393 = vmatprep.subr.bf16.mxu0 %v13555_v3 }
 0xcce   : > { %v6269_v29 = vsub.f32 %v13000_v56, %v14583_v23  ;;  %v6276_v1 = vsub.f32 %v14584_v24, %v14585_v15  ;;  %v6151_v28 = vand.u32 4294901760, %v6150_v6  ;;  %v14590_v13 = vand.u32 4294901760, %v13022_v5  ;;  %9431 = vmatpush3.bf16.msra.mxu1 %v9430_v32 }
 0xccf   : > { %v13575_v38 = vpack.c.bf16 %v14587_v34, %v14586_v63  ;;  %v13582_v20 = vpack.c.bf16 %v14589_v50, %v14588_v37  ;;  %v9434_v46 = vpack.c.bf16 %v6137_v19, %v6130_v41  ;;  %v9436_v22 = vpack.c.bf16 %v6263_v14, %v6256_v35  ;;  %9433 = vmatprep.subr.bf16.mxu1 %v9432_v12 }
 0xcd0   : > { %v6157_v9 = vsub.f32 %v13022_v5, %v14590_v13  ;;  %v14591_v59 = vand.u32 4294901760, %v13032_v0  ;;  %v5085_v2 = vsub.s32 2, %v12044_v25  ;;  %v6270_v49 = vand.u32 4294901760, %v6269_v29 }
 0xcd1   : > { %v6277_v43 = vand.u32 4294901760, %v6276_v1  ;;  %v14592_v40 = vand.u32 4294901760, %v13037_v33  ;;  %v14593_v48 = vand.u32 4294901760, %v13042_v21  ;;  %9395 = vmatpush3.bf16.msra.mxu0 %v13575_v38  ;;  %v14594_v6 = vand.u32 4294901760, %v13326_v7 }
 0xcd2   : > { %v6164_v36 = vsub.f32 %v13032_v0, %v14591_v59  ;;  %v14595_v41 = vand.u32 4294901760, %v13331_v62  ;;  %v9438_v25 = vpack.c.bf16 %v6151_v28, %v6144_v42  ;;  %v14596_v35 = vand.u32 4294901760, %v13359_v18  ;;  %9435 = vmatpush3.bf16.msra.mxu1 %v9434_v46  ;;  %9397 = vmatprep.subr.bf16.mxu0 %v13582_v20  ;;  %v14602_v28 = vld [vmem:[#allocation41_spill] sm:$0xff] }
 0xcd3   : > { %v6283_v47 = vsub.f32 %v13037_v33, %v14592_v40  ;;  %v6290_v32 = vsub.f32 %v13042_v21, %v14593_v48  ;;  %v14597_v14 = vand.u32 4294901760, %v13364_v51  ;;  %v6158_v23 = vand.u32 4294901760, %v6157_v9  ;;  %9437 = vmatprep.subr.bf16.mxu1 %v9436_v22  ;;  %v14604_v9 = vld [vmem:[#allocation34_spill] sm:$0xff] }
 0xcd4   : > { %v13603_v19 = vpack.c.bf16 %v14595_v41, %v14594_v6  ;;  %v6165_v29 = vand.u32 4294901760, %v6164_v36  ;;  %v14598_v15 = vand.u32 4294901760, %v13055_v44  ;;  %v14599_v62 = vand.u32 4294901760, %v13060_v10  ;;  %v14612_v41 = vld [vmem:[#allocation11_spill] sm:$0xff] }
 0xcd5   : > { %v13609_v12 = vpack.c.bf16 %v14597_v14, %v14596_v35  ;;  %v5086_v63 = vrot.slane %v14528_v45, %v5085_v2  ;;  %v9440_v18 = vpack.c.bf16 %v6277_v43, %v6270_v49  ;;  %v6284_v51 = vand.u32 4294901760, %v6283_v47  ;;  %v14608_v43 = vld [vmem:[#allocation13_spill] sm:$0xff] }
 0xcd6   : > { %v6171_v7 = vsub.f32 %v13055_v44, %v14598_v15  ;;  %v6178_v1 = vsub.f32 %v13060_v10, %v14599_v62  ;;  %v6291_v34 = vand.u32 4294901760, %v6290_v32  ;;  %9399 = vmatpush3.bf16.msra.mxu0 %v13603_v19  ;;  %v14600_v37 = vand.u32 4294901760, %v13383_v31  ;;  %9439 = vmatpush3.bf16.msra.mxu1 %v9438_v25  ;;  %v14610_v32 = vld [vmem:[#allocation23_spill] sm:$0xff]  ;;  %v14616_v15 = vld [vmem:[#allocation18_spill] sm:$0xff] }
 0xcd7   : > { %v14601_v50 = vand.u32 4294901760, %v13398_v53  ;;  %v14603_v13 = vand.u32 4294901760, %v14602_v28  ;;  %v14605_v46 = vand.u32 4294901760, %v14604_v9  ;;  %9401 = vmatprep.subr.bf16.mxu0 %v13609_v12  ;;  %v9442_v45 = vpack.c.bf16 %v6165_v29, %v6158_v23  ;;  %9441 = vmatprep.subr.bf16.mxu1 %v9440_v18  ;;  %v14606_v53 = vld [vmem:[#allocation43_spill] sm:$0xff]  ;;  %v14614_v23 = vld [vmem:[#allocation14_spill] sm:$0xff]  ;;  %v14618_v18 = vld [vmem:[#allocation8_spill] sm:$0xff] }
 0xcd8   : > { %v6172_v22 = vand.u32 4294901760, %v6171_v7  ;;  %v6179_v36 = vand.u32 4294901760, %v6178_v1  ;;  %v13633_v2 = vand.u32 4294901760, %v5086_v63  ;;  %v9444_v31 = vpack.c.bf16 %v6291_v34, %v6284_v51 }
 0xcd9   : > { %v13624_v42 = vpack.c.bf16 %v14601_v50, %v14600_v37  ;;  %v13630_v59 = vpack.c.bf16 %v14605_v46, %v14603_v13  ;;  %v14607_v49 = vand.u32 4294901760, %v14606_v53  ;;  %v14609_v40 = vand.u32 4294901760, %v14608_v43  ;;  %v14622_v50 = vld [vmem:[#allocation16_spill] sm:$0xff]  ;;  %v14630_v43 = vld [vmem:[#allocation26_spill] sm:$0xff] }
 0xcda   : > { %9443 = vmatpush3.bf16.msra.mxu1 %v9442_v45  ;;  %v9446_v48 = vpack.c.bf16 %v6179_v36, %v6172_v22  ;;  %v14611_v6 = vand.u32 4294901760, %v14610_v32  ;;  %v14613_v25 = vand.u32 4294901760, %v14612_v41  ;;  %v13650_v14 = vsub.f32 %v5086_v63, %v13633_v2  ;;  %v14620_v63 = vld [vmem:[#allocation12_spill] sm:$0xff]  ;;  %v14627_v36 = vld [vmem:[#allocation27_spill] sm:$0xff]  ;;  %v14631_v32 = vld [vmem:[#allocation5_spill] sm:$0xff] }
 0xcdb   : > { %9403 = vmatpush3.bf16.msra.mxu0 %v13624_v42  ;;  %v13640_v47 = vpack.c.bf16 %v14609_v40, %v14607_v49  ;;  %9445 = vmatprep.subr.bf16.mxu1 %v9444_v31  ;;  %v14615_v29 = vand.u32 4294901760, %v14614_v23  ;;  %v14617_v7 = vand.u32 4294901760, %v14616_v15  ;;  %v14619_v51 = vand.u32 4294901760, %v14618_v18  ;;  %v14624_v13 = vld [vmem:[#allocation24_spill] sm:$0xff]  ;;  %v14628_v31 = vld [vmem:[#allocation6_spill] sm:$0xff]  ;;  %v14629_v49 = vld [vmem:[#allocation9_spill] sm:$0xff] }
 0xcdc   : > { %9405 = vmatprep.subr.bf16.mxu0 %v13630_v59  ;;  %v13647_v35 = vpack.c.bf16 %v14613_v25, %v14611_v6  ;;  %v6061_v1 = vand.u32 4294901760, %v13650_v14  ;;  %v14621_v34 = vand.u32 4294901760, %v14620_v63  ;;  %v14623_v28 = vand.u32 4294901760, %v14622_v50  ;;  %v14632_v6 = vld [vmem:[#allocation10_spill] sm:$0xff]  ;;  %v14633_v25 = vld [vmem:[#allocation7_spill] sm:$0xff]  ;;  %v14639_v50 = vld [vmem:[#allocation32_spill] sm:$0xff] }
 0xcdd   : > { %v13657_v62 = vpack.c.bf16 %v14617_v7, %v14615_v29  ;;  %v14625_v9 = vand.u32 4294901760, %v14624_v13  ;;  %v14626_v45 = vand.u32 4294901760, %v13436_v55  ;;  %v9448_v53 = vpack.c.bf16 %v14628_v31, %v14627_v36  ;;  %v14634_v23 = vld [vmem:[#allocation15_spill] sm:$0xff]  ;;  %v14636_v7 = vld [vmem:[#allocation28_spill] sm:$0xff]  ;;  %v14638_v63 = vld [vmem:[#allocation30_spill] sm:$0xff] }
 0xcde   : > { %9447 = vmatpush3.bf16.msra.mxu1 %v9446_v48  ;;  %v13666_v37 = vpack.c.bf16 %v14621_v34, %v14619_v51  ;;  %v6062_v22 = vsub.f32 %v13650_v14, %v6061_v1  ;;  %v9450_v40 = vpack.c.bf16 %v14630_v43, %v14629_v49  ;;  %v9452_v41 = vpack.c.bf16 %v14632_v6, %v14631_v32  ;;  %v14635_v15 = vld [vmem:[#allocation31_spill] sm:$0xff]  ;;  %v14637_v51 = vld [vmem:[#allocation29_spill] sm:$0xff] }
 0xcdf   : > { %9407 = vmatpush3.bf16.msra.mxu0 %v13640_v47  ;;  %9481 = vmatprep.subr.bf16.mxu1 %v13492_v16  ;;  %v13674_v46 = vpack.c.bf16 %v14625_v9, %v14623_v28  ;;  %v9454_v29 = vpack.c.bf16 %v14634_v23, %v14633_v25  ;;  %v9456_v18 = vpack.c.bf16 %v14636_v7, %v14635_v15 }
 0xce0   : > { %9409 = vmatprep.subr.bf16.mxu0 %v13647_v35  ;;  %v6063_v48 = vand.u32 4294901760, %v6062_v22  ;;  %v9458_v34 = vpack.c.bf16 %v14638_v63, %v14637_v51  ;;  %v9462_v28 = vpack.c.bf16 %v13427_v60, %v13422_v4  ;;  %v9464_v13 = vpack.c.bf16 %v13447_v17, %v13442_v8 }
 0xce1   : > { %6296 = vmatmul.mubr.f32.vlgmr.msra.gmra.mrb[48].mxu1 %v13633_v2  ;;  %v9466_v9 = vpack.c.bf16 %v13470_v58, %v13463_v11  ;;  %v9470_v22 = vpack.c.bf16 %v12977_v61, %v12972_v27  ;;  %v9476_v61 = vpack.c.bf16 %v13042_v21, %v13037_v33  ;;  %v9478_v27 = vpack.c.bf16 %v13060_v10, %v13055_v44 }
 0xce2   : > { %9483 = vmatpush3.bf16.msra.mxu1 %v13522_v57  ;;  %6538 = vmatprep.mubr.f32.mxu1 %v14626_v45  ;;  %v9468_v45 = vpack.c.bf16 %v13480_v54, %v13475_v30  ;;  %v14643_v33 = vand.u32 4294901760, %v14629_v49  ;;  %v14644_v21 = vand.u32 4294901760, %v14630_v43  ;;  %v14645_v44 = vand.u32 4294901760, %v14631_v32 }
 0xce3   : > { %9411 = vmatpush3.bf16.msra.mxu0 %v13657_v62  ;;  %9485 = vmatprep.subr.bf16.mxu1 %v13528_v39  ;;  %v14646_v10 = vand.u32 4294901760, %v14632_v6  ;;  %v14655_v6 = vand.u32 4294901760, %v13422_v4  ;;  %v14661_v4 = vand.u32 4294901760, %v13475_v30  ;;  %v14665_v30 = vld [vmem:[#allocation25_spill] sm:$0xff] }
 0xce4   : > { %9413 = vmatprep.subr.bf16.mxu0 %v13666_v37 }
 0xce6   : > { %9487 = vmatpush3.bf16.msra.mxu1 %v13549_v26 }
 0xce7   : > { %9415 = vmatpush3.bf16.msra.mxu0 %v13674_v46  ;;  %9489 = vmatprep.subr.bf16.mxu1 %v13555_v3 }
 0xce8   : > { %9449 = vmatprep.subr.bf16.mxu0 %v9448_v53  ;;  %v9472_v53 = vpack.c.bf16 %v14584_v24, %v13000_v56  ;;  %v14640_v56 = vld [vmem:[#allocation33_spill] sm:$0xff]  ;;  %v14641_v24 = vand.u32 4294901760, %v14627_v36 }
 0xcea   : > { %6064 = vmatmul.mubr.f32.vlgmr.msra.gmra.mrb[38].mxu0 %v6063_v48  ;;  %9491 = vmatpush3.bf16.msra.mxu1 %v13575_v38  ;;  %v14653_v48 = vand.u32 4294901760, %v14639_v50 }
 0xceb   : > { %9451 = vmatpush3.bf16.msra.mxu0 %v9450_v40  ;;  %6431 = vmatprep.mubr.f32.mxu0 %v13436_v55  ;;  %v9460_v55 = vpack.c.bf16 %v13391_v52, %v14639_v50  ;;  %v9474_v40 = vpack.c.bf16 %v13032_v0, %v13022_v5  ;;  %v14642_v5 = vand.u32 4294901760, %v14628_v31  ;;  %v14650_v31 = vand.u32 4294901760, %v14636_v7 }
 0xcec   : > { %9453 = vmatprep.subr.bf16.mxu0 %v9452_v41  ;;  %9493 = vmatprep.subr.bf16.mxu1 %v13582_v20 }
 0xced   : > { %v9512_v0 = vpack.c.bf16 %v14642_v5, %v14641_v24 }
 0xcee   : > { %9495 = vmatpush3.bf16.msra.mxu1 %v13603_v19 }
 0xcef   : > { %9455 = vmatpush3.bf16.msra.mxu0 %v9454_v29  ;;  %9497 = vmatprep.subr.bf16.mxu1 %v13609_v12 }
 0xcf0   : > { %9457 = vmatprep.subr.bf16.mxu0 %v9456_v18 }
 0xcf2   : > { %9499 = vmatpush3.bf16.msra.mxu1 %v13624_v42 }
 0xcf3   : > { %9459 = vmatpush3.bf16.msra.mxu0 %v9458_v34  ;;  %9501 = vmatprep.subr.bf16.mxu1 %v13630_v59 }
 0xcf4   : > { %9461 = vmatprep.subr.bf16.mxu0 %v9460_v55 }
 0xcf6   : > { %9503 = vmatpush3.bf16.msra.mxu1 %v13640_v47 }
 0xcf7   : > { %9463 = vmatpush3.bf16.msra.mxu0 %v9462_v28  ;;  %9505 = vmatprep.subr.bf16.mxu1 %v13647_v35  ;;  %v6823_v28 = vld [vmem:[%s13962_s17 + $0x8] sm:$0xff] }
 0xcf8   : > { %9465 = vmatprep.subr.bf16.mxu0 %v9464_v13 }
 0xcfa   : > { %9507 = vmatpush3.bf16.msra.mxu1 %v13657_v62 }
 0xcfb   : > { %9467 = vmatpush3.bf16.msra.mxu0 %v9466_v9  ;;  %9509 = vmatprep.subr.bf16.mxu1 %v13666_v37 }
 0xcfc   : > { %9469 = vmatprep.subr.bf16.mxu0 %v9468_v45  ;;  %v6838_v45 = vand.u32 4294901760, %v6823_v28 }
 0xcfe   : > { %9511 = vmatpush3.bf16.msra.mxu1 %v13674_v46 }
 0xcff   : > { %9471 = vmatpush3.bf16.msra.mxu0 %v9470_v22  ;;  %9545 = vmatprep.subr.bf16.mxu1 %v13492_v16  ;;  %v9514_v16 = vpack.c.bf16 %v14644_v21, %v14643_v33  ;;  %v6827_v33 = vld [vmem:[%s13962_s17 + $0x28] sm:$0xff] }
 0xd00   : > { %9473 = vmatprep.subr.bf16.mxu0 %v9472_v53 }
 0xd01   : > { %6542 = vmatmul.mubr.f32.vlgmr.msra.gmra.mrb[50].mxu1 %v6061_v1  ;;  %v14648_v1 = vand.u32 4294901760, %v14634_v23 }
 0xd02   : > { %9547 = vmatpush3.bf16.msra.mxu1 %v13522_v57  ;;  %6812 = vmatprep.mubr.f32.mxu1 %v14640_v56  ;;  %v9516_v57 = vpack.c.bf16 %v14646_v10, %v14645_v44  ;;  %v13833_v10 = vsub.f32 %v6823_v28, %v6838_v45 }
 0xd03   : > { %9475 = vmatpush3.bf16.msra.mxu0 %v9474_v40  ;;  %9549 = vmatprep.subr.bf16.mxu1 %v13528_v39  ;;  %v14647_v39 = vand.u32 4294901760, %v14633_v25  ;;  %v14657_v25 = vand.u32 4294901760, %v13442_v8  ;;  %v14663_v8 = vld [vmem:[#allocation22_spill] sm:$0xff]  ;;  %v9770_v40 = vmov 0.0|0.0  }
 0xd04   : > { %9477 = vmatprep.subr.bf16.mxu0 %v9476_v61  ;;  %v6824_v61 = vld [vmem:[%s13962_s17 + $0x10] sm:$0xff] }
 0xd05   : > { %v9518_v36 = vpack.c.bf16 %v14648_v1, %v14647_v39  ;;  %v6828_v1 = vld [vmem:[%s13962_s17 + $0x30] sm:$0xff] }
 0xd06   : > { %9551 = vmatpush3.bf16.msra.mxu1 %v13549_v26  ;;  %v14649_v26 = vand.u32 4294901760, %v14635_v15 }
 0xd07   : > { %9479 = vmatpush3.bf16.msra.mxu0 %v9478_v27  ;;  %9553 = vmatprep.subr.bf16.mxu1 %v13555_v3  ;;  %v14651_v3 = vand.u32 4294901760, %v14637_v51  ;;  %v6825_v27 = vld [vmem:[%s13962_s17 + $0x18] sm:$0xff] }
 0xd08   : > { %9513 = vmatprep.subr.bf16.mxu0 %v9512_v0  ;;  %v9520_v49 = vpack.c.bf16 %v14650_v31, %v14649_v26  ;;  %v6844_v24 = vand.u32 4294901760, %v6825_v27  ;;  %v6826_v0 = vld [vmem:[%s13962_s17 + $0x20] sm:$0xff] }
 0xd09   : > { %v6847_v21 = vand.u32 4294901760, %v6826_v0 }
 0xd0a   : > { %6434 = vmatmul.mubr.f32.vlgmr.msra.gmra.mrb[40].mxu0 %v13650_v14  ;;  %9555 = vmatpush3.bf16.msra.mxu1 %v13575_v38  ;;  %v14652_v14 = vand.u32 4294901760, %v14638_v63  ;;  %v14654_v38 = vand.u32 4294901760, %v13391_v52  ;;  %v14659_v52 = vand.u32 4294901760, %v13463_v11  ;;  %v14667_v11 = vld [vmem:[#allocation21_spill] sm:$0xff]  ;;  %v13837_v39 = vsub.f32 %v6825_v27, %v6844_v24 }
 0xd0b   : > { %9515 = vmatpush3.bf16.msra.mxu0 %v9514_v16  ;;  %6708 = vmatprep.mubr.f32.mxu0 %v14640_v56  ;;  %v6841_v56 = vand.u32 4294901760, %v6824_v61  ;;  %v6850_v16 = vand.u32 4294901760, %v6827_v33  ;;  %v13847_v31 = vsub.f32 %v6826_v0, %v6847_v21 }
 0xd0c   : > { %9517 = vmatprep.subr.bf16.mxu0 %v9516_v57  ;;  %9557 = vmatprep.subr.bf16.mxu1 %v13582_v20  ;;  %v9522_v43 = vpack.c.bf16 %v14652_v14, %v14651_v3  ;;  %v9524_v32 = vpack.c.bf16 %v14654_v38, %v14653_v48  ;;  %v14656_v20 = vand.u32 4294901760, %v13427_v60  ;;  %v14662_v60 = vand.u32 4294901760, %v13480_v54  ;;  %v14666_v54 = vld [vmem:[#allocation19_spill] sm:$0xff] }
 0xd0d   : > { %v13821_v5 = vpack.c.bf16 %v6844_v24, %v6841_v56  ;;  %v13835_v57 = vsub.f32 %v6824_v61, %v6841_v56  ;;  %v13845_v26 = vpack.c.bf16 %v6850_v16, %v6847_v21  ;;  %v6853_v3 = vand.u32 4294901760, %v6828_v1 }
 0xd0e   : > { %9559 = vmatpush3.bf16.msra.mxu1 %v13603_v19  ;;  %v9526_v41 = vpack.c.bf16 %v14656_v20, %v14655_v6  ;;  %v14658_v19 = vand.u32 4294901760, %v13447_v17  ;;  %v14664_v17 = vld [vmem:[#allocation17_spill] sm:$0xff]  ;;  %v6927_v48 = vand.u32 4294901760, %v13833_v10 }
 0xd0f   : > { %9519 = vmatpush3.bf16.msra.mxu0 %v9518_v36  ;;  %9561 = vmatprep.subr.bf16.mxu1 %v13609_v12  ;;  %v14660_v12 = vand.u32 4294901760, %v13470_v58  ;;  %v6829_v36 = vld [vmem:[%s13962_s17 + $0x38] sm:$0xff]  ;;  %v13854_v38 = vsub.f32 %v6828_v1, %v6853_v3  ;;  %v9604_v61 = vpack.c.bf16 %v13837_v39, %v13835_v57 }
 0xd10   : > { %9521 = vmatprep.subr.bf16.mxu0 %v9520_v49  ;;  %v9528_v23 = vpack.c.bf16 %v14658_v19, %v14657_v25  ;;  %v13849_v49 = vsub.f32 %v6827_v33, %v6850_v16  ;;  %v6856_v14 = vand.u32 4294901760, %v6829_v36  ;;  %v6928_v25 = vsub.f32 %v13833_v10, %v6927_v48 }
 0xd11   : > { %v9530_v29 = vpack.c.bf16 %v14660_v12, %v14659_v52  ;;  %v6934_v52 = vand.u32 4294901760, %v13835_v57  ;;  %v6941_v12 = vand.u32 4294901760, %v13837_v39 }
 0xd12   : > { %9563 = vmatpush3.bf16.msra.mxu1 %v13624_v42  ;;  %v9532_v42 = vpack.c.bf16 %v14662_v60, %v14661_v4  ;;  %v13859_v6 = vpack.c.bf16 %v6856_v14, %v6853_v3  ;;  %v13861_v20 = vsub.f32 %v6829_v36, %v6856_v14  ;;  %v9607_v27 = vpack.c.bf16 %v13849_v49, %v13847_v31 }
 0xd13   : > { %9523 = vmatpush3.bf16.msra.mxu0 %v9522_v43  ;;  %9565 = vmatprep.subr.bf16.mxu1 %v13630_v59  ;;  %v6935_v4 = vsub.f32 %v13835_v57, %v6934_v52  ;;  %v6942_v60 = vsub.f32 %v13837_v39, %v6941_v12  ;;  %v9628_v14 = vpack.c.bf16 %v6941_v12, %v6934_v52 }
 0xd14   : > { %9525 = vmatprep.subr.bf16.mxu0 %v9524_v32  ;;  %v14668_v32 = vmov 0.0   ;;  %v9610_v56 = vpack.c.bf16 %v13861_v20, %v13854_v38 }
 0xd16   : > { %9567 = vmatpush3.bf16.msra.mxu1 %v13640_v47 }
 0xd17   : > { %9527 = vmatpush3.bf16.msra.mxu0 %v9526_v41  ;;  %9569 = vmatprep.subr.bf16.mxu1 %v13647_v35 }
 0xd18   : > { %9529 = vmatprep.subr.bf16.mxu0 %v9528_v23  ;;  %v6929_v23 = vand.u32 4294901760, %v6928_v25 }
 0xd1a   : > { %9571 = vmatpush3.bf16.msra.mxu1 %v13657_v62  ;;  %v5073_v62 = vld [vmem:[%s13961_s16] sm:$0x1] }
 0xd1b   : > { %9531 = vmatpush3.bf16.msra.mxu0 %v9530_v29  ;;  %9573 = vmatprep.subr.bf16.mxu1 %v13666_v37 }
 0xd1c   : > { %9533 = vmatprep.subr.bf16.mxu0 %v9532_v42  ;;  %v6936_v42 = vand.u32 4294901760, %v6935_v4 }
 0xd1e   : > { %9575 = vmatpush3.bf16.msra.mxu1 %v13674_v46 }
 0xd1f   : > { %9535 = vmatpush3.bf16.msra.mxu0 %v14663_v8  ;;  %v6943_v8 = vand.u32 4294901760, %v6942_v60 }
 0xd20   : > { %9537 = vmatprep.subr.bf16.mxu0 %v14664_v17  ;;  %v6948_v17 = vand.u32 4294901760, %v13847_v31 }
 0xd21   : > { %6814 = vmatmul.mubr.f32.vlgmr.msra.gmra.mrb[52].mxu1 %v13633_v2 }
 0xd23   : > { %9539 = vmatpush3.bf16.msra.mxu0 %v14665_v30  ;;  %v6955_v30 = vand.u32 4294901760, %v13849_v49 }
 0xd24   : > { %9541 = vmatprep.subr.bf16.mxu0 %v14666_v54 }
 0xd27   : > { %9543 = vmatpush3.bf16.msra.mxu0 %v14667_v11 }
 0xd28   : > { %9576 = vmatprep.subr.bf16.mxu0 %v9770_v40 }
 0xd2a   : > { %6710 = vmatmul.mubr.f32.vlgmr.msra.gmra.mrb[42].mxu0 %v13633_v2  ;;  %v6822_v2 = vld [vmem:[%s13962_s17] sm:$0xff] }
 0xd2b   : > { %v6835_v9 = vand.u32 4294901760, %v6822_v2  ;;  %8638 = vmatprep.mubr.msk.f32.mxu0 %vm9771_vm14, %v14668_v32 }
 0xd2d   : > { %v13810_v53 = vpack.c.bf16 %v6838_v45, %v6835_v9  ;;  %v13831_v44 = vsub.f32 %v6822_v2, %v6835_v9 }
 0xd2f   : > { %9578 = vmatpush3.bf16.msra.mxu0 %v13810_v53  ;;  %v6920_v43 = vand.u32 4294901760, %v13831_v44  ;;  %v9601_v45 = vpack.c.bf16 %v13833_v10, %v13831_v44 }
 0xd30   : > { %9579 = vmatprep.subr.bf16.mxu0 %v9770_v40 }
 0xd31   : > { %v6921_v41 = vsub.f32 %v13831_v44, %v6920_v43  ;;  %v9625_v3 = vpack.c.bf16 %v6927_v48, %v6920_v43  ;;  %v9631_v44 = vpack.c.bf16 %v6955_v30, %v6948_v17 }
 0xd33   : > { %9581 = vmatpush3.bf16.msra.mxu0 %v13821_v5  ;;  %v6922_v19 = vand.u32 4294901760, %v6921_v41 }
 0xd34   : > { %9582 = vmatprep.subr.bf16.mxu0 %v9770_v40 }
 0xd35   : > { %v13869_v29 = vpack.c.bf16 %v6929_v23, %v6922_v19 }
 0xd37   : > { %9584 = vmatpush3.bf16.msra.mxu0 %v13845_v26 }
 0xd38   : > { %9585 = vmatprep.subr.bf16.mxu0 %v9770_v40 }
 0xd3b   : > { %9587 = vmatpush3.bf16.msra.mxu0 %v13859_v6 }
 0xd3c   : > { %9588 = vmatprep.subr.bf16.mxu0 %v9770_v40 }
 0xd51   : > { %v8005_v58 = vpop.f32.mrb[42].mxu1 }
 0xd52   : > { %v8006_v59 = vpop.f32.mrb[43].mxu1 }
 0xd53   : > { %v8007_v47 = vadd.f32 %v8006_v59, %v8005_v58  ;;  %v13875_v58 = vpack.c.bf16 %v6943_v8, %v6936_v42  ;;  %v6949_v59 = vsub.f32 %v13847_v31, %v6948_v17 }
 0xd59   : > { %v7970_v35 = vpop.f32.mrb[32].mxu0 }
 0xd5a   : > { %v7971_v37 = vpop.f32.mrb[33].mxu0 }
 0xd5b   : > { %v7972_v46 = vadd.f32 %v7971_v37, %v7970_v35 }
 0xd5d   : > { %v5204_v15 = vadd.f32 %v7972_v46, %v5073_v62  ;;  %v6950_v62 = vand.u32 4294901760, %v6949_v59  ;;  %v6962_v46 = vand.u32 4294901760, %v13854_v38 }
 0xd5f   : > { %v5436_v7 = vadd.f32 %v8007_v47, %v5204_v15  ;;  %v6956_v47 = vsub.f32 %v13849_v49, %v6955_v30  ;;  %v6969_v15 = vand.u32 4294901760, %v13861_v20 }
 0xd61   : > { %v6957_v37 = vand.u32 4294901760, %v6956_v47  ;;  %v13892_v10 = vpack.c.bf16 %v6969_v15, %v6962_v46 }
 0xd71   : > { %v8075_v18 = vpop.f32.mrb[44].mxu1 }
 0xd72   : > { %v8076_v51 = vpop.f32.mrb[45].mxu1 }
 0xd73   : > { %v8077_v63 = vadd.f32 %v8076_v51, %v8075_v18  ;;  %v6963_v18 = vsub.f32 %v13854_v38, %v6962_v46  ;;  %v6970_v51 = vsub.f32 %v13861_v20, %v6969_v15 }
 0xd79   : > { %v8040_v34 = vpop.f32.mrb[34].mxu0 }
 0xd7a   : > { %v8041_v50 = vpop.f32.mrb[35].mxu0 }
 0xd7b   : > { %v8042_v55 = vadd.f32 %v8041_v50, %v8040_v34  ;;  %v6964_v34 = vand.u32 4294901760, %v6963_v18  ;;  %v6971_v50 = vand.u32 4294901760, %v6970_v51 }
 0xd7d   : > { %v5574_v13 = vadd.f32 %v8042_v55, %v5436_v7  ;;  %v9595_v7 = vpack.c.bf16 %v6957_v37, %v6950_v62  ;;  %v9598_v28 = vpack.c.bf16 %v6971_v50, %v6964_v34 }
 0xd7f   : > { %v13808_v22 = vadd.f32 %v8077_v63, %v5574_v13 }
 0xd94   : > { %v8145_v54 = vpop.f32.mrb[46].mxu1 }
 0xd95   : > { %v8146_v11 = vpop.f32.mrb[47].mxu1 }
 0xd96   : > { %v8147_v35 = vadd.f32 %v8146_v11, %v8145_v54 }
 0xd99   : > { %v8110_v63 = vpop.f32.mrb[36].mxu0 }
 0xd9a   : > { %v8111_v55 = vpop.f32.mrb[37].mxu0 }
 0xd9b   : > { %v8112_v2 = vadd.f32 %v8111_v55, %v8110_v63 }
 0xd9d   : > { %v5850_v13 = vadd.f32 %v8112_v2, %v13808_v22 }
 0xd9f   : > { %v5954_v9 = vadd.f32 %v8147_v35, %v5850_v13 }
 0xdb4   : > { %v8215_v24 = vpop.f32.mrb[48].mxu1 }
 0xdb5   : > { %v8216_v0 = vpop.f32.mrb[49].mxu1 }
 0xdb6   : > { %v8217_v33 = vadd.f32 %v8216_v0, %v8215_v24 }
 0xdbd   : > { %v8180_v21 = vpop.f32.mrb[38].mxu0 }
 0xdbe   : > { %v8181_v16 = vpop.f32.mrb[39].mxu0 }
 0xdbf   : > { %v8182_v1 = vadd.f32 %v8181_v16, %v8180_v21 }
 0xdc1   : > { %v6066_v22 = vadd.f32 %v8182_v1, %v5954_v9 }
 0xdc3   : > { %v6298_v36 = vadd.f32 %v8217_v33, %v6066_v22 }
 0xdd4   : > { %v8285_v57 = vpop.f32.mrb[50].mxu1 }
 0xdd5   : > { %v8286_v39 = vpop.f32.mrb[51].mxu1 }
 0xdd6   : > { %v8287_v41 = vadd.f32 %v8286_v39, %v8285_v57 }
 0xddd   : > { %v8250_v31 = vpop.f32.mrb[40].mxu0 }
 0xdde   : > { %v8251_v49 = vpop.f32.mrb[41].mxu0 }
 0xddf   : > { %v8252_v25 = vadd.f32 %v8251_v49, %v8250_v31 }
 0xde1   : > { %v6436_v38 = vadd.f32 %v8252_v25, %v6298_v36 }
 0xde3   : > { %v6544_v20 = vadd.f32 %v8287_v41, %v6436_v38 }
 0xdf4   : > { %v8355_v19 = vpop.f32.mrb[52].mxu1 }
 0xdf5   : > { %v8356_v23 = vpop.f32.mrb[53].mxu1 }
 0xdf6   : > { %v8357_v4 = vadd.f32 %v8356_v23, %v8355_v19 }
 0xdfd   : > { %v8320_v60 = vpop.f32.mrb[42].mxu0 }
 0xdfe   : > { %v8321_v42 = vpop.f32.mrb[43].mxu0 }
 0xdff   : > { %v8322_v8 = vadd.f32 %v8321_v42, %v8320_v60 }
 0xe01   : > { %v6712_v54 = vadd.f32 %v8322_v8, %v6544_v20 }
 0xe03   : > { %v6816_v43 = vadd.f32 %v8357_v4, %v6712_v54 }
 0xe05   : > { %vm6819_vm1 = vcmp.ge.f32.partialorder %v6816_v43, 0.0  ;;  %v6820_v48 = vmul.f32 0.2, %v6816_v43 }
 0xe07   : > { %v6821_v52 = vsel %vm6819_vm1, %v6816_v43, %v6820_v48 }
 0xe08   : > { %v6832_v12 = vsel %vm2361_vm3, %v6821_v52, 0  ;;  %vm7371_vm3 = vcmask 32768  }
 0xe09   : > { %v6907_v17 = vand.u32 4294901760, %v6832_v12 }
 0xe0b   : > { %v6908_v30 = vsub.f32 %v6832_v12, %v6907_v17 }
 0xe0d   : > { %v6909_v11 = vand.u32 4294901760, %v6908_v30 }
 0xe0f   : > { %v6910_v59 = vsub.f32 %v6908_v30, %v6909_v11 }
 0xe11   : > { %v6911_v47 = vand.u32 4294901760, %v6910_v59 }
 0xe13   : > { %8639 = vmatmul.mubr.f32.vlgmr.msra.gmra.mrb[44].mxu0 %v6911_v47 }
 0xe14   : > { %9590 = vmatpush3.bf16.msra.mxu0 %v13869_v29  ;;  %8657 = vmatprep.mubr.msk.f32.mxu0 %vm9771_vm14, %v14668_v32 }
 0xe15   : > { %9591 = vmatprep.subr.bf16.mxu0 %v9770_v40 }
 0xe18   : > { %9593 = vmatpush3.bf16.msra.mxu0 %v13875_v58 }
 0xe19   : > { %9594 = vmatprep.subr.bf16.mxu0 %v9770_v40 }
 0xe1c   : > { %9596 = vmatpush3.bf16.msra.mxu0 %v9595_v7 }
 0xe1d   : > { %9597 = vmatprep.subr.bf16.mxu0 %v9770_v40 }
 0xe20   : > { %9599 = vmatpush3.bf16.msra.mxu0 %v9598_v28 }
 0xe21   : > { %9600 = vmatprep.subr.bf16.mxu0 %v9770_v40 }
 0xe23   : > { %8658 = vmatmul.mubr.f32.vlgmr.msra.gmra.mrb[44].mxu0 %v6907_v17 }
 0xe24   : > { %9602 = vmatpush3.bf16.msra.mxu0 %v9601_v45  ;;  %8676 = vmatprep.mubr.msk.f32.mxu0 %vm9771_vm14, %v14668_v32 }
 0xe25   : > { %9603 = vmatprep.subr.bf16.mxu0 %v9770_v40 }
 0xe28   : > { %9605 = vmatpush3.bf16.msra.mxu0 %v9604_v61 }
 0xe29   : > { %9606 = vmatprep.subr.bf16.mxu0 %v9770_v40 }
 0xe2c   : > { %9608 = vmatpush3.bf16.msra.mxu0 %v9607_v27 }
 0xe2d   : > { %9609 = vmatprep.subr.bf16.mxu0 %v9770_v40 }
 0xe30   : > { %9611 = vmatpush3.bf16.msra.mxu0 %v9610_v56 }
 0xe31   : > { %9612 = vmatprep.subr.bf16.mxu0 %v9770_v40 }
 0xe33   : > { %8677 = vmatmul.mubr.f32.vlgmr.msra.gmra.mrb[44].mxu0 %v6908_v30 }
 0xe34   : > { %9614 = vmatpush3.bf16.msra.mxu0 %v13810_v53  ;;  %8695 = vmatprep.mubr.msk.f32.mxu0 %vm9771_vm14, %v14668_v32 }
 0xe35   : > { %9615 = vmatprep.subr.bf16.mxu0 %v9770_v40 }
 0xe38   : > { %9617 = vmatpush3.bf16.msra.mxu0 %v13821_v5 }
 0xe39   : > { %9618 = vmatprep.subr.bf16.mxu0 %v9770_v40 }
 0xe3c   : > { %9620 = vmatpush3.bf16.msra.mxu0 %v13845_v26 }
 0xe3d   : > { %9621 = vmatprep.subr.bf16.mxu0 %v9770_v40 }
 0xe40   : > { %9623 = vmatpush3.bf16.msra.mxu0 %v13859_v6 }
 0xe41   : > { %9624 = vmatprep.subr.bf16.mxu0 %v9770_v40 }
 0xe43   : > { %8696 = vmatmul.mubr.f32.vlgmr.msra.gmra.mrb[44].mxu0 %v6909_v11 }
 0xe44   : > { %9626 = vmatpush3.bf16.msra.mxu0 %v9625_v3  ;;  %8714 = vmatprep.mubr.msk.f32.mxu0 %vm9771_vm14, %v14668_v32 }
 0xe45   : > { %9627 = vmatprep.subr.bf16.mxu0 %v9770_v40 }
 0xe48   : > { %9629 = vmatpush3.bf16.msra.mxu0 %v9628_v14 }
 0xe49   : > { %9630 = vmatprep.subr.bf16.mxu0 %v9770_v40 }
 0xe4c   : > { %9632 = vmatpush3.bf16.msra.mxu0 %v9631_v44 }
 0xe4d   : > { %9633 = vmatprep.subr.bf16.mxu0 %v9770_v40 }
 0xe50   : > { %9635 = vmatpush3.bf16.msra.mxu0 %v13892_v10 }
 0xe51   : > { %9636 = vmatprep.subr.bf16.mxu0 %v9770_v40 }
 0xe53   : > { %8715 = vmatmul.mubr.f32.vlgmr.msra.gmra.mrb[44].mxu0 %v6907_v17 }
 0xe54   : > { %9638 = vmatpush3.bf16.msra.mxu0 %v13810_v53  ;;  %8733 = vmatprep.mubr.msk.f32.mxu0 %vm9771_vm14, %v14668_v32  ;;  %v6830_v53 = vld [vmem:[%s13963_s18] sm:$0x1] }
 0xe55   : > { %9639 = vmatprep.subr.bf16.mxu0 %v9770_v40 }
 0xe58   : > { %9641 = vmatpush3.bf16.msra.mxu0 %v13821_v5 }
 0xe59   : > { %9642 = vmatprep.subr.bf16.mxu0 %v9770_v40 }
 0xe5c   : > { %9644 = vmatpush3.bf16.msra.mxu0 %v13845_v26 }
 0xe5d   : > { %9645 = vmatprep.subr.bf16.mxu0 %v9770_v40 }
 0xe60   : > { %9647 = vmatpush3.bf16.msra.mxu0 %v13859_v6 }
 0xe63   : > { %8734 = vmatmul.mubr.f32.vlgmr.msra.gmra.mrb[44].mxu0 %v6907_v17 }
 0xf36   : > { %v7367_v32 = vpop.f32.mrb[44].mxu0 }
 0xf37   : > { %v9654_v5 = vadd.f32 %v7367_v32, %v6830_v53  ;;  %v8735_v29 = vpop.f32.mrb[45].mxu0 }
 0xf39   : > { %7372 = vst.msk [vmem:[%s598_s2] sm:$0x1] %vm7371_vm3, %v9654_v5 }
 0xf3a PF: > { %s29_s0 = sadd.s32 1, %s9758_s0  }
 0xf3b   : > { %p26_p4 = scmp.ge.s32.totalorder %s29_s0, 4  }
 0xf3d   :  { %28 = sbr.rel (!%p26_p4) target bundleno = 5 (0x5), region = 126 }

</bundles_post_ra>
